<compile_context>
chip_gen: v6e
topology: v6e:2x2x1
jax: 0.10.0
libtpu: 0.0.40
codegen_flags: <defaults>
</compile_context>

<pallas_src>
import functools

import jax
import jax.numpy as jnp
from jax import lax
from jax.experimental import pallas as pl
from jax.experimental.pallas import tpu as pltpu
import numpy as np


def _round_up(x, m):
    return ((x + m - 1) // m) * m


# ----------------------------------------------------------------------------
# Shared in-kernel helper: zero-pad the image in VMEM and build the
# (25*Cin_pad, H*W) im2col slab (taps on sublanes, pixels on lanes).
# ----------------------------------------------------------------------------
def _build_im2col(x_ref, xpad_ref, col_ref, *, H, W, Cin, Cin_pad):
    # 2-pixel zero border added in VMEM — no HBM pad round trip.
    xpad_ref[...] = jnp.zeros_like(xpad_ref)
    xpad_ref[:, 2:2 + H, 2:2 + W] = x_ref[0]
    xpad = xpad_ref[...]                                   # (Cin, H+4, W+4)

    zfill = None
    if Cin_pad > Cin:
        zfill = jnp.zeros((Cin_pad - Cin, H * W), xpad.dtype)

    t = 0
    for kh in range(5):
        for kw in range(5):
            blk = xpad[:, kh:kh + H, kw:kw + W].reshape(Cin, H * W)
            if zfill is not None:
                blk = jnp.concatenate([blk, zfill], axis=0)   # aligned 8-row block
            col_ref[t * Cin_pad:(t + 1) * Cin_pad, :] = blk   # lane-dense store
            t += 1


# ----------------------------------------------------------------------------
# Pass 1: all three conv branches as ONE big-K MXU matmul, but only the BN
# partial sums leave VMEM (cat itself is never written to HBM).
# ----------------------------------------------------------------------------
def stats_kernel(x_ref, wslab_ref, bcat_ref, stats_ref, xpad_ref, col_ref,
                 *, H, W, Cin, Cin_pad):
    # x_ref    : (1, Cin, H, W)        channel-major (NCHW) image
    # wslab_ref: (3*Cout, 25*Cin_pad)  combined 1x1/3x3/5x5 weight slab
    # bcat_ref : (3*Cout, 1)           concatenated branch biases
    # stats_ref: (1, 3*Cout, 2)        [:, :, 0] = sum, [:, :, 1] = sum of squares
    _build_im2col(x_ref, xpad_ref, col_ref, H=H, W=W, Cin=Cin, Cin_pad=Cin_pad)

    w = wslab_ref[...]
    cat = jnp.dot(w, col_ref[...].astype(w.dtype),
                  preferred_element_type=jnp.float32)       # (3*Cout, H*W), f32 acc
    cat = cat + bcat_ref[...]

    s = jnp.sum(cat, axis=1, keepdims=True)
    sq = jnp.sum(cat * cat, axis=1, keepdims=True)
    stats_ref[0] = jnp.concatenate([s, sq], axis=1)         # single packed store


# ----------------------------------------------------------------------------
# Pass 2: BN + 1x1 compress fully folded into the branch weights, recomputed
# straight from x (no cat HBM traffic): out = w_fold @ im2col + b_fold.
# ----------------------------------------------------------------------------
def compress_kernel(x_ref, wfold_ref, bfold_ref, out_ref, xpad_ref, col_ref,
                    *, H, W, Cin, Cin_pad):
    # wfold_ref: (Cout, 25*Cin_pad)   (wc * bn_scale) @ w_slab
    # bfold_ref: (Cout, 1)
    # out_ref  : (1, Cout, H*W)       channel-major, lane-dense
    _build_im2col(x_ref, xpad_ref, col_ref, H=H, W=W, Cin=Cin, Cin_pad=Cin_pad)

    w = wfold_ref[...]
    o = jnp.dot(w, col_ref[...].astype(w.dtype),
                preferred_element_type=jnp.float32)
    out_ref[0] = o + bfold_ref[...]


# ----------------------------------------------------------------------------
# Wrapper
# ----------------------------------------------------------------------------
def multi_scale_block(x_nchw, params, *, eps=1e-5, matmul_dtype=jnp.float32):
    """Forward pass of MultiScaleBlock. Input/output are NCHW float32."""
    N, Cin, H, W = x_nchw.shape
    Cout = params["wc_t"].shape[0]
    C3 = 3 * Cout
    HW = H * W
    Cin_pad = _round_up(Cin, 8)
    K = 25 * Cin_pad

    x = x_nchw.astype(jnp.float32)   # already channel-major; no transpose, no pad

    kw_args = dict(H=H, W=W, Cin=Cin, Cin_pad=Cin_pad)

    def scratch():
        return [pltpu.VMEM((Cin, H + 4, W + 4), jnp.float32),   # padded image
                pltpu.VMEM((K, HW), jnp.float32)]               # im2col slab

    # --- Pass 1: BN batch statistics (training mode, batch stats) ---
    stats = pl.pallas_call(
        functools.partial(stats_kernel, **kw_args),
        out_shape=jax.ShapeDtypeStruct((N, C3, 2), jnp.float32),
        grid_spec=pltpu.PrefetchScalarGridSpec(
            num_scalar_prefetch=0,
            grid=(N,),
            in_specs=[
                pl.BlockSpec((1, Cin, H, W), lambda n: (n, 0, 0, 0)),
                pl.BlockSpec((C3, K), lambda n: (0, 0)),
                pl.BlockSpec((C3, 1), lambda n: (0, 0)),
            ],
            out_specs=pl.BlockSpec((1, C3, 2), lambda n: (n, 0, 0)),
            scratch_shapes=scratch(),
        ),
        compiler_params=pltpu.CompilerParams(
            dimension_semantics=("parallel",)),
    )(x, params["w_slab"].astype(matmul_dtype), params["b_cat"])

    # --- Finalize BatchNorm (biased variance) from the tiny partial sums ---
    cnt = jnp.float32(N * HW)
    ssum = jnp.sum(stats[:, :, 0], axis=0)            # (C3,)
    ssq = jnp.sum(stats[:, :, 1], axis=0)             # (C3,)
    mean = ssum / cnt
    var = ssq / cnt - mean * mean                     # biased (training mode)
    scale = params["gamma"] * lax.rsqrt(var + eps)    # (C3,)
    shift = params["beta"] - mean * scale             # (C3,)

    # Fold BN + 1x1 compress into the branch weights (all f32, then cast):
    #   out = (wc*scale) @ (w_slab @ col + b_cat) + (wc @ shift + bc)
    wcf = params["wc_t"] * scale[None, :]                             # (Cout, C3)
    w_fold = wcf @ params["w_slab"]                                   # (Cout, K)
    b_fold = (wcf @ params["b_cat"][:, 0]
              + params["wc_t"] @ shift + params["bc"]).reshape(Cout, 1)

    # --- Pass 2: fully-folded conv straight from x (no cat round trip) ---
    out = pl.pallas_call(
        functools.partial(compress_kernel, **kw_args),
        out_shape=jax.ShapeDtypeStruct((N, Cout, HW), jnp.float32),
        grid_spec=pltpu.PrefetchScalarGridSpec(
            num_scalar_prefetch=0,
            grid=(N,),
            in_specs=[
                pl.BlockSpec((1, Cin, H, W), lambda n: (n, 0, 0, 0)),
                pl.BlockSpec((Cout, K), lambda n: (0, 0)),
                pl.BlockSpec((Cout, 1), lambda n: (0, 0)),
            ],
            out_specs=pl.BlockSpec((1, Cout, HW), lambda n: (n, 0, 0)),
            scratch_shapes=scratch(),
        ),
        compiler_params=pltpu.CompilerParams(
            dimension_semantics=("parallel",)),
    )(x, w_fold.astype(matmul_dtype), b_fold)

    # (N, Cout, H*W) is already channel-major: free reshape back to NCHW.
    return out.reshape(N, Cout, H, W)


# ----------------------------------------------------------------------------
# Pure-JAX reference (lax convs) for verification.
# ----------------------------------------------------------------------------
def ref_forward(x, raw, eps=1e-5):
    dn = ("NCHW", "OIHW", "NCHW")
    conv = lambda inp, w, pad: lax.conv_general_dilated(
        inp, w, (1, 1), [(pad, pad), (pad, pad)], dimension_numbers=dn)
    o1 = conv(x, raw["w1_oihw"], 0) + raw["b1"].reshape(1, -1, 1, 1)
    o2 = conv(x, raw["w3_oihw"], 1) + raw["b2"].reshape(1, -1, 1, 1)
    o3 = conv(x, raw["w5_oihw"], 2) + raw["b3"].reshape(1, -1, 1, 1)
    cat = jnp.concatenate([o1, o2, o3], axis=1)
    mean = jnp.mean(cat, axis=(0, 2, 3), keepdims=True)
    var = jnp.var(cat, axis=(0, 2, 3), keepdims=True)
    g = raw["gamma"].reshape(1, -1, 1, 1)
    b = raw["beta"].reshape(1, -1, 1, 1)
    bn = (cat - mean) / jnp.sqrt(var + eps) * g + b
    out = conv(bn, raw["wc_oihw"], 0) + raw["bc"].reshape(1, -1, 1, 1)
    return out


def make_params(key, in_channels, out_channels):
    Cin, Cout = in_channels, out_channels
    C3 = 3 * Cout
    Cin_pad = _round_up(Cin, 8)
    ks = jax.random.split(key, 8)
    f32 = jnp.float32
    raw = {
        "w1_oihw": 0.1 * jax.random.normal(ks[0], (Cout, Cin, 1, 1), f32),
        "b1": 0.1 * jax.random.normal(ks[1], (Cout,), f32),
        "w3_oihw": 0.1 * jax.random.normal(ks[2], (Cout, Cin, 3, 3), f32),
        "b2": 0.1 * jax.random.normal(ks[3], (Cout,), f32),
        "w5_oihw": 0.1 * jax.random.normal(ks[4], (Cout, Cin, 5, 5), f32),
        "b3": 0.1 * jax.random.normal(ks[5], (Cout,), f32),
        "wc_oihw": 0.1 * jax.random.normal(ks[6], (Cout, C3, 1, 1), f32),
        "bc": 0.1 * jax.random.normal(ks[7], (Cout,), f32),
        "gamma": jnp.ones((C3,), f32),   # nn.BatchNorm2d default affine
        "beta": jnp.zeros((C3,), f32),
    }

    # Combined tap-major weight cube (25, Cin_pad, 3*Cout); padded Cin rows
    # stay zero and line up with the zero rows of the in-kernel im2col slab.
    #   cols 0..Cout-1      : 1x1 branch, center tap (2, 2)
    #   cols Cout..2Cout-1  : 3x3 branch, inner 3x3 taps
    #   cols 2Cout..3Cout-1 : 5x5 branch, all 25 taps
    w1 = np.asarray(raw["w1_oihw"])
    w3 = np.asarray(raw["w3_oihw"])
    w5 = np.asarray(raw["w5_oihw"])
    wtaps = np.zeros((25, Cin_pad, C3), np.float32)
    wtaps[2 * 5 + 2, :Cin, 0:Cout] = w1[:, :, 0, 0].T
    for kh in range(3):
        for kw in range(3):
            wtaps[(kh + 1) * 5 + (kw + 1), :Cin, Cout:2 * Cout] = w3[:, :, kh, kw].T
    for kh in range(5):
        for kw in range(5):
            wtaps[kh * 5 + kw, :Cin, 2 * Cout:3 * Cout] = w5[:, :, kh, kw].T
    w_slab = jnp.asarray(wtaps.reshape(25 * Cin_pad, C3).T)   # (3*Cout, 25*Cin_pad)

    params = {
        "w_slab": w_slab,
        "b_cat": jnp.concatenate([raw["b1"], raw["b2"], raw["b3"]]).reshape(C3, 1),
        "wc_t": raw["wc_oihw"][:, :, 0, 0],   # (Cout, 3*Cout)
        "bc": raw["bc"],
        "gamma": raw["gamma"],
        "beta": raw["beta"],
    }
    return params, raw


if __name__ == "__main__":
    N, Cin, H, W = 2, 4, 16, 16
    Cout = 8

    key = jax.random.PRNGKey(0)
    kx, kp = jax.random.split(key)
    x = jax.random.normal(kx, (N, Cin, H, W), jnp.float32)   # NCHW, like PyTorch
    params, raw = make_params(kp, Cin, Cout)

    fwd_f32 = jax.jit(functools.partial(multi_scale_block,
                                        matmul_dtype=jnp.float32))
    fwd_bf16 = jax.jit(functools.partial(multi_scale_block,
                                         matmul_dtype=jnp.bfloat16))

    out = jax.block_until_ready(fwd_f32(x, params))
    assert out.shape == (N, Cout, H, W), out.shape

    ref = jax.block_until_ready(ref_forward(x, raw))
    np.testing.assert_allclose(np.asarray(out), np.asarray(ref),
                               rtol=1e-4, atol=1e-4)

    # bf16 MXU operands with f32 accumulation (recommended for throughput on
    # v5e/v6e/v7x); checked at a looser tolerance consistent with bf16 inputs.
    out_bf16 = jax.block_until_ready(fwd_bf16(x, params))
    np.testing.assert_allclose(np.asarray(out_bf16), np.asarray(ref),
                               rtol=5e-2, atol=5e-2)

    print("KERNEL_OK")
</pallas_src>

<mosaic_0001>
module attributes {stable_mosaic.version = 11 : i64} {
  func.func @stats_kernel(%arg0: i32, %arg1: memref<1x4x16x16xf32, #tpu.memory_space<vmem>>, %arg2: memref<24x200xf32, #tpu.memory_space<vmem>>, %arg3: memref<24x1xf32, #tpu.memory_space<vmem>>, %arg4: memref<1x24x2xf32, #tpu.memory_space<vmem>>, %arg5: memref<4x20x20xf32, #tpu.memory_space<vmem>>, %arg6: memref<200x256xf32, #tpu.memory_space<vmem>>) attributes {dimension_semantics = [#tpu.dimension_semantics<parallel>], iteration_bounds = array<i64: 2>, scalar_prefetch = 0 : i64, scratch_operands = 2 : i64, tpu.core_type = #tpu.core_type<tc>, window_params = [{transform_indices = @transform_0, window_bounds = array<i64: 1, 4, 16, 16>}, {pipeline_mode = #tpu.pipeline_mode<synchronous>, transform_indices = @transform_1, window_bounds = array<i64: 24, 200>}, {pipeline_mode = #tpu.pipeline_mode<synchronous>, transform_indices = @transform_2, window_bounds = array<i64: 24, 1>}, {transform_indices = @transform_3, window_bounds = array<i64: 1, 24, 2>}]} {
    %cst = arith.constant 0.000000e+00 : f32
    %0 = vector.broadcast %cst : f32 to vector<4x20x20xf32>
    %c0 = arith.constant 0 : index
    %c0_0 = arith.constant 0 : index
    %c0_1 = arith.constant 0 : index
    %1 = vector.load %arg5[%c0, %c0_0, %c0_1] : memref<4x20x20xf32, #tpu.memory_space<vmem>>, vector<4x20x20xf32>
    tpu.vector_store %arg5[%c0, %c0_0, %c0_1], %0 {strides = array<i32>} : memref<4x20x20xf32, #tpu.memory_space<vmem>>, vector<4x20x20xf32>,
    %c0_2 = arith.constant 0 : index
    %c0_3 = arith.constant 0 : index
    %c0_4 = arith.constant 0 : index
    %c0_5 = arith.constant 0 : index
    %2 = vector.load %arg1[%c0_2, %c0_3, %c0_4, %c0_5] : memref<1x4x16x16xf32, #tpu.memory_space<vmem>>, vector<1x4x16x16xf32>
    %3 = vector.shape_cast %2 : vector<1x4x16x16xf32> to vector<4x16x16xf32>
    %c0_6 = arith.constant 0 : index
    %c2 = arith.constant 2 : index
    %c2_7 = arith.constant 2 : index
    %4 = vector.load %arg5[%c0_6, %c2, %c2_7] : memref<4x20x20xf32, #tpu.memory_space<vmem>>, vector<4x16x16xf32>
    tpu.vector_store %arg5[%c0_6, %c2, %c2_7], %3 {strides = array<i32>} : memref<4x20x20xf32, #tpu.memory_space<vmem>>, vector<4x16x16xf32>,
    %c0_8 = arith.constant 0 : index
    %c0_9 = arith.constant 0 : index
    %c0_10 = arith.constant 0 : index
    %5 = vector.load %arg5[%c0_8, %c0_9, %c0_10] : memref<4x20x20xf32, #tpu.memory_space<vmem>>, vector<4x20x20xf32>
    %cst_11 = arith.constant 0.000000e+00 : f32
    %6 = vector.broadcast %cst_11 : f32 to vector<4x256xf32>
    %7 = vector.extract_strided_slice %5 {offsets = [0, 0, 0], sizes = [4, 16, 16], strides = [1, 1, 1]} : vector<4x20x20xf32> to vector<4x16x16xf32>
    %8 = vector.shape_cast %7 : vector<4x16x16xf32> to vector<4x256xf32>
    %9 = tpu.concatenate %8, %6 in 0 : vector<4x256xf32>, vector<4x256xf32> -> vector<8x256xf32>
    %c0_12 = arith.constant 0 : index
    %c0_13 = arith.constant 0 : index
    %10 = vector.load %arg6[%c0_12, %c0_13] : memref<200x256xf32, #tpu.memory_space<vmem>>, vector<8x256xf32>
    tpu.vector_store %arg6[%c0_12, %c0_13], %9 {strides = array<i32>} : memref<200x256xf32, #tpu.memory_space<vmem>>, vector<8x256xf32>,
    %11 = vector.extract_strided_slice %5 {offsets = [0, 0, 1], sizes = [4, 16, 16], strides = [1, 1, 1]} : vector<4x20x20xf32> to vector<4x16x16xf32>
    %12 = vector.shape_cast %11 : vector<4x16x16xf32> to vector<4x256xf32>
    %13 = tpu.concatenate %12, %6 in 0 : vector<4x256xf32>, vector<4x256xf32> -> vector<8x256xf32>
    %c8 = arith.constant 8 : index
    %c0_14 = arith.constant 0 : index
    %14 = vector.load %arg6[%c8, %c0_14] : memref<200x256xf32, #tpu.memory_space<vmem>>, vector<8x256xf32>
    tpu.vector_store %arg6[%c8, %c0_14], %13 {strides = array<i32>} : memref<200x256xf32, #tpu.memory_space<vmem>>, vector<8x256xf32>,
    %15 = vector.extract_strided_slice %5 {offsets = [0, 0, 2], sizes = [4, 16, 16], strides = [1, 1, 1]} : vector<4x20x20xf32> to vector<4x16x16xf32>
    %16 = vector.shape_cast %15 : vector<4x16x16xf32> to vector<4x256xf32>
    %17 = tpu.concatenate %16, %6 in 0 : vector<4x256xf32>, vector<4x256xf32> -> vector<8x256xf32>
    %c16 = arith.constant 16 : index
    %c0_15 = arith.constant 0 : index
    %18 = vector.load %arg6[%c16, %c0_15] : memref<200x256xf32, #tpu.memory_space<vmem>>, vector<8x256xf32>
    tpu.vector_store %arg6[%c16, %c0_15], %17 {strides = array<i32>} : memref<200x256xf32, #tpu.memory_space<vmem>>, vector<8x256xf32>,
    %19 = vector.extract_strided_slice %5 {offsets = [0, 0, 3], sizes = [4, 16, 16], strides = [1, 1, 1]} : vector<4x20x20xf32> to vector<4x16x16xf32>
    %20 = vector.shape_cast %19 : vector<4x16x16xf32> to vector<4x256xf32>
    %21 = tpu.concatenate %20, %6 in 0 : vector<4x256xf32>, vector<4x256xf32> -> vector<8x256xf32>
    %c24 = arith.constant 24 : index
    %c0_16 = arith.constant 0 : index
    %22 = vector.load %arg6[%c24, %c0_16] : memref<200x256xf32, #tpu.memory_space<vmem>>, vector<8x256xf32>
    tpu.vector_store %arg6[%c24, %c0_16], %21 {strides = array<i32>} : memref<200x256xf32, #tpu.memory_space<vmem>>, vector<8x256xf32>,
    %23 = vector.extract_strided_slice %5 {offsets = [0, 0, 4], sizes = [4, 16, 16], strides = [1, 1, 1]} : vector<4x20x20xf32> to vector<4x16x16xf32>
    %24 = vector.shape_cast %23 : vector<4x16x16xf32> to vector<4x256xf32>
    %25 = tpu.concatenate %24, %6 in 0 : vector<4x256xf32>, vector<4x256xf32> -> vector<8x256xf32>
    %c32 = arith.constant 32 : index
    %c0_17 = arith.constant 0 : index
    %26 = vector.load %arg6[%c32, %c0_17] : memref<200x256xf32, #tpu.memory_space<vmem>>, vector<8x256xf32>
    tpu.vector_store %arg6[%c32, %c0_17], %25 {strides = array<i32>} : memref<200x256xf32, #tpu.memory_space<vmem>>, vector<8x256xf32>,
    %27 = vector.extract_strided_slice %5 {offsets = [0, 1, 0], sizes = [4, 16, 16], strides = [1, 1, 1]} : vector<4x20x20xf32> to vector<4x16x16xf32>
    %28 = vector.shape_cast %27 : vector<4x16x16xf32> to vector<4x256xf32>
    %29 = tpu.concatenate %28, %6 in 0 : vector<4x256xf32>, vector<4x256xf32> -> vector<8x256xf32>
    %c40 = arith.constant 40 : index
    %c0_18 = arith.constant 0 : index
    %30 = vector.load %arg6[%c40, %c0_18] : memref<200x256xf32, #tpu.memory_space<vmem>>, vector<8x256xf32>
    tpu.vector_store %arg6[%c40, %c0_18], %29 {strides = array<i32>} : memref<200x256xf32, #tpu.memory_space<vmem>>, vector<8x256xf32>,
    %31 = vector.extract_strided_slice %5 {offsets = [0, 1, 1], sizes = [4, 16, 16], strides = [1, 1, 1]} : vector<4x20x20xf32> to vector<4x16x16xf32>
    %32 = vector.shape_cast %31 : vector<4x16x16xf32> to vector<4x256xf32>
    %33 = tpu.concatenate %32, %6 in 0 : vector<4x256xf32>, vector<4x256xf32> -> vector<8x256xf32>
    %c48 = arith.constant 48 : index
    %c0_19 = arith.constant 0 : index
    %34 = vector.load %arg6[%c48, %c0_19] : memref<200x256xf32, #tpu.memory_space<vmem>>, vector<8x256xf32>
    tpu.vector_store %arg6[%c48, %c0_19], %33 {strides = array<i32>} : memref<200x256xf32, #tpu.memory_space<vmem>>, vector<8x256xf32>,
    %35 = vector.extract_strided_slice %5 {offsets = [0, 1, 2], sizes = [4, 16, 16], strides = [1, 1, 1]} : vector<4x20x20xf32> to vector<4x16x16xf32>
    %36 = vector.shape_cast %35 : vector<4x16x16xf32> to vector<4x256xf32>
    %37 = tpu.concatenate %36, %6 in 0 : vector<4x256xf32>, vector<4x256xf32> -> vector<8x256xf32>
    %c56 = arith.constant 56 : index
    %c0_20 = arith.constant 0 : index
    %38 = vector.load %arg6[%c56, %c0_20] : memref<200x256xf32, #tpu.memory_space<vmem>>, vector<8x256xf32>
    tpu.vector_store %arg6[%c56, %c0_20], %37 {strides = array<i32>} : memref<200x256xf32, #tpu.memory_space<vmem>>, vector<8x256xf32>,
    %39 = vector.extract_strided_slice %5 {offsets = [0, 1, 3], sizes = [4, 16, 16], strides = [1, 1, 1]} : vector<4x20x20xf32> to vector<4x16x16xf32>
    %40 = vector.shape_cast %39 : vector<4x16x16xf32> to vector<4x256xf32>
    %41 = tpu.concatenate %40, %6 in 0 : vector<4x256xf32>, vector<4x256xf32> -> vector<8x256xf32>
    %c64 = arith.constant 64 : index
    %c0_21 = arith.constant 0 : index
    %42 = vector.load %arg6[%c64, %c0_21] : memref<200x256xf32, #tpu.memory_space<vmem>>, vector<8x256xf32>
    tpu.vector_store %arg6[%c64, %c0_21], %41 {strides = array<i32>} : memref<200x256xf32, #tpu.memory_space<vmem>>, vector<8x256xf32>,
    %43 = vector.extract_strided_slice %5 {offsets = [0, 1, 4], sizes = [4, 16, 16], strides = [1, 1, 1]} : vector<4x20x20xf32> to vector<4x16x16xf32>
    %44 = vector.shape_cast %43 : vector<4x16x16xf32> to vector<4x256xf32>
    %45 = tpu.concatenate %44, %6 in 0 : vector<4x256xf32>, vector<4x256xf32> -> vector<8x256xf32>
    %c72 = arith.constant 72 : index
    %c0_22 = arith.constant 0 : index
    %46 = vector.load %arg6[%c72, %c0_22] : memref<200x256xf32, #tpu.memory_space<vmem>>, vector<8x256xf32>
    tpu.vector_store %arg6[%c72, %c0_22], %45 {strides = array<i32>} : memref<200x256xf32, #tpu.memory_space<vmem>>, vector<8x256xf32>,
    %47 = vector.extract_strided_slice %5 {offsets = [0, 2, 0], sizes = [4, 16, 16], strides = [1, 1, 1]} : vector<4x20x20xf32> to vector<4x16x16xf32>
    %48 = vector.shape_cast %47 : vector<4x16x16xf32> to vector<4x256xf32>
    %49 = tpu.concatenate %48, %6 in 0 : vector<4x256xf32>, vector<4x256xf32> -> vector<8x256xf32>
    %c80 = arith.constant 80 : index
    %c0_23 = arith.constant 0 : index
    %50 = vector.load %arg6[%c80, %c0_23] : memref<200x256xf32, #tpu.memory_space<vmem>>, vector<8x256xf32>
    tpu.vector_store %arg6[%c80, %c0_23], %49 {strides = array<i32>} : memref<200x256xf32, #tpu.memory_space<vmem>>, vector<8x256xf32>,
    %51 = vector.extract_strided_slice %5 {offsets = [0, 2, 1], sizes = [4, 16, 16], strides = [1, 1, 1]} : vector<4x20x20xf32> to vector<4x16x16xf32>
    %52 = vector.shape_cast %51 : vector<4x16x16xf32> to vector<4x256xf32>
    %53 = tpu.concatenate %52, %6 in 0 : vector<4x256xf32>, vector<4x256xf32> -> vector<8x256xf32>
    %c88 = arith.constant 88 : index
    %c0_24 = arith.constant 0 : index
    %54 = vector.load %arg6[%c88, %c0_24] : memref<200x256xf32, #tpu.memory_space<vmem>>, vector<8x256xf32>
    tpu.vector_store %arg6[%c88, %c0_24], %53 {strides = array<i32>} : memref<200x256xf32, #tpu.memory_space<vmem>>, vector<8x256xf32>,
    %55 = vector.extract_strided_slice %5 {offsets = [0, 2, 2], sizes = [4, 16, 16], strides = [1, 1, 1]} : vector<4x20x20xf32> to vector<4x16x16xf32>
    %56 = vector.shape_cast %55 : vector<4x16x16xf32> to vector<4x256xf32>
    %57 = tpu.concatenate %56, %6 in 0 : vector<4x256xf32>, vector<4x256xf32> -> vector<8x256xf32>
    %c96 = arith.constant 96 : index
    %c0_25 = arith.constant 0 : index
    %58 = vector.load %arg6[%c96, %c0_25] : memref<200x256xf32, #tpu.memory_space<vmem>>, vector<8x256xf32>
    tpu.vector_store %arg6[%c96, %c0_25], %57 {strides = array<i32>} : memref<200x256xf32, #tpu.memory_space<vmem>>, vector<8x256xf32>,
    %59 = vector.extract_strided_slice %5 {offsets = [0, 2, 3], sizes = [4, 16, 16], strides = [1, 1, 1]} : vector<4x20x20xf32> to vector<4x16x16xf32>
    %60 = vector.shape_cast %59 : vector<4x16x16xf32> to vector<4x256xf32>
    %61 = tpu.concatenate %60, %6 in 0 : vector<4x256xf32>, vector<4x256xf32> -> vector<8x256xf32>
    %c104 = arith.constant 104 : index
    %c0_26 = arith.constant 0 : index
    %62 = vector.load %arg6[%c104, %c0_26] : memref<200x256xf32, #tpu.memory_space<vmem>>, vector<8x256xf32>
    tpu.vector_store %arg6[%c104, %c0_26], %61 {strides = array<i32>} : memref<200x256xf32, #tpu.memory_space<vmem>>, vector<8x256xf32>,
    %63 = vector.extract_strided_slice %5 {offsets = [0, 2, 4], sizes = [4, 16, 16], strides = [1, 1, 1]} : vector<4x20x20xf32> to vector<4x16x16xf32>
    %64 = vector.shape_cast %63 : vector<4x16x16xf32> to vector<4x256xf32>
    %65 = tpu.concatenate %64, %6 in 0 : vector<4x256xf32>, vector<4x256xf32> -> vector<8x256xf32>
    %c112 = arith.constant 112 : index
    %c0_27 = arith.constant 0 : index
    %66 = vector.load %arg6[%c112, %c0_27] : memref<200x256xf32, #tpu.memory_space<vmem>>, vector<8x256xf32>
    tpu.vector_store %arg6[%c112, %c0_27], %65 {strides = array<i32>} : memref<200x256xf32, #tpu.memory_space<vmem>>, vector<8x256xf32>,
    %67 = vector.extract_strided_slice %5 {offsets = [0, 3, 0], sizes = [4, 16, 16], strides = [1, 1, 1]} : vector<4x20x20xf32> to vector<4x16x16xf32>
    %68 = vector.shape_cast %67 : vector<4x16x16xf32> to vector<4x256xf32>
    %69 = tpu.concatenate %68, %6 in 0 : vector<4x256xf32>, vector<4x256xf32> -> vector<8x256xf32>
    %c120 = arith.constant 120 : index
    %c0_28 = arith.constant 0 : index
    %70 = vector.load %arg6[%c120, %c0_28] : memref<200x256xf32, #tpu.memory_space<vmem>>, vector<8x256xf32>
    tpu.vector_store %arg6[%c120, %c0_28], %69 {strides = array<i32>} : memref<200x256xf32, #tpu.memory_space<vmem>>, vector<8x256xf32>,
    %71 = vector.extract_strided_slice %5 {offsets = [0, 3, 1], sizes = [4, 16, 16], strides = [1, 1, 1]} : vector<4x20x20xf32> to vector<4x16x16xf32>
    %72 = vector.shape_cast %71 : vector<4x16x16xf32> to vector<4x256xf32>
    %73 = tpu.concatenate %72, %6 in 0 : vector<4x256xf32>, vector<4x256xf32> -> vector<8x256xf32>
    %c128 = arith.constant 128 : index
    %c0_29 = arith.constant 0 : index
    %74 = vector.load %arg6[%c128, %c0_29] : memref<200x256xf32, #tpu.memory_space<vmem>>, vector<8x256xf32>
    tpu.vector_store %arg6[%c128, %c0_29], %73 {strides = array<i32>} : memref<200x256xf32, #tpu.memory_space<vmem>>, vector<8x256xf32>,
    %75 = vector.extract_strided_slice %5 {offsets = [0, 3, 2], sizes = [4, 16, 16], strides = [1, 1, 1]} : vector<4x20x20xf32> to vector<4x16x16xf32>
    %76 = vector.shape_cast %75 : vector<4x16x16xf32> to vector<4x256xf32>
    %77 = tpu.concatenate %76, %6 in 0 : vector<4x256xf32>, vector<4x256xf32> -> vector<8x256xf32>
    %c136 = arith.constant 136 : index
    %c0_30 = arith.constant 0 : index
    %78 = vector.load %arg6[%c136, %c0_30] : memref<200x256xf32, #tpu.memory_space<vmem>>, vector<8x256xf32>
    tpu.vector_store %arg6[%c136, %c0_30], %77 {strides = array<i32>} : memref<200x256xf32, #tpu.memory_space<vmem>>, vector<8x256xf32>,
    %79 = vector.extract_strided_slice %5 {offsets = [0, 3, 3], sizes = [4, 16, 16], strides = [1, 1, 1]} : vector<4x20x20xf32> to vector<4x16x16xf32>
    %80 = vector.shape_cast %79 : vector<4x16x16xf32> to vector<4x256xf32>
    %81 = tpu.concatenate %80, %6 in 0 : vector<4x256xf32>, vector<4x256xf32> -> vector<8x256xf32>
    %c144 = arith.constant 144 : index
    %c0_31 = arith.constant 0 : index
    %82 = vector.load %arg6[%c144, %c0_31] : memref<200x256xf32, #tpu.memory_space<vmem>>, vector<8x256xf32>
    tpu.vector_store %arg6[%c144, %c0_31], %81 {strides = array<i32>} : memref<200x256xf32, #tpu.memory_space<vmem>>, vector<8x256xf32>,
    %83 = vector.extract_strided_slice %5 {offsets = [0, 3, 4], sizes = [4, 16, 16], strides = [1, 1, 1]} : vector<4x20x20xf32> to vector<4x16x16xf32>
    %84 = vector.shape_cast %83 : vector<4x16x16xf32> to vector<4x256xf32>
    %85 = tpu.concatenate %84, %6 in 0 : vector<4x256xf32>, vector<4x256xf32> -> vector<8x256xf32>
    %c152 = arith.constant 152 : index
    %c0_32 = arith.constant 0 : index
    %86 = vector.load %arg6[%c152, %c0_32] : memref<200x256xf32, #tpu.memory_space<vmem>>, vector<8x256xf32>
    tpu.vector_store %arg6[%c152, %c0_32], %85 {strides = array<i32>} : memref<200x256xf32, #tpu.memory_space<vmem>>, vector<8x256xf32>,
    %87 = vector.extract_strided_slice %5 {offsets = [0, 4, 0], sizes = [4, 16, 16], strides = [1, 1, 1]} : vector<4x20x20xf32> to vector<4x16x16xf32>
    %88 = vector.shape_cast %87 : vector<4x16x16xf32> to vector<4x256xf32>
    %89 = tpu.concatenate %88, %6 in 0 : vector<4x256xf32>, vector<4x256xf32> -> vector<8x256xf32>
    %c160 = arith.constant 160 : index
    %c0_33 = arith.constant 0 : index
    %90 = vector.load %arg6[%c160, %c0_33] : memref<200x256xf32, #tpu.memory_space<vmem>>, vector<8x256xf32>
    tpu.vector_store %arg6[%c160, %c0_33], %89 {strides = array<i32>} : memref<200x256xf32, #tpu.memory_space<vmem>>, vector<8x256xf32>,
    %91 = vector.extract_strided_slice %5 {offsets = [0, 4, 1], sizes = [4, 16, 16], strides = [1, 1, 1]} : vector<4x20x20xf32> to vector<4x16x16xf32>
    %92 = vector.shape_cast %91 : vector<4x16x16xf32> to vector<4x256xf32>
    %93 = tpu.concatenate %92, %6 in 0 : vector<4x256xf32>, vector<4x256xf32> -> vector<8x256xf32>
    %c168 = arith.constant 168 : index
    %c0_34 = arith.constant 0 : index
    %94 = vector.load %arg6[%c168, %c0_34] : memref<200x256xf32, #tpu.memory_space<vmem>>, vector<8x256xf32>
    tpu.vector_store %arg6[%c168, %c0_34], %93 {strides = array<i32>} : memref<200x256xf32, #tpu.memory_space<vmem>>, vector<8x256xf32>,
    %95 = vector.extract_strided_slice %5 {offsets = [0, 4, 2], sizes = [4, 16, 16], strides = [1, 1, 1]} : vector<4x20x20xf32> to vector<4x16x16xf32>
    %96 = vector.shape_cast %95 : vector<4x16x16xf32> to vector<4x256xf32>
    %97 = tpu.concatenate %96, %6 in 0 : vector<4x256xf32>, vector<4x256xf32> -> vector<8x256xf32>
    %c176 = arith.constant 176 : index
    %c0_35 = arith.constant 0 : index
    %98 = vector.load %arg6[%c176, %c0_35] : memref<200x256xf32, #tpu.memory_space<vmem>>, vector<8x256xf32>
    tpu.vector_store %arg6[%c176, %c0_35], %97 {strides = array<i32>} : memref<200x256xf32, #tpu.memory_space<vmem>>, vector<8x256xf32>,
    %99 = vector.extract_strided_slice %5 {offsets = [0, 4, 3], sizes = [4, 16, 16], strides = [1, 1, 1]} : vector<4x20x20xf32> to vector<4x16x16xf32>
    %100 = vector.shape_cast %99 : vector<4x16x16xf32> to vector<4x256xf32>
    %101 = tpu.concatenate %100, %6 in 0 : vector<4x256xf32>, vector<4x256xf32> -> vector<8x256xf32>
    %c184 = arith.constant 184 : index
    %c0_36 = arith.constant 0 : index
    %102 = vector.load %arg6[%c184, %c0_36] : memref<200x256xf32, #tpu.memory_space<vmem>>, vector<8x256xf32>
    tpu.vector_store %arg6[%c184, %c0_36], %101 {strides = array<i32>} : memref<200x256xf32, #tpu.memory_space<vmem>>, vector<8x256xf32>,
    %103 = vector.extract_strided_slice %5 {offsets = [0, 4, 4], sizes = [4, 16, 16], strides = [1, 1, 1]} : vector<4x20x20xf32> to vector<4x16x16xf32>
    %104 = vector.shape_cast %103 : vector<4x16x16xf32> to vector<4x256xf32>
    %105 = tpu.concatenate %104, %6 in 0 : vector<4x256xf32>, vector<4x256xf32> -> vector<8x256xf32>
    %c192 = arith.constant 192 : index
    %c0_37 = arith.constant 0 : index
    %106 = vector.load %arg6[%c192, %c0_37] : memref<200x256xf32, #tpu.memory_space<vmem>>, vector<8x256xf32>
    tpu.vector_store %arg6[%c192, %c0_37], %105 {strides = array<i32>} : memref<200x256xf32, #tpu.memory_space<vmem>>, vector<8x256xf32>,
    %c0_38 = arith.constant 0 : index
    %c0_39 = arith.constant 0 : index
    %107 = vector.load %arg2[%c0_38, %c0_39] : memref<24x200xf32, #tpu.memory_space<vmem>>, vector<24x200xf32>
    %c0_40 = arith.constant 0 : index
    %c0_41 = arith.constant 0 : index
    %108 = vector.load %arg6[%c0_40, %c0_41] : memref<200x256xf32, #tpu.memory_space<vmem>>, vector<200x256xf32>
    %cst_42 = arith.constant dense<0.000000e+00> : vector<24x256xf32>
    %109 = tpu.matmul %107, %108, %cst_42 {dimension_numbers = #tpu.dot_dimension_numbers<[1], [0], [0], [1], [0, 0, 1, 1], [], []>} : vector<24x200xf32>, vector<200x256xf32>, vector<24x256xf32> -> vector<24x256xf32>
    %c0_43 = arith.constant 0 : index
    %c0_44 = arith.constant 0 : index
    %110 = vector.load %arg3[%c0_43, %c0_44] : memref<24x1xf32, #tpu.memory_space<vmem>>, vector<24x1xf32>
    %111 = vector.broadcast %110 : vector<24x1xf32> to vector<24x256xf32>
    %112 = arith.addf %109, %111 : vector<24x256xf32>
    %cst_45 = arith.constant dense<0.000000e+00> : vector<24xf32>
    %113 = vector.multi_reduction <add>, %112, %cst_45 [1] : vector<24x256xf32> to vector<24xf32>
    %114 = vector.shape_cast %113 : vector<24xf32> to vector<24x1xf32>
    %115 = arith.mulf %112, %112 : vector<24x256xf32>
    %cst_46 = arith.constant dense<0.000000e+00> : vector<24xf32>
    %116 = vector.multi_reduction <add>, %115, %cst_46 [1] : vector<24x256xf32> to vector<24xf32>
    %117 = vector.shape_cast %116 : vector<24xf32> to vector<24x1xf32>
    %118 = tpu.concatenate %114, %117 in 1 : vector<24x1xf32>, vector<24x1xf32> -> vector<24x2xf32>
    %c0_47 = arith.constant 0 : index
    %c0_48 = arith.constant 0 : index
    %c0_49 = arith.constant 0 : index
    %119 = vector.load %arg4[%c0_47, %c0_48, %c0_49] : memref<1x24x2xf32, #tpu.memory_space<vmem>>, vector<1x24x2xf32>
    %120 = vector.shape_cast %119 : vector<1x24x2xf32> to vector<24x2xf32>
    %121 = vector.shape_cast %118 : vector<24x2xf32> to vector<1x24x2xf32>
    tpu.vector_store %arg4[%c0_47, %c0_48, %c0_49], %121 {strides = array<i32>} : memref<1x24x2xf32, #tpu.memory_space<vmem>>, vector<1x24x2xf32>,
    return
  }
  func.func @transform_0(%arg0: i32) -> (i32, i32, i32, i32) {
    %c0_i32 = arith.constant 0 : i32
    %c0_i32_0 = arith.constant 0 : i32
    %c0_i32_1 = arith.constant 0 : i32
    %c0_i32_2 = arith.constant 0 : i32
    return %arg0, %c0_i32, %c0_i32_0, %c0_i32_1 : i32, i32, i32, i32
  }
  func.func @transform_1(%arg0: i32) -> (i32, i32) {
    %c0_i32 = arith.constant 0 : i32
    %c0_i32_0 = arith.constant 0 : i32
    %c0_i32_1 = arith.constant 0 : i32
    return %c0_i32, %c0_i32_0 : i32, i32
  }
  func.func @transform_2(%arg0: i32) -> (i32, i32) {
    %c0_i32 = arith.constant 0 : i32
    %c0_i32_0 = arith.constant 0 : i32
    %c0_i32_1 = arith.constant 0 : i32
    return %c0_i32, %c0_i32_0 : i32, i32
  }
  func.func @transform_3(%arg0: i32) -> (i32, i32, i32) {
    %c0_i32 = arith.constant 0 : i32
    %c0_i32_0 = arith.constant 0 : i32
    %c0_i32_1 = arith.constant 0 : i32
    return %arg0, %c0_i32, %c0_i32_0 : i32, i32, i32
  }
}

module attributes {stable_mosaic.version = 11 : i64} {
  func.func @compress_kernel(%arg0: i32, %arg1: memref<1x4x16x16xf32, #tpu.memory_space<vmem>>, %arg2: memref<8x200xf32, #tpu.memory_space<vmem>>, %arg3: memref<8x1xf32, #tpu.memory_space<vmem>>, %arg4: memref<1x8x256xf32, #tpu.memory_space<vmem>>, %arg5: memref<4x20x20xf32, #tpu.memory_space<vmem>>, %arg6: memref<200x256xf32, #tpu.memory_space<vmem>>) attributes {dimension_semantics = [#tpu.dimension_semantics<parallel>], iteration_bounds = array<i64: 2>, scalar_prefetch = 0 : i64, scratch_operands = 2 : i64, tpu.core_type = #tpu.core_type<tc>, window_params = [{transform_indices = @transform_0, window_bounds = array<i64: 1, 4, 16, 16>}, {pipeline_mode = #tpu.pipeline_mode<synchronous>, transform_indices = @transform_1, window_bounds = array<i64: 8, 200>}, {pipeline_mode = #tpu.pipeline_mode<synchronous>, transform_indices = @transform_2, window_bounds = array<i64: 8, 1>}, {transform_indices = @transform_3, window_bounds = array<i64: 1, 8, 256>}]} {
    %cst = arith.constant 0.000000e+00 : f32
    %0 = vector.broadcast %cst : f32 to vector<4x20x20xf32>
    %c0 = arith.constant 0 : index
    %c0_0 = arith.constant 0 : index
    %c0_1 = arith.constant 0 : index
    %1 = vector.load %arg5[%c0, %c0_0, %c0_1] : memref<4x20x20xf32, #tpu.memory_space<vmem>>, vector<4x20x20xf32>
    tpu.vector_store %arg5[%c0, %c0_0, %c0_1], %0 {strides = array<i32>} : memref<4x20x20xf32, #tpu.memory_space<vmem>>, vector<4x20x20xf32>,
    %c0_2 = arith.constant 0 : index
    %c0_3 = arith.constant 0 : index
    %c0_4 = arith.constant 0 : index
    %c0_5 = arith.constant 0 : index
    %2 = vector.load %arg1[%c0_2, %c0_3, %c0_4, %c0_5] : memref<1x4x16x16xf32, #tpu.memory_space<vmem>>, vector<1x4x16x16xf32>
    %3 = vector.shape_cast %2 : vector<1x4x16x16xf32> to vector<4x16x16xf32>
    %c0_6 = arith.constant 0 : index
    %c2 = arith.constant 2 : index
    %c2_7 = arith.constant 2 : index
    %4 = vector.load %arg5[%c0_6, %c2, %c2_7] : memref<4x20x20xf32, #tpu.memory_space<vmem>>, vector<4x16x16xf32>
    tpu.vector_store %arg5[%c0_6, %c2, %c2_7], %3 {strides = array<i32>} : memref<4x20x20xf32, #tpu.memory_space<vmem>>, vector<4x16x16xf32>,
    %c0_8 = arith.constant 0 : index
    %c0_9 = arith.constant 0 : index
    %c0_10 = arith.constant 0 : index
    %5 = vector.load %arg5[%c0_8, %c0_9, %c0_10] : memref<4x20x20xf32, #tpu.memory_space<vmem>>, vector<4x20x20xf32>
    %cst_11 = arith.constant 0.000000e+00 : f32
    %6 = vector.broadcast %cst_11 : f32 to vector<4x256xf32>
    %7 = vector.extract_strided_slice %5 {offsets = [0, 0, 0], sizes = [4, 16, 16], strides = [1, 1, 1]} : vector<4x20x20xf32> to vector<4x16x16xf32>
    %8 = vector.shape_cast %7 : vector<4x16x16xf32> to vector<4x256xf32>
    %9 = tpu.concatenate %8, %6 in 0 : vector<4x256xf32>, vector<4x256xf32> -> vector<8x256xf32>
    %c0_12 = arith.constant 0 : index
    %c0_13 = arith.constant 0 : index
    %10 = vector.load %arg6[%c0_12, %c0_13] : memref<200x256xf32, #tpu.memory_space<vmem>>, vector<8x256xf32>
    tpu.vector_store %arg6[%c0_12, %c0_13], %9 {strides = array<i32>} : memref<200x256xf32, #tpu.memory_space<vmem>>, vector<8x256xf32>,
    %11 = vector.extract_strided_slice %5 {offsets = [0, 0, 1], sizes = [4, 16, 16], strides = [1, 1, 1]} : vector<4x20x20xf32> to vector<4x16x16xf32>
    %12 = vector.shape_cast %11 : vector<4x16x16xf32> to vector<4x256xf32>
    %13 = tpu.concatenate %12, %6 in 0 : vector<4x256xf32>, vector<4x256xf32> -> vector<8x256xf32>
    %c8 = arith.constant 8 : index
    %c0_14 = arith.constant 0 : index
    %14 = vector.load %arg6[%c8, %c0_14] : memref<200x256xf32, #tpu.memory_space<vmem>>, vector<8x256xf32>
    tpu.vector_store %arg6[%c8, %c0_14], %13 {strides = array<i32>} : memref<200x256xf32, #tpu.memory_space<vmem>>, vector<8x256xf32>,
    %15 = vector.extract_strided_slice %5 {offsets = [0, 0, 2], sizes = [4, 16, 16], strides = [1, 1, 1]} : vector<4x20x20xf32> to vector<4x16x16xf32>
    %16 = vector.shape_cast %15 : vector<4x16x16xf32> to vector<4x256xf32>
    %17 = tpu.concatenate %16, %6 in 0 : vector<4x256xf32>, vector<4x256xf32> -> vector<8x256xf32>
    %c16 = arith.constant 16 : index
    %c0_15 = arith.constant 0 : index
    %18 = vector.load %arg6[%c16, %c0_15] : memref<200x256xf32, #tpu.memory_space<vmem>>, vector<8x256xf32>
    tpu.vector_store %arg6[%c16, %c0_15], %17 {strides = array<i32>} : memref<200x256xf32, #tpu.memory_space<vmem>>, vector<8x256xf32>,
    %19 = vector.extract_strided_slice %5 {offsets = [0, 0, 3], sizes = [4, 16, 16], strides = [1, 1, 1]} : vector<4x20x20xf32> to vector<4x16x16xf32>
    %20 = vector.shape_cast %19 : vector<4x16x16xf32> to vector<4x256xf32>
    %21 = tpu.concatenate %20, %6 in 0 : vector<4x256xf32>, vector<4x256xf32> -> vector<8x256xf32>
    %c24 = arith.constant 24 : index
    %c0_16 = arith.constant 0 : index
    %22 = vector.load %arg6[%c24, %c0_16] : memref<200x256xf32, #tpu.memory_space<vmem>>, vector<8x256xf32>
    tpu.vector_store %arg6[%c24, %c0_16], %21 {strides = array<i32>} : memref<200x256xf32, #tpu.memory_space<vmem>>, vector<8x256xf32>,
    %23 = vector.extract_strided_slice %5 {offsets = [0, 0, 4], sizes = [4, 16, 16], strides = [1, 1, 1]} : vector<4x20x20xf32> to vector<4x16x16xf32>
    %24 = vector.shape_cast %23 : vector<4x16x16xf32> to vector<4x256xf32>
    %25 = tpu.concatenate %24, %6 in 0 : vector<4x256xf32>, vector<4x256xf32> -> vector<8x256xf32>
    %c32 = arith.constant 32 : index
    %c0_17 = arith.constant 0 : index
    %26 = vector.load %arg6[%c32, %c0_17] : memref<200x256xf32, #tpu.memory_space<vmem>>, vector<8x256xf32>
    tpu.vector_store %arg6[%c32, %c0_17], %25 {strides = array<i32>} : memref<200x256xf32, #tpu.memory_space<vmem>>, vector<8x256xf32>,
    %27 = vector.extract_strided_slice %5 {offsets = [0, 1, 0], sizes = [4, 16, 16], strides = [1, 1, 1]} : vector<4x20x20xf32> to vector<4x16x16xf32>
    %28 = vector.shape_cast %27 : vector<4x16x16xf32> to vector<4x256xf32>
    %29 = tpu.concatenate %28, %6 in 0 : vector<4x256xf32>, vector<4x256xf32> -> vector<8x256xf32>
    %c40 = arith.constant 40 : index
    %c0_18 = arith.constant 0 : index
    %30 = vector.load %arg6[%c40, %c0_18] : memref<200x256xf32, #tpu.memory_space<vmem>>, vector<8x256xf32>
    tpu.vector_store %arg6[%c40, %c0_18], %29 {strides = array<i32>} : memref<200x256xf32, #tpu.memory_space<vmem>>, vector<8x256xf32>,
    %31 = vector.extract_strided_slice %5 {offsets = [0, 1, 1], sizes = [4, 16, 16], strides = [1, 1, 1]} : vector<4x20x20xf32> to vector<4x16x16xf32>
    %32 = vector.shape_cast %31 : vector<4x16x16xf32> to vector<4x256xf32>
    %33 = tpu.concatenate %32, %6 in 0 : vector<4x256xf32>, vector<4x256xf32> -> vector<8x256xf32>
    %c48 = arith.constant 48 : index
    %c0_19 = arith.constant 0 : index
    %34 = vector.load %arg6[%c48, %c0_19] : memref<200x256xf32, #tpu.memory_space<vmem>>, vector<8x256xf32>
    tpu.vector_store %arg6[%c48, %c0_19], %33 {strides = array<i32>} : memref<200x256xf32, #tpu.memory_space<vmem>>, vector<8x256xf32>,
    %35 = vector.extract_strided_slice %5 {offsets = [0, 1, 2], sizes = [4, 16, 16], strides = [1, 1, 1]} : vector<4x20x20xf32> to vector<4x16x16xf32>
    %36 = vector.shape_cast %35 : vector<4x16x16xf32> to vector<4x256xf32>
    %37 = tpu.concatenate %36, %6 in 0 : vector<4x256xf32>, vector<4x256xf32> -> vector<8x256xf32>
    %c56 = arith.constant 56 : index
    %c0_20 = arith.constant 0 : index
    %38 = vector.load %arg6[%c56, %c0_20] : memref<200x256xf32, #tpu.memory_space<vmem>>, vector<8x256xf32>
    tpu.vector_store %arg6[%c56, %c0_20], %37 {strides = array<i32>} : memref<200x256xf32, #tpu.memory_space<vmem>>, vector<8x256xf32>,
    %39 = vector.extract_strided_slice %5 {offsets = [0, 1, 3], sizes = [4, 16, 16], strides = [1, 1, 1]} : vector<4x20x20xf32> to vector<4x16x16xf32>
    %40 = vector.shape_cast %39 : vector<4x16x16xf32> to vector<4x256xf32>
    %41 = tpu.concatenate %40, %6 in 0 : vector<4x256xf32>, vector<4x256xf32> -> vector<8x256xf32>
    %c64 = arith.constant 64 : index
    %c0_21 = arith.constant 0 : index
    %42 = vector.load %arg6[%c64, %c0_21] : memref<200x256xf32, #tpu.memory_space<vmem>>, vector<8x256xf32>
    tpu.vector_store %arg6[%c64, %c0_21], %41 {strides = array<i32>} : memref<200x256xf32, #tpu.memory_space<vmem>>, vector<8x256xf32>,
    %43 = vector.extract_strided_slice %5 {offsets = [0, 1, 4], sizes = [4, 16, 16], strides = [1, 1, 1]} : vector<4x20x20xf32> to vector<4x16x16xf32>
    %44 = vector.shape_cast %43 : vector<4x16x16xf32> to vector<4x256xf32>
    %45 = tpu.concatenate %44, %6 in 0 : vector<4x256xf32>, vector<4x256xf32> -> vector<8x256xf32>
    %c72 = arith.constant 72 : index
    %c0_22 = arith.constant 0 : index
    %46 = vector.load %arg6[%c72, %c0_22] : memref<200x256xf32, #tpu.memory_space<vmem>>, vector<8x256xf32>
    tpu.vector_store %arg6[%c72, %c0_22], %45 {strides = array<i32>} : memref<200x256xf32, #tpu.memory_space<vmem>>, vector<8x256xf32>,
    %47 = vector.extract_strided_slice %5 {offsets = [0, 2, 0], sizes = [4, 16, 16], strides = [1, 1, 1]} : vector<4x20x20xf32> to vector<4x16x16xf32>
    %48 = vector.shape_cast %47 : vector<4x16x16xf32> to vector<4x256xf32>
    %49 = tpu.concatenate %48, %6 in 0 : vector<4x256xf32>, vector<4x256xf32> -> vector<8x256xf32>
    %c80 = arith.constant 80 : index
    %c0_23 = arith.constant 0 : index
    %50 = vector.load %arg6[%c80, %c0_23] : memref<200x256xf32, #tpu.memory_space<vmem>>, vector<8x256xf32>
    tpu.vector_store %arg6[%c80, %c0_23], %49 {strides = array<i32>} : memref<200x256xf32, #tpu.memory_space<vmem>>, vector<8x256xf32>,
    %51 = vector.extract_strided_slice %5 {offsets = [0, 2, 1], sizes = [4, 16, 16], strides = [1, 1, 1]} : vector<4x20x20xf32> to vector<4x16x16xf32>
    %52 = vector.shape_cast %51 : vector<4x16x16xf32> to vector<4x256xf32>
    %53 = tpu.concatenate %52, %6 in 0 : vector<4x256xf32>, vector<4x256xf32> -> vector<8x256xf32>
    %c88 = arith.constant 88 : index
    %c0_24 = arith.constant 0 : index
    %54 = vector.load %arg6[%c88, %c0_24] : memref<200x256xf32, #tpu.memory_space<vmem>>, vector<8x256xf32>
    tpu.vector_store %arg6[%c88, %c0_24], %53 {strides = array<i32>} : memref<200x256xf32, #tpu.memory_space<vmem>>, vector<8x256xf32>,
    %55 = vector.extract_strided_slice %5 {offsets = [0, 2, 2], sizes = [4, 16, 16], strides = [1, 1, 1]} : vector<4x20x20xf32> to vector<4x16x16xf32>
    %56 = vector.shape_cast %55 : vector<4x16x16xf32> to vector<4x256xf32>
    %57 = tpu.concatenate %56, %6 in 0 : vector<4x256xf32>, vector<4x256xf32> -> vector<8x256xf32>
    %c96 = arith.constant 96 : index
    %c0_25 = arith.constant 0 : index
    %58 = vector.load %arg6[%c96, %c0_25] : memref<200x256xf32, #tpu.memory_space<vmem>>, vector<8x256xf32>
    tpu.vector_store %arg6[%c96, %c0_25], %57 {strides = array<i32>} : memref<200x256xf32, #tpu.memory_space<vmem>>, vector<8x256xf32>,
    %59 = vector.extract_strided_slice %5 {offsets = [0, 2, 3], sizes = [4, 16, 16], strides = [1, 1, 1]} : vector<4x20x20xf32> to vector<4x16x16xf32>
    %60 = vector.shape_cast %59 : vector<4x16x16xf32> to vector<4x256xf32>
    %61 = tpu.concatenate %60, %6 in 0 : vector<4x256xf32>, vector<4x256xf32> -> vector<8x256xf32>
    %c104 = arith.constant 104 : index
    %c0_26 = arith.constant 0 : index
    %62 = vector.load %arg6[%c104, %c0_26] : memref<200x256xf32, #tpu.memory_space<vmem>>, vector<8x256xf32>
    tpu.vector_store %arg6[%c104, %c0_26], %61 {strides = array<i32>} : memref<200x256xf32, #tpu.memory_space<vmem>>, vector<8x256xf32>,
    %63 = vector.extract_strided_slice %5 {offsets = [0, 2, 4], sizes = [4, 16, 16], strides = [1, 1, 1]} : vector<4x20x20xf32> to vector<4x16x16xf32>
    %64 = vector.shape_cast %63 : vector<4x16x16xf32> to vector<4x256xf32>
    %65 = tpu.concatenate %64, %6 in 0 : vector<4x256xf32>, vector<4x256xf32> -> vector<8x256xf32>
    %c112 = arith.constant 112 : index
    %c0_27 = arith.constant 0 : index
    %66 = vector.load %arg6[%c112, %c0_27] : memref<200x256xf32, #tpu.memory_space<vmem>>, vector<8x256xf32>
    tpu.vector_store %arg6[%c112, %c0_27], %65 {strides = array<i32>} : memref<200x256xf32, #tpu.memory_space<vmem>>, vector<8x256xf32>,
    %67 = vector.extract_strided_slice %5 {offsets = [0, 3, 0], sizes = [4, 16, 16], strides = [1, 1, 1]} : vector<4x20x20xf32> to vector<4x16x16xf32>
    %68 = vector.shape_cast %67 : vector<4x16x16xf32> to vector<4x256xf32>
    %69 = tpu.concatenate %68, %6 in 0 : vector<4x256xf32>, vector<4x256xf32> -> vector<8x256xf32>
    %c120 = arith.constant 120 : index
    %c0_28 = arith.constant 0 : index
    %70 = vector.load %arg6[%c120, %c0_28] : memref<200x256xf32, #tpu.memory_space<vmem>>, vector<8x256xf32>
    tpu.vector_store %arg6[%c120, %c0_28], %69 {strides = array<i32>} : memref<200x256xf32, #tpu.memory_space<vmem>>, vector<8x256xf32>,
    %71 = vector.extract_strided_slice %5 {offsets = [0, 3, 1], sizes = [4, 16, 16], strides = [1, 1, 1]} : vector<4x20x20xf32> to vector<4x16x16xf32>
    %72 = vector.shape_cast %71 : vector<4x16x16xf32> to vector<4x256xf32>
    %73 = tpu.concatenate %72, %6 in 0 : vector<4x256xf32>, vector<4x256xf32> -> vector<8x256xf32>
    %c128 = arith.constant 128 : index
    %c0_29 = arith.constant 0 : index
    %74 = vector.load %arg6[%c128, %c0_29] : memref<200x256xf32, #tpu.memory_space<vmem>>, vector<8x256xf32>
    tpu.vector_store %arg6[%c128, %c0_29], %73 {strides = array<i32>} : memref<200x256xf32, #tpu.memory_space<vmem>>, vector<8x256xf32>,
    %75 = vector.extract_strided_slice %5 {offsets = [0, 3, 2], sizes = [4, 16, 16], strides = [1, 1, 1]} : vector<4x20x20xf32> to vector<4x16x16xf32>
    %76 = vector.shape_cast %75 : vector<4x16x16xf32> to vector<4x256xf32>
    %77 = tpu.concatenate %76, %6 in 0 : vector<4x256xf32>, vector<4x256xf32> -> vector<8x256xf32>
    %c136 = arith.constant 136 : index
    %c0_30 = arith.constant 0 : index
    %78 = vector.load %arg6[%c136, %c0_30] : memref<200x256xf32, #tpu.memory_space<vmem>>, vector<8x256xf32>
    tpu.vector_store %arg6[%c136, %c0_30], %77 {strides = array<i32>} : memref<200x256xf32, #tpu.memory_space<vmem>>, vector<8x256xf32>,
    %79 = vector.extract_strided_slice %5 {offsets = [0, 3, 3], sizes = [4, 16, 16], strides = [1, 1, 1]} : vector<4x20x20xf32> to vector<4x16x16xf32>
    %80 = vector.shape_cast %79 : vector<4x16x16xf32> to vector<4x256xf32>
    %81 = tpu.concatenate %80, %6 in 0 : vector<4x256xf32>, vector<4x256xf32> -> vector<8x256xf32>
    %c144 = arith.constant 144 : index
    %c0_31 = arith.constant 0 : index
    %82 = vector.load %arg6[%c144, %c0_31] : memref<200x256xf32, #tpu.memory_space<vmem>>, vector<8x256xf32>
    tpu.vector_store %arg6[%c144, %c0_31], %81 {strides = array<i32>} : memref<200x256xf32, #tpu.memory_space<vmem>>, vector<8x256xf32>,
    %83 = vector.extract_strided_slice %5 {offsets = [0, 3, 4], sizes = [4, 16, 16], strides = [1, 1, 1]} : vector<4x20x20xf32> to vector<4x16x16xf32>
    %84 = vector.shape_cast %83 : vector<4x16x16xf32> to vector<4x256xf32>
    %85 = tpu.concatenate %84, %6 in 0 : vector<4x256xf32>, vector<4x256xf32> -> vector<8x256xf32>
    %c152 = arith.constant 152 : index
    %c0_32 = arith.constant 0 : index
    %86 = vector.load %arg6[%c152, %c0_32] : memref<200x256xf32, #tpu.memory_space<vmem>>, vector<8x256xf32>
    tpu.vector_store %arg6[%c152, %c0_32], %85 {strides = array<i32>} : memref<200x256xf32, #tpu.memory_space<vmem>>, vector<8x256xf32>,
    %87 = vector.extract_strided_slice %5 {offsets = [0, 4, 0], sizes = [4, 16, 16], strides = [1, 1, 1]} : vector<4x20x20xf32> to vector<4x16x16xf32>
    %88 = vector.shape_cast %87 : vector<4x16x16xf32> to vector<4x256xf32>
    %89 = tpu.concatenate %88, %6 in 0 : vector<4x256xf32>, vector<4x256xf32> -> vector<8x256xf32>
    %c160 = arith.constant 160 : index
    %c0_33 = arith.constant 0 : index
    %90 = vector.load %arg6[%c160, %c0_33] : memref<200x256xf32, #tpu.memory_space<vmem>>, vector<8x256xf32>
    tpu.vector_store %arg6[%c160, %c0_33], %89 {strides = array<i32>} : memref<200x256xf32, #tpu.memory_space<vmem>>, vector<8x256xf32>,
    %91 = vector.extract_strided_slice %5 {offsets = [0, 4, 1], sizes = [4, 16, 16], strides = [1, 1, 1]} : vector<4x20x20xf32> to vector<4x16x16xf32>
    %92 = vector.shape_cast %91 : vector<4x16x16xf32> to vector<4x256xf32>
    %93 = tpu.concatenate %92, %6 in 0 : vector<4x256xf32>, vector<4x256xf32> -> vector<8x256xf32>
    %c168 = arith.constant 168 : index
    %c0_34 = arith.constant 0 : index
    %94 = vector.load %arg6[%c168, %c0_34] : memref<200x256xf32, #tpu.memory_space<vmem>>, vector<8x256xf32>
    tpu.vector_store %arg6[%c168, %c0_34], %93 {strides = array<i32>} : memref<200x256xf32, #tpu.memory_space<vmem>>, vector<8x256xf32>,
    %95 = vector.extract_strided_slice %5 {offsets = [0, 4, 2], sizes = [4, 16, 16], strides = [1, 1, 1]} : vector<4x20x20xf32> to vector<4x16x16xf32>
    %96 = vector.shape_cast %95 : vector<4x16x16xf32> to vector<4x256xf32>
    %97 = tpu.concatenate %96, %6 in 0 : vector<4x256xf32>, vector<4x256xf32> -> vector<8x256xf32>
    %c176 = arith.constant 176 : index
    %c0_35 = arith.constant 0 : index
    %98 = vector.load %arg6[%c176, %c0_35] : memref<200x256xf32, #tpu.memory_space<vmem>>, vector<8x256xf32>
    tpu.vector_store %arg6[%c176, %c0_35], %97 {strides = array<i32>} : memref<200x256xf32, #tpu.memory_space<vmem>>, vector<8x256xf32>,
    %99 = vector.extract_strided_slice %5 {offsets = [0, 4, 3], sizes = [4, 16, 16], strides = [1, 1, 1]} : vector<4x20x20xf32> to vector<4x16x16xf32>
    %100 = vector.shape_cast %99 : vector<4x16x16xf32> to vector<4x256xf32>
    %101 = tpu.concatenate %100, %6 in 0 : vector<4x256xf32>, vector<4x256xf32> -> vector<8x256xf32>
    %c184 = arith.constant 184 : index
    %c0_36 = arith.constant 0 : index
    %102 = vector.load %arg6[%c184, %c0_36] : memref<200x256xf32, #tpu.memory_space<vmem>>, vector<8x256xf32>
    tpu.vector_store %arg6[%c184, %c0_36], %101 {strides = array<i32>} : memref<200x256xf32, #tpu.memory_space<vmem>>, vector<8x256xf32>,
    %103 = vector.extract_strided_slice %5 {offsets = [0, 4, 4], sizes = [4, 16, 16], strides = [1, 1, 1]} : vector<4x20x20xf32> to vector<4x16x16xf32>
    %104 = vector.shape_cast %103 : vector<4x16x16xf32> to vector<4x256xf32>
    %105 = tpu.concatenate %104, %6 in 0 : vector<4x256xf32>, vector<4x256xf32> -> vector<8x256xf32>
    %c192 = arith.constant 192 : index
    %c0_37 = arith.constant 0 : index
    %106 = vector.load %arg6[%c192, %c0_37] : memref<200x256xf32, #tpu.memory_space<vmem>>, vector<8x256xf32>
    tpu.vector_store %arg6[%c192, %c0_37], %105 {strides = array<i32>} : memref<200x256xf32, #tpu.memory_space<vmem>>, vector<8x256xf32>,
    %c0_38 = arith.constant 0 : index
    %c0_39 = arith.constant 0 : index
    %107 = vector.load %arg2[%c0_38, %c0_39] : memref<8x200xf32, #tpu.memory_space<vmem>>, vector<8x200xf32>
    %c0_40 = arith.constant 0 : index
    %c0_41 = arith.constant 0 : index
    %108 = vector.load %arg6[%c0_40, %c0_41] : memref<200x256xf32, #tpu.memory_space<vmem>>, vector<200x256xf32>
    %cst_42 = arith.constant dense<0.000000e+00> : vector<8x256xf32>
    %109 = tpu.matmul %107, %108, %cst_42 {dimension_numbers = #tpu.dot_dimension_numbers<[1], [0], [0], [1], [0, 0, 1, 1], [], []>} : vector<8x200xf32>, vector<200x256xf32>, vector<8x256xf32> -> vector<8x256xf32>
    %c0_43 = arith.constant 0 : index
    %c0_44 = arith.constant 0 : index
    %110 = vector.load %arg3[%c0_43, %c0_44] : memref<8x1xf32, #tpu.memory_space<vmem>>, vector<8x1xf32>
    %111 = vector.broadcast %110 : vector<8x1xf32> to vector<8x256xf32>
    %112 = arith.addf %109, %111 : vector<8x256xf32>
    %c0_45 = arith.constant 0 : index
    %c0_46 = arith.constant 0 : index
    %c0_47 = arith.constant 0 : index
    %113 = vector.load %arg4[%c0_45, %c0_46, %c0_47] : memref<1x8x256xf32, #tpu.memory_space<vmem>>, vector<1x8x256xf32>
    %114 = vector.shape_cast %113 : vector<1x8x256xf32> to vector<8x256xf32>
    %115 = vector.shape_cast %112 : vector<8x256xf32> to vector<1x8x256xf32>
    tpu.vector_store %arg4[%c0_45, %c0_46, %c0_47], %115 {strides = array<i32>} : memref<1x8x256xf32, #tpu.memory_space<vmem>>, vector<1x8x256xf32>,
    return
  }
  func.func @transform_0(%arg0: i32) -> (i32, i32, i32, i32) {
    %c0_i32 = arith.constant 0 : i32
    %c0_i32_0 = arith.constant 0 : i32
    %c0_i32_1 = arith.constant 0 : i32
    %c0_i32_2 = arith.constant 0 : i32
    return %arg0, %c0_i32, %c0_i32_0, %c0_i32_1 : i32, i32, i32, i32
  }
  func.func @transform_1(%arg0: i32) -> (i32, i32) {
    %c0_i32 = arith.constant 0 : i32
    %c0_i32_0 = arith.constant 0 : i32
    %c0_i32_1 = arith.constant 0 : i32
    return %c0_i32, %c0_i32_0 : i32, i32
  }
  func.func @transform_2(%arg0: i32) -> (i32, i32) {
    %c0_i32 = arith.constant 0 : i32
    %c0_i32_0 = arith.constant 0 : i32
    %c0_i32_1 = arith.constant 0 : i32
    return %c0_i32, %c0_i32_0 : i32, i32
  }
  func.func @transform_3(%arg0: i32) -> (i32, i32, i32) {
    %c0_i32 = arith.constant 0 : i32
    %c0_i32_0 = arith.constant 0 : i32
    %c0_i32_1 = arith.constant 0 : i32
    return %arg0, %c0_i32, %c0_i32_0 : i32, i32, i32
  }
}

</mosaic_0001>

<bundles_post_ra>
// kernel: multi_scale_block.3
= control target key start
LH: loop header
LB: loop body
LE: loop exit
PB: predicated region body
PF: predicated region fallthrough
CT: control target
= control target key end

     0   :  { %s6440_s12 = smov 0   ;;  %s10139_s0 = inlined_call_operand.vmem [shape: f32[2,4,16,16], index: 0, kind: input, shape index: {}]   ;;  %s10140_s1 = inlined_call_operand.vmem [shape: f32[8,200], index: 1, kind: input, shape index: {}]   ;;  %s10141_s2 = inlined_call_operand.vmem [shape: f32[8,1], index: 2, kind: input, shape index: {}]   ;;  %s10142_s3 = inlined_call_operand.vmem [shape: f32[2,8,256], index: 3, kind: output, shape index: {}]  }
   0x1 LB: > { %s6301_s13 = sadd.s32 4294967295, %s6402_s12   ;;  %p6305_p0 = scmp.ge.s32.totalorder %s6402_s12, 1  ;;  %s6402_s12 = sphi %s6440_s12, %s13_s12  }
   0x2   : > { %p137_p1 = scmp.lt.s32.totalorder %s6402_s12, 3 }
   0x4   : > { %p138_p2 = pnand %p6305_p0, %p137_p1 }
   0x6   : > { %141 = sbr.rel (%p138_p2) target bundleno = 2614 (0xa36), region = 32 }
   0xb   : > { %p6448_p3 = scmp.lt.s32.totalorder %s6301_s13, 1  ;;  %vm171_vm0 = vcmask 162816   ;;  %vm174_vm1 = vcmask 158720   ;;  %v10143_v0 = vmov 0.0   ;;  %s6405_s19 = smov 2   ;;  %vm225_vm2 = vcmask 146448  }
   0xc   : > { %176 = vst.msk [vmem:[#allocation2 + $0x18] sm:$0xff] %vm171_vm0, %v10143_v0  ;;  %177 = vst.msk [vmem:[#allocation2 + $0x20] sm:$0xff] %vm171_vm0, %v10143_v0  ;;  %s6406_s20 = smov 127   ;;  %v6407_v17 = vmov 1983009808   ;;  %v251_v19 = vlaneseq  ;;  %vm2587_vm3 = vcmask 1045504  }
   0xd   : > { %172 = vst.msk [vmem:[#allocation2] sm:$0xff] %vm171_vm0, %v10143_v0  ;;  %173 = vst.msk [vmem:[#allocation2 + $0x8] sm:$0xff] %vm171_vm0, %v10143_v0  ;;  %s10715_s13 = smov (!%p6448_p3, %s6301_s13), 1  ;;  %v249_v18 = vunpack.c.l.s4 %v6407_v17  ;;  %vm1412_vm4 = vcmask 1046528   ;;  %s6408_s21 = smov 126   ;;  %vm3762_vm5 = vcmask 1044480  }
   0xe   : > { %179 = vst.msk [vmem:[#allocation2 + $0x30] sm:$0xff] %vm171_vm0, %v10143_v0  ;;  %180 = vst.msk [vmem:[#allocation2 + $0x38] sm:$0xff] %vm171_vm0, %v10143_v0  ;;  %s6313_s15 = sshll.u32 %s10715_s13, 6  ;;  %v6494_v25 = vshrl.u32 %v251_v19, 7  ;;  %s6409_s22 = smov 125   ;;  %vm459_vm6 = vcmask 1043456  }
   0xf   : > { %182 = vst.msk [vmem:[#allocation2 + $0x48] sm:$0xff] %vm171_vm0, %v10143_v0  ;;  %183 = vst.msk [vmem:[#allocation2 + $0x50] sm:$0xff] %vm171_vm0, %v10143_v0  ;;  %s165_s18 = scalar_lea.vmem %s10139_s0, %s6313_s15  ;;  %v250_v24 = vunpack.c.0.s8 %v249_v18  ;;  %s6410_s23 = smov 124   ;;  %vm438_vm7 = vcmask 130048   ;;  %vm440_vm8 = vcmask 261120   ;;  %vm442_vm9 = vcmask 392192  }
  0x10   : > { %178 = vst.msk [vmem:[#allocation2 + $0x28] sm:$0xf] %vm174_vm1, %v10143_v0  ;;  %175 = vst.msk [vmem:[#allocation2 + $0x10] sm:$0xf] %vm174_vm1, %v10143_v0  ;;  %v187_v1 = vld [vmem:[%s165_s18 + $0x10] sm:$0xff]  ;;  %v185_v2 = vld [vmem:[%s165_s18] sm:$0xff] }
  0x11   : > { %181 = vst.msk [vmem:[#allocation2 + $0x40] sm:$0xf] %vm174_vm1, %v10143_v0  ;;  %184 = vst.msk [vmem:[#allocation2 + $0x58] sm:$0xf] %vm174_vm1, %v10143_v0  ;;  %205 = vrot.lane.b32.xlu1 %v187_v1, %s6405_s19  ;;  %201 = vrot.lane.b32.xlu0 %v185_v2, %s6405_s19  ;;  %v188_v3 = vld [vmem:[%s165_s18 + $0x18] sm:$0xff]  ;;  %v186_v4 = vld [vmem:[%s165_s18 + $0x8] sm:$0xff]  ;;  %v6516_v36 = vsub.s32 %v250_v24, %v6494_v25 }
  0x12   : > { %v190_v5 = vld [vmem:[%s165_s18 + $0x28] sm:$0xff]  ;;  %v189_v6 = vld [vmem:[%s165_s18 + $0x20] sm:$0xff]  ;;  %v192_v7 = vld [vmem:[%s165_s18 + $0x38] sm:$0xff]  ;;  %s6412_s24 = smov 32   ;;  %s6413_s25 = smov 64   ;;  %vm444_vm10 = vcmask 523264  }
  0x13   : > { %v191_v8 = vld [vmem:[%s165_s18 + $0x30] sm:$0xff]  ;;  %s6414_s26 = smov 96   ;;  %s6415_s27 = smov 16   ;;  %vm446_vm11 = vcmask 654336   ;;  %vm448_vm12 = vcmask 785408   ;;  %vm450_vm13 = vcmask 916480  }
  0x14   : > { %s6416_s28 = smov 48   ;;  %s6417_s29 = smov 80   ;;  %vm6169_vm14 = vcmask 588800  }
  0x15   : > { %207 = vrot.lane.b32.xlu1 %v188_v3, %s6405_s19  ;;  %203 = vrot.lane.b32.xlu0 %v186_v4, %s6405_s19  ;;  %s6418_s30 = smov 112   ;;  %s6314_s10 = sshll.u32 %s10715_s13, 4 }
  0x16   : > { %s170_s15 = scalar_lea.vmem %s10142_s3, %s6314_s10 }
  0x19   : > { %211 = vrot.lane.b32.xlu1 %v190_v5, %s6405_s19  ;;  %209 = vrot.lane.b32.xlu0 %v189_v6, %s6405_s19 }
  0x1d   : > { %215 = vrot.lane.b32.xlu1 %v192_v7, %s6405_s19  ;;  %213 = vrot.lane.b32.xlu0 %v191_v8, %s6405_s19 }
  0x83   : > { %v206_v9 = vpop.permute.xlu1 %205  ;;  %v202_v10 = vpop.permute.xlu0 %201 }
  0x84   : > { %228 = vst.msk [vmem:[#allocation2 + $0x1a] sm:$0xff] %vm225_vm2, %v206_v9  ;;  %226 = vst.msk [vmem:[#allocation2 + $0x2] sm:$0xff] %vm225_vm2, %v202_v10 }
  0x87   : > { %v208_v11 = vpop.permute.xlu1 %207  ;;  %v204_v12 = vpop.permute.xlu0 %203 }
  0x88   : > { %229 = vst.msk [vmem:[#allocation2 + $0x22] sm:$0xff] %vm225_vm2, %v208_v11  ;;  %227 = vst.msk [vmem:[#allocation2 + $0xa] sm:$0xff] %vm225_vm2, %v204_v12 }
  0x8b   : > { %v212_v13 = vpop.permute.xlu1 %211  ;;  %v210_v14 = vpop.permute.xlu0 %209  ;;  %v6476_v15 = vld [vmem:[#allocation2] sm:$0xff]  ;;  %v6482_v16 = vld [vmem:[#allocation2 + $0x18] sm:$0xff] }
  0x8c   : > { %231 = vst.msk [vmem:[#allocation2 + $0x3a] sm:$0xff] %vm225_vm2, %v212_v13  ;;  %230 = vst.msk [vmem:[#allocation2 + $0x32] sm:$0xff] %vm225_vm2, %v210_v14  ;;  %472 = vrot.lane.b32.xlu0 %v6476_v15, %s6406_s20  ;;  %v2593_v27 = vrot.slane %v6482_v16, 2  ;;  %v2588_v31 = vrot.slane %v6476_v15, 2  ;;  %v3768_v11 = vrot.slane %v6482_v16, 3  ;;  %v3763_v18 = vrot.slane %v6476_v15, 3 }
  0x8f   : > { %v216_v20 = vpop.permute.xlu1 %215  ;;  %v214_v21 = vpop.permute.xlu0 %213  ;;  %v6484_v22 = vld [vmem:[#allocation2 + $0x8] sm:$0xff]  ;;  %v6486_v23 = vld [vmem:[#allocation2 + $0x20] sm:$0xff]  ;;  %v6589_v61 = vld [vmem:[#allocation2 + $0x10] sm:$0xf] }
  0x90   : > { %233 = vst.msk [vmem:[#allocation2 + $0x52] sm:$0xff] %vm225_vm2, %v216_v20  ;;  %232 = vst.msk [vmem:[#allocation2 + $0x4a] sm:$0xff] %vm225_vm2, %v214_v21  ;;  %476 = vrot.lane.b32.xlu0 %v6482_v16, %s6406_s20  ;;  %474 = vrot.lane.b32.xlu1 %v6484_v22, %s6406_s20  ;;  %v2589_v26 = vrot.slane %v6484_v22, 2  ;;  %v2594_v28 = vrot.slane %v6486_v23, 2  ;;  %v6591_v62 = vld [vmem:[#allocation2 + $0x28] sm:$0xf] }
  0x91   : > { %v2591_v2 = vrot.slane %v6589_v61, 2  ;;  %v2596_v3 = vrot.slane %v6591_v62, 2  ;;  %v3764_v10 = vrot.slane %v6484_v22, 3  ;;  %v3769_v12 = vrot.slane %v6486_v23, 3 }
  0x92   : > { %v6513_v35 = vsel %vm2587_vm3, %v2588_v31, %v2589_v26  ;;  %v6521_v38 = vsel %vm2587_vm3, %v2593_v27, %v2594_v28  ;;  %v3766_v17 = vrot.slane %v6589_v61, 3  ;;  %v3771_v19 = vrot.slane %v6591_v62, 3 }
  0x93   : > { %v6499_v29 = vld [vmem:[#allocation2 + $0x30] sm:$0xff]  ;;  %v6501_v30 = vld [vmem:[#allocation2 + $0x38] sm:$0xff]  ;;  %10214 = vst [vmem:[#allocation4_spill] sm:$0xff] %v6513_v35  ;;  %v6593_v63 = vld [vmem:[#allocation2 + $0x40] sm:$0xf]  ;;  %v6610_v6 = vsel %vm2587_vm3, %v2589_v26, %v2591_v2  ;;  %v6613_v7 = vsel %vm2587_vm3, %v2594_v28, %v2596_v3  ;;  %v6638_v20 = vsel %vm3762_vm5, %v3763_v18, %v3764_v10  ;;  %v6641_v21 = vsel %vm3762_vm5, %v3768_v11, %v3769_v12 }
  0x94   : > { %478 = vrot.lane.b32.xlu1 %v6486_v23, %s6406_s20  ;;  %480 = vrot.lane.b32.xlu0 %v6499_v29, %s6406_s20  ;;  %v1424_v32 = vrot.slane %v6501_v30, 1  ;;  %v247_v33 = vcombine.high %v6476_v15, %v6499_v29  ;;  %v1423_v34 = vrot.slane %v6499_v29, 1  ;;  %v246_v37 = vcombine.low %v6476_v15, %v6499_v29  ;;  %10215 = vst [vmem:[#allocation5_spill] sm:$0xff] %v6610_v6 }
  0x95   : > { %v2598_v55 = vrot.slane %v6499_v29, 2  ;;  %v2599_v56 = vrot.slane %v6501_v30, 2  ;;  %v2601_v4 = vrot.slane %v6593_v63, 2  ;;  %10216 = vst [vmem:[#allocation6_spill] sm:$0xff] %v6613_v7  ;;  %v3773_v13 = vrot.slane %v6499_v29, 3  ;;  %10219 = vst [vmem:[#allocation9_spill] sm:$0xff] %v6638_v20 }
  0x96   : > { %v6530_v41 = vsel %vm1412_vm4, %v1423_v34, %v1424_v32  ;;  %v6543_v46 = vrot.slane %v246_v37, %v6516_v36  ;;  %v6549_v48 = vrot.slane %v247_v33, %v6516_v36  ;;  %v3774_v14 = vrot.slane %v6501_v30, 3  ;;  %10220 = vst [vmem:[#allocation10_spill] sm:$0xff] %v6641_v21 }
  0x97   : > { %v6523_v39 = vld [vmem:[#allocation2 + $0x48] sm:$0xff]  ;;  %v6525_v40 = vld [vmem:[#allocation2 + $0x50] sm:$0xff]  ;;  %v6583_v58 = vsel %vm2587_vm3, %v2598_v55, %v2599_v56  ;;  %v6599_v1 = vld [vmem:[#allocation2 + $0x58] sm:$0xf]  ;;  %v6616_v8 = vsel %vm2587_vm3, %v2599_v56, %v2601_v4  ;;  %v6653_v28 = vsel %vm3762_vm5, %v3764_v10, %v3766_v17  ;;  %v6659_v33 = vsel %vm3762_vm5, %v3769_v12, %v3771_v19 }
  0x98   : > { %482 = vrot.lane.b32.xlu1 %v6501_v30, %s6406_s20  ;;  %484 = vrot.lane.b32.xlu0 %v6523_v39, %s6406_s20  ;;  %v262_v42 = vcombine.low %v6482_v16, %v6523_v39  ;;  %v1429_v43 = vrot.slane %v6525_v40, 1  ;;  %v263_v44 = vcombine.high %v6482_v16, %v6523_v39  ;;  %v1428_v45 = vrot.slane %v6523_v39, 1  ;;  %10217 = vst [vmem:[#allocation7_spill] sm:$0xff] %v6616_v8 }
  0x99   : > { %v2603_v57 = vrot.slane %v6523_v39, 2  ;;  %v2604_v59 = vrot.slane %v6525_v40, 2  ;;  %v2606_v5 = vrot.slane %v6599_v1, 2  ;;  %v6644_v24 = vsel %vm3762_vm5, %v3773_v13, %v3774_v14  ;;  %10222 = vst [vmem:[#allocation12_spill] sm:$0xff] %v6653_v28  ;;  %10224 = vst [vmem:[#allocation14_spill] sm:$0xff] %v6659_v33 }
  0x9a   : > { %v6546_v47 = vrot.slane %v262_v42, %v6516_v36  ;;  %v6552_v49 = vrot.slane %v263_v44, %v6516_v36  ;;  %v6557_v50 = vsel %vm1412_vm4, %v1428_v45, %v1429_v43  ;;  %10221 = vst [vmem:[#allocation11_spill] sm:$0xff] %v6644_v24  ;;  %v3778_v26 = vrot.slane %v6523_v39, 3 }
  0x9b   : > { %v6587_v60 = vsel %vm2587_vm3, %v2603_v57, %v2604_v59  ;;  %v6619_v9 = vsel %vm2587_vm3, %v2604_v59, %v2606_v5  ;;  %v3779_v27 = vrot.slane %v6525_v40, 3  ;;  %v3776_v34 = vrot.slane %v6593_v63, 3 }
  0x9c   : > { %486 = vrot.lane.b32.xlu1 %v6525_v40, %s6406_s20  ;;  %706 = vrot.lane.b32.xlu0 %v6476_v15, %s6408_s21  ;;  %v279_v51 = vcombine.high %v6543_v46, %v6546_v47  ;;  %v294_v52 = vcombine.low %v6549_v48, %v6552_v49  ;;  %v295_v53 = vcombine.high %v6549_v48, %v6552_v49  ;;  %v3781_v42 = vrot.slane %v6599_v1, 3 }
  0x9d   : > { %v278_v54 = vcombine.low %v6543_v46, %v6546_v47  ;;  %10218 = vst [vmem:[#allocation8_spill] sm:$0xff] %v6619_v9  ;;  %v6656_v31 = vsel %vm3762_vm5, %v3778_v26, %v3779_v27  ;;  %v6667_v37 = vsel %vm3762_vm5, %v3774_v14, %v3776_v34  ;;  %v4943_v44 = vrot.slane %v6486_v23, 4 }
  0x9e   : > { %10223 = vst [vmem:[#allocation13_spill] sm:$0xff] %v6656_v31  ;;  %10225 = vst [vmem:[#allocation15_spill] sm:$0xff] %v6667_v37  ;;  %v6672_v45 = vsel %vm3762_vm5, %v3779_v27, %v3781_v42  ;;  %v4945_v55 = vrot.slane %v6591_v62, 4  ;;  %v4938_v56 = vrot.slane %v6484_v22, 4  ;;  %v4940_v57 = vrot.slane %v6589_v61, 4 }
  0x9f   : > { %10226 = vst [vmem:[#allocation16_spill] sm:$0xff] %v6672_v45  ;;  %v4953_v3 = vrot.slane %v6525_v40, 4  ;;  %v4942_v4 = vrot.slane %v6482_v16, 4  ;;  %v4955_v5 = vrot.slane %v6599_v1, 4  ;;  %v6411_v10 = vmov 1934713408  }
  0xa0   : > { %708 = vrot.lane.b32.xlu1 %v6484_v22, %s6408_s21  ;;  %710 = vrot.lane.b32.xlu0 %v6482_v16, %s6408_s21  ;;  %v6682_v59 = vsel %vm459_vm6, %v4943_v44, %v4945_v55  ;;  %v6685_v2 = vsel %vm459_vm6, %v4938_v56, %v4940_v57  ;;  %v281_v11 = vunpack.c.l.s4 %v6411_v10  ;;  %v4948_v12 = vrot.slane %v6501_v30, 4 }
  0xa1   : > { %10227 = vst [vmem:[#allocation17_spill] sm:$0xff] %v6682_v59  ;;  %10228 = vst [vmem:[#allocation18_spill] sm:$0xff] %v6685_v2  ;;  %v4950_v13 = vrot.slane %v6593_v63, 4  ;;  %v4937_v14 = vrot.slane %v6476_v15, 4  ;;  %v330_v17 = vcombine.low %v6486_v23, %v6525_v40  ;;  %v6700_v18 = vsel %vm459_vm6, %v4953_v3, %v4955_v5 }
  0xa2   : > { %10229 = vst [vmem:[#allocation19_spill] sm:$0xff] %v6700_v18  ;;  %v6703_v19 = vsel %vm459_vm6, %v4942_v4, %v4943_v44  ;;  %v1414_v26 = vrot.slane %v6484_v22, 1  ;;  %v314_v42 = vcombine.low %v6484_v22, %v6501_v30  ;;  %v4952_v44 = vrot.slane %v6523_v39, 4 }
  0xa3   : > { %10230 = vst [vmem:[#allocation20_spill] sm:$0xff] %v6703_v19  ;;  %v6707_v27 = vsel %vm459_vm6, %v4948_v12, %v4950_v13  ;;  %v6710_v34 = vsel %vm459_vm6, %v4937_v14, %v4938_v56  ;;  %v4947_v55 = vrot.slane %v6499_v29, 4  ;;  %v1413_v57 = vrot.slane %v6476_v15, 1 }
  0xa4   : > { %712 = vrot.lane.b32.xlu1 %v6486_v23, %s6408_s21  ;;  %714 = vrot.lane.b32.xlu0 %v6499_v29, %s6408_s21  ;;  %10231 = vst [vmem:[#allocation21_spill] sm:$0xff] %v6707_v27  ;;  %10232 = vst [vmem:[#allocation22_spill] sm:$0xff] %v6710_v34  ;;  %v282_v4 = vunpack.c.0.s8 %v281_v11  ;;  %v338_v5 = vrot.slane %v330_v17, %v6516_v36  ;;  %v331_v56 = vcombine.high %v6486_v23, %v6525_v40 }
  0xa5   : > { %v6725_v10 = vsel %vm459_vm6, %v4952_v44, %v4953_v3  ;;  %v6728_v13 = vsel %vm459_vm6, %v4947_v55, %v4948_v12  ;;  %v6731_v14 = vsel %vm1412_vm4, %v1413_v57, %v1414_v26  ;;  %v322_v3 = vrot.slane %v314_v42, %v6516_v36 }
  0xa6   : > { %10233 = vst [vmem:[#allocation23_spill] sm:$0xff] %v6725_v10  ;;  %10234 = vst [vmem:[#allocation24_spill] sm:$0xff] %v6728_v13  ;;  %v315_v11 = vcombine.high %v6484_v22, %v6501_v30  ;;  %v6744_v12 = vsub.s32 %v282_v4, %v6494_v25  ;;  %v1421_v44 = vrot.slane %v6591_v62, 1 }
  0xa7   : > { %v347_v17 = vcombine.high %v322_v3, %v338_v5 }
  0xa8   : > { %716 = vrot.lane.b32.xlu1 %v6501_v30, %s6408_s21  ;;  %718 = vrot.lane.b32.xlu0 %v6523_v39, %s6408_s21 }
  0xa9   : > { %v361_v25 = vrot.slane %v347_v17, %v6744_v12 }
  0xac   : > { %720 = vrot.lane.b32.xlu1 %v6525_v40, %s6408_s21  ;;  %940 = vrot.lane.b32.xlu0 %v6476_v15, %s6409_s22 }
  0xb0   : > { %942 = vrot.lane.b32.xlu1 %v6484_v22, %s6409_s22  ;;  %944 = vrot.lane.b32.xlu0 %v6482_v16, %s6409_s22 }
  0xb4   : > { %946 = vrot.lane.b32.xlu1 %v6486_v23, %s6409_s22  ;;  %948 = vrot.lane.b32.xlu0 %v6499_v29, %s6409_s22 }
  0xb8   : > { %950 = vrot.lane.b32.xlu1 %v6501_v30, %s6409_s22  ;;  %952 = vrot.lane.b32.xlu0 %v6523_v39, %s6409_s22 }
  0xbc   : > { %954 = vrot.lane.b32.xlu1 %v6525_v40, %s6409_s22  ;;  %1174 = vrot.lane.b32.xlu0 %v6476_v15, %s6410_s23  ;;  %v1419_v15 = vrot.slane %v6486_v23, 1 }
  0xbe   : > { %v6761_v55 = vsel %vm1412_vm4, %v1419_v15, %v1421_v44 }
  0xc0   : > { %1176 = vrot.lane.b32.xlu1 %v6484_v22, %s6410_s23  ;;  %1178 = vrot.lane.b32.xlu0 %v6482_v16, %s6410_s23  ;;  %v329_v22 = vrot.slane %v315_v11, %v6516_v36  ;;  %v1441_v11 = vcombine.low %v6731_v14, %v6530_v41 }
  0xc4   : > { %1180 = vrot.lane.b32.xlu1 %v6486_v23, %s6410_s23  ;;  %1182 = vrot.lane.b32.xlu0 %v6499_v29, %s6410_s23  ;;  %v1418_v29 = vrot.slane %v6482_v16, 1 }
  0xc6   : > { %v6751_v23 = vsel %vm1412_vm4, %v1418_v29, %v1419_v15  ;;  %v1431_v29 = vrot.slane %v6599_v1, 1  ;;  %v1426_v15 = vrot.slane %v6593_v63, 1 }
  0xc7   : > { %v1457_v1 = vcombine.low %v6751_v23, %v6557_v50 }
  0xc8   : > { %1184 = vrot.lane.b32.xlu1 %v6501_v30, %s6410_s23  ;;  %1186 = vrot.lane.b32.xlu0 %v6523_v39, %s6410_s23  ;;  %v1416_v39 = vrot.slane %v6589_v61, 1  ;;  %v345_v61 = vrot.slane %v331_v56, %v6516_v36  ;;  %v302_v56 = vrot.slane %v294_v52, %v6744_v12  ;;  %v309_v52 = vrot.slane %v295_v53, %v6744_v12 }
  0xc9   : > { %v6807_v48 = vsel %vm1412_vm4, %v1424_v32, %v1426_v15  ;;  %v379_v30 = vcombine.high %v361_v25, %v10143_v0 }
  0xca   : > { %v6748_v16 = vsel %vm1412_vm4, %v1414_v26, %v1416_v39  ;;  %v362_v42 = vcombine.low %v329_v22, %v345_v61  ;;  %v293_v26 = vrot.slane %v279_v51, %v6744_v12  ;;  %v363_v57 = vcombine.high %v329_v22, %v345_v61 }
  0xcb   : > { %v6782_v39 = vrot.slane %v278_v54, %v6744_v12  ;;  %v346_v51 = vcombine.low %v322_v3, %v338_v5  ;;  %v6800_v54 = vsel %vm1412_vm4, %v1429_v43, %v1431_v29  ;;  %v1509_v43 = vcombine.low %v6748_v16, %v6807_v48 }
  0xcc   : > { %1188 = vrot.lane.b32.xlu1 %v6525_v40, %s6410_s23  ;;  %1651 = vrot.lane.b32.xlu0 %v6731_v14, %s6406_s20  ;;  %v370_v62 = vrot.slane %v362_v42, %v6744_v12  ;;  %v377_v4 = vrot.slane %v363_v57, %v6744_v12  ;;  %v311_v53 = vcombine.high %v293_v26, %v10143_v0 }
  0xcd   : > { %10235 = vst [vmem:[#allocation25_spill] sm:$0xff] %v6782_v39  ;;  %v310_v46 = vcombine.high %v6782_v39, %v10143_v0  ;;  %v6795_v47 = vrot.slane %v346_v51, %v6744_v12  ;;  %v1525_v40 = vcombine.low %v6761_v55, %v6800_v54  ;;  %v312_v32 = vcombine.high %v302_v56, %v10143_v0 }
  0xce   : > { %v1526_v5 = vcombine.high %v6761_v55, %v6800_v54  ;;  %v1517_v3 = vrot.slane %v1509_v43, %v6516_v36  ;;  %v1510_v17 = vcombine.high %v6748_v16, %v6807_v48  ;;  %v380_v61 = vcombine.high %v370_v62, %v10143_v0 }
  0xcf   : > { %10236 = vst [vmem:[#allocation26_spill] sm:$0xff] %v6795_v47  ;;  %v378_v49 = vcombine.high %v6795_v47, %v10143_v0  ;;  %v1533_v63 = vrot.slane %v1525_v40, %v6516_v36  ;;  %v313_v44 = vcombine.high %v309_v52, %v10143_v0  ;;  %v1449_v57 = vrot.slane %v1441_v11, %v6516_v36 }
  0xd0   : > { %1653 = vrot.lane.b32.xlu1 %v6748_v16, %s6406_s20  ;;  %1655 = vrot.lane.b32.xlu0 %v6751_v23, %s6406_s20  ;;  %v1540_v42 = vrot.slane %v1526_v5, %v6516_v36  ;;  %v381_v51 = vcombine.high %v377_v4, %v10143_v0 }
  0xd1   : > { %v1542_v22 = vcombine.high %v1517_v3, %v1533_v63 }
  0xd3   : > { %v1556_v29 = vrot.slane %v1542_v22, %v6744_v12 }
  0xd4   : > { %1657 = vrot.lane.b32.xlu1 %v6761_v55, %s6406_s20  ;;  %415 = vrot.lane.b32.xlu0 %v361_v25, %s6412_s24  ;;  %v1465_v25 = vrot.slane %v1457_v1, %v6516_v36 }
  0xd6   : > { %v1474_v15 = vcombine.high %v1449_v57, %v1465_v25 }
  0xd8   : > { %423 = vrot.lane.b32.xlu0 %v370_v62, %s6413_s25  ;;  %387 = vrot.lane.b32.xlu1 %v293_v26, %s6412_s24  ;;  %v1458_v26 = vcombine.high %v6751_v23, %v6557_v50  ;;  %v1442_v62 = vcombine.high %v6731_v14, %v6530_v41  ;;  %v1488_v40 = vrot.slane %v1474_v15, %v6744_v12 }
  0xdc   : > { %431 = vrot.lane.b32.xlu0 %v377_v4, %s6414_s26  ;;  %395 = vrot.lane.b32.xlu1 %v302_v56, %s6413_s25  ;;  %v1524_v56 = vrot.slane %v1510_v17, %v6516_v36  ;;  %v1541_v4 = vcombine.low %v1517_v3, %v1533_v63 }
  0xde   : > { %v6865_v22 = vrot.slane %v1541_v4, %v6744_v12 }
  0xe0   : > { %403 = vrot.lane.b32.xlu1 %v309_v52, %s6414_s26  ;;  %383 = vrot.lane.b32.xlu0 %v310_v46, %s6415_s27  ;;  %v1557_v52 = vcombine.low %v1524_v56, %v1540_v42  ;;  %v1472_v46 = vrot.slane %v1458_v26, %v6516_v36  ;;  %10238 = vst [vmem:[#allocation28_spill] sm:$0xff] %v6865_v22 }
  0xe1   : > { %v1573_v3 = vcombine.high %v6865_v22, %v10143_v0 }
  0xe2   : > { %v1565_v43 = vrot.slane %v1557_v52, %v6744_v12 }
  0xe4   : > { %411 = vrot.lane.b32.xlu1 %v378_v49, %s6415_s27  ;;  %391 = vrot.lane.b32.xlu0 %v311_v53, %s6416_s28  ;;  %v1456_v49 = vrot.slane %v1442_v62, %v6516_v36  ;;  %v1558_v53 = vcombine.high %v1524_v56, %v1540_v42  ;;  %v1575_v15 = vcombine.high %v1565_v43, %v10143_v0 }
  0xe6   : > { %v1572_v5 = vrot.slane %v1558_v53, %v6744_v12  ;;  %v1490_v11 = vcombine.high %v1456_v49, %v1472_v46 }
  0xe8   : > { %419 = vrot.lane.b32.xlu1 %v379_v30, %s6416_s28  ;;  %399 = vrot.lane.b32.xlu0 %v312_v32, %s6417_s29  ;;  %v1489_v30 = vcombine.low %v1456_v49, %v1472_v46  ;;  %v1473_v32 = vcombine.low %v1449_v57, %v1465_v25  ;;  %v1506_v25 = vcombine.high %v1488_v40, %v10143_v0 }
  0xe9   : > { %v1574_v57 = vcombine.high %v1556_v29, %v10143_v0 }
  0xea   : > { %v1497_v1 = vrot.slane %v1489_v30, %v6744_v12  ;;  %v6857_v17 = vrot.slane %v1473_v32, %v6744_v12 }
  0xec   : > { %427 = vrot.lane.b32.xlu1 %v380_v61, %s6417_s29  ;;  %407 = vrot.lane.b32.xlu0 %v313_v44, %s6418_s30  ;;  %10237 = vst [vmem:[#allocation27_spill] sm:$0xff] %v6857_v17  ;;  %v1504_v61 = vrot.slane %v1490_v11, %v6744_v12  ;;  %v1505_v44 = vcombine.high %v6857_v17, %v10143_v0 }
  0xed   : > { %v1507_v56 = vcombine.high %v1497_v1, %v10143_v0 }
  0xee   : > { %v1508_v52 = vcombine.high %v1504_v61, %v10143_v0 }
  0xf0   : > { %435 = vrot.lane.b32.xlu1 %v381_v51, %s6418_s30  ;;  %1610 = vrot.lane.b32.xlu0 %v1556_v29, %s6412_s24 }
  0xf4   : > { %1582 = vrot.lane.b32.xlu1 %v1488_v40, %s6412_s24  ;;  %1618 = vrot.lane.b32.xlu0 %v1565_v43, %s6413_s25  ;;  %v1576_v40 = vcombine.high %v1572_v5, %v10143_v0 }
  0xf8   : > { %1590 = vrot.lane.b32.xlu1 %v1497_v1, %s6413_s25  ;;  %1626 = vrot.lane.b32.xlu0 %v1572_v5, %s6414_s26 }
  0xfc   : > { %1598 = vrot.lane.b32.xlu1 %v1504_v61, %s6414_s26  ;;  %1578 = vrot.lane.b32.xlu0 %v1505_v44, %s6415_s27 }
  0xfe   : > { %v473_v63 = vpop.permute.xlu0 %472 }
 0x100   : > { %1606 = vrot.lane.b32.xlu1 %v1573_v3, %s6415_s27  ;;  %1586 = vrot.lane.b32.xlu0 %v1506_v25, %s6416_s28 }
 0x102   : > { %v475_v42 = vpop.permute.xlu1 %474  ;;  %v477_v26 = vpop.permute.xlu0 %476 }
 0x104   : > { %1614 = vrot.lane.b32.xlu1 %v1574_v57, %s6416_s28  ;;  %1594 = vrot.lane.b32.xlu0 %v1507_v56, %s6417_s29 }
 0x106   : > { %v479_v62 = vpop.permute.xlu1 %478  ;;  %v481_v51 = vpop.permute.xlu0 %480 }
 0x107   : > { %v496_v46 = vcombine.low %v473_v63, %v481_v51  ;;  %v497_v49 = vcombine.high %v473_v63, %v481_v51 }
 0x108   : > { %1622 = vrot.lane.b32.xlu1 %v1575_v15, %s6417_s29  ;;  %1602 = vrot.lane.b32.xlu0 %v1508_v52, %s6418_s30 }
 0x109   : > { %v6885_v1 = vrot.slane %v496_v46, %v6516_v36  ;;  %v511_v61 = vrot.slane %v497_v49, %v6516_v36 }
 0x10a   : > { %v483_v53 = vpop.permute.xlu1 %482  ;;  %v485_v29 = vpop.permute.xlu0 %484 }
 0x10b   : > { %v512_v30 = vcombine.low %v477_v26, %v485_v29  ;;  %v513_v32 = vcombine.high %v477_v26, %v485_v29  ;;  %v564_v4 = vcombine.low %v475_v42, %v483_v53  ;;  %v565_v3 = vcombine.high %v475_v42, %v483_v53 }
 0x10c   : > { %1630 = vrot.lane.b32.xlu1 %v1576_v40, %s6418_s30 }
 0x10d   : > { %v6888_v43 = vrot.slane %v512_v30, %v6516_v36  ;;  %v527_v11 = vrot.slane %v513_v32, %v6516_v36  ;;  %v6895_v57 = vrot.slane %v564_v4, %v6516_v36  ;;  %v579_v42 = vrot.slane %v565_v3, %v6516_v36 }
 0x10e   : > { %v487_v44 = vpop.permute.xlu1 %486  ;;  %v707_v63 = vpop.permute.xlu0 %706 }
 0x10f   : > { %v580_v25 = vcombine.low %v479_v62, %v487_v44  ;;  %v581_v5 = vcombine.high %v479_v62, %v487_v44  ;;  %v529_v26 = vcombine.high %v6885_v1, %v6888_v43  ;;  %v544_v52 = vcombine.low %v511_v61, %v527_v11 }
 0x110   : > { %v545_v4 = vcombine.high %v511_v61, %v527_v11 }
 0x111   : > { %v6898_v56 = vrot.slane %v580_v25, %v6516_v36  ;;  %v595_v51 = vrot.slane %v581_v5, %v6516_v36  ;;  %v6902_v15 = vrot.slane %v529_v26, %v6744_v12  ;;  %v6913_v29 = vrot.slane %v544_v52, %v6744_v12 }
 0x112   : > { %v709_v46 = vpop.permute.xlu1 %708  ;;  %v711_v49 = vpop.permute.xlu0 %710  ;;  %v6923_v52 = vrot.slane %v545_v4, %v6744_v12 }
 0x113   : > { %637 = vrot.lane.b32.xlu1 %v6902_v15, %s6412_s24  ;;  %v597_v62 = vcombine.high %v6895_v57, %v6898_v56  ;;  %v612_v40 = vcombine.low %v579_v42, %v595_v51  ;;  %v613_v25 = vcombine.high %v579_v42, %v595_v51 }
 0x115   : > { %v6910_v53 = vrot.slane %v597_v62, %v6744_v12  ;;  %v6920_v3 = vrot.slane %v612_v40, %v6744_v12  ;;  %v6937_v42 = vrot.slane %v613_v25, %v6744_v12 }
 0x116   : > { %v713_v30 = vpop.permute.xlu1 %712  ;;  %v715_v32 = vpop.permute.xlu0 %714 }
 0x117   : > { %665 = vrot.lane.b32.xlu0 %v6910_v53, %s6412_s24  ;;  %645 = vrot.lane.b32.xlu1 %v6913_v29, %s6413_s25  ;;  %v730_v44 = vcombine.low %v707_v63, %v715_v32  ;;  %v731_v5 = vcombine.high %v707_v63, %v715_v32 }
 0x119   : > { %v6930_v61 = vrot.slane %v730_v44, %v6516_v36 }
 0x11a   : > { %v717_v26 = vpop.permute.xlu1 %716  ;;  %v719_v62 = vpop.permute.xlu0 %718 }
 0x11b   : > { %v746_v0 = vcombine.low %v711_v49, %v719_v62  ;;  %v747_v13 = vcombine.high %v711_v49, %v719_v62  ;;  %673 = vrot.lane.b32.xlu0 %v6920_v3, %s6413_s25  ;;  %v798_v11 = vcombine.low %v709_v46, %v717_v26  ;;  %653 = vrot.lane.b32.xlu1 %v6923_v52, %s6414_s26 }
 0x11c   : > { %v745_v49 = vrot.slane %v731_v5, %v6516_v36  ;;  %v799_v4 = vcombine.high %v709_v46, %v717_v26 }
 0x11d   : > { %v6933_v51 = vrot.slane %v746_v0, %v6516_v36  ;;  %v761_v63 = vrot.slane %v747_v13, %v6516_v36  ;;  %v6945_v0 = vrot.slane %v798_v11, %v6516_v36 }
 0x11e   : > { %v721_v40 = vpop.permute.xlu1 %720  ;;  %v941_v32 = vpop.permute.xlu0 %940 }
 0x11f   : > { %v814_v62 = vcombine.low %v713_v30, %v721_v40  ;;  %v815_v10 = vcombine.high %v713_v30, %v721_v40  ;;  %681 = vrot.lane.b32.xlu0 %v6937_v42, %s6414_s26  ;;  %v763_v44 = vcombine.high %v6930_v61, %v6933_v51  ;;  %v778_v46 = vcombine.low %v745_v49, %v761_v63 }
 0x120   : > { %v813_v40 = vrot.slane %v799_v4, %v6516_v36  ;;  %v779_v27 = vcombine.high %v745_v49, %v761_v63 }
 0x121   : > { %v6948_v13 = vrot.slane %v814_v62, %v6516_v36  ;;  %v829_v25 = vrot.slane %v815_v10, %v6516_v36  ;;  %v6952_v5 = vrot.slane %v763_v44, %v6744_v12  ;;  %v6963_v62 = vrot.slane %v778_v46, %v6744_v12 }
 0x122   : > { %v943_v26 = vpop.permute.xlu1 %942  ;;  %v945_v30 = vpop.permute.xlu0 %944  ;;  %v6973_v46 = vrot.slane %v779_v27, %v6744_v12 }
 0x123   : > { %871 = vrot.lane.b32.xlu1 %v6952_v5, %s6412_s24  ;;  %v831_v11 = vcombine.high %v6945_v0, %v6948_v13  ;;  %v846_v10 = vcombine.low %v813_v40, %v829_v25  ;;  %v847_v2 = vcombine.high %v813_v40, %v829_v25 }
 0x125   : > { %v6960_v34 = vrot.slane %v831_v11, %v6744_v12  ;;  %v6970_v18 = vrot.slane %v846_v10, %v6744_v12  ;;  %v6987_v27 = vrot.slane %v847_v2, %v6744_v12 }
 0x126   : > { %v947_v44 = vpop.permute.xlu1 %946  ;;  %v949_v19 = vpop.permute.xlu0 %948 }
 0x127   : > { %899 = vrot.lane.b32.xlu0 %v6960_v34, %s6412_s24  ;;  %879 = vrot.lane.b32.xlu1 %v6963_v62, %s6413_s25  ;;  %v964_v4 = vcombine.low %v941_v32, %v949_v19  ;;  %v965_v11 = vcombine.high %v941_v32, %v949_v19 }
 0x129   : > { %v6980_v49 = vrot.slane %v964_v4, %v6516_v36 }
 0x12a   : > { %v951_v59 = vpop.permute.xlu1 %950  ;;  %v953_v47 = vpop.permute.xlu0 %952 }
 0x12b   : > { %v980_v39 = vcombine.low %v945_v30, %v953_v47  ;;  %v981_v22 = vcombine.high %v945_v30, %v953_v47  ;;  %907 = vrot.lane.b32.xlu0 %v6970_v18, %s6413_s25  ;;  %v1032_v63 = vcombine.low %v943_v26, %v951_v59  ;;  %887 = vrot.lane.b32.xlu1 %v6973_v46, %s6414_s26 }
 0x12c   : > { %v979_v47 = vrot.slane %v965_v11, %v6516_v36  ;;  %v1033_v40 = vcombine.high %v943_v26, %v951_v59 }
 0x12d   : > { %v6983_v25 = vrot.slane %v980_v39, %v6516_v36  ;;  %v995_v19 = vrot.slane %v981_v22, %v6516_v36  ;;  %v6995_v39 = vrot.slane %v1032_v63, %v6516_v36 }
 0x12e   : > { %v955_v32 = vpop.permute.xlu1 %954  ;;  %v1175_v30 = vpop.permute.xlu0 %1174 }
 0x12f   : > { %v1048_v10 = vcombine.low %v947_v44, %v955_v32  ;;  %v1049_v17 = vcombine.high %v947_v44, %v955_v32  ;;  %915 = vrot.lane.b32.xlu0 %v6987_v27, %s6414_s26  ;;  %v997_v4 = vcombine.high %v6980_v49, %v6983_v25  ;;  %v1012_v59 = vcombine.low %v979_v47, %v995_v19 }
 0x130   : > { %v1047_v32 = vrot.slane %v1033_v40, %v6516_v36  ;;  %v1013_v33 = vcombine.high %v979_v47, %v995_v19 }
 0x131   : > { %v6998_v22 = vrot.slane %v1048_v10, %v6516_v36  ;;  %v1063_v2 = vrot.slane %v1049_v17, %v6516_v36  ;;  %v7002_v11 = vrot.slane %v997_v4, %v6744_v12  ;;  %v7013_v10 = vrot.slane %v1012_v59, %v6744_v12 }
 0x132   : > { %v1177_v26 = vpop.permute.xlu1 %1176  ;;  %v1179_v44 = vpop.permute.xlu0 %1178  ;;  %v7023_v59 = vrot.slane %v1013_v33, %v6744_v12 }
 0x133   : > { %1105 = vrot.lane.b32.xlu1 %v7002_v11, %s6412_s24  ;;  %v1065_v63 = vcombine.high %v6995_v39, %v6998_v22  ;;  %v1080_v17 = vcombine.low %v1047_v32, %v1063_v2  ;;  %v1081_v20 = vcombine.high %v1047_v32, %v1063_v2 }
 0x135   : > { %v7010_v28 = vrot.slane %v1065_v63, %v6744_v12  ;;  %v7020_v45 = vrot.slane %v1080_v17, %v6744_v12  ;;  %v7037_v33 = vrot.slane %v1081_v20, %v6744_v12 }
 0x136   : > { %v1181_v4 = vpop.permute.xlu1 %1180  ;;  %v1183_v37 = vpop.permute.xlu0 %1182 }
 0x137   : > { %1133 = vrot.lane.b32.xlu0 %v7010_v28, %s6412_s24  ;;  %1113 = vrot.lane.b32.xlu1 %v7013_v10, %s6413_s25  ;;  %v1198_v40 = vcombine.low %v1175_v30, %v1183_v37  ;;  %v1199_v63 = vcombine.high %v1175_v30, %v1183_v37 }
 0x139   : > { %v7030_v47 = vrot.slane %v1198_v40, %v6516_v36 }
 0x13a   : > { %v1185_v24 = vpop.permute.xlu1 %1184  ;;  %v1187_v21 = vpop.permute.xlu0 %1186 }
 0x13b   : > { %v1214_v31 = vcombine.low %v1179_v44, %v1187_v21  ;;  %v1215_v6 = vcombine.high %v1179_v44, %v1187_v21  ;;  %1141 = vrot.lane.b32.xlu0 %v7020_v45, %s6413_s25  ;;  %v1266_v19 = vcombine.low %v1177_v26, %v1185_v24  ;;  %1121 = vrot.lane.b32.xlu1 %v7023_v59, %s6414_s26 }
 0x13c   : > { %v1213_v21 = vrot.slane %v1199_v63, %v6516_v36  ;;  %v1267_v32 = vcombine.high %v1177_v26, %v1185_v24 }
 0x13d   : > { %v7033_v2 = vrot.slane %v1214_v31, %v6516_v36  ;;  %v1229_v37 = vrot.slane %v1215_v6, %v6516_v36  ;;  %v7047_v40 = vrot.slane %v1266_v19, %v6516_v36 }
 0x13e   : > { %v1189_v30 = vpop.permute.xlu1 %1188  ;;  %v7040_v44 = vpop.permute.xlu0 %1651 }
 0x13f   : > { %v1282_v17 = vcombine.low %v1181_v4, %v1189_v30  ;;  %v1283_v8 = vcombine.high %v1181_v4, %v1189_v30  ;;  %1149 = vrot.lane.b32.xlu0 %v7037_v33, %s6414_s26  ;;  %v1231_v31 = vcombine.high %v7030_v47, %v7033_v2  ;;  %v1246_v24 = vcombine.low %v1213_v21, %v1229_v37 }
 0x140   : > { %v1281_v30 = vrot.slane %v1267_v32, %v6516_v36  ;;  %v1247_v9 = vcombine.high %v1213_v21, %v1229_v37 }
 0x141   : > { %v7050_v6 = vrot.slane %v1282_v17, %v6516_v36  ;;  %v1297_v20 = vrot.slane %v1283_v8, %v6516_v36  ;;  %v7054_v63 = vrot.slane %v1231_v31, %v6744_v12  ;;  %v596_v17 = vcombine.low %v6895_v57, %v6898_v56 }
 0x142   : > { %v7056_v26 = vpop.permute.xlu1 %1653  ;;  %v7058_v4 = vpop.permute.xlu0 %1655  ;;  %v7071_v31 = vrot.slane %v1246_v24, %v6744_v12  ;;  %v528_v57 = vcombine.low %v6885_v1, %v6888_v43  ;;  %v7087_v24 = vrot.slane %v1247_v9, %v6744_v12  ;;  %v10242_v1 = vmov 0.0  }
 0x143   : > { %1339 = vrot.lane.b32.xlu1 %v7054_v63, %s6412_s24  ;;  %v1299_v19 = vcombine.high %v7047_v40, %v7050_v6  ;;  %v1314_v7 = vcombine.low %v1281_v30, %v1297_v20  ;;  %v1315_v37 = vcombine.high %v1281_v30, %v1297_v20  ;;  %v7090_v21 = vrot.slane %v596_v17, %v6744_v12 }
 0x144   : > { %v7106_v43 = vrot.slane %v528_v57, %v6744_v12  ;;  %v629_v17 = vcombine.high %v6910_v53, %v10242_v1  ;;  %v561_v57 = vcombine.high %v6902_v15, %v10242_v1  ;;  %v830_v53 = vcombine.low %v6945_v0, %v6948_v13 }
 0x145   : > { %v7068_v8 = vrot.slane %v1299_v19, %v6744_v12  ;;  %v7084_v56 = vrot.slane %v1314_v7, %v6744_v12  ;;  %10240 = vst [vmem:[#allocation30_spill] sm:$0xff] %v7090_v21  ;;  %v7101_v7 = vrot.slane %v1315_v37, %v6744_v12  ;;  %v628_v9 = vcombine.high %v7090_v21, %v10242_v1 }
 0x146   : > { %v7073_v35 = vpop.permute.xlu1 %1657  ;;  %v7075_v32 = vpop.permute.xlu0 %415  ;;  %10243 = vst [vmem:[#allocation32_spill] sm:$0xff] %v7106_v43  ;;  %v560_v37 = vcombine.high %v7106_v43, %v10242_v1  ;;  %v762_v15 = vcombine.low %v6930_v61, %v6933_v51 }
 0x147   : > { %10239 = vst [vmem:[#allocation29_spill] sm:$0xff] %v7075_v32  ;;  %1367 = vrot.lane.b32.xlu0 %v7068_v8, %s6412_s24  ;;  %1347 = vrot.lane.b32.xlu1 %v7071_v31, %s6413_s25 }
 0x148   : > { %v7157_v51 = vrot.slane %v762_v15, %v6744_v12  ;;  %v795_v15 = vcombine.high %v6952_v5, %v10242_v1  ;;  %v996_v5 = vcombine.low %v6980_v49, %v6983_v25 }
 0x14a   : > { %v7092_v19 = vpop.permute.xlu1 %387  ;;  %v7094_v32 = vpop.permute.xlu0 %423  ;;  %v7207_v49 = vrot.slane %v996_v5, %v6744_v12  ;;  %v1098_v5 = vcombine.high %v7020_v45, %v10242_v1 }
 0x14b   : > { %10241 = vst [vmem:[#allocation31_spill] sm:$0xff] %v7094_v32  ;;  %1375 = vrot.lane.b32.xlu0 %v7084_v56, %s6413_s25  ;;  %1355 = vrot.lane.b32.xlu1 %v7087_v24, %s6414_s26 }
 0x14c   : > { %10250 = vst [vmem:[#allocation39_spill] sm:$0xff] %v7207_v49 }
 0x14e   : > { %v7108_v20 = vpop.permute.xlu1 %395  ;;  %v7110_v30 = vpop.permute.xlu0 %431 }
 0x14f   : > { %10244 = vst [vmem:[#allocation33_spill] sm:$0xff] %v7110_v30  ;;  %1383 = vrot.lane.b32.xlu0 %v7101_v7, %s6414_s26  ;;  %661 = vrot.lane.b32.xlu1 %v628_v9, %s6415_s27  ;;  %v630_v9 = vcombine.high %v6920_v3, %v10242_v1  ;;  %v631_v3 = vcombine.high %v6937_v42, %v10242_v1 }
 0x152   : > { %v7119_v32 = vpop.permute.xlu1 %403  ;;  %v7121_v21 = vpop.permute.xlu0 %383 }
 0x153   : > { %10245 = vst [vmem:[#allocation34_spill] sm:$0xff] %v7119_v32  ;;  %633 = vrot.lane.b32.xlu0 %v560_v37, %s6415_s27  ;;  %669 = vrot.lane.b32.xlu1 %v629_v17, %s6416_s28  ;;  %v562_v17 = vcombine.high %v6913_v29, %v10242_v1  ;;  %v7144_v37 = vrot.slane %v830_v53, %v6744_v12 }
 0x154   : > { %v563_v29 = vcombine.high %v6923_v52, %v10242_v1  ;;  %v794_v52 = vcombine.high %v7157_v51, %v10242_v1 }
 0x155   : > { %v862_v61 = vcombine.high %v7144_v37, %v10242_v1 }
 0x156   : > { %v7131_v30 = vpop.permute.xlu1 %411  ;;  %v7133_v43 = vpop.permute.xlu0 %391 }
 0x157   : > { %641 = vrot.lane.b32.xlu0 %v561_v57, %s6416_s28  ;;  %677 = vrot.lane.b32.xlu1 %v630_v9, %s6417_s29  ;;  %v863_v9 = vcombine.high %v6960_v34, %v10242_v1  ;;  %v1064_v34 = vcombine.low %v6995_v39, %v6998_v22  ;;  %v797_v22 = vcombine.high %v6973_v46, %v10242_v1 }
 0x158   : > { %v1028_v46 = vcombine.high %v7207_v49, %v10242_v1 }
 0x15a   : > { %v7146_v0 = vpop.permute.xlu1 %419  ;;  %v7148_v13 = vpop.permute.xlu0 %399 }
 0x15b   : > { %649 = vrot.lane.b32.xlu0 %v562_v17, %s6417_s29  ;;  %685 = vrot.lane.b32.xlu1 %v631_v3, %s6418_s30  ;;  %v864_v3 = vcombine.high %v6970_v18, %v10242_v1  ;;  %v865_v18 = vcombine.high %v6987_v27, %v10242_v1  ;;  %v1097_v27 = vcombine.high %v7010_v28, %v10242_v1 }
 0x15c   : > { %v1298_v28 = vcombine.low %v7047_v40, %v7050_v6  ;;  %v1331_v6 = vcombine.high %v7068_v8, %v10242_v1  ;;  %v1264_v8 = vcombine.high %v7071_v31, %v10242_v1 }
 0x15e   : > { %v7159_v42 = vpop.permute.xlu1 %427  ;;  %v7161_v57 = vpop.permute.xlu0 %407  ;;  %v7242_v45 = vrot.slane %v1298_v28, %v6744_v12 }
 0x15f   : > { %10246 = vst [vmem:[#allocation35_spill] sm:$0xff] %v7161_v57  ;;  %657 = vrot.lane.b32.xlu0 %v563_v29, %s6418_s30  ;;  %895 = vrot.lane.b32.xlu1 %v862_v61, %s6415_s27 }
 0x160   : > { %10251 = vst [vmem:[#allocation40_spill] sm:$0xff] %v7242_v45 }
 0x162   : > { %v7169_v53 = vpop.permute.xlu1 %435  ;;  %v7171_v17 = vpop.permute.xlu0 %1610 }
 0x163   : > { %10247 = vst [vmem:[#allocation36_spill] sm:$0xff] %v7169_v53  ;;  %867 = vrot.lane.b32.xlu0 %v794_v52, %s6415_s27  ;;  %903 = vrot.lane.b32.xlu1 %v863_v9, %s6416_s28  ;;  %v796_v9 = vcombine.high %v6963_v62, %v10242_v1  ;;  %v7194_v52 = vrot.slane %v1064_v34, %v6744_v12 }
 0x165   : > { %10248 = vst [vmem:[#allocation37_spill] sm:$0xff] %v7194_v52  ;;  %v1096_v62 = vcombine.high %v7194_v52, %v10242_v1 }
 0x166   : > { %v7181_v29 = vpop.permute.xlu1 %1582  ;;  %v7183_v61 = vpop.permute.xlu0 %1618 }
 0x167   : > { %875 = vrot.lane.b32.xlu0 %v795_v15, %s6416_s28  ;;  %911 = vrot.lane.b32.xlu1 %v864_v3, %s6417_s29 }
 0x16a   : > { %v7196_v39 = vpop.permute.xlu1 %1590  ;;  %v7202_v15 = vpop.permute.xlu0 %1626 }
 0x16b   : > { %883 = vrot.lane.b32.xlu0 %v796_v9, %s6417_s29  ;;  %919 = vrot.lane.b32.xlu1 %v865_v18, %s6418_s30  ;;  %10249 = vst [vmem:[#allocation38_spill] sm:$0xff] %v7202_v15  ;;  %v1029_v9 = vcombine.high %v7002_v11, %v10242_v1  ;;  %v1099_v11 = vcombine.high %v7037_v33, %v10242_v1 }
 0x16e   : > { %v7209_v25 = vpop.permute.xlu1 %1598  ;;  %v7219_v34 = vpop.permute.xlu0 %1578 }
 0x16f   : > { %891 = vrot.lane.b32.xlu0 %v797_v22, %s6418_s30  ;;  %1129 = vrot.lane.b32.xlu1 %v1096_v62, %s6415_s27  ;;  %v1030_v22 = vcombine.high %v7013_v10, %v10242_v1  ;;  %v1230_v62 = vcombine.low %v7030_v47, %v7033_v2  ;;  %v1031_v10 = vcombine.high %v7023_v59, %v10242_v1 }
 0x170   : > { %v1330_v47 = vcombine.high %v7242_v45, %v10242_v1 }
 0x171   : > { %v7253_v2 = vrot.slane %v1230_v62, %v6744_v12  ;;  %v1333_v62 = vcombine.high %v7101_v7, %v10242_v1 }
 0x172   : > { %v7217_v3 = vpop.permute.xlu1 %1606 }
 0x173   : > { %1101 = vrot.lane.b32.xlu0 %v1028_v46, %s6415_s27  ;;  %1137 = vrot.lane.b32.xlu1 %v1097_v27, %s6416_s28  ;;  %v7239_v27 = vpop.permute.xlu0 %1586  ;;  %10252 = vst [vmem:[#allocation41_spill] sm:$0xff] %v7253_v2  ;;  %v1262_v59 = vcombine.high %v7253_v2, %v10242_v1 }
 0x176   : > { %v7229_v18 = vpop.permute.xlu1 %1614 }
 0x177   : > { %1109 = vrot.lane.b32.xlu0 %v1029_v9, %s6416_s28  ;;  %1145 = vrot.lane.b32.xlu1 %v1098_v5, %s6417_s29  ;;  %v7255_v33 = vpop.permute.xlu0 %1594  ;;  %v1263_v9 = vcombine.high %v7054_v63, %v10242_v1  ;;  %v1332_v5 = vcombine.high %v7084_v56, %v10242_v1  ;;  %v1265_v56 = vcombine.high %v7087_v24, %v10242_v1 }
 0x17a   : > { %v7244_v40 = vpop.permute.xlu1 %1622 }
 0x17b   : > { %1117 = vrot.lane.b32.xlu0 %v1030_v22, %s6417_s29  ;;  %1153 = vrot.lane.b32.xlu1 %v1099_v11, %s6418_s30  ;;  %v7271_v28 = vpop.permute.xlu0 %1602 }
 0x17c   : > { %10254 = vst [vmem:[#allocation43_spill] sm:$0xff] %v7271_v28 }
 0x17e   : > { %v7261_v46 = vpop.permute.xlu1 %1630 }
 0x17f   : > { %1125 = vrot.lane.b32.xlu0 %v1031_v10, %s6418_s30  ;;  %1363 = vrot.lane.b32.xlu1 %v1330_v47, %s6415_s27  ;;  %10253 = vst [vmem:[#allocation42_spill] sm:$0xff] %v7261_v46 }
 0x183   : > { %1371 = vrot.lane.b32.xlu1 %v1331_v6, %s6416_s28  ;;  %1335 = vrot.lane.b32.xlu0 %v1262_v59, %s6415_s27 }
 0x185   : > { %v7273_v22 = vpop.permute.xlu1 %637 }
 0x186   : > { %10255 = vst [vmem:[#allocation44_spill] sm:$0xff] %v7273_v22 }
 0x187   : > { %1379 = vrot.lane.b32.xlu1 %v1332_v5, %s6417_s29  ;;  %1343 = vrot.lane.b32.xlu0 %v1263_v9, %s6416_s28 }
 0x189   : > { %v7281_v11 = vpop.permute.xlu0 %665  ;;  %v7283_v63 = vpop.permute.xlu1 %645 }
 0x18a   : > { %10256 = vst [vmem:[#allocation45_spill] sm:$0xff] %v7283_v63 }
 0x18b   : > { %1387 = vrot.lane.b32.xlu1 %v1333_v62, %s6418_s30  ;;  %1351 = vrot.lane.b32.xlu0 %v1264_v8, %s6417_s29 }
 0x18d   : > { %v7289_v10 = vpop.permute.xlu0 %673  ;;  %v7294_v31 = vpop.permute.xlu1 %653 }
 0x18e   : > { %10257 = vst [vmem:[#allocation46_spill] sm:$0xff] %v7289_v10  ;;  %10258 = vst [vmem:[#allocation47_spill] sm:$0xff] %v7294_v31 }
 0x18f   : > { %1661 = vrot.lane.b32.xlu1 %v6807_v48, %s6406_s20  ;;  %1359 = vrot.lane.b32.xlu0 %v1265_v56, %s6418_s30 }
 0x191   : > { %v7300_v7 = vpop.permute.xlu0 %681 }
 0x192   : > { %10259 = vst [vmem:[#allocation48_spill] sm:$0xff] %v7300_v7 }
 0x193   : > { %1665 = vrot.lane.b32.xlu1 %v6800_v54, %s6406_s20  ;;  %1659 = vrot.lane.b32.xlu0 %v6530_v41, %s6406_s20 }
 0x195   : > { %v7302_v47 = vpop.permute.xlu1 %871 }
 0x196   : > { %10260 = vst [vmem:[#allocation49_spill] sm:$0xff] %v7302_v47 }
 0x197   : > { %1663 = vrot.lane.b32.xlu0 %v6557_v50, %s6406_s20 }
 0x199   : > { %v7306_v24 = vpop.permute.xlu0 %899  ;;  %v7308_v6 = vpop.permute.xlu1 %879 }
 0x19a   : > { %10261 = vst [vmem:[#allocation50_spill] sm:$0xff] %v7306_v24  ;;  %10262 = vst [vmem:[#allocation51_spill] sm:$0xff] %v7308_v6 }
 0x19d   : > { %v7310_v59 = vpop.permute.xlu0 %907  ;;  %v7312_v9 = vpop.permute.xlu1 %887 }
 0x19e   : > { %10263 = vst [vmem:[#allocation52_spill] sm:$0xff] %v7310_v59  ;;  %10264 = vst [vmem:[#allocation53_spill] sm:$0xff] %v7312_v9 }
 0x1a1   : > { %v7314_v5 = vpop.permute.xlu0 %915 }
 0x1a2   : > { %10265 = vst [vmem:[#allocation54_spill] sm:$0xff] %v7314_v5 }
 0x1a5   : > { %v7316_v8 = vpop.permute.xlu1 %1105 }
 0x1a6   : > { %10266 = vst [vmem:[#allocation55_spill] sm:$0xff] %v7316_v8 }
 0x1a9   : > { %v7318_v62 = vpop.permute.xlu0 %1133  ;;  %v7320_v56 = vpop.permute.xlu1 %1113 }
 0x1aa   : > { %10267 = vst [vmem:[#allocation56_spill] sm:$0xff] %v7318_v62  ;;  %10268 = vst [vmem:[#allocation57_spill] sm:$0xff] %v7320_v56 }
 0x1ad   : > { %v7322_v57 = vpop.permute.xlu0 %1141  ;;  %v7324_v53 = vpop.permute.xlu1 %1121 }
 0x1ae   : > { %10269 = vst [vmem:[#allocation58_spill] sm:$0xff] %v7322_v57  ;;  %10270 = vst [vmem:[#allocation59_spill] sm:$0xff] %v7324_v53 }
 0x1b1   : > { %v7326_v32 = vpop.permute.xlu0 %1149 }
 0x1b2   : > { %10271 = vst [vmem:[#allocation60_spill] sm:$0xff] %v7326_v32 }
 0x1b5   : > { %v7328_v31 = vpop.permute.xlu1 %1339 }
 0x1b6   : > { %10272 = vst [vmem:[#allocation61_spill] sm:$0xff] %v7328_v31 }
 0x1b9   : > { %v7330_v7 = vpop.permute.xlu1 %1347  ;;  %v7332_v63 = vpop.permute.xlu0 %1367 }
 0x1ba   : > { %10273 = vst [vmem:[#allocation62_spill] sm:$0xff] %v7330_v7  ;;  %10274 = vst [vmem:[#allocation63_spill] sm:$0xff] %v7332_v63 }
 0x1bd   : > { %v7334_v9 = vpop.permute.xlu1 %1355  ;;  %v7336_v5 = vpop.permute.xlu0 %1375 }
 0x1be   : > { %10275 = vst [vmem:[#allocation64_spill] sm:$0xff] %v7334_v9  ;;  %10276 = vst [vmem:[#allocation65_spill] sm:$0xff] %v7336_v5 }
 0x1c1   : > { %v7338_v8 = vpop.permute.xlu1 %661  ;;  %v7340_v6 = vpop.permute.xlu0 %1383 }
 0x1c2   : > { %10277 = vst [vmem:[#allocation66_spill] sm:$0xff] %v7340_v6 }
 0x1c5   : > { %v7342_v56 = vpop.permute.xlu1 %669  ;;  %v7344_v57 = vpop.permute.xlu0 %633 }
 0x1c9   : > { %v7346_v53 = vpop.permute.xlu1 %677  ;;  %v7348_v32 = vpop.permute.xlu0 %641 }
 0x1ca   : > { %10278 = vst [vmem:[#allocation67_spill] sm:$0xff] %v7346_v53  ;;  %10279 = vst [vmem:[#allocation68_spill] sm:$0xff] %v7348_v32 }
 0x1cd   : > { %v7350_v31 = vpop.permute.xlu1 %685  ;;  %v7352_v7 = vpop.permute.xlu0 %649 }
 0x1ce   : > { %10280 = vst [vmem:[#allocation69_spill] sm:$0xff] %v7350_v31  ;;  %10281 = vst [vmem:[#allocation70_spill] sm:$0xff] %v7352_v7 }
 0x1d1   : > { %v7354_v59 = vpop.permute.xlu1 %895  ;;  %v7356_v9 = vpop.permute.xlu0 %657 }
 0x1d2   : > { %10282 = vst [vmem:[#allocation71_spill] sm:$0xff] %v7356_v9 }
 0x1d5   : > { %v7358_v5 = vpop.permute.xlu1 %903  ;;  %v7360_v2 = vpop.permute.xlu0 %867 }
 0x1d6   : > { %10283 = vst [vmem:[#allocation72_spill] sm:$0xff] %v7358_v5 }
 0x1d9   : > { %v7362_v6 = vpop.permute.xlu1 %911  ;;  %v7364_v63 = vpop.permute.xlu0 %875 }
 0x1da   : > { %10284 = vst [vmem:[#allocation73_spill] sm:$0xff] %v7362_v6  ;;  %10285 = vst [vmem:[#allocation74_spill] sm:$0xff] %v7364_v63 }
 0x1dd   : > { %v7366_v49 = vpop.permute.xlu1 %919  ;;  %v7368_v62 = vpop.permute.xlu0 %883 }
 0x1de   : > { %10286 = vst [vmem:[#allocation75_spill] sm:$0xff] %v7366_v49  ;;  %10287 = vst [vmem:[#allocation76_spill] sm:$0xff] %v7368_v62 }
 0x1e1   : > { %v7370_v32 = vpop.permute.xlu1 %1129  ;;  %v7372_v31 = vpop.permute.xlu0 %891 }
 0x1e2   : > { %10288 = vst [vmem:[#allocation77_spill] sm:$0xff] %v7370_v32  ;;  %10289 = vst [vmem:[#allocation78_spill] sm:$0xff] %v7372_v31 }
 0x1e5   : > { %v7374_v7 = vpop.permute.xlu1 %1137  ;;  %v7376_v53 = vpop.permute.xlu0 %1101 }
 0x1e6   : > { %10290 = vst [vmem:[#allocation79_spill] sm:$0xff] %v7374_v7  ;;  %10291 = vst [vmem:[#allocation80_spill] sm:$0xff] %v7376_v53 }
 0x1e9   : > { %v7378_v9 = vpop.permute.xlu1 %1145  ;;  %v7380_v47 = vpop.permute.xlu0 %1109 }
 0x1ea   : > { %10292 = vst [vmem:[#allocation81_spill] sm:$0xff] %v7378_v9  ;;  %10293 = vst [vmem:[#allocation82_spill] sm:$0xff] %v7380_v47 }
 0x1ed   : > { %v7382_v5 = vpop.permute.xlu1 %1153  ;;  %v7384_v6 = vpop.permute.xlu0 %1117 }
 0x1ee   : > { %10294 = vst [vmem:[#allocation83_spill] sm:$0xff] %v7382_v5  ;;  %10295 = vst [vmem:[#allocation84_spill] sm:$0xff] %v7384_v6 }
 0x1f1   : > { %v7386_v63 = vpop.permute.xlu1 %1363  ;;  %v7388_v49 = vpop.permute.xlu0 %1125 }
 0x1f2   : > { %10296 = vst [vmem:[#allocation85_spill] sm:$0xff] %v7386_v63  ;;  %10297 = vst [vmem:[#allocation86_spill] sm:$0xff] %v7388_v49 }
 0x1f5   : > { %v7390_v62 = vpop.permute.xlu1 %1371  ;;  %v7392_v22 = vpop.permute.xlu0 %1335 }
 0x1f6   : > { %10298 = vst [vmem:[#allocation87_spill] sm:$0xff] %v7390_v62  ;;  %10299 = vst [vmem:[#allocation88_spill] sm:$0xff] %v7392_v22 }
 0x1f9   : > { %v7394_v31 = vpop.permute.xlu1 %1379  ;;  %v7396_v7 = vpop.permute.xlu0 %1343 }
 0x1fa   : > { %10300 = vst [vmem:[#allocation89_spill] sm:$0xff] %v7394_v31  ;;  %10301 = vst [vmem:[#allocation90_spill] sm:$0xff] %v7396_v7 }
 0x1fd   : > { %v7398_v53 = vpop.permute.xlu0 %1351  ;;  %v7400_v9 = vpop.permute.xlu1 %1387 }
 0x1fe   : > { %10302 = vst [vmem:[#allocation91_spill] sm:$0xff] %v7398_v53  ;;  %10303 = vst [vmem:[#allocation92_spill] sm:$0xff] %v7400_v9 }
 0x201   : > { %v7402_v47 = vpop.permute.xlu0 %1359  ;;  %v1662_v5 = vpop.permute.xlu1 %1661 }
 0x202   : > { %10304 = vst [vmem:[#allocation93_spill] sm:$0xff] %v7402_v47  ;;  %v1743_v24 = vcombine.low %v7056_v26, %v1662_v5 }
 0x205   : > { %v1660_v6 = vpop.permute.xlu0 %1659  ;;  %v1666_v49 = vpop.permute.xlu1 %1665 }
 0x206   : > { %v1675_v45 = vcombine.low %v7040_v44, %v1660_v6  ;;  %v1676_v62 = vcombine.high %v7040_v44, %v1660_v6  ;;  %v1759_v7 = vcombine.low %v7073_v35, %v1666_v49 }
 0x208   : > { %v1683_v53 = vrot.slane %v1675_v45, %v6516_v36  ;;  %v1690_v10 = vrot.slane %v1676_v62, %v6516_v36  ;;  %v1767_v44 = vrot.slane %v1759_v7, %v6516_v36  ;;  %v1751_v45 = vrot.slane %v1743_v24, %v6516_v36 }
 0x209   : > { %v1664_v63 = vpop.permute.xlu0 %1663 }
 0x20a   : > { %v1691_v22 = vcombine.low %v7058_v4, %v1664_v63  ;;  %v1692_v31 = vcombine.high %v7058_v4, %v1664_v63  ;;  %v1760_v63 = vcombine.high %v7073_v35, %v1666_v49  ;;  %v1776_v24 = vcombine.high %v1751_v45, %v1767_v44 }
 0x20c   : > { %v1699_v9 = vrot.slane %v1691_v22, %v6516_v36  ;;  %v1706_v47 = vrot.slane %v1692_v31, %v6516_v36  ;;  %v1775_v31 = vcombine.low %v1751_v45, %v1767_v44  ;;  %v1774_v7 = vrot.slane %v1760_v63, %v6516_v36 }
 0x20e   : > { %v1707_v46 = vcombine.low %v1683_v53, %v1699_v9  ;;  %v1708_v52 = vcombine.high %v1683_v53, %v1699_v9  ;;  %v1723_v6 = vcombine.low %v1690_v10, %v1706_v47  ;;  %v1724_v62 = vcombine.high %v1690_v10, %v1706_v47 }
 0x20f   : > { %v7433_v35 = vrot.slane %v1775_v31, %v6744_v12  ;;  %v1790_v47 = vrot.slane %v1776_v24, %v6744_v12 }
 0x210   : > { %v1722_v32 = vrot.slane %v1708_v52, %v6744_v12  ;;  %v7417_v4 = vrot.slane %v1707_v46, %v6744_v12  ;;  %v1731_v53 = vrot.slane %v1723_v6, %v6744_v12  ;;  %v1744_v52 = vcombine.high %v7056_v26, %v1662_v5 }
 0x211   : > { %v1738_v9 = vrot.slane %v1724_v62, %v6744_v12  ;;  %10306 = vst [vmem:[#allocation95_spill] sm:$0xff] %v7433_v35  ;;  %v1808_v6 = vcombine.high %v1790_v47, %v10242_v1 }
 0x212   : > { %10305 = vst [vmem:[#allocation94_spill] sm:$0xff] %v7417_v4  ;;  %1816 = vrot.lane.b32.xlu1 %v1722_v32, %s6412_s24  ;;  %v1739_v22 = vcombine.high %v7417_v4, %v10242_v1  ;;  %v1740_v46 = vcombine.high %v1722_v32, %v10242_v1  ;;  %v1758_v49 = vrot.slane %v1744_v52, %v6516_v36 }
 0x213   : > { %v1741_v26 = vcombine.high %v1731_v53, %v10242_v1  ;;  %v1807_v32 = vcombine.high %v7433_v35, %v10242_v1  ;;  %v1742_v5 = vcombine.high %v1738_v9, %v10242_v1 }
 0x214   : > { %1812 = vrot.lane.b32.xlu0 %v1739_v22, %s6415_s27  ;;  %v1791_v10 = vcombine.low %v1758_v49, %v1774_v7  ;;  %v1792_v44 = vcombine.high %v1758_v49, %v1774_v7 }
 0x216   : > { %1824 = vrot.lane.b32.xlu1 %v1731_v53, %s6413_s25  ;;  %v1799_v45 = vrot.slane %v1791_v10, %v6744_v12  ;;  %v1806_v63 = vrot.slane %v1792_v44, %v6744_v12 }
 0x218   : > { %1820 = vrot.lane.b32.xlu0 %v1740_v46, %s6416_s28  ;;  %v1809_v22 = vcombine.high %v1799_v45, %v10242_v1  ;;  %v1810_v31 = vcombine.high %v1806_v63, %v10242_v1 }
 0x21a   : > { %1832 = vrot.lane.b32.xlu1 %v1738_v9, %s6414_s26 }
 0x21c   : > { %1828 = vrot.lane.b32.xlu0 %v1741_v26, %s6417_s29 }
 0x21e   : > { %1840 = vrot.lane.b32.xlu1 %v1807_v32, %s6415_s27 }
 0x220   : > { %1836 = vrot.lane.b32.xlu0 %v1742_v5, %s6418_s30 }
 0x222   : > { %1848 = vrot.lane.b32.xlu1 %v1808_v6, %s6416_s28 }
 0x224   : > { %1844 = vrot.lane.b32.xlu0 %v1790_v47, %s6412_s24 }
 0x226   : > { %1856 = vrot.lane.b32.xlu1 %v1809_v22, %s6417_s29 }
 0x228   : > { %1852 = vrot.lane.b32.xlu0 %v1799_v45, %s6413_s25 }
 0x22a   : > { %1864 = vrot.lane.b32.xlu1 %v1810_v31, %s6418_s30 }
 0x22c   : > { %1860 = vrot.lane.b32.xlu0 %v1806_v63, %s6414_s26 }
 0x22e   : > { %1887 = vrot.lane.b32.xlu1 %v6748_v16, %s6408_s21 }
 0x230   : > { %1885 = vrot.lane.b32.xlu0 %v6731_v14, %s6408_s21 }
 0x232   : > { %1891 = vrot.lane.b32.xlu1 %v6761_v55, %s6408_s21 }
 0x234   : > { %1889 = vrot.lane.b32.xlu0 %v6751_v23, %s6408_s21 }
 0x236   : > { %1895 = vrot.lane.b32.xlu1 %v6807_v48, %s6408_s21 }
 0x238   : > { %1893 = vrot.lane.b32.xlu0 %v6530_v41, %s6408_s21 }
 0x23a   : > { %1899 = vrot.lane.b32.xlu1 %v6800_v54, %s6408_s21 }
 0x23c   : > { %1897 = vrot.lane.b32.xlu0 %v6557_v50, %s6408_s21 }
 0x284   : > { %v7472_v62 = vpop.permute.xlu1 %1816 }
 0x285   : > { %10307 = vst [vmem:[#allocation96_spill] sm:$0xff] %v7472_v62 }
 0x286   : > { %v7474_v53 = vpop.permute.xlu0 %1812 }
 0x287   : > { %10308 = vst [vmem:[#allocation97_spill] sm:$0xff] %v7474_v53 }
 0x288   : > { %v7476_v52 = vpop.permute.xlu1 %1824 }
 0x289   : > { %10309 = vst [vmem:[#allocation98_spill] sm:$0xff] %v7476_v52 }
 0x28a   : > { %v7478_v46 = vpop.permute.xlu0 %1820 }
 0x28b   : > { %10310 = vst [vmem:[#allocation99_spill] sm:$0xff] %v7478_v46 }
 0x28c   : > { %v7480_v7 = vpop.permute.xlu1 %1832 }
 0x28d   : > { %10311 = vst [vmem:[#allocation100_spill] sm:$0xff] %v7480_v7 }
 0x28e   : > { %v7482_v24 = vpop.permute.xlu0 %1828 }
 0x28f   : > { %10312 = vst [vmem:[#allocation101_spill] sm:$0xff] %v7482_v24 }
 0x290   : > { %v7484_v9 = vpop.permute.xlu1 %1840 }
 0x291   : > { %10313 = vst [vmem:[#allocation102_spill] sm:$0xff] %v7484_v9 }
 0x292   : > { %v7486_v49 = vpop.permute.xlu0 %1836 }
 0x293   : > { %10314 = vst [vmem:[#allocation103_spill] sm:$0xff] %v7486_v49 }
 0x294   : > { %v7488_v26 = vpop.permute.xlu1 %1848 }
 0x295   : > { %10315 = vst [vmem:[#allocation104_spill] sm:$0xff] %v7488_v26 }
 0x296   : > { %v7490_v10 = vpop.permute.xlu0 %1844 }
 0x297   : > { %10316 = vst [vmem:[#allocation105_spill] sm:$0xff] %v7490_v10 }
 0x298   : > { %v7492_v32 = vpop.permute.xlu1 %1856 }
 0x299   : > { %10317 = vst [vmem:[#allocation106_spill] sm:$0xff] %v7492_v32 }
 0x29a   : > { %v7494_v47 = vpop.permute.xlu0 %1852 }
 0x29b   : > { %10318 = vst [vmem:[#allocation107_spill] sm:$0xff] %v7494_v47 }
 0x29c   : > { %v7496_v5 = vpop.permute.xlu1 %1864 }
 0x29d   : > { %10319 = vst [vmem:[#allocation108_spill] sm:$0xff] %v7496_v5 }
 0x29e   : > { %v7498_v44 = vpop.permute.xlu0 %1860 }
 0x29f   : > { %10320 = vst [vmem:[#allocation109_spill] sm:$0xff] %v7498_v44 }
 0x2a0   : > { %v1888_v6 = vpop.permute.xlu1 %1887 }
 0x2a2   : > { %v1886_v45 = vpop.permute.xlu0 %1885 }
 0x2a4   : > { %v1892_v22 = vpop.permute.xlu1 %1891 }
 0x2a6   : > { %v1890_v63 = vpop.permute.xlu0 %1889 }
 0x2a8   : > { %v1896_v31 = vpop.permute.xlu1 %1895 }
 0x2a9   : > { %v1977_v44 = vcombine.low %v1888_v6, %v1896_v31 }
 0x2aa   : > { %v1894_v7 = vpop.permute.xlu0 %1893 }
 0x2ab   : > { %v1909_v24 = vcombine.low %v1886_v45, %v1894_v7  ;;  %v1910_v10 = vcombine.high %v1886_v45, %v1894_v7  ;;  %v1985_v7 = vrot.slane %v1977_v44, %v6516_v36 }
 0x2ac   : > { %v1900_v52 = vpop.permute.xlu1 %1899 }
 0x2ad   : > { %v1917_v32 = vrot.slane %v1909_v24, %v6516_v36  ;;  %v1993_v35 = vcombine.low %v1892_v22, %v1900_v52  ;;  %v1924_v9 = vrot.slane %v1910_v10, %v6516_v36  ;;  %v1994_v24 = vcombine.high %v1892_v22, %v1900_v52 }
 0x2ae   : > { %v1898_v49 = vpop.permute.xlu0 %1897 }
 0x2af   : > { %v1925_v26 = vcombine.low %v1890_v63, %v1898_v49  ;;  %v1926_v46 = vcombine.high %v1890_v63, %v1898_v49  ;;  %v2001_v53 = vrot.slane %v1993_v35, %v6516_v36 }
 0x2b1   : > { %v1933_v47 = vrot.slane %v1925_v26, %v6516_v36  ;;  %v1940_v5 = vrot.slane %v1926_v46, %v6516_v36  ;;  %v2009_v26 = vcombine.low %v1985_v7, %v2001_v53 }
 0x2b3   : > { %v1941_v62 = vcombine.low %v1917_v32, %v1933_v47  ;;  %v1942_v4 = vcombine.high %v1917_v32, %v1933_v47  ;;  %v1957_v15 = vcombine.low %v1924_v9, %v1940_v5  ;;  %v1958_v10 = vcombine.high %v1924_v9, %v1940_v5 }
 0x2b4   : > { %v1978_v32 = vcombine.high %v1888_v6, %v1896_v31  ;;  %v2010_v47 = vcombine.high %v1985_v7, %v2001_v53  ;;  %v7521_v52 = vrot.slane %v2009_v26, %v6744_v12 }
 0x2b5   : > { %v1956_v28 = vrot.slane %v1942_v4, %v6744_v12  ;;  %v7507_v49 = vrot.slane %v1941_v62, %v6744_v12  ;;  %v1965_v35 = vrot.slane %v1957_v15, %v6744_v12  ;;  %v2008_v62 = vrot.slane %v1994_v24, %v6516_v36 }
 0x2b6   : > { %v1972_v44 = vrot.slane %v1958_v10, %v6744_v12  ;;  %10322 = vst [vmem:[#allocation111_spill] sm:$0xff] %v7521_v52  ;;  %v1992_v9 = vrot.slane %v1978_v32, %v6516_v36  ;;  %v2024_v53 = vrot.slane %v2010_v47, %v6744_v12 }
 0x2b7   : > { %10321 = vst [vmem:[#allocation110_spill] sm:$0xff] %v7507_v49  ;;  %2050 = vrot.lane.b32.xlu1 %v1956_v28, %s6412_s24  ;;  %v1973_v46 = vcombine.high %v7507_v49, %v10242_v1  ;;  %v1974_v4 = vcombine.high %v1956_v28, %v10242_v1  ;;  %v1975_v15 = vcombine.high %v1965_v35, %v10242_v1 }
 0x2b8   : > { %v2025_v5 = vcombine.low %v1992_v9, %v2008_v62  ;;  %v2041_v28 = vcombine.high %v7521_v52, %v10242_v1  ;;  %v1976_v6 = vcombine.high %v1972_v44, %v10242_v1  ;;  %v2026_v45 = vcombine.high %v1992_v9, %v2008_v62 }
 0x2b9   : > { %2046 = vrot.lane.b32.xlu0 %v1973_v46, %s6415_s27  ;;  %v2042_v22 = vcombine.high %v2024_v53, %v10242_v1 }
 0x2ba   : > { %v2033_v63 = vrot.slane %v2025_v5, %v6744_v12  ;;  %v2040_v7 = vrot.slane %v2026_v45, %v6744_v12 }
 0x2bb   : > { %2058 = vrot.lane.b32.xlu1 %v1965_v35, %s6413_s25 }
 0x2bc   : > { %v2043_v31 = vcombine.high %v2033_v63, %v10242_v1  ;;  %v2044_v46 = vcombine.high %v2040_v7, %v10242_v1 }
 0x2bd   : > { %2054 = vrot.lane.b32.xlu0 %v1974_v4, %s6416_s28 }
 0x2bf   : > { %2066 = vrot.lane.b32.xlu1 %v1972_v44, %s6414_s26 }
 0x2c1   : > { %2062 = vrot.lane.b32.xlu0 %v1975_v15, %s6417_s29 }
 0x2c3   : > { %2074 = vrot.lane.b32.xlu1 %v2041_v28, %s6415_s27 }
 0x2c5   : > { %2070 = vrot.lane.b32.xlu0 %v1976_v6, %s6418_s30 }
 0x2c7   : > { %2082 = vrot.lane.b32.xlu1 %v2042_v22, %s6416_s28 }
 0x2c9   : > { %2078 = vrot.lane.b32.xlu0 %v2024_v53, %s6412_s24 }
 0x2cb   : > { %2090 = vrot.lane.b32.xlu1 %v2043_v31, %s6417_s29 }
 0x2cd   : > { %2086 = vrot.lane.b32.xlu0 %v2033_v63, %s6413_s25 }
 0x2cf   : > { %2098 = vrot.lane.b32.xlu1 %v2044_v46, %s6418_s30 }
 0x2d1   : > { %2094 = vrot.lane.b32.xlu0 %v2040_v7, %s6414_s26 }
 0x2d3   : > { %2121 = vrot.lane.b32.xlu1 %v6748_v16, %s6409_s22 }
 0x2d5   : > { %2119 = vrot.lane.b32.xlu0 %v6731_v14, %s6409_s22 }
 0x2d7   : > { %2125 = vrot.lane.b32.xlu1 %v6761_v55, %s6409_s22 }
 0x2d9   : > { %2123 = vrot.lane.b32.xlu0 %v6751_v23, %s6409_s22 }
 0x2db   : > { %2129 = vrot.lane.b32.xlu1 %v6807_v48, %s6409_s22 }
 0x2dd   : > { %2127 = vrot.lane.b32.xlu0 %v6530_v41, %s6409_s22 }
 0x2df   : > { %2133 = vrot.lane.b32.xlu1 %v6800_v54, %s6409_s22 }
 0x2e1   : > { %2131 = vrot.lane.b32.xlu0 %v6557_v50, %s6409_s22 }
 0x329   : > { %v7560_v24 = vpop.permute.xlu1 %2050 }
 0x32a   : > { %10323 = vst [vmem:[#allocation112_spill] sm:$0xff] %v7560_v24 }
 0x32b   : > { %v7562_v26 = vpop.permute.xlu0 %2046 }
 0x32c   : > { %10324 = vst [vmem:[#allocation113_spill] sm:$0xff] %v7562_v26 }
 0x32d   : > { %v7564_v10 = vpop.permute.xlu1 %2058 }
 0x32e   : > { %10325 = vst [vmem:[#allocation114_spill] sm:$0xff] %v7564_v10 }
 0x32f   : > { %v7566_v35 = vpop.permute.xlu0 %2054 }
 0x330   : > { %10326 = vst [vmem:[#allocation115_spill] sm:$0xff] %v7566_v35 }
 0x331   : > { %v7568_v32 = vpop.permute.xlu1 %2066 }
 0x332   : > { %10327 = vst [vmem:[#allocation116_spill] sm:$0xff] %v7568_v32 }
 0x333   : > { %v7570_v4 = vpop.permute.xlu0 %2062 }
 0x334   : > { %10328 = vst [vmem:[#allocation117_spill] sm:$0xff] %v7570_v4 }
 0x335   : > { %v7572_v62 = vpop.permute.xlu1 %2074 }
 0x336   : > { %10329 = vst [vmem:[#allocation118_spill] sm:$0xff] %v7572_v62 }
 0x337   : > { %v7574_v47 = vpop.permute.xlu0 %2070 }
 0x338   : > { %10330 = vst [vmem:[#allocation119_spill] sm:$0xff] %v7574_v47 }
 0x339   : > { %v7576_v44 = vpop.permute.xlu1 %2082 }
 0x33a   : > { %10331 = vst [vmem:[#allocation120_spill] sm:$0xff] %v7576_v44 }
 0x33b   : > { %v7578_v9 = vpop.permute.xlu0 %2078 }
 0x33c   : > { %10332 = vst [vmem:[#allocation121_spill] sm:$0xff] %v7578_v9 }
 0x33d   : > { %v7580_v15 = vpop.permute.xlu1 %2090 }
 0x33e   : > { %10333 = vst [vmem:[#allocation122_spill] sm:$0xff] %v7580_v15 }
 0x33f   : > { %v7582_v5 = vpop.permute.xlu0 %2086 }
 0x340   : > { %10334 = vst [vmem:[#allocation123_spill] sm:$0xff] %v7582_v5 }
 0x341   : > { %v7584_v28 = vpop.permute.xlu1 %2098 }
 0x342   : > { %10335 = vst [vmem:[#allocation124_spill] sm:$0xff] %v7584_v28 }
 0x343   : > { %v7586_v53 = vpop.permute.xlu0 %2094 }
 0x344   : > { %10336 = vst [vmem:[#allocation125_spill] sm:$0xff] %v7586_v53 }
 0x345   : > { %v2122_v6 = vpop.permute.xlu1 %2121 }
 0x347   : > { %v2120_v45 = vpop.permute.xlu0 %2119 }
 0x349   : > { %v2126_v22 = vpop.permute.xlu1 %2125 }
 0x34b   : > { %v2124_v63 = vpop.permute.xlu0 %2123 }
 0x34d   : > { %v2130_v31 = vpop.permute.xlu1 %2129 }
 0x34e   : > { %v2211_v53 = vcombine.low %v2122_v6, %v2130_v31 }
 0x34f   : > { %v2128_v7 = vpop.permute.xlu0 %2127 }
 0x350   : > { %v2143_v46 = vcombine.low %v2120_v45, %v2128_v7  ;;  %v2144_v44 = vcombine.high %v2120_v45, %v2128_v7  ;;  %v2219_v45 = vrot.slane %v2211_v53, %v6516_v36 }
 0x351   : > { %v2134_v32 = vpop.permute.xlu1 %2133 }
 0x352   : > { %v2151_v15 = vrot.slane %v2143_v46, %v6516_v36  ;;  %v2227_v35 = vcombine.low %v2126_v22, %v2134_v32  ;;  %v2158_v9 = vrot.slane %v2144_v44, %v6516_v36 }
 0x353   : > { %v2132_v47 = vpop.permute.xlu0 %2131 }
 0x354   : > { %v2159_v4 = vcombine.low %v2124_v63, %v2132_v47  ;;  %v2160_v10 = vcombine.high %v2124_v63, %v2132_v47  ;;  %v2235_v62 = vrot.slane %v2227_v35, %v6516_v36 }
 0x356   : > { %v2167_v5 = vrot.slane %v2159_v4, %v6516_v36  ;;  %v2174_v28 = vrot.slane %v2160_v10, %v6516_v36  ;;  %v2228_v4 = vcombine.high %v2126_v22, %v2134_v32  ;;  %v2243_v63 = vcombine.low %v2219_v45, %v2235_v62 }
 0x358   : > { %v2175_v24 = vcombine.low %v2151_v15, %v2167_v5  ;;  %v2176_v52 = vcombine.high %v2151_v15, %v2167_v5  ;;  %v2191_v49 = vcombine.low %v2158_v9, %v2174_v28  ;;  %v2192_v44 = vcombine.high %v2158_v9, %v2174_v28 }
 0x359   : > { %v2212_v15 = vcombine.high %v2122_v6, %v2130_v31  ;;  %v2244_v5 = vcombine.high %v2219_v45, %v2235_v62  ;;  %v7609_v32 = vrot.slane %v2243_v63, %v6744_v12 }
 0x35a   : > { %v2190_v26 = vrot.slane %v2176_v52, %v6744_v12  ;;  %v7595_v47 = vrot.slane %v2175_v24, %v6744_v12  ;;  %v2199_v35 = vrot.slane %v2191_v49, %v6744_v12  ;;  %v2242_v24 = vrot.slane %v2228_v4, %v6516_v36 }
 0x35b   : > { %v2206_v53 = vrot.slane %v2192_v44, %v6744_v12  ;;  %10337 = vst [vmem:[#allocation126_spill] sm:$0xff] %v7609_v32  ;;  %v2226_v9 = vrot.slane %v2212_v15, %v6516_v36  ;;  %v2258_v62 = vrot.slane %v2244_v5, %v6744_v12 }
 0x35c   : > { %2284 = vrot.lane.b32.xlu1 %v2190_v26, %s6412_s24  ;;  %v2207_v10 = vcombine.high %v7595_v47, %v10242_v1  ;;  %v2208_v52 = vcombine.high %v2190_v26, %v10242_v1  ;;  %v2209_v49 = vcombine.high %v2199_v35, %v10242_v1  ;;  %v2275_v26 = vcombine.high %v7609_v32, %v10242_v1 }
 0x35d   : > { %v2259_v28 = vcombine.low %v2226_v9, %v2242_v24  ;;  %v2210_v6 = vcombine.high %v2206_v53, %v10242_v1  ;;  %v2260_v22 = vcombine.high %v2226_v9, %v2242_v24  ;;  %v2276_v31 = vcombine.high %v2258_v62, %v10242_v1 }
 0x35e   : > { %2280 = vrot.lane.b32.xlu0 %v2207_v10, %s6415_s27 }
 0x35f   : > { %v2267_v7 = vrot.slane %v2259_v28, %v6744_v12  ;;  %v2274_v45 = vrot.slane %v2260_v22, %v6744_v12 }
 0x360   : > { %2292 = vrot.lane.b32.xlu1 %v2199_v35, %s6413_s25 }
 0x361   : > { %v2277_v46 = vcombine.high %v2267_v7, %v10242_v1  ;;  %v2278_v10 = vcombine.high %v2274_v45, %v10242_v1 }
 0x362   : > { %2288 = vrot.lane.b32.xlu0 %v2208_v52, %s6416_s28 }
 0x364   : > { %2300 = vrot.lane.b32.xlu1 %v2206_v53, %s6414_s26 }
 0x366   : > { %2296 = vrot.lane.b32.xlu0 %v2209_v49, %s6417_s29 }
 0x368   : > { %2308 = vrot.lane.b32.xlu1 %v2275_v26, %s6415_s27 }
 0x36a   : > { %2304 = vrot.lane.b32.xlu0 %v2210_v6, %s6418_s30 }
 0x36c   : > { %2316 = vrot.lane.b32.xlu1 %v2276_v31, %s6416_s28 }
 0x36e   : > { %2312 = vrot.lane.b32.xlu0 %v2258_v62, %s6412_s24 }
 0x370   : > { %2324 = vrot.lane.b32.xlu1 %v2277_v46, %s6417_s29 }
 0x372   : > { %2320 = vrot.lane.b32.xlu0 %v2267_v7, %s6413_s25 }
 0x374   : > { %2332 = vrot.lane.b32.xlu1 %v2278_v10, %s6418_s30 }
 0x376   : > { %2328 = vrot.lane.b32.xlu0 %v2274_v45, %s6414_s26 }
 0x378   : > { %2355 = vrot.lane.b32.xlu1 %v6748_v16, %s6410_s23 }
 0x37a   : > { %2353 = vrot.lane.b32.xlu0 %v6731_v14, %s6410_s23 }
 0x37c   : > { %2359 = vrot.lane.b32.xlu1 %v6761_v55, %s6410_s23 }
 0x37e   : > { %2357 = vrot.lane.b32.xlu0 %v6751_v23, %s6410_s23 }
 0x380   : > { %2363 = vrot.lane.b32.xlu1 %v6807_v48, %s6410_s23 }
 0x382   : > { %2361 = vrot.lane.b32.xlu0 %v6530_v41, %s6410_s23 }
 0x384   : > { %2367 = vrot.lane.b32.xlu1 %v6800_v54, %s6410_s23 }
 0x386   : > { %2365 = vrot.lane.b32.xlu0 %v6557_v50, %s6410_s23 }
 0x3ce   : > { %v7648_v16 = vpop.permute.xlu1 %2284 }
 0x3cf   : > { %10338 = vst [vmem:[#allocation127_spill] sm:$0xff] %v7648_v16 }
 0x3d0   : > { %v7650_v14 = vpop.permute.xlu0 %2280 }
 0x3d2   : > { %v7652_v55 = vpop.permute.xlu1 %2292 }
 0x3d3   : > { %10339 = vst [vmem:[#allocation128_spill] sm:$0xff] %v7652_v55 }
 0x3d4   : > { %v7654_v4 = vpop.permute.xlu0 %2288 }
 0x3d5   : > { %10340 = vst [vmem:[#allocation129_spill] sm:$0xff] %v7654_v4 }
 0x3d6   : > { %v7656_v23 = vpop.permute.xlu1 %2300 }
 0x3d7   : > { %10341 = vst [vmem:[#allocation130_spill] sm:$0xff] %v7656_v23 }
 0x3d8   : > { %v7658_v48 = vpop.permute.xlu0 %2296 }
 0x3d9   : > { %10342 = vst [vmem:[#allocation131_spill] sm:$0xff] %v7658_v48 }
 0x3da   : > { %v7660_v63 = vpop.permute.xlu1 %2308 }
 0x3dc   : > { %v7662_v41 = vpop.permute.xlu0 %2304 }
 0x3dd   : > { %10343 = vst [vmem:[#allocation132_spill] sm:$0xff] %v7662_v41 }
 0x3de   : > { %v7664_v54 = vpop.permute.xlu1 %2316 }
 0x3df   : > { %10344 = vst [vmem:[#allocation133_spill] sm:$0xff] %v7664_v54 }
 0x3e0   : > { %v7666_v44 = vpop.permute.xlu0 %2312 }
 0x3e1   : > { %10345 = vst [vmem:[#allocation134_spill] sm:$0xff] %v7666_v44 }
 0x3e2   : > { %v7668_v50 = vpop.permute.xlu1 %2324 }
 0x3e3   : > { %10346 = vst [vmem:[#allocation135_spill] sm:$0xff] %v7668_v50 }
 0x3e4   : > { %v7670_v35 = vpop.permute.xlu0 %2320 }
 0x3e5   : > { %10347 = vst [vmem:[#allocation136_spill] sm:$0xff] %v7670_v35 }
 0x3e6   : > { %v7672_v15 = vpop.permute.xlu1 %2332 }
 0x3e7   : > { %10348 = vst [vmem:[#allocation137_spill] sm:$0xff] %v7672_v15 }
 0x3e8   : > { %v7674_v52 = vpop.permute.xlu0 %2328 }
 0x3e9   : > { %10349 = vst [vmem:[#allocation138_spill] sm:$0xff] %v7674_v52 }
 0x3ea   : > { %v2356_v24 = vpop.permute.xlu1 %2355 }
 0x3ec   : > { %v2354_v5 = vpop.permute.xlu0 %2353 }
 0x3ee   : > { %v2360_v53 = vpop.permute.xlu1 %2359 }
 0x3f0   : > { %v2358_v9 = vpop.permute.xlu0 %2357 }
 0x3f2   : > { %v2364_v49 = vpop.permute.xlu1 %2363 }
 0x3f3   : > { %v2445_v15 = vcombine.low %v2356_v24, %v2364_v49 }
 0x3f4   : > { %v2362_v28 = vpop.permute.xlu0 %2361 }
 0x3f5   : > { %v2377_v26 = vcombine.low %v2354_v5, %v2362_v28  ;;  %v2378_v7 = vcombine.high %v2354_v5, %v2362_v28  ;;  %v2453_v5 = vrot.slane %v2445_v15, %v6516_v36 }
 0x3f6   : > { %v2368_v6 = vpop.permute.xlu1 %2367 }
 0x3f7   : > { %v2385_v46 = vrot.slane %v2377_v26, %v6516_v36  ;;  %v2461_v45 = vcombine.low %v2360_v53, %v2368_v6  ;;  %v2392_v23 = vrot.slane %v2378_v7, %v6516_v36  ;;  %v2462_v26 = vcombine.high %v2360_v53, %v2368_v6 }
 0x3f8   : > { %v2366_v62 = vpop.permute.xlu0 %2365  ;;  %v2446_v7 = vcombine.high %v2356_v24, %v2364_v49  ;;  %v2632_v49 = vcombine.low %v6521_v38, %v6587_v60 }
 0x3f9   : > { %v2393_v22 = vcombine.low %v2358_v9, %v2366_v62  ;;  %v2394_v31 = vcombine.high %v2358_v9, %v2366_v62  ;;  %v2469_v50 = vrot.slane %v2461_v45, %v6516_v36 }
 0x3fb   : > { %v2401_v10 = vrot.slane %v2393_v22, %v6516_v36  ;;  %v2408_v41 = vrot.slane %v2394_v31, %v6516_v36  ;;  %v2477_v62 = vcombine.low %v2453_v5, %v2469_v50  ;;  %v2478_v15 = vcombine.high %v2453_v5, %v2469_v50  ;;  %v10352_v5 = vld [vmem:[#allocation4_spill] sm:$0xff] }
 0x3fd   : > { %v2409_v52 = vcombine.low %v2385_v46, %v2401_v10  ;;  %v2410_v48 = vcombine.high %v2385_v46, %v2401_v10  ;;  %v2425_v55 = vcombine.low %v2392_v23, %v2408_v41  ;;  %v2426_v22 = vcombine.high %v2392_v23, %v2408_v41 }
 0x3fe   : > { %v7697_v53 = vrot.slane %v2477_v62, %v6744_v12  ;;  %v2460_v23 = vrot.slane %v2446_v7, %v6516_v36  ;;  %v2492_v50 = vrot.slane %v2478_v15, %v6744_v12  ;;  %v2633_v7 = vcombine.high %v6521_v38, %v6587_v60 }
 0x3ff   : > { %v2424_v35 = vrot.slane %v2410_v48, %v6744_v12  ;;  %v7683_v9 = vrot.slane %v2409_v52, %v6744_v12  ;;  %v2433_v31 = vrot.slane %v2425_v55, %v6744_v12  ;;  %v2476_v52 = vrot.slane %v2462_v26, %v6516_v36 }
 0x400   : > { %v2440_v46 = vrot.slane %v2426_v22, %v6744_v12  ;;  %10351 = vst [vmem:[#allocation140_spill] sm:$0xff] %v7697_v53  ;;  %v2510_v45 = vcombine.high %v2492_v50, %v10242_v1  ;;  %v2640_v26 = vrot.slane %v2632_v49, %v6516_v36  ;;  %v10356_v49 = vld [vmem:[#allocation7_spill] sm:$0xff] }
 0x401   : > { %10350 = vst [vmem:[#allocation139_spill] sm:$0xff] %v7683_v9  ;;  %2518 = vrot.lane.b32.xlu1 %v2424_v35, %s6412_s24  ;;  %v2441_v28 = vcombine.high %v7683_v9, %v10242_v1  ;;  %v2442_v48 = vcombine.high %v2424_v35, %v10242_v1  ;;  %v2443_v55 = vcombine.high %v2433_v31, %v10242_v1 }
 0x402   : > { %v2493_v41 = vcombine.low %v2460_v23, %v2476_v52  ;;  %v2509_v35 = vcombine.high %v7697_v53, %v10242_v1  ;;  %v2444_v24 = vcombine.high %v2440_v46, %v10242_v1  ;;  %v2494_v6 = vcombine.high %v2460_v23, %v2476_v52 }
 0x403   : > { %2514 = vrot.lane.b32.xlu0 %v2441_v28, %s6415_s27  ;;  %v2616_v28 = vcombine.low %v10352_v5, %v6583_v58  ;;  %v2617_v52 = vcombine.high %v10352_v5, %v6583_v58  ;;  %v2647_v23 = vrot.slane %v2633_v7, %v6516_v36 }
 0x404   : > { %v2501_v10 = vrot.slane %v2493_v41, %v6744_v12  ;;  %v2508_v22 = vrot.slane %v2494_v6, %v6744_v12  ;;  %v10354_v41 = vld [vmem:[#allocation6_spill] sm:$0xff]  ;;  %v10357_v6 = vld [vmem:[#allocation5_spill] sm:$0xff] }
 0x405   : > { %2526 = vrot.lane.b32.xlu1 %v2433_v31, %s6413_s25  ;;  %v2624_v31 = vrot.slane %v2616_v28, %v6516_v36 }
 0x406   : > { %v2511_v62 = vcombine.high %v2501_v10, %v10242_v1  ;;  %v2512_v15 = vcombine.high %v2508_v22, %v10242_v1 }
 0x407   : > { %2522 = vrot.lane.b32.xlu0 %v2442_v48, %s6416_s28  ;;  %v2648_v48 = vcombine.low %v2624_v31, %v2640_v26 }
 0x409   : > { %2534 = vrot.lane.b32.xlu1 %v2440_v46, %s6414_s26  ;;  %v2649_v46 = vcombine.high %v2624_v31, %v2640_v26 }
 0x40b   : > { %2530 = vrot.lane.b32.xlu0 %v2443_v55, %s6417_s29  ;;  %v10353_v55 = vld [vmem:[#allocation8_spill] sm:$0xff] }
 0x40d   : > { %2542 = vrot.lane.b32.xlu1 %v2509_v35, %s6415_s27  ;;  %v2700_v35 = vcombine.low %v10354_v41, %v10353_v55 }
 0x40f   : > { %2538 = vrot.lane.b32.xlu0 %v2444_v24, %s6418_s30  ;;  %v2631_v24 = vrot.slane %v2617_v52, %v6516_v36  ;;  %v2708_v26 = vrot.slane %v2700_v35, %v6516_v36 }
 0x411   : > { %2550 = vrot.lane.b32.xlu1 %v2510_v45, %s6416_s28  ;;  %v2684_v45 = vcombine.low %v10357_v6, %v10356_v49  ;;  %v2664_v28 = vcombine.low %v2631_v24, %v2647_v23 }
 0x413   : > { %2546 = vrot.lane.b32.xlu0 %v2492_v50, %s6412_s24  ;;  %v7733_v50 = vrot.slane %v2648_v48, %v6744_v12  ;;  %v2692_v31 = vrot.slane %v2684_v45, %v6516_v36  ;;  %v2672_v7 = vrot.slane %v2664_v28, %v6744_v12  ;;  %v2665_v48 = vcombine.high %v2631_v24, %v2647_v23 }
 0x415   : > { %2558 = vrot.lane.b32.xlu1 %v2511_v62, %s6417_s29  ;;  %10355 = vst [vmem:[#allocation4_spill] sm:$0xff] %v7733_v50  ;;  %v2680_v62 = vcombine.high %v7733_v50, %v10242_v1  ;;  %v2716_v52 = vcombine.low %v2692_v31, %v2708_v26  ;;  %v2679_v35 = vrot.slane %v2665_v48, %v6744_v12 }
 0x416   : > { %v2717_v28 = vcombine.high %v2692_v31, %v2708_v26  ;;  %v2682_v24 = vcombine.high %v2672_v7, %v10242_v1 }
 0x417   : > { %2554 = vrot.lane.b32.xlu0 %v2501_v10, %s6413_s25  ;;  %v2663_v10 = vrot.slane %v2649_v46, %v6744_v12  ;;  %v2685_v46 = vcombine.high %v10357_v6, %v10356_v49  ;;  %v7756_v45 = vrot.slane %v2716_v52, %v6744_v12  ;;  %v2683_v26 = vcombine.high %v2679_v35, %v10242_v1 }
 0x419   : > { %2566 = vrot.lane.b32.xlu1 %v2512_v15, %s6418_s30  ;;  %v2681_v15 = vcombine.high %v2663_v10, %v10242_v1  ;;  %10358 = vst [vmem:[#allocation8_spill] sm:$0xff] %v7756_v45 }
 0x41b   : > { %2562 = vrot.lane.b32.xlu0 %v2508_v22, %s6414_s26  ;;  %v2701_v22 = vcombine.high %v10354_v41, %v10353_v55 }
 0x41d   : > { %2757 = vrot.lane.b32.xlu1 %v2663_v10, %s6412_s24  ;;  %v2715_v23 = vrot.slane %v2701_v22, %v6516_v36  ;;  %v2748_v10 = vcombine.high %v7756_v45, %v10242_v1 }
 0x41f   : > { %2753 = vrot.lane.b32.xlu0 %v2680_v62, %s6415_s27  ;;  %v2699_v62 = vrot.slane %v2685_v46, %v6516_v36 }
 0x421   : > { %2765 = vrot.lane.b32.xlu1 %v2672_v7, %s6413_s25  ;;  %v2732_v48 = vcombine.low %v2699_v62, %v2715_v23  ;;  %v2733_v52 = vcombine.high %v2699_v62, %v2715_v23 }
 0x423   : > { %2761 = vrot.lane.b32.xlu0 %v2681_v15, %s6416_s28  ;;  %v2731_v15 = vrot.slane %v2717_v28, %v6744_v12  ;;  %v2740_v7 = vrot.slane %v2732_v48, %v6744_v12  ;;  %v2747_v46 = vrot.slane %v2733_v52, %v6744_v12 }
 0x425   : > { %2773 = vrot.lane.b32.xlu1 %v2679_v35, %s6414_s26  ;;  %v2749_v31 = vcombine.high %v2731_v15, %v10242_v1  ;;  %v2750_v22 = vcombine.high %v2740_v7, %v10242_v1  ;;  %v2751_v35 = vcombine.high %v2747_v46, %v10242_v1 }
 0x427   : > { %2769 = vrot.lane.b32.xlu0 %v2682_v24, %s6417_s29 }
 0x429   : > { %2781 = vrot.lane.b32.xlu1 %v2748_v10, %s6415_s27 }
 0x42b   : > { %2777 = vrot.lane.b32.xlu0 %v2683_v26, %s6418_s30 }
 0x42d   : > { %2789 = vrot.lane.b32.xlu1 %v2749_v31, %s6416_s28 }
 0x42f   : > { %2785 = vrot.lane.b32.xlu0 %v2731_v15, %s6412_s24 }
 0x431   : > { %2797 = vrot.lane.b32.xlu1 %v2750_v22, %s6417_s29 }
 0x433   : > { %2793 = vrot.lane.b32.xlu0 %v2740_v7, %s6413_s25 }
 0x435   : > { %2805 = vrot.lane.b32.xlu1 %v2751_v35, %s6418_s30 }
 0x437   : > { %2801 = vrot.lane.b32.xlu0 %v2747_v46, %s6414_s26 }
 0x439   : > { %2828 = vrot.lane.b32.xlu1 %v10357_v6, %s6406_s20 }
 0x43b   : > { %2826 = vrot.lane.b32.xlu0 %v10352_v5, %s6406_s20 }
 0x43d   : > { %2832 = vrot.lane.b32.xlu1 %v10354_v41, %s6406_s20 }
 0x43f   : > { %2830 = vrot.lane.b32.xlu0 %v6521_v38, %s6406_s20 }
 0x441   : > { %2836 = vrot.lane.b32.xlu1 %v10356_v49, %s6406_s20 }
 0x443   : > { %2834 = vrot.lane.b32.xlu0 %v6583_v58, %s6406_s20 }
 0x445   : > { %2840 = vrot.lane.b32.xlu1 %v10353_v55, %s6406_s20 }
 0x447   : > { %2838 = vrot.lane.b32.xlu0 %v6587_v60, %s6406_s20 }
 0x473   : > { %v7796_v28 = vpop.permute.xlu1 %2518 }
 0x474   : > { %10359 = vst [vmem:[#allocation6_spill] sm:$0xff] %v7796_v28 }
 0x475   : > { %v7798_v23 = vpop.permute.xlu0 %2514 }
 0x476   : > { %10360 = vst [vmem:[#allocation7_spill] sm:$0xff] %v7798_v23 }
 0x477   : > { %v7800_v24 = vpop.permute.xlu1 %2526 }
 0x478   : > { %10361 = vst [vmem:[#allocation5_spill] sm:$0xff] %v7800_v24 }
 0x479   : > { %v7802_v62 = vpop.permute.xlu0 %2522 }
 0x47a   : > { %10362 = vst [vmem:[#allocation141_spill] sm:$0xff] %v7802_v62 }
 0x47b   : > { %v7804_v10 = vpop.permute.xlu1 %2534 }
 0x47c   : > { %10363 = vst [vmem:[#allocation142_spill] sm:$0xff] %v7804_v10 }
 0x47d   : > { %v7806_v15 = vpop.permute.xlu0 %2530 }
 0x47e   : > { %10364 = vst [vmem:[#allocation143_spill] sm:$0xff] %v7806_v15 }
 0x47f   : > { %v7808_v48 = vpop.permute.xlu1 %2542 }
 0x480   : > { %10365 = vst [vmem:[#allocation144_spill] sm:$0xff] %v7808_v48 }
 0x481   : > { %v7810_v26 = vpop.permute.xlu0 %2538 }
 0x482   : > { %10366 = vst [vmem:[#allocation145_spill] sm:$0xff] %v7810_v26 }
 0x483   : > { %v7812_v31 = vpop.permute.xlu1 %2550 }
 0x484   : > { %10367 = vst [vmem:[#allocation146_spill] sm:$0xff] %v7812_v31 }
 0x485   : > { %v7814_v7 = vpop.permute.xlu0 %2546 }
 0x486   : > { %10368 = vst [vmem:[#allocation147_spill] sm:$0xff] %v7814_v7 }
 0x487   : > { %v7816_v52 = vpop.permute.xlu1 %2558 }
 0x488   : > { %10369 = vst [vmem:[#allocation148_spill] sm:$0xff] %v7816_v52 }
 0x489   : > { %v7818_v22 = vpop.permute.xlu0 %2554 }
 0x48a   : > { %10370 = vst [vmem:[#allocation149_spill] sm:$0xff] %v7818_v22 }
 0x48b   : > { %v7820_v46 = vpop.permute.xlu1 %2566 }
 0x48c   : > { %10371 = vst [vmem:[#allocation150_spill] sm:$0xff] %v7820_v46 }
 0x48d   : > { %v7822_v35 = vpop.permute.xlu0 %2562 }
 0x48e   : > { %10372 = vst [vmem:[#allocation151_spill] sm:$0xff] %v7822_v35 }
 0x48f   : > { %v7824_v24 = vpop.permute.xlu1 %2757 }
 0x490   : > { %10373 = vst [vmem:[#allocation152_spill] sm:$0xff] %v7824_v24 }
 0x491   : > { %v7826_v10 = vpop.permute.xlu0 %2753 }
 0x492   : > { %10374 = vst [vmem:[#allocation153_spill] sm:$0xff] %v7826_v10 }
 0x493   : > { %v7828_v15 = vpop.permute.xlu1 %2765 }
 0x494   : > { %10375 = vst [vmem:[#allocation154_spill] sm:$0xff] %v7828_v15 }
 0x495   : > { %v7830_v62 = vpop.permute.xlu0 %2761 }
 0x496   : > { %10376 = vst [vmem:[#allocation155_spill] sm:$0xff] %v7830_v62 }
 0x497   : > { %v7832_v26 = vpop.permute.xlu1 %2773 }
 0x498   : > { %10377 = vst [vmem:[#allocation156_spill] sm:$0xff] %v7832_v26 }
 0x499   : > { %v7834_v31 = vpop.permute.xlu0 %2769 }
 0x49a   : > { %10378 = vst [vmem:[#allocation157_spill] sm:$0xff] %v7834_v31 }
 0x49b   : > { %v7836_v54 = vpop.permute.xlu1 %2781 }
 0x49c   : > { %10379 = vst [vmem:[#allocation158_spill] sm:$0xff] %v7836_v54 }
 0x49d   : > { %v7838_v52 = vpop.permute.xlu0 %2777 }
 0x49e   : > { %10380 = vst [vmem:[#allocation159_spill] sm:$0xff] %v7838_v52 }
 0x49f   : > { %v7840_v22 = vpop.permute.xlu1 %2789 }
 0x4a0   : > { %10381 = vst [vmem:[#allocation160_spill] sm:$0xff] %v7840_v22 }
 0x4a1   : > { %v7842_v46 = vpop.permute.xlu0 %2785 }
 0x4a2   : > { %10382 = vst [vmem:[#allocation161_spill] sm:$0xff] %v7842_v46 }
 0x4a3   : > { %v7844_v35 = vpop.permute.xlu1 %2797 }
 0x4a4   : > { %10383 = vst [vmem:[#allocation162_spill] sm:$0xff] %v7844_v35 }
 0x4a5   : > { %v7846_v24 = vpop.permute.xlu0 %2793 }
 0x4a6   : > { %10384 = vst [vmem:[#allocation163_spill] sm:$0xff] %v7846_v24 }
 0x4a7   : > { %v7848_v28 = vpop.permute.xlu1 %2805 }
 0x4a8   : > { %10385 = vst [vmem:[#allocation164_spill] sm:$0xff] %v7848_v28 }
 0x4a9   : > { %v7850_v15 = vpop.permute.xlu0 %2801 }
 0x4aa   : > { %10386 = vst [vmem:[#allocation165_spill] sm:$0xff] %v7850_v15 }
 0x4ab   : > { %v2829_v62 = vpop.permute.xlu1 %2828 }
 0x4ad   : > { %v2827_v26 = vpop.permute.xlu0 %2826 }
 0x4af   : > { %v2833_v4 = vpop.permute.xlu1 %2832 }
 0x4b1   : > { %v2831_v31 = vpop.permute.xlu0 %2830 }
 0x4b3   : > { %v2837_v45 = vpop.permute.xlu1 %2836 }
 0x4b4   : > { %v2918_v15 = vcombine.low %v2829_v62, %v2837_v45 }
 0x4b5   : > { %v2835_v54 = vpop.permute.xlu0 %2834 }
 0x4b6   : > { %v2850_v50 = vcombine.low %v2827_v26, %v2835_v54  ;;  %v2851_v46 = vcombine.high %v2827_v26, %v2835_v54  ;;  %v2926_v54 = vrot.slane %v2918_v15, %v6516_v36 }
 0x4b7   : > { %v2841_v10 = vpop.permute.xlu1 %2840 }
 0x4b8   : > { %v2858_v35 = vrot.slane %v2850_v50, %v6516_v36  ;;  %v2934_v16 = vcombine.low %v2833_v4, %v2841_v10  ;;  %v2865_v53 = vrot.slane %v2851_v46, %v6516_v36  ;;  %v2935_v26 = vcombine.high %v2833_v4, %v2841_v10 }
 0x4b9   : > { %v2839_v52 = vpop.permute.xlu0 %2838 }
 0x4ba   : > { %v2866_v22 = vcombine.low %v2831_v31, %v2839_v52  ;;  %v2867_v7 = vcombine.high %v2831_v31, %v2839_v52  ;;  %v2942_v9 = vrot.slane %v2934_v16, %v6516_v36 }
 0x4bc   : > { %v2874_v24 = vrot.slane %v2866_v22, %v6516_v36  ;;  %v2881_v28 = vrot.slane %v2867_v7, %v6516_v36  ;;  %v2950_v7 = vcombine.low %v2926_v54, %v2942_v9  ;;  %v2951_v15 = vcombine.high %v2926_v54, %v2942_v9 }
 0x4be   : > { %v2882_v48 = vcombine.low %v2858_v35, %v2874_v24  ;;  %v2883_v44 = vcombine.high %v2858_v35, %v2874_v24  ;;  %v2898_v23 = vcombine.low %v2865_v53, %v2881_v28  ;;  %v2899_v52 = vcombine.high %v2865_v53, %v2881_v28 }
 0x4bf   : > { %v2919_v24 = vcombine.high %v2829_v62, %v2837_v45  ;;  %v7873_v4 = vrot.slane %v2950_v7, %v6744_v12  ;;  %v2965_v9 = vrot.slane %v2951_v15, %v6744_v12 }
 0x4c0   : > { %v2897_v32 = vrot.slane %v2883_v44, %v6744_v12  ;;  %v7859_v31 = vrot.slane %v2882_v48, %v6744_v12  ;;  %v2906_v16 = vrot.slane %v2898_v23, %v6744_v12  ;;  %v2949_v48 = vrot.slane %v2935_v26, %v6516_v36 }
 0x4c1   : > { %v2913_v22 = vrot.slane %v2899_v52, %v6744_v12  ;;  %10388 = vst [vmem:[#allocation167_spill] sm:$0xff] %v7873_v4  ;;  %v2933_v53 = vrot.slane %v2919_v24, %v6516_v36  ;;  %v2983_v10 = vcombine.high %v2965_v9, %v10242_v1 }
 0x4c2   : > { %10387 = vst [vmem:[#allocation166_spill] sm:$0xff] %v7859_v31  ;;  %2991 = vrot.lane.b32.xlu1 %v2897_v32, %s6412_s24  ;;  %v2914_v50 = vcombine.high %v7859_v31, %v10242_v1  ;;  %v2915_v44 = vcombine.high %v2897_v32, %v10242_v1  ;;  %v2916_v45 = vcombine.high %v2906_v16, %v10242_v1 }
 0x4c3   : > { %v2966_v28 = vcombine.low %v2933_v53, %v2949_v48  ;;  %v2982_v32 = vcombine.high %v7873_v4, %v10242_v1  ;;  %v2917_v23 = vcombine.high %v2913_v22, %v10242_v1  ;;  %v2967_v62 = vcombine.high %v2933_v53, %v2949_v48 }
 0x4c4   : > { %2987 = vrot.lane.b32.xlu0 %v2914_v50, %s6415_s27 }
 0x4c5   : > { %v2974_v46 = vrot.slane %v2966_v28, %v6744_v12  ;;  %v2981_v54 = vrot.slane %v2967_v62, %v6744_v12 }
 0x4c6   : > { %2999 = vrot.lane.b32.xlu1 %v2906_v16, %s6413_s25 }
 0x4c7   : > { %v2984_v35 = vcombine.high %v2974_v46, %v10242_v1  ;;  %v2985_v50 = vcombine.high %v2981_v54, %v10242_v1 }
 0x4c8   : > { %2995 = vrot.lane.b32.xlu0 %v2915_v44, %s6416_s28 }
 0x4ca   : > { %3007 = vrot.lane.b32.xlu1 %v2913_v22, %s6414_s26 }
 0x4cc   : > { %3003 = vrot.lane.b32.xlu0 %v2916_v45, %s6417_s29 }
 0x4ce   : > { %3015 = vrot.lane.b32.xlu1 %v2982_v32, %s6415_s27 }
 0x4d0   : > { %3011 = vrot.lane.b32.xlu0 %v2917_v23, %s6418_s30 }
 0x4d2   : > { %3023 = vrot.lane.b32.xlu1 %v2983_v10, %s6416_s28 }
 0x4d4   : > { %3019 = vrot.lane.b32.xlu0 %v2965_v9, %s6412_s24 }
 0x4d6   : > { %3031 = vrot.lane.b32.xlu1 %v2984_v35, %s6417_s29 }
 0x4d8   : > { %3027 = vrot.lane.b32.xlu0 %v2974_v46, %s6413_s25 }
 0x4da   : > { %3039 = vrot.lane.b32.xlu1 %v2985_v50, %s6418_s30 }
 0x4dc   : > { %3035 = vrot.lane.b32.xlu0 %v2981_v54, %s6414_s26 }
 0x4de   : > { %3062 = vrot.lane.b32.xlu1 %v10357_v6, %s6408_s21 }
 0x4e0   : > { %3060 = vrot.lane.b32.xlu0 %v10352_v5, %s6408_s21 }
 0x4e2   : > { %3066 = vrot.lane.b32.xlu1 %v10354_v41, %s6408_s21 }
 0x4e4   : > { %3064 = vrot.lane.b32.xlu0 %v6521_v38, %s6408_s21 }
 0x4e6   : > { %3070 = vrot.lane.b32.xlu1 %v10356_v49, %s6408_s21 }
 0x4e8   : > { %3068 = vrot.lane.b32.xlu0 %v6583_v58, %s6408_s21 }
 0x4ea   : > { %3074 = vrot.lane.b32.xlu1 %v10353_v55, %s6408_s21 }
 0x4ec   : > { %3072 = vrot.lane.b32.xlu0 %v6587_v60, %s6408_s21 }
 0x534   : > { %v7912_v26 = vpop.permute.xlu1 %2991 }
 0x535   : > { %10389 = vst [vmem:[#allocation168_spill] sm:$0xff] %v7912_v26 }
 0x536   : > { %v7914_v7 = vpop.permute.xlu0 %2987 }
 0x537   : > { %10390 = vst [vmem:[#allocation169_spill] sm:$0xff] %v7914_v7 }
 0x538   : > { %v7916_v52 = vpop.permute.xlu1 %2999 }
 0x539   : > { %10391 = vst [vmem:[#allocation170_spill] sm:$0xff] %v7916_v52 }
 0x53a   : > { %v7918_v16 = vpop.permute.xlu0 %2995 }
 0x53b   : > { %10392 = vst [vmem:[#allocation171_spill] sm:$0xff] %v7918_v16 }
 0x53c   : > { %v7920_v24 = vpop.permute.xlu1 %3007 }
 0x53d   : > { %10393 = vst [vmem:[#allocation172_spill] sm:$0xff] %v7920_v24 }
 0x53e   : > { %v7922_v44 = vpop.permute.xlu0 %3003 }
 0x53f   : > { %10394 = vst [vmem:[#allocation173_spill] sm:$0xff] %v7922_v44 }
 0x540   : > { %v7924_v48 = vpop.permute.xlu1 %3015 }
 0x541   : > { %10395 = vst [vmem:[#allocation174_spill] sm:$0xff] %v7924_v48 }
 0x542   : > { %v7926_v15 = vpop.permute.xlu0 %3011 }
 0x543   : > { %10396 = vst [vmem:[#allocation175_spill] sm:$0xff] %v7926_v15 }
 0x544   : > { %v7928_v22 = vpop.permute.xlu1 %3023 }
 0x545   : > { %10397 = vst [vmem:[#allocation176_spill] sm:$0xff] %v7928_v22 }
 0x546   : > { %v7930_v53 = vpop.permute.xlu0 %3019 }
 0x547   : > { %10398 = vst [vmem:[#allocation177_spill] sm:$0xff] %v7930_v53 }
 0x548   : > { %v7932_v45 = vpop.permute.xlu1 %3031 }
 0x549   : > { %10399 = vst [vmem:[#allocation178_spill] sm:$0xff] %v7932_v45 }
 0x54a   : > { %v7934_v28 = vpop.permute.xlu0 %3027 }
 0x54b   : > { %10400 = vst [vmem:[#allocation179_spill] sm:$0xff] %v7934_v28 }
 0x54c   : > { %v7936_v32 = vpop.permute.xlu1 %3039 }
 0x54d   : > { %10401 = vst [vmem:[#allocation180_spill] sm:$0xff] %v7936_v32 }
 0x54e   : > { %v7938_v9 = vpop.permute.xlu0 %3035 }
 0x54f   : > { %10402 = vst [vmem:[#allocation181_spill] sm:$0xff] %v7938_v9 }
 0x550   : > { %v3063_v23 = vpop.permute.xlu1 %3062 }
 0x552   : > { %v3061_v62 = vpop.permute.xlu0 %3060 }
 0x554   : > { %v3067_v10 = vpop.permute.xlu1 %3066 }
 0x556   : > { %v3065_v46 = vpop.permute.xlu0 %3064 }
 0x558   : > { %v3071_v35 = vpop.permute.xlu1 %3070 }
 0x559   : > { %v3152_v9 = vcombine.low %v3063_v23, %v3071_v35 }
 0x55a   : > { %v3069_v54 = vpop.permute.xlu0 %3068 }
 0x55b   : > { %v3084_v50 = vcombine.low %v3061_v62, %v3069_v54  ;;  %v3085_v22 = vcombine.high %v3061_v62, %v3069_v54  ;;  %v3160_v62 = vrot.slane %v3152_v9, %v6516_v36 }
 0x55c   : > { %v3075_v24 = vpop.permute.xlu1 %3074 }
 0x55d   : > { %v3092_v45 = vrot.slane %v3084_v50, %v6516_v36  ;;  %v3168_v16 = vcombine.low %v3067_v10, %v3075_v24  ;;  %v3099_v26 = vrot.slane %v3085_v22, %v6516_v36 }
 0x55e   : > { %v3073_v15 = vpop.permute.xlu0 %3072 }
 0x55f   : > { %v3100_v44 = vcombine.low %v3065_v46, %v3073_v15  ;;  %v3101_v52 = vcombine.high %v3065_v46, %v3073_v15  ;;  %v3176_v48 = vrot.slane %v3168_v16, %v6516_v36 }
 0x561   : > { %v3108_v28 = vrot.slane %v3100_v44, %v6516_v36  ;;  %v3115_v32 = vrot.slane %v3101_v52, %v6516_v36  ;;  %v3169_v44 = vcombine.high %v3067_v10, %v3075_v24  ;;  %v3184_v46 = vcombine.low %v3160_v62, %v3176_v48 }
 0x563   : > { %v3116_v53 = vcombine.low %v3092_v45, %v3108_v28  ;;  %v3117_v4 = vcombine.high %v3092_v45, %v3108_v28  ;;  %v3132_v31 = vcombine.low %v3099_v26, %v3115_v32  ;;  %v3133_v22 = vcombine.high %v3099_v26, %v3115_v32 }
 0x564   : > { %v3153_v45 = vcombine.high %v3063_v23, %v3071_v35  ;;  %v3185_v28 = vcombine.high %v3160_v62, %v3176_v48  ;;  %v7961_v24 = vrot.slane %v3184_v46, %v6744_v12 }
 0x565   : > { %v3131_v7 = vrot.slane %v3117_v4, %v6744_v12  ;;  %v7947_v15 = vrot.slane %v3116_v53, %v6744_v12  ;;  %v3140_v16 = vrot.slane %v3132_v31, %v6744_v12  ;;  %v3183_v53 = vrot.slane %v3169_v44, %v6516_v36 }
 0x566   : > { %v3147_v9 = vrot.slane %v3133_v22, %v6744_v12  ;;  %10404 = vst [vmem:[#allocation183_spill] sm:$0xff] %v7961_v24  ;;  %v3167_v26 = vrot.slane %v3153_v45, %v6516_v36  ;;  %v3199_v48 = vrot.slane %v3185_v28, %v6744_v12 }
 0x567   : > { %10403 = vst [vmem:[#allocation182_spill] sm:$0xff] %v7947_v15  ;;  %3225 = vrot.lane.b32.xlu1 %v3131_v7, %s6412_s24  ;;  %v3148_v52 = vcombine.high %v7947_v15, %v10242_v1  ;;  %v3149_v4 = vcombine.high %v3131_v7, %v10242_v1  ;;  %v3150_v31 = vcombine.high %v3140_v16, %v10242_v1 }
 0x568   : > { %v3200_v32 = vcombine.low %v3167_v26, %v3183_v53  ;;  %v3216_v7 = vcombine.high %v7961_v24, %v10242_v1  ;;  %v3151_v23 = vcombine.high %v3147_v9, %v10242_v1  ;;  %v3201_v10 = vcombine.high %v3167_v26, %v3183_v53 }
 0x569   : > { %3221 = vrot.lane.b32.xlu0 %v3148_v52, %s6415_s27  ;;  %v3217_v35 = vcombine.high %v3199_v48, %v10242_v1 }
 0x56a   : > { %v3208_v54 = vrot.slane %v3200_v32, %v6744_v12  ;;  %v3215_v62 = vrot.slane %v3201_v10, %v6744_v12 }
 0x56b   : > { %3233 = vrot.lane.b32.xlu1 %v3140_v16, %s6413_s25 }
 0x56c   : > { %v3218_v50 = vcombine.high %v3208_v54, %v10242_v1  ;;  %v3219_v52 = vcombine.high %v3215_v62, %v10242_v1 }
 0x56d   : > { %3229 = vrot.lane.b32.xlu0 %v3149_v4, %s6416_s28 }
 0x56f   : > { %3241 = vrot.lane.b32.xlu1 %v3147_v9, %s6414_s26 }
 0x571   : > { %3237 = vrot.lane.b32.xlu0 %v3150_v31, %s6417_s29 }
 0x573   : > { %3249 = vrot.lane.b32.xlu1 %v3216_v7, %s6415_s27 }
 0x575   : > { %3245 = vrot.lane.b32.xlu0 %v3151_v23, %s6418_s30 }
 0x577   : > { %3257 = vrot.lane.b32.xlu1 %v3217_v35, %s6416_s28 }
 0x579   : > { %3253 = vrot.lane.b32.xlu0 %v3199_v48, %s6412_s24 }
 0x57b   : > { %3265 = vrot.lane.b32.xlu1 %v3218_v50, %s6417_s29 }
 0x57d   : > { %3261 = vrot.lane.b32.xlu0 %v3208_v54, %s6413_s25 }
 0x57f   : > { %3273 = vrot.lane.b32.xlu1 %v3219_v52, %s6418_s30 }
 0x581   : > { %3269 = vrot.lane.b32.xlu0 %v3215_v62, %s6414_s26 }
 0x583   : > { %3296 = vrot.lane.b32.xlu1 %v10357_v6, %s6409_s22 }
 0x585   : > { %3294 = vrot.lane.b32.xlu0 %v10352_v5, %s6409_s22 }
 0x587   : > { %3300 = vrot.lane.b32.xlu1 %v10354_v41, %s6409_s22 }
 0x589   : > { %3298 = vrot.lane.b32.xlu0 %v6521_v38, %s6409_s22 }
 0x58b   : > { %3304 = vrot.lane.b32.xlu1 %v10356_v49, %s6409_s22 }
 0x58d   : > { %3302 = vrot.lane.b32.xlu0 %v6583_v58, %s6409_s22 }
 0x58f   : > { %3308 = vrot.lane.b32.xlu1 %v10353_v55, %s6409_s22 }
 0x591   : > { %3306 = vrot.lane.b32.xlu0 %v6587_v60, %s6409_s22 }
 0x5d9   : > { %v8000_v44 = vpop.permute.xlu1 %3225 }
 0x5da   : > { %10405 = vst [vmem:[#allocation184_spill] sm:$0xff] %v8000_v44 }
 0x5db   : > { %v8002_v46 = vpop.permute.xlu0 %3221 }
 0x5dc   : > { %10406 = vst [vmem:[#allocation185_spill] sm:$0xff] %v8002_v46 }
 0x5dd   : > { %v8004_v22 = vpop.permute.xlu1 %3233 }
 0x5de   : > { %10407 = vst [vmem:[#allocation186_spill] sm:$0xff] %v8004_v22 }
 0x5df   : > { %v8006_v16 = vpop.permute.xlu0 %3229 }
 0x5e0   : > { %10408 = vst [vmem:[#allocation187_spill] sm:$0xff] %v8006_v16 }
 0x5e1   : > { %v8008_v45 = vpop.permute.xlu1 %3241 }
 0x5e2   : > { %10409 = vst [vmem:[#allocation188_spill] sm:$0xff] %v8008_v45 }
 0x5e3   : > { %v8010_v4 = vpop.permute.xlu0 %3237 }
 0x5e4   : > { %10410 = vst [vmem:[#allocation189_spill] sm:$0xff] %v8010_v4 }
 0x5e5   : > { %v8012_v53 = vpop.permute.xlu1 %3249 }
 0x5e6   : > { %10411 = vst [vmem:[#allocation190_spill] sm:$0xff] %v8012_v53 }
 0x5e7   : > { %v8014_v28 = vpop.permute.xlu0 %3245 }
 0x5e8   : > { %10412 = vst [vmem:[#allocation191_spill] sm:$0xff] %v8014_v28 }
 0x5e9   : > { %v8016_v9 = vpop.permute.xlu1 %3257 }
 0x5ea   : > { %10413 = vst [vmem:[#allocation192_spill] sm:$0xff] %v8016_v9 }
 0x5eb   : > { %v8018_v26 = vpop.permute.xlu0 %3253 }
 0x5ec   : > { %10414 = vst [vmem:[#allocation193_spill] sm:$0xff] %v8018_v26 }
 0x5ed   : > { %v8020_v31 = vpop.permute.xlu1 %3265 }
 0x5ee   : > { %10415 = vst [vmem:[#allocation194_spill] sm:$0xff] %v8020_v31 }
 0x5ef   : > { %v8022_v32 = vpop.permute.xlu0 %3261 }
 0x5f0   : > { %10416 = vst [vmem:[#allocation195_spill] sm:$0xff] %v8022_v32 }
 0x5f1   : > { %v8024_v7 = vpop.permute.xlu1 %3273 }
 0x5f2   : > { %10417 = vst [vmem:[#allocation196_spill] sm:$0xff] %v8024_v7 }
 0x5f3   : > { %v8026_v48 = vpop.permute.xlu0 %3269 }
 0x5f4   : > { %10418 = vst [vmem:[#allocation197_spill] sm:$0xff] %v8026_v48 }
 0x5f5   : > { %v3297_v23 = vpop.permute.xlu1 %3296 }
 0x5f7   : > { %v3295_v10 = vpop.permute.xlu0 %3294 }
 0x5f9   : > { %v3301_v35 = vpop.permute.xlu1 %3300 }
 0x5fb   : > { %v3299_v54 = vpop.permute.xlu0 %3298 }
 0x5fd   : > { %v3305_v50 = vpop.permute.xlu1 %3304 }
 0x5fe   : > { %v3386_v48 = vcombine.low %v3297_v23, %v3305_v50 }
 0x5ff   : > { %v3303_v62 = vpop.permute.xlu0 %3302 }
 0x600   : > { %v3318_v52 = vcombine.low %v3295_v10, %v3303_v62  ;;  %v3319_v9 = vcombine.high %v3295_v10, %v3303_v62  ;;  %v3394_v10 = vrot.slane %v3386_v48, %v6516_v36 }
 0x601   : > { %v3309_v45 = vpop.permute.xlu1 %3308 }
 0x602   : > { %v3326_v31 = vrot.slane %v3318_v52, %v6516_v36  ;;  %v3402_v16 = vcombine.low %v3301_v35, %v3309_v45  ;;  %v3333_v44 = vrot.slane %v3319_v9, %v6516_v36 }
 0x603   : > { %v3307_v28 = vpop.permute.xlu0 %3306 }
 0x604   : > { %v3334_v4 = vcombine.low %v3299_v54, %v3307_v28  ;;  %v3335_v22 = vcombine.high %v3299_v54, %v3307_v28  ;;  %v3410_v53 = vrot.slane %v3402_v16, %v6516_v36 }
 0x606   : > { %v3342_v32 = vrot.slane %v3334_v4, %v6516_v36  ;;  %v3349_v7 = vrot.slane %v3335_v22, %v6516_v36  ;;  %v3403_v4 = vcombine.high %v3301_v35, %v3309_v45  ;;  %v3418_v54 = vcombine.low %v3394_v10, %v3410_v53 }
 0x608   : > { %v3350_v26 = vcombine.low %v3326_v31, %v3342_v32  ;;  %v3351_v24 = vcombine.high %v3326_v31, %v3342_v32  ;;  %v3366_v15 = vcombine.low %v3333_v44, %v3349_v7  ;;  %v3367_v9 = vcombine.high %v3333_v44, %v3349_v7 }
 0x609   : > { %v3387_v31 = vcombine.high %v3297_v23, %v3305_v50  ;;  %v3419_v32 = vcombine.high %v3394_v10, %v3410_v53  ;;  %v8049_v45 = vrot.slane %v3418_v54, %v6744_v12 }
 0x60a   : > { %v3365_v46 = vrot.slane %v3351_v24, %v6744_v12  ;;  %v8035_v28 = vrot.slane %v3350_v26, %v6744_v12  ;;  %v3374_v16 = vrot.slane %v3366_v15, %v6744_v12  ;;  %v3417_v26 = vrot.slane %v3403_v4, %v6516_v36 }
 0x60b   : > { %v3381_v48 = vrot.slane %v3367_v9, %v6744_v12  ;;  %v3401_v44 = vrot.slane %v3387_v31, %v6516_v36  ;;  %v3433_v53 = vrot.slane %v3419_v32, %v6744_v12 }
 0x60c   : > { %3459 = vrot.lane.b32.xlu1 %v3365_v46, %s6412_s24  ;;  %v3382_v22 = vcombine.high %v8035_v28, %v10242_v1  ;;  %v3383_v24 = vcombine.high %v3365_v46, %v10242_v1  ;;  %v3384_v15 = vcombine.high %v3374_v16, %v10242_v1  ;;  %v3450_v46 = vcombine.high %v8049_v45, %v10242_v1 }
 0x60d   : > { %v3434_v7 = vcombine.low %v3401_v44, %v3417_v26  ;;  %v3385_v23 = vcombine.high %v3381_v48, %v10242_v1  ;;  %v3435_v35 = vcombine.high %v3401_v44, %v3417_v26  ;;  %v3451_v50 = vcombine.high %v3433_v53, %v10242_v1 }
 0x60e   : > { %3455 = vrot.lane.b32.xlu0 %v3382_v22, %s6415_s27 }
 0x60f   : > { %v3442_v62 = vrot.slane %v3434_v7, %v6744_v12  ;;  %v3449_v10 = vrot.slane %v3435_v35, %v6744_v12 }
 0x610   : > { %3467 = vrot.lane.b32.xlu1 %v3374_v16, %s6413_s25 }
 0x611   : > { %v3452_v52 = vcombine.high %v3442_v62, %v10242_v1  ;;  %v3453_v22 = vcombine.high %v3449_v10, %v10242_v1 }
 0x612   : > { %3463 = vrot.lane.b32.xlu0 %v3383_v24, %s6416_s28 }
 0x614   : > { %3475 = vrot.lane.b32.xlu1 %v3381_v48, %s6414_s26 }
 0x616   : > { %3471 = vrot.lane.b32.xlu0 %v3384_v15, %s6417_s29 }
 0x618   : > { %3483 = vrot.lane.b32.xlu1 %v3450_v46, %s6415_s27 }
 0x61a   : > { %3479 = vrot.lane.b32.xlu0 %v3385_v23, %s6418_s30 }
 0x61c   : > { %3491 = vrot.lane.b32.xlu1 %v3451_v50, %s6416_s28 }
 0x61e   : > { %3487 = vrot.lane.b32.xlu0 %v3433_v53, %s6412_s24 }
 0x620   : > { %3499 = vrot.lane.b32.xlu1 %v3452_v52, %s6417_s29 }
 0x622   : > { %3495 = vrot.lane.b32.xlu0 %v3442_v62, %s6413_s25 }
 0x624   : > { %3507 = vrot.lane.b32.xlu1 %v3453_v22, %s6418_s30 }
 0x626   : > { %3503 = vrot.lane.b32.xlu0 %v3449_v10, %s6414_s26 }
 0x628   : > { %3530 = vrot.lane.b32.xlu1 %v10357_v6, %s6410_s23 }
 0x62a   : > { %3528 = vrot.lane.b32.xlu0 %v10352_v5, %s6410_s23 }
 0x62c   : > { %3534 = vrot.lane.b32.xlu1 %v10354_v41, %s6410_s23 }
 0x62e   : > { %3532 = vrot.lane.b32.xlu0 %v6521_v38, %s6410_s23 }
 0x630   : > { %3538 = vrot.lane.b32.xlu1 %v10356_v49, %s6410_s23 }
 0x632   : > { %3536 = vrot.lane.b32.xlu0 %v6583_v58, %s6410_s23 }
 0x634   : > { %3542 = vrot.lane.b32.xlu1 %v10353_v55, %s6410_s23 }
 0x636   : > { %3540 = vrot.lane.b32.xlu0 %v6587_v60, %s6410_s23 }
 0x67e   : > { %v8088_v6 = vpop.permute.xlu1 %3459 }
 0x67f   : > { %10419 = vst [vmem:[#allocation198_spill] sm:$0xff] %v8088_v6 }
 0x680   : > { %v8090_v5 = vpop.permute.xlu0 %3455 }
 0x682   : > { %v8092_v41 = vpop.permute.xlu1 %3467 }
 0x683   : > { %10420 = vst [vmem:[#allocation199_spill] sm:$0xff] %v8092_v41 }
 0x684   : > { %v8094_v4 = vpop.permute.xlu0 %3463 }
 0x685   : > { %10421 = vst [vmem:[#allocation200_spill] sm:$0xff] %v8094_v4 }
 0x686   : > { %v8096_v38 = vpop.permute.xlu1 %3475 }
 0x687   : > { %10422 = vst [vmem:[#allocation201_spill] sm:$0xff] %v8096_v38 }
 0x688   : > { %v8098_v49 = vpop.permute.xlu0 %3471 }
 0x689   : > { %10423 = vst [vmem:[#allocation202_spill] sm:$0xff] %v8098_v49 }
 0x68a   : > { %v8100_v54 = vpop.permute.xlu1 %3483 }
 0x68c   : > { %v8102_v58 = vpop.permute.xlu0 %3479 }
 0x68d   : > { %10424 = vst [vmem:[#allocation203_spill] sm:$0xff] %v8102_v58 }
 0x68e   : > { %v8104_v55 = vpop.permute.xlu1 %3491 }
 0x68f   : > { %10425 = vst [vmem:[#allocation204_spill] sm:$0xff] %v8104_v55 }
 0x690   : > { %v8106_v9 = vpop.permute.xlu0 %3487 }
 0x692   : > { %v8108_v60 = vpop.permute.xlu1 %3499 }
 0x693   : > { %10426 = vst [vmem:[#allocation205_spill] sm:$0xff] %v8108_v60 }
 0x694   : > { %v8110_v16 = vpop.permute.xlu0 %3495 }
 0x695   : > { %10427 = vst [vmem:[#allocation206_spill] sm:$0xff] %v8110_v16 }
 0x696   : > { %v8112_v31 = vpop.permute.xlu1 %3507 }
 0x697   : > { %10428 = vst [vmem:[#allocation207_spill] sm:$0xff] %v8112_v31 }
 0x698   : > { %v8114_v24 = vpop.permute.xlu0 %3503 }
 0x699   : > { %10429 = vst [vmem:[#allocation208_spill] sm:$0xff] %v8114_v24 }
 0x69a   : > { %v3531_v26 = vpop.permute.xlu1 %3530 }
 0x69c   : > { %v3529_v32 = vpop.permute.xlu0 %3528 }
 0x69e   : > { %v3535_v48 = vpop.permute.xlu1 %3534 }
 0x6a0   : > { %v3533_v44 = vpop.permute.xlu0 %3532 }
 0x6a2   : > { %v3539_v15 = vpop.permute.xlu1 %3538 }
 0x6a3   : > { %v3620_v31 = vcombine.low %v3531_v26, %v3539_v15 }
 0x6a4   : > { %v3537_v7 = vpop.permute.xlu0 %3536 }
 0x6a5   : > { %v3552_v46 = vcombine.low %v3529_v32, %v3537_v7  ;;  %v3553_v62 = vcombine.high %v3529_v32, %v3537_v7  ;;  %v3628_v32 = vrot.slane %v3620_v31, %v6516_v36 }
 0x6a6   : > { %v3543_v23 = vpop.permute.xlu1 %3542 }
 0x6a7   : > { %v3560_v52 = vrot.slane %v3552_v46, %v6516_v36  ;;  %v3636_v10 = vcombine.low %v3535_v48, %v3543_v23  ;;  %v3567_v38 = vrot.slane %v3553_v62, %v6516_v36  ;;  %v3637_v46 = vcombine.high %v3535_v48, %v3543_v23  ;;  %v10431_v23 = vld [vmem:[#allocation10_spill] sm:$0xff] }
 0x6a8   : > { %v3541_v53 = vpop.permute.xlu0 %3540  ;;  %v3621_v62 = vcombine.high %v3531_v26, %v3539_v15  ;;  %v10430_v15 = vld [vmem:[#allocation13_spill] sm:$0xff] }
 0x6a9   : > { %v3568_v35 = vcombine.low %v3533_v44, %v3541_v53  ;;  %v3569_v50 = vcombine.high %v3533_v44, %v3541_v53  ;;  %v3644_v60 = vrot.slane %v3636_v10, %v6516_v36  ;;  %v3807_v10 = vcombine.low %v10431_v23, %v10430_v15 }
 0x6ab   : > { %v3576_v22 = vrot.slane %v3568_v35, %v6516_v36  ;;  %v3583_v58 = vrot.slane %v3569_v50, %v6516_v36  ;;  %v3652_v53 = vcombine.low %v3628_v32, %v3644_v60  ;;  %v3653_v31 = vcombine.high %v3628_v32, %v3644_v60 }
 0x6ad   : > { %v3584_v24 = vcombine.low %v3560_v52, %v3576_v22  ;;  %v3585_v49 = vcombine.high %v3560_v52, %v3576_v22  ;;  %v3600_v41 = vcombine.low %v3567_v38, %v3583_v58  ;;  %v3601_v35 = vcombine.high %v3567_v38, %v3583_v58 }
 0x6ae   : > { %v8137_v48 = vrot.slane %v3652_v53, %v6744_v12  ;;  %v3635_v38 = vrot.slane %v3621_v62, %v6516_v36  ;;  %v3667_v60 = vrot.slane %v3653_v31, %v6744_v12  ;;  %v10433_v53 = vld [vmem:[#allocation9_spill] sm:$0xff]  ;;  %v3808_v31 = vcombine.high %v10431_v23, %v10430_v15 }
 0x6af   : > { %v3599_v16 = vrot.slane %v3585_v49, %v6744_v12  ;;  %v8123_v44 = vrot.slane %v3584_v24, %v6744_v12  ;;  %v3608_v50 = vrot.slane %v3600_v41, %v6744_v12  ;;  %v3651_v24 = vrot.slane %v3637_v46, %v6516_v36  ;;  %v10432_v46 = vld [vmem:[#allocation11_spill] sm:$0xff] }
 0x6b0   : > { %v3615_v52 = vrot.slane %v3601_v35, %v6744_v12  ;;  %v3685_v32 = vcombine.high %v3667_v60, %v10242_v1  ;;  %v3791_v35 = vcombine.low %v10433_v53, %v10432_v46 }
 0x6b1   : > { %3693 = vrot.lane.b32.xlu1 %v3599_v16, %s6412_s24  ;;  %v3616_v7 = vcombine.high %v8123_v44, %v10242_v1  ;;  %v3617_v49 = vcombine.high %v3599_v16, %v10242_v1  ;;  %v3618_v41 = vcombine.high %v3608_v50, %v10242_v1  ;;  %v3668_v58 = vcombine.low %v3635_v38, %v3651_v24 }
 0x6b2   : > { %v3684_v16 = vcombine.high %v8137_v48, %v10242_v1  ;;  %v3619_v26 = vcombine.high %v3615_v52, %v10242_v1  ;;  %v3669_v22 = vcombine.high %v3635_v38, %v3651_v24  ;;  %v3799_v24 = vrot.slane %v3791_v35, %v6516_v36  ;;  %v10436_v35 = vld [vmem:[#allocation15_spill] sm:$0xff] }
 0x6b3   : > { %3689 = vrot.lane.b32.xlu0 %v3616_v7, %s6415_s27  ;;  %v3676_v7 = vrot.slane %v3668_v58, %v6744_v12  ;;  %v3792_v38 = vcombine.high %v10433_v53, %v10432_v46 }
 0x6b5   : > { %3701 = vrot.lane.b32.xlu1 %v3608_v50, %s6413_s25  ;;  %v3815_v50 = vrot.slane %v3807_v10, %v6516_v36  ;;  %v3686_v62 = vcombine.high %v3676_v7, %v10242_v1 }
 0x6b7   : > { %3697 = vrot.lane.b32.xlu0 %v3617_v49, %s6416_s28  ;;  %v3683_v49 = vrot.slane %v3669_v22, %v6744_v12  ;;  %v3824_v58 = vcombine.high %v3799_v24, %v3815_v50 }
 0x6b9   : > { %3709 = vrot.lane.b32.xlu1 %v3615_v52, %s6414_s26  ;;  %v3823_v52 = vcombine.low %v3799_v24, %v3815_v50 }
 0x6bb   : > { %3705 = vrot.lane.b32.xlu0 %v3618_v41, %s6417_s29  ;;  %v3687_v41 = vcombine.high %v3683_v49, %v10242_v1  ;;  %v8173_v22 = vrot.slane %v3823_v52, %v6744_v12 }
 0x6bd   : > { %3717 = vrot.lane.b32.xlu1 %v3684_v16, %s6415_s27  ;;  %v3822_v16 = vrot.slane %v3808_v31, %v6516_v36  ;;  %v3855_v31 = vcombine.high %v8173_v22, %v10242_v1 }
 0x6bf   : > { %3713 = vrot.lane.b32.xlu0 %v3619_v26, %s6418_s30  ;;  %v10435_v26 = vld [vmem:[#allocation14_spill] sm:$0xff] }
 0x6c1   : > { %3725 = vrot.lane.b32.xlu1 %v3685_v32, %s6416_s28  ;;  %v3806_v32 = vrot.slane %v3792_v38, %v6516_v36 }
 0x6c3   : > { %3721 = vrot.lane.b32.xlu0 %v3667_v60, %s6412_s24  ;;  %v10434_v60 = vld [vmem:[#allocation16_spill] sm:$0xff]  ;;  %v3839_v50 = vcombine.low %v3806_v32, %v3822_v16 }
 0x6c4   : > { %v3875_v10 = vcombine.low %v10435_v26, %v10434_v60 }
 0x6c5   : > { %3733 = vrot.lane.b32.xlu1 %v3686_v62, %s6417_s29  ;;  %v10437_v62 = vld [vmem:[#allocation12_spill] sm:$0xff]  ;;  %v3847_v38 = vrot.slane %v3839_v50, %v6744_v12 }
 0x6c6   : > { %v3859_v4 = vcombine.low %v10437_v62, %v10436_v35  ;;  %v3883_v24 = vrot.slane %v3875_v10, %v6516_v36  ;;  %v3860_v10 = vcombine.high %v10437_v62, %v10436_v35 }
 0x6c7   : > { %3729 = vrot.lane.b32.xlu0 %v3676_v7, %s6413_s25  ;;  %v3838_v7 = vrot.slane %v3824_v58, %v6744_v12 }
 0x6c8   : > { %v3867_v52 = vrot.slane %v3859_v4, %v6516_v36  ;;  %v3874_v6 = vrot.slane %v3860_v10, %v6516_v36 }
 0x6c9   : > { %3741 = vrot.lane.b32.xlu1 %v3687_v41, %s6418_s30  ;;  %v3840_v41 = vcombine.high %v3806_v32, %v3822_v16  ;;  %v3856_v58 = vcombine.high %v3838_v7, %v10242_v1  ;;  %v3857_v32 = vcombine.high %v3847_v38, %v10242_v1 }
 0x6ca   : > { %v3891_v55 = vcombine.low %v3867_v52, %v3883_v24  ;;  %v3892_v50 = vcombine.high %v3867_v52, %v3883_v24 }
 0x6cb   : > { %3737 = vrot.lane.b32.xlu0 %v3683_v49, %s6414_s26  ;;  %v3876_v49 = vcombine.high %v10435_v26, %v10434_v60  ;;  %v3854_v4 = vrot.slane %v3840_v41, %v6744_v12 }
 0x6cd   : > { %3932 = vrot.lane.b32.xlu1 %v3838_v7, %s6412_s24  ;;  %v3890_v16 = vrot.slane %v3876_v49, %v6516_v36 }
 0x6cf   : > { %3928 = vrot.lane.b32.xlu0 %v3855_v31, %s6415_s27  ;;  %v8196_v31 = vrot.slane %v3891_v55, %v6744_v12  ;;  %v3907_v41 = vcombine.low %v3874_v6, %v3890_v16  ;;  %v3858_v55 = vcombine.high %v3854_v4, %v10242_v1 }
 0x6d1   : > { %3940 = vrot.lane.b32.xlu1 %v3847_v38, %s6413_s25  ;;  %v3923_v7 = vcombine.high %v8196_v31, %v10242_v1  ;;  %v3915_v52 = vrot.slane %v3907_v41, %v6744_v12  ;;  %v3908_v38 = vcombine.high %v3874_v6, %v3890_v16 }
 0x6d3   : > { %3936 = vrot.lane.b32.xlu0 %v3856_v58, %s6416_s28  ;;  %v3906_v58 = vrot.slane %v3892_v50, %v6744_v12  ;;  %v3925_v49 = vcombine.high %v3915_v52, %v10242_v1  ;;  %v3922_v10 = vrot.slane %v3908_v38, %v6744_v12 }
 0x6d5   : > { %3948 = vrot.lane.b32.xlu1 %v3854_v4, %s6414_s26  ;;  %v3924_v24 = vcombine.high %v3906_v58, %v10242_v1  ;;  %v3926_v4 = vcombine.high %v3922_v10, %v10242_v1 }
 0x6d7   : > { %3944 = vrot.lane.b32.xlu0 %v3857_v32, %s6417_s29 }
 0x6d9   : > { %3956 = vrot.lane.b32.xlu1 %v3923_v7, %s6415_s27 }
 0x6db   : > { %3952 = vrot.lane.b32.xlu0 %v3858_v55, %s6418_s30 }
 0x6dd   : > { %3964 = vrot.lane.b32.xlu1 %v3924_v24, %s6416_s28 }
 0x6df   : > { %3960 = vrot.lane.b32.xlu0 %v3906_v58, %s6412_s24 }
 0x6e1   : > { %3972 = vrot.lane.b32.xlu1 %v3925_v49, %s6417_s29 }
 0x6e3   : > { %3968 = vrot.lane.b32.xlu0 %v3915_v52, %s6413_s25  ;;  %v10438_v52 = vld [vmem:[#allocation27_spill] sm:$0xff] }
 0x6e4   : > { %v1633_v38 = vsel %vm438_vm7, %v10438_v52, %v7219_v34 }
 0x6e5   : > { %3980 = vrot.lane.b32.xlu1 %v3926_v4, %s6418_s30 }
 0x6e7   : > { %3976 = vrot.lane.b32.xlu0 %v3922_v10, %s6414_s26  ;;  %v10439_v10 = vld [vmem:[#allocation28_spill] sm:$0xff] }
 0x6e8   : > { %v1640_v4 = vsel %vm438_vm7, %v10439_v10, %v7217_v3 }
 0x6e9   : > { %4003 = vrot.lane.b32.xlu1 %v10437_v62, %s6406_s20  ;;  %v1641_v3 = vsel %vm440_vm8, %v1640_v4, %v7171_v17  ;;  %v10500_v62 = vld [vmem:[#allocation7_spill] sm:$0xff] }
 0x6eb   : > { %4001 = vrot.lane.b32.xlu0 %v10433_v53, %s6406_s20 }
 0x6ed   : > { %4007 = vrot.lane.b32.xlu1 %v10435_v26, %s6406_s20 }
 0x6ef   : > { %4005 = vrot.lane.b32.xlu0 %v10431_v23, %s6406_s20  ;;  %v1634_v23 = vsel %vm440_vm8, %v1633_v38, %v7181_v29 }
 0x6f0   : > { %v1635_v52 = vsel %vm442_vm9, %v1634_v23, %v7239_v27  ;;  %v10443_v23 = vld [vmem:[#allocation29_spill] sm:$0xff] }
 0x6f1   : > { %4011 = vrot.lane.b32.xlu1 %v10436_v35, %s6406_s20  ;;  %v10441_v35 = vld [vmem:[#allocation26_spill] sm:$0xff] }
 0x6f2   : > { %v452_v34 = vsel %vm438_vm7, %v10441_v35, %v7131_v30  ;;  %v10442_v30 = vld [vmem:[#allocation30_spill] sm:$0xff] }
 0x6f3   : > { %4009 = vrot.lane.b32.xlu0 %v10432_v46, %s6406_s20  ;;  %v10440_v46 = vld [vmem:[#allocation25_spill] sm:$0xff]  ;;  %v695_v35 = vsel %vm438_vm7, %v10442_v30, %v7338_v8  ;;  %v453_v17 = vsel %vm440_vm8, %v452_v34, %v10443_v23  ;;  %v10445_v34 = vld [vmem:[#allocation31_spill] sm:$0xff]  ;;  %v10454_v23 = vld [vmem:[#allocation50_spill] sm:$0xff] }
 0x6f5   : > { %4015 = vrot.lane.b32.xlu1 %v10434_v60, %s6406_s20  ;;  %v10489_v60 = vld [vmem:[#allocation81_spill] sm:$0xff] }
 0x6f7   : > { %4013 = vrot.lane.b32.xlu0 %v10430_v15, %s6406_s20  ;;  %v439_v15 = vsel %vm438_vm7, %v10440_v46, %v7121_v21  ;;  %v1642_v46 = vsel %vm442_vm9, %v1641_v3, %v7229_v18  ;;  %v454_v18 = vsel %vm442_vm9, %v453_v17, %v7146_v0 }
 0x6f8   : > { %v441_v21 = vsel %vm440_vm8, %v439_v15, %v7092_v19  ;;  %v1636_v19 = vsel %vm444_vm10, %v1635_v52, %v7196_v39  ;;  %v1643_v15 = vsel %vm444_vm10, %v1642_v46, %v7183_v61  ;;  %v696_v39 = vsel %vm440_vm8, %v695_v35, %v7281_v11  ;;  %v10446_v52 = vld [vmem:[#allocation32_spill] sm:$0xff]  ;;  %v10452_v35 = vld [vmem:[#allocation42_spill] sm:$0xff] }
 0x6f9   : > { %v443_v29 = vsel %vm442_vm9, %v441_v21, %v7133_v43  ;;  %v1637_v43 = vsel %vm446_vm11, %v1636_v19, %v7255_v33  ;;  %v1644_v4 = vsel %vm446_vm11, %v1643_v15, %v7244_v40  ;;  %v697_v61 = vsel %vm442_vm9, %v696_v39, %v7342_v56  ;;  %v10449_v21 = vld [vmem:[#allocation38_spill] sm:$0xff]  ;;  %v10455_v19 = vld [vmem:[#allocation85_spill] sm:$0xff]  ;;  %v10457_v15 = vld [vmem:[#allocation44_spill] sm:$0xff] }
 0x6fa   : > { %v445_v8 = vsel %vm444_vm10, %v443_v29, %v7108_v20  ;;  %v929_v33 = vsel %vm438_vm7, %v7144_v37, %v7354_v59  ;;  %v455_v40 = vsel %vm444_vm10, %v454_v18, %v10445_v34  ;;  %v1638_v11 = vsel %vm448_vm12, %v1637_v43, %v7209_v25  ;;  %v10448_v37 = vld [vmem:[#allocation43_spill] sm:$0xff]  ;;  %v10450_v25 = vld [vmem:[#allocation77_spill] sm:$0xff]  ;;  %v10456_v18 = vld [vmem:[#allocation40_spill] sm:$0xff] }
 0x6fb   : > { %v8309_v0 = vsel %vm446_vm11, %v445_v8, %v7148_v13  ;;  %v688_v13 = vsel %vm438_vm7, %v10446_v52, %v7344_v57  ;;  %v922_v56 = vsel %vm438_vm7, %v7157_v51, %v7360_v2  ;;  %v8330_v3 = vsel %vm446_vm11, %v455_v40, %v7159_v42  ;;  %v10451_v29 = vld [vmem:[#allocation37_spill] sm:$0xff]  ;;  %v10453_v2 = vld [vmem:[#allocation46_spill] sm:$0xff] }
 0x6fc   : > { %10444 = vst [vmem:[#allocation27_spill] sm:$0xff] %v8309_v0  ;;  %10447 = vst [vmem:[#allocation28_spill] sm:$0xff] %v8330_v3  ;;  %v8334_v59 = vsel %vm450_vm13, %v1638_v11, %v10448_v37  ;;  %v1645_v46 = vsel %vm448_vm12, %v1644_v4, %v10449_v21  ;;  %v1163_v30 = vsel %vm438_vm7, %v10451_v29, %v10450_v25  ;;  %v10458_v4 = vld [vmem:[#allocation72_spill] sm:$0xff]  ;;  %v10459_v34 = vld [vmem:[#allocation49_spill] sm:$0xff] }
 0x6fd   : > { %v8345_v51 = vsel %vm450_vm13, %v1645_v46, %v10452_v35  ;;  %v698_v42 = vsel %vm444_vm10, %v697_v61, %v10453_v2  ;;  %v930_v17 = vsel %vm440_vm8, %v929_v33, %v10454_v23  ;;  %v1397_v43 = vsel %vm438_vm7, %v10456_v18, %v10455_v19  ;;  %v10460_v11 = vld [vmem:[#allocation97_spill] sm:$0xff]  ;;  %v10461_v52 = vld [vmem:[#allocation94_spill] sm:$0xff]  ;;  %v10462_v33 = vld [vmem:[#allocation67_spill] sm:$0xff] }
 0x6fe   : > { %v689_v8 = vsel %vm440_vm8, %v688_v13, %v10457_v15  ;;  %v931_v39 = vsel %vm442_vm9, %v930_v17, %v10458_v4  ;;  %v923_v40 = vsel %vm440_vm8, %v922_v56, %v10459_v34  ;;  %v1867_v61 = vsel %vm438_vm7, %v10461_v52, %v10460_v11  ;;  %v10464_v46 = vld [vmem:[#allocation68_spill] sm:$0xff]  ;;  %v10466_v13 = vld [vmem:[#allocation74_spill] sm:$0xff]  ;;  %v10468_v2 = vld [vmem:[#allocation79_spill] sm:$0xff] }
 0x6ff   : > { %v8367_v21 = vsel %vm446_vm11, %v698_v42, %v10462_v33  ;;  %v8371_v25 = vsel %vm442_vm9, %v689_v8, %v10464_v46  ;;  %v924_v29 = vsel %vm442_vm9, %v923_v40, %v10466_v13  ;;  %v10467_v35 = vld [vmem:[#allocation56_spill] sm:$0xff]  ;;  %v10470_v19 = vld [vmem:[#allocation39_spill] sm:$0xff]  ;;  %v10473_v34 = vld [vmem:[#allocation41_spill] sm:$0xff] }
 0x700   : > { %10463 = vst [vmem:[#allocation25_spill] sm:$0xff] %v8367_v21  ;;  %10465 = vst [vmem:[#allocation26_spill] sm:$0xff] %v8371_v25  ;;  %v1164_v56 = vsel %vm440_vm8, %v1163_v30, %v10467_v35  ;;  %v10469_v17 = vld [vmem:[#allocation80_spill] sm:$0xff]  ;;  %v10471_v15 = vld [vmem:[#allocation63_spill] sm:$0xff] }
 0x701   : > { %v1165_v23 = vsel %vm442_vm9, %v1164_v56, %v10468_v2  ;;  %v1156_v18 = vsel %vm438_vm7, %v10470_v19, %v10469_v17  ;;  %v1398_v42 = vsel %vm440_vm8, %v1397_v43, %v10471_v15  ;;  %v10472_v4 = vld [vmem:[#allocation88_spill] sm:$0xff]  ;;  %v10475_v30 = vld [vmem:[#allocation87_spill] sm:$0xff]  ;;  %v10477_v35 = vld [vmem:[#allocation102_spill] sm:$0xff] }
 0x702   : > { %v1390_v8 = vsel %vm438_vm7, %v10473_v34, %v10472_v4  ;;  %v10474_v40 = vld [vmem:[#allocation52_spill] sm:$0xff]  ;;  %v1399_v33 = vsel %vm442_vm9, %v1398_v42, %v10475_v30  ;;  %v10478_v56 = vld [vmem:[#allocation95_spill] sm:$0xff]  ;;  %v10479_v43 = vld [vmem:[#allocation73_spill] sm:$0xff] }
 0x703   : > { %v932_v52 = vsel %vm444_vm10, %v931_v39, %v10474_v40  ;;  %v10476_v46 = vld [vmem:[#allocation96_spill] sm:$0xff]  ;;  %v1874_v2 = vsel %vm438_vm7, %v10478_v56, %v10477_v35  ;;  %v10481_v19 = vld [vmem:[#allocation51_spill] sm:$0xff]  ;;  %v10483_v34 = vld [vmem:[#allocation105_spill] sm:$0xff] }
 0x704   : > { %v1868_v13 = vsel %vm440_vm8, %v1867_v61, %v10476_v46  ;;  %v8400_v17 = vsel %vm446_vm11, %v932_v52, %v10479_v43  ;;  %v8404_v15 = vsel %vm444_vm10, %v924_v29, %v10481_v19  ;;  %v10482_v4 = vld [vmem:[#allocation99_spill] sm:$0xff]  ;;  %v1875_v42 = vsel %vm440_vm8, %v1874_v2, %v10483_v34  ;;  %v10484_v61 = vld [vmem:[#allocation58_spill] sm:$0xff]  ;;  %v10486_v52 = vld [vmem:[#allocation61_spill] sm:$0xff] }
 0x705   : > { %10480 = vst [vmem:[#allocation30_spill] sm:$0xff] %v8400_v17  ;;  %v1869_v39 = vsel %vm442_vm9, %v1868_v13, %v10482_v4  ;;  %v1166_v30 = vsel %vm444_vm10, %v1165_v23, %v10484_v61  ;;  %v10485_v46 = vld [vmem:[#allocation55_spill] sm:$0xff]  ;;  %v1391_v56 = vsel %vm440_vm8, %v1390_v8, %v10486_v52  ;;  %v10487_v43 = vld [vmem:[#allocation113_spill] sm:$0xff]  ;;  %v10488_v29 = vld [vmem:[#allocation110_spill] sm:$0xff] }
 0x706   : > { %v1157_v35 = vsel %vm440_vm8, %v1156_v18, %v10485_v46  ;;  %v2101_v19 = vsel %vm438_vm7, %v10488_v29, %v10487_v43  ;;  %v8423_v13 = vsel %vm446_vm11, %v1166_v30, %v10489_v60  ;;  %v10490_v2 = vld [vmem:[#allocation82_spill] sm:$0xff]  ;;  %v10491_v34 = vld [vmem:[#allocation65_spill] sm:$0xff]  ;;  %v10494_v60 = vld [vmem:[#allocation104_spill] sm:$0xff] }
 0x707   : > { %v8427_v4 = vsel %vm442_vm9, %v1157_v35, %v10490_v2  ;;  %v8431_v23 = vsel %vm444_vm10, %v1399_v33, %v10491_v34  ;;  %v10492_v18 = vld [vmem:[#allocation90_spill] sm:$0xff]  ;;  %v1876_v30 = vsel %vm442_vm9, %v1875_v42, %v10494_v60  ;;  %v10496_v35 = vld [vmem:[#allocation111_spill] sm:$0xff]  ;;  %v2335_v33 = vsel %vm438_vm7, %v7595_v47, %v7650_v14  ;;  %v10497_v2 = vld [vmem:[#allocation112_spill] sm:$0xff] }
 0x708   : > { %v8435_v61 = vsel %vm442_vm9, %v1391_v56, %v10492_v18  ;;  %v10493_v46 = vld [vmem:[#allocation98_spill] sm:$0xff]  ;;  %v2102_v56 = vsel %vm440_vm8, %v2101_v19, %v10497_v2  ;;  %v10498_v34 = vld [vmem:[#allocation121_spill] sm:$0xff]  ;;  %v10501_v42 = vld [vmem:[#allocation139_spill] sm:$0xff] }
 0x709   : > { %v8441_v52 = vsel %vm444_vm10, %v1869_v39, %v10493_v46  ;;  %v10495_v43 = vld [vmem:[#allocation118_spill] sm:$0xff]  ;;  %v2569_v60 = vsel %vm438_vm7, %v10501_v42, %v10500_v62  ;;  %v10503_v47 = vld [vmem:[#allocation115_spill] sm:$0xff]  ;;  %v10505_v2 = vld [vmem:[#allocation144_spill] sm:$0xff] }
 0x70a   : > { %v2108_v29 = vsel %vm438_vm7, %v10496_v35, %v10495_v43  ;;  %v10499_v39 = vld [vmem:[#allocation126_spill] sm:$0xff]  ;;  %v10502_v43 = vld [vmem:[#allocation107_spill] sm:$0xff]  ;;  %v8467_v14 = vsel %vm442_vm9, %v2102_v56, %v10503_v47  ;;  %v10509_v21 = vld [vmem:[#allocation153_spill] sm:$0xff] }
 0x70b   : > { %v2109_v18 = vsel %vm440_vm8, %v2108_v29, %v10498_v34  ;;  %v2342_v46 = vsel %vm438_vm7, %v10499_v39, %v7660_v63  ;;  %v8463_v35 = vsel %vm444_vm10, %v1876_v30, %v10502_v43  ;;  %v10504_v19 = vld [vmem:[#allocation134_spill] sm:$0xff]  ;;  %v10506_v34 = vld [vmem:[#allocation140_spill] sm:$0xff]  ;;  %v10507_v39 = vld [vmem:[#allocation127_spill] sm:$0xff] }
 0x70c   : > { %v2343_v29 = vsel %vm440_vm8, %v2342_v46, %v10504_v19  ;;  %v2576_v63 = vsel %vm438_vm7, %v10506_v34, %v10505_v2  ;;  %v2336_v0 = vsel %vm440_vm8, %v2335_v33, %v10507_v39  ;;  %v10508_v62 = vld [vmem:[#allocation147_spill] sm:$0xff]  ;;  %v10510_v30 = vld [vmem:[#allocation4_spill] sm:$0xff]  ;;  %v10511_v3 = vld [vmem:[#allocation158_spill] sm:$0xff] }
 0x70d   : > { %v2577_v42 = vsel %vm440_vm8, %v2576_v63, %v10508_v62  ;;  %v2808_v43 = vsel %vm438_vm7, %v10510_v30, %v10509_v21  ;;  %v10512_v56 = vld [vmem:[#allocation8_spill] sm:$0xff]  ;;  %v10514_v2 = vld [vmem:[#allocation129_spill] sm:$0xff]  ;;  %v10515_v34 = vld [vmem:[#allocation6_spill] sm:$0xff] }
 0x70e   : > { %v2815_v47 = vsel %vm438_vm7, %v10512_v56, %v10511_v3  ;;  %v10513_v46 = vld [vmem:[#allocation120_spill] sm:$0xff]  ;;  %v8492_v33 = vsel %vm442_vm9, %v2336_v0, %v10514_v2  ;;  %v2570_v63 = vsel %vm440_vm8, %v2569_v60, %v10515_v34  ;;  %v10516_v39 = vld [vmem:[#allocation161_spill] sm:$0xff]  ;;  %v10521_v0 = vld [vmem:[#allocation174_spill] sm:$0xff] }
 0x70f   : > { %v8488_v19 = vsel %vm442_vm9, %v2109_v18, %v10513_v46  ;;  %v2816_v21 = vsel %vm440_vm8, %v2815_v47, %v10516_v39  ;;  %v10517_v62 = vld [vmem:[#allocation133_spill] sm:$0xff]  ;;  %v10520_v46 = vld [vmem:[#allocation166_spill] sm:$0xff]  ;;  %v10522_v2 = vld [vmem:[#allocation167_spill] sm:$0xff] }
 0x710   : > { %v8500_v30 = vsel %vm442_vm9, %v2343_v29, %v10517_v62  ;;  %v10518_v3 = vld [vmem:[#allocation141_spill] sm:$0xff]  ;;  %v3049_v25 = vsel %vm438_vm7, %v10522_v2, %v10521_v0  ;;  %v10523_v34 = vld [vmem:[#allocation146_spill] sm:$0xff]  ;;  %v10524_v39 = vld [vmem:[#allocation152_spill] sm:$0xff] }
 0x711   : > { %v8504_v56 = vsel %vm442_vm9, %v2570_v63, %v10518_v3  ;;  %v10519_v18 = vld [vmem:[#allocation169_spill] sm:$0xff]  ;;  %v8514_v47 = vsel %vm442_vm9, %v2577_v42, %v10523_v34  ;;  %v2809_v29 = vsel %vm440_vm8, %v2808_v43, %v10524_v39  ;;  %v10527_v0 = vld [vmem:[#allocation160_spill] sm:$0xff] }
 0x712   : > { %v3042_v17 = vsel %vm438_vm7, %v10520_v46, %v10519_v18  ;;  %v10525_v62 = vld [vmem:[#allocation177_spill] sm:$0xff]  ;;  %v10526_v18 = vld [vmem:[#allocation155_spill] sm:$0xff]  ;;  %v2817_v2 = vsel %vm442_vm9, %v2816_v21, %v10527_v0 }
 0x713   : > { %v3050_v63 = vsel %vm440_vm8, %v3049_v25, %v10525_v62  ;;  %v8525_v46 = vsel %vm442_vm9, %v2809_v29, %v10526_v18  ;;  %v10528_v25 = vld [vmem:[#allocation168_spill] sm:$0xff]  ;;  %v10529_v29 = vld [vmem:[#allocation171_spill] sm:$0xff]  ;;  %v3510_v18 = vsel %vm438_vm7, %v8035_v28, %v8090_v5  ;;  %v10535_v28 = vld [vmem:[#allocation193_spill] sm:$0xff] }
 0x714   : > { %v3043_v39 = vsel %vm440_vm8, %v3042_v17, %v10528_v25 }
 0x715   : > { %v3044_v62 = vsel %vm442_vm9, %v3043_v39, %v10529_v29  ;;  %v10536_v39 = vld [vmem:[#allocation184_spill] sm:$0xff] }
 0x723   : > { %v8236_v6 = vpop.permute.xlu1 %3693 }
 0x725   : > { %v8238_v50 = vpop.permute.xlu0 %3689 }
 0x727   : > { %v8240_v16 = vpop.permute.xlu1 %3701 }
 0x729   : > { %v8242_v32 = vpop.permute.xlu0 %3697 }
 0x72b   : > { %v8244_v7 = vpop.permute.xlu1 %3709 }
 0x72d   : > { %v8246_v58 = vpop.permute.xlu0 %3705 }
 0x72f   : > { %v8248_v41 = vpop.permute.xlu1 %3717 }
 0x730   : > { %v3751_v42 = vsel %vm438_vm7, %v8137_v48, %v8248_v41  ;;  %v10530_v48 = vld [vmem:[#allocation176_spill] sm:$0xff] }
 0x731   : > { %v8250_v55 = vpop.permute.xlu0 %3713  ;;  %v3051_v41 = vsel %vm442_vm9, %v3050_v63, %v10530_v48  ;;  %v10539_v48 = vld [vmem:[#allocation187_spill] sm:$0xff] }
 0x733   : > { %v8252_v24 = vpop.permute.xlu1 %3725 }
 0x735   : > { %v8257_v49 = vpop.permute.xlu0 %3721 }
 0x737   : > { %v8265_v53 = vpop.permute.xlu1 %3733 }
 0x739   : > { %v8276_v10 = vpop.permute.xlu0 %3729 }
 0x73b   : > { %v8287_v27 = vpop.permute.xlu1 %3741 }
 0x73d   : > { %v8299_v38 = vpop.permute.xlu0 %3737 }
 0x73f   : > { %v8316_v20 = vpop.permute.xlu1 %3932 }
 0x741   : > { %v8341_v57 = vpop.permute.xlu0 %3928 }
 0x742   : > { %v3983_v3 = vsel %vm438_vm7, %v8173_v22, %v8341_v57  ;;  %v3744_v22 = vsel %vm438_vm7, %v8123_v44, %v8238_v50  ;;  %v3752_v57 = vsel %vm440_vm8, %v3751_v42, %v8257_v49  ;;  %v10531_v44 = vld [vmem:[#allocation185_spill] sm:$0xff]  ;;  %v10532_v50 = vld [vmem:[#allocation182_spill] sm:$0xff] }
 0x743   : > { %v8363_v37 = vpop.permute.xlu1 %3940  ;;  %v3276_v49 = vsel %vm438_vm7, %v10532_v50, %v10531_v44  ;;  %v10533_v42 = vld [vmem:[#allocation190_spill] sm:$0xff] }
 0x745   : > { %v8387_v11 = vpop.permute.xlu0 %3936 }
 0x747   : > { %v8410_v40 = vpop.permute.xlu1 %3948 }
 0x749   : > { %v8437_v8 = vpop.permute.xlu0 %3944 }
 0x74b   : > { %v3957_v26 = vpop.permute.xlu1 %3956 }
 0x74c   : > { %v3990_v43 = vsel %vm438_vm7, %v8196_v31, %v3957_v26  ;;  %v3517_v26 = vsel %vm438_vm7, %v8049_v45, %v8100_v54  ;;  %v3984_v31 = vsel %vm440_vm8, %v3983_v3, %v8316_v20  ;;  %v10534_v45 = vld [vmem:[#allocation183_spill] sm:$0xff]  ;;  %v3745_v20 = vsel %vm440_vm8, %v3744_v22, %v8236_v6  ;;  %v10537_v22 = vld [vmem:[#allocation198_spill] sm:$0xff] }
 0x74d   : > { %v8484_v1 = vpop.permute.xlu0 %3952  ;;  %v3518_v0 = vsel %vm440_vm8, %v3517_v26, %v8106_v9  ;;  %v3985_v63 = vsel %vm442_vm9, %v3984_v31, %v8387_v11  ;;  %v3283_v54 = vsel %vm438_vm7, %v10534_v45, %v10533_v42  ;;  %v3753_v3 = vsel %vm442_vm9, %v3752_v57, %v8252_v24  ;;  %v10538_v57 = vld [vmem:[#allocation204_spill] sm:$0xff]  ;;  %v10541_v31 = vld [vmem:[#allocation206_spill] sm:$0xff]  ;;  %v10543_v45 = vld [vmem:[#allocation195_spill] sm:$0xff] }
 0x74e   : > { %v3284_v5 = vsel %vm440_vm8, %v3283_v54, %v10535_v28  ;;  %v3746_v9 = vsel %vm442_vm9, %v3745_v20, %v8242_v32  ;;  %v3754_v11 = vsel %vm444_vm10, %v3753_v3, %v8276_v10  ;;  %v3277_v6 = vsel %vm440_vm8, %v3276_v49, %v10536_v39  ;;  %v10540_v26 = vld [vmem:[#allocation200_spill] sm:$0xff] }
 0x74f   : > { %v3965_v60 = vpop.permute.xlu1 %3964  ;;  %v3511_v24 = vsel %vm440_vm8, %v3510_v18, %v10537_v22  ;;  %v3278_v32 = vsel %vm442_vm9, %v3277_v6, %v10539_v48  ;;  %v10542_v49 = vld [vmem:[#allocation192_spill] sm:$0xff]  ;;  %v10550_v22 = vld [vmem:[#allocation186_spill] sm:$0xff] }
 0x750   : > { %v3512_v10 = vsel %vm442_vm9, %v3511_v24, %v10540_v26  ;;  %v3285_v18 = vsel %vm442_vm9, %v3284_v5, %v10542_v49  ;;  %v3279_v24 = vsel %vm444_vm10, %v3278_v32, %v10550_v22  ;;  %v10554_v32 = vld [vmem:[#allocation197_spill] sm:$0xff] }
 0x751   : > { %v3961_v34 = vpop.permute.xlu0 %3960  ;;  %v3286_v54 = vsel %vm444_vm10, %v3285_v18, %v10543_v45  ;;  %v10557_v49 = vld [vmem:[#allocation201_spill] sm:$0xff] }
 0x752   : > { %v3991_v21 = vsel %vm440_vm8, %v3990_v43, %v3961_v34  ;;  %v10562_v45 = vld [vmem:[#allocation181_spill] sm:$0xff] }
 0x753   : > { %v3973_v17 = vpop.permute.xlu1 %3972  ;;  %v3992_v43 = vsel %vm442_vm9, %v3991_v21, %v3965_v60  ;;  %v3519_v60 = vsel %vm442_vm9, %v3518_v0, %v10538_v57  ;;  %v3986_v21 = vsel %vm444_vm10, %v3985_v63, %v8363_v37  ;;  %v3747_v0 = vsel %vm444_vm10, %v3746_v9, %v8240_v16  ;;  %v10547_v9 = vld [vmem:[#allocation179_spill] sm:$0xff]  ;;  %v10551_v57 = vld [vmem:[#allocation194_spill] sm:$0xff] }
 0x754   : > { %v3520_v44 = vsel %vm444_vm10, %v3519_v60, %v10541_v31  ;;  %v3987_v50 = vsel %vm446_vm11, %v3986_v21, %v8437_v8  ;;  %v3755_v37 = vsel %vm446_vm11, %v3754_v11, %v8265_v53  ;;  %v3748_v20 = vsel %vm446_vm11, %v3747_v0, %v8246_v58  ;;  %v10548_v11 = vld [vmem:[#allocation202_spill] sm:$0xff]  ;;  %v10559_v0 = vld [vmem:[#allocation207_spill] sm:$0xff] }
 0x755   : > { %v3969_v34 = vpop.permute.xlu0 %3968  ;;  %v3756_v8 = vsel %vm448_vm12, %v3755_v37, %v8299_v38  ;;  %v3988_v5 = vsel %vm448_vm12, %v3987_v50, %v8410_v40  ;;  %v3052_v58 = vsel %vm444_vm10, %v3051_v41, %v10547_v9  ;;  %v3287_v40 = vsel %vm446_vm11, %v3286_v54, %v10551_v57  ;;  %v10556_v50 = vld [vmem:[#allocation178_spill] sm:$0xff] }
 0x756   : > { %v3993_v25 = vsel %vm444_vm10, %v3992_v43, %v3969_v34  ;;  %v10544_v43 = vld [vmem:[#allocation199_spill] sm:$0xff]  ;;  %v10545_v34 = vld [vmem:[#allocation205_spill] sm:$0xff]  ;;  %v3989_v6 = vsel %vm450_vm13, %v3988_v5, %v8484_v1  ;;  %v3749_v41 = vsel %vm448_vm12, %v3748_v20, %v8244_v7  ;;  %v3757_v21 = vsel %vm450_vm13, %v3756_v8, %v8287_v27  ;;  %v10555_v7 = vld [vmem:[#allocation170_spill] sm:$0xff] }
 0x757   : > { %v3981_v29 = vpop.permute.xlu1 %3980  ;;  %v3994_v63 = vsel %vm446_vm11, %v3993_v25, %v3973_v17  ;;  %v3513_v16 = vsel %vm444_vm10, %v3512_v10, %v10544_v43  ;;  %v3521_v53 = vsel %vm446_vm11, %v3520_v44, %v10545_v34  ;;  %v10549_v25 = vld [vmem:[#allocation208_spill] sm:$0xff]  ;;  %v10553_v1 = vld [vmem:[#allocation189_spill] sm:$0xff]  ;;  %v3288_v10 = vsel %vm448_vm12, %v3287_v40, %v10554_v32  ;;  %v10563_v20 = vld [vmem:[#allocation203_spill] sm:$0xff] }
 0x758   : > { %v3514_v38 = vsel %vm446_vm11, %v3513_v16, %v10548_v11  ;;  %v3522_v39 = vsel %vm448_vm12, %v3521_v53, %v10549_v25  ;;  %v3280_v26 = vsel %vm446_vm11, %v3279_v24, %v10553_v1  ;;  %v3750_v31 = vsel %vm450_vm13, %v3749_v41, %v8250_v55  ;;  %v10565_v16 = vld [vmem:[#allocation162_spill] sm:$0xff]  ;;  %v10566_v53 = vld [vmem:[#allocation188_spill] sm:$0xff]  ;;  %v10570_v25 = vld [vmem:[#allocation165_spill] sm:$0xff] }
 0x759   : > { %v3977_v42 = vpop.permute.xlu0 %3976  ;;  %v3045_v44 = vsel %vm444_vm10, %v3044_v62, %v10555_v7  ;;  %v3053_v27 = vsel %vm446_vm11, %v3052_v58, %v10556_v50  ;;  %v3523_v37 = vsel %vm450_vm13, %v3522_v39, %v10559_v0  ;;  %v10567_v5 = vld [vmem:[#allocation196_spill] sm:$0xff]  ;;  %v10572_v24 = vld [vmem:[#allocation5_spill] sm:$0xff]  ;;  %v10576_v1 = vld [vmem:[#allocation123_spill] sm:$0xff] }
 0x75a   : > { %v3995_v3 = vsel %vm448_vm12, %v3994_v63, %v3977_v42  ;;  %v10560_v63 = vld [vmem:[#allocation149_spill] sm:$0xff]  ;;  %v3054_v54 = vsel %vm448_vm12, %v3053_v27, %v10562_v45  ;;  %v3289_v9 = vsel %vm450_vm13, %v3288_v10, %v10567_v5  ;;  %v10568_v58 = vld [vmem:[#allocation136_spill] sm:$0xff]  ;;  %v2572_v57 = vsel %vm444_vm10, %v8504_v56, %v10572_v24  ;;  %v10577_v32 = vld [vmem:[#allocation143_spill] sm:$0xff] }
 0x75b   : > { %v8610_v28 = vpop.permute.xlu1 %4003  ;;  %v3996_v17 = vsel %vm450_vm13, %v3995_v3, %v3981_v29  ;;  %v10552_v29 = vld [vmem:[#allocation163_spill] sm:$0xff]  ;;  %v2579_v55 = vsel %vm444_vm10, %v8514_v47, %v10560_v63  ;;  %v10561_v42 = vld [vmem:[#allocation173_spill] sm:$0xff]  ;;  %v10564_v3 = vld [vmem:[#allocation154_spill] sm:$0xff]  ;;  %v3281_v47 = vsel %vm448_vm12, %v3280_v26, %v10566_v53  ;;  %v2345_v11 = vsel %vm444_vm10, %v8500_v30, %v10568_v58 }
 0x75c   : > { %10546 = vst [vmem:[#allocation29_spill] sm:$0xff] %v8610_v28  ;;  %6315 = vmatprep.subr.msk.mxu0 %vm459_vm6, %v3996_v17  ;;  %v2818_v48 = vsel %vm444_vm10, %v2817_v2, %v10552_v29  ;;  %v3515_v2 = vsel %vm448_vm12, %v3514_v38, %v10557_v49  ;;  %v3046_v62 = vsel %vm446_vm11, %v3045_v44, %v10561_v42  ;;  %v10569_v38 = vld [vmem:[#allocation157_spill] sm:$0xff]  ;;  %v10573_v40 = vld [vmem:[#allocation148_spill] sm:$0xff]  ;;  %v10579_v7 = vld [vmem:[#allocation175_spill] sm:$0xff] }
 0x75d   : > { %6316 = vmatpush1.msk.msra.mxu0 %vm459_vm6, %v3989_v6  ;;  %v8631_v60 = vpop.permute.xlu0 %4001  ;;  %v3516_v8 = vsel %vm450_vm13, %v3515_v2, %v10563_v20  ;;  %v2811_v43 = vsel %vm444_vm10, %v8525_v46, %v10564_v3  ;;  %v2819_v34 = vsel %vm446_vm11, %v2818_v48, %v10565_v16  ;;  %v10571_v6 = vld [vmem:[#allocation191_spill] sm:$0xff]  ;;  %v2580_v41 = vsel %vm446_vm11, %v2579_v55, %v10573_v40  ;;  %v10575_v29 = vld [vmem:[#allocation180_spill] sm:$0xff]  ;;  %v10589_v16 = vld [vmem:[#allocation114_spill] sm:$0xff] }
 0x75e   : > { %6317 = vmatprep.subr.msk.mxu0 %vm459_vm6, %v3757_v21  ;;  %v2812_v46 = vsel %vm446_vm11, %v2811_v43, %v10569_v38  ;;  %v2820_v39 = vsel %vm448_vm12, %v2819_v34, %v10570_v25  ;;  %v3282_v22 = vsel %vm450_vm13, %v3281_v47, %v10571_v6  ;;  %v10574_v21 = vld [vmem:[#allocation172_spill] sm:$0xff]  ;;  %v3055_v48 = vsel %vm450_vm13, %v3054_v54, %v10575_v29  ;;  %v10582_v2 = vld [vmem:[#allocation135_spill] sm:$0xff]  ;;  %v10590_v53 = vld [vmem:[#allocation122_spill] sm:$0xff] }
 0x75f   : > { %v8650_v18 = vpop.permute.xlu1 %4007  ;;  %6318 = vmatpush1.msk.msra.mxu0 %vm459_vm6, %v3750_v31  ;;  %v3047_v30 = vsel %vm448_vm12, %v3046_v62, %v10574_v21  ;;  %v2111_v26 = vsel %vm444_vm10, %v8488_v19, %v10576_v1  ;;  %v2573_v10 = vsel %vm446_vm11, %v2572_v57, %v10577_v32  ;;  %v10578_v31 = vld [vmem:[#allocation151_spill] sm:$0xff]  ;;  %v10581_v27 = vld [vmem:[#allocation128_spill] sm:$0xff]  ;;  %v2346_v19 = vsel %vm446_vm11, %v2345_v11, %v10582_v2  ;;  %v10585_v62 = vld [vmem:[#allocation101_spill] sm:$0xff] }
 0x760   : > { %10558 = vst [vmem:[#allocation31_spill] sm:$0xff] %v8650_v18  ;;  %6319 = vmatprep.subr.msk.mxu0 %vm459_vm6, %v3523_v37  ;;  %v2581_v56 = vsel %vm448_vm12, %v2580_v41, %v10578_v31  ;;  %v3048_v44 = vsel %vm450_vm13, %v3047_v30, %v10579_v7  ;;  %v2338_v49 = vsel %vm444_vm10, %v8492_v33, %v10581_v27  ;;  %v10583_v0 = vld [vmem:[#allocation156_spill] sm:$0xff]  ;;  %v10586_v54 = vld [vmem:[#allocation131_spill] sm:$0xff]  ;;  %v10587_v33 = vld [vmem:[#allocation138_spill] sm:$0xff] }
 0x761   : > { %6320 = vmatpush1.msk.msra.mxu0 %vm459_vm6, %v3516_v8  ;;  %v8673_v17 = vpop.permute.xlu0 %4005  ;;  %v2813_v37 = vsel %vm448_vm12, %v2812_v46, %v10583_v0  ;;  %v10584_v55 = vld [vmem:[#allocation164_spill] sm:$0xff]  ;;  %v1871_v45 = vsel %vm446_vm11, %v8441_v52, %v10585_v62  ;;  %v2339_v20 = vsel %vm446_vm11, %v2338_v49, %v10586_v54  ;;  %v2347_v8 = vsel %vm448_vm12, %v2346_v19, %v10587_v33  ;;  %v10588_v3 = vld [vmem:[#allocation159_spill] sm:$0xff]  ;;  %v10591_v5 = vld [vmem:[#allocation142_spill] sm:$0xff] }
 0x762   : > { %6321 = vmatprep.subr.msk.mxu0 %vm459_vm6, %v3289_v9  ;;  %v2821_v42 = vsel %vm450_vm13, %v2820_v39, %v10584_v55  ;;  %v2814_v43 = vsel %vm450_vm13, %v2813_v37, %v10588_v3  ;;  %v2104_v34 = vsel %vm444_vm10, %v8467_v14, %v10589_v16  ;;  %v2112_v47 = vsel %vm446_vm11, %v2111_v26, %v10590_v53  ;;  %v10592_v9 = vld [vmem:[#allocation150_spill] sm:$0xff]  ;;  %v10594_v46 = vld [vmem:[#allocation117_spill] sm:$0xff]  ;;  %v10601_v26 = vld [vmem:[#allocation132_spill] sm:$0xff] }
 0x763   : > { %6322 = vmatpush1.msk.msra.mxu0 %vm459_vm6, %v3282_v22  ;;  %v8706_v50 = vpop.permute.xlu1 %4011  ;;  %v2574_v52 = vsel %vm448_vm12, %v2573_v10, %v10591_v5  ;;  %v2582_v58 = vsel %vm450_vm13, %v2581_v56, %v10592_v9  ;;  %v10593_v11 = vld [vmem:[#allocation106_spill] sm:$0xff]  ;;  %v2105_v25 = vsel %vm446_vm11, %v2104_v34, %v10594_v46  ;;  %v10595_v39 = vld [vmem:[#allocation125_spill] sm:$0xff]  ;;  %v10603_v27 = vld [vmem:[#allocation116_spill] sm:$0xff] }
 0x764   : > { %10580 = vst [vmem:[#allocation32_spill] sm:$0xff] %v8706_v50  ;;  %6323 = vmatprep.subr.msk.mxu0 %vm459_vm6, %v3055_v48  ;;  %v1878_v38 = vsel %vm446_vm11, %v8463_v35, %v10593_v11  ;;  %v2113_v14 = vsel %vm448_vm12, %v2112_v47, %v10595_v39  ;;  %v10596_v6 = vld [vmem:[#allocation145_spill] sm:$0xff]  ;;  %v10598_v40 = vld [vmem:[#allocation130_spill] sm:$0xff]  ;;  %v2106_v49 = vsel %vm448_vm12, %v2105_v25, %v10603_v27  ;;  %v10604_v2 = vld [vmem:[#allocation124_spill] sm:$0xff] }
 0x765   : > { %6324 = vmatpush1.msk.msra.mxu0 %vm459_vm6, %v3048_v44  ;;  %v4010_v63 = vpop.permute.xlu0 %4009  ;;  %v2575_v22 = vsel %vm450_vm13, %v2574_v52, %v10596_v6  ;;  %v10597_v24 = vld [vmem:[#allocation109_spill] sm:$0xff]  ;;  %v2340_v41 = vsel %vm448_vm12, %v2339_v20, %v10598_v40  ;;  %v10602_v7 = vld [vmem:[#allocation62_spill] sm:$0xff]  ;;  %v2114_v19 = vsel %vm450_vm13, %v2113_v14, %v10604_v2  ;;  %v10605_v0 = vld [vmem:[#allocation91_spill] sm:$0xff]  ;;  %v4093_v5 = vcombine.low %v8610_v28, %v8706_v50 }
 0x766   : > { %6325 = vmatprep.subr.msk.mxu0 %vm459_vm6, %v2821_v42  ;;  %v1879_v57 = vsel %vm448_vm12, %v1878_v38, %v10597_v24  ;;  %v4025_v21 = vcombine.low %v8631_v60, %v4010_v63  ;;  %v10599_v30 = vld [vmem:[#allocation137_spill] sm:$0xff]  ;;  %v2341_v32 = vsel %vm450_vm13, %v2340_v41, %v10601_v26  ;;  %v1393_v44 = vsel %vm444_vm10, %v8435_v61, %v10602_v7  ;;  %v10607_v42 = vld [vmem:[#allocation119_spill] sm:$0xff]  ;;  %v10608_v61 = vld [vmem:[#allocation108_spill] sm:$0xff] }
 0x767   : > { %6326 = vmatpush1.msk.msra.mxu0 %vm459_vm6, %v2814_v43  ;;  %v2348_v29 = vsel %vm450_vm13, %v2347_v8, %v10599_v30  ;;  %v10600_v48 = vld [vmem:[#allocation89_spill] sm:$0xff]  ;;  %v8762_v10 = vpop.permute.xlu1 %4015  ;;  %v1394_v37 = vsel %vm446_vm11, %v1393_v44, %v10605_v0  ;;  %v2107_v62 = vsel %vm450_vm13, %v2106_v49, %v10607_v42  ;;  %v1880_v54 = vsel %vm450_vm13, %v1879_v57, %v10608_v61  ;;  %v10611_v16 = vld [vmem:[#allocation66_spill] sm:$0xff]  ;;  %v10612_v53 = vld [vmem:[#allocation103_spill] sm:$0xff] }
 0x768   : > { %6327 = vmatprep.subr.msk.mxu0 %vm459_vm6, %v2582_v58  ;;  %v1401_v1 = vsel %vm446_vm11, %v8431_v23, %v10600_v48  ;;  %v4026_v23 = vcombine.high %v8631_v60, %v4010_v63  ;;  %v4033_v60 = vrot.slane %v4025_v21, %v6516_v36  ;;  %v4109_v63 = vcombine.low %v8650_v18, %v8762_v10  ;;  %v10610_v3 = vld [vmem:[#allocation57_spill] sm:$0xff]  ;;  %v10614_v11 = vld [vmem:[#allocation84_spill] sm:$0xff]  ;;  %v10619_v40 = vld [vmem:[#allocation26_spill] sm:$0xff] }
 0x769   : > { %6328 = vmatpush1.msk.msra.mxu0 %vm459_vm6, %v2575_v22  ;;  %v4014_v35 = vpop.permute.xlu0 %4013  ;;  %v1159_v43 = vsel %vm444_vm10, %v8427_v4, %v10610_v3  ;;  %v1402_v34 = vsel %vm448_vm12, %v1401_v1, %v10611_v16  ;;  %v10615_v46 = vld [vmem:[#allocation92_spill] sm:$0xff]  ;;  %v10618_v57 = vld [vmem:[#allocation45_spill] sm:$0xff]  ;;  %v10620_v21 = vld [vmem:[#allocation54_spill] sm:$0xff] }
 0x76a   : > { %v4041_v31 = vcombine.low %v8673_v17, %v4014_v35  ;;  %v4042_v56 = vcombine.high %v8673_v17, %v4014_v35  ;;  %6329 = vmatprep.subr.msk.mxu0 %vm459_vm6, %v2348_v29  ;;  %v10606_v17 = vld [vmem:[#allocation100_spill] sm:$0xff]  ;;  %v4040_v52 = vrot.slane %v4026_v23, %v6516_v36  ;;  %v1160_v38 = vsel %vm446_vm11, %v1159_v43, %v10614_v11  ;;  %v10621_v35 = vld [vmem:[#allocation30_spill] sm:$0xff]  ;;  %v10623_v48 = vld [vmem:[#allocation93_spill] sm:$0xff] }
 0x76b   : > { %6330 = vmatpush1.msk.msra.mxu0 %vm459_vm6, %v2341_v32  ;;  %v1872_v55 = vsel %vm448_vm12, %v1871_v45, %v10606_v17  ;;  %v10609_v45 = vld [vmem:[#allocation76_spill] sm:$0xff]  ;;  %v1403_v25 = vsel %vm450_vm13, %v1402_v34, %v10615_v46  ;;  %v4117_v6 = vrot.slane %v4109_v63, %v6516_v36  ;;  %v691_v41 = vsel %vm444_vm10, %v10619_v40, %v10618_v57  ;;  %v10626_v7 = vld [vmem:[#allocation70_spill] sm:$0xff]  ;;  %v10627_v27 = vld [vmem:[#allocation75_spill] sm:$0xff] }
 0x76c   : > { %6331 = vmatprep.subr.msk.mxu0 %vm459_vm6, %v2114_v19  ;;  %v4049_v20 = vrot.slane %v4041_v31, %v6516_v36  ;;  %v4056_v33 = vrot.slane %v4042_v56, %v6516_v36  ;;  %v926_v8 = vsel %vm446_vm11, %v8404_v15, %v10609_v45  ;;  %v1873_v47 = vsel %vm450_vm13, %v1872_v55, %v10612_v53  ;;  %v10613_v15 = vld [vmem:[#allocation60_spill] sm:$0xff]  ;;  %v10628_v23 = vld [vmem:[#allocation53_spill] sm:$0xff]  ;;  %v10629_v19 = vld [vmem:[#allocation86_spill] sm:$0xff] }
 0x76d   : > { %6332 = vmatpush1.msk.msra.mxu0 %vm459_vm6, %v2107_v62  ;;  %v1168_v4 = vsel %vm448_vm12, %v8423_v13, %v10613_v15  ;;  %v10616_v39 = vld [vmem:[#allocation64_spill] sm:$0xff]  ;;  %v934_v30 = vsel %vm448_vm12, %v10621_v35, %v10620_v21  ;;  %v4101_v32 = vrot.slane %v4093_v5, %v6516_v36  ;;  %v10625_v31 = vmov 0.0   ;;  %v10630_v42 = vld [vmem:[#allocation33_spill] sm:$0xff]  ;;  %v10636_v3 = vld [vmem:[#allocation47_spill] sm:$0xff] }
 0x76e   : > { %6333 = vmatprep.subr.msk.mxu0 %vm459_vm6, %v1880_v54  ;;  %v4057_v9 = vcombine.low %v4033_v60, %v4049_v20  ;;  %v4058_v58 = vcombine.high %v4033_v60, %v4049_v20  ;;  %v1395_v14 = vsel %vm448_vm12, %v1394_v37, %v10616_v39  ;;  %v4073_v22 = vcombine.low %v4040_v52, %v4056_v33  ;;  %v10631_v62 = vld [vmem:[#allocation28_spill] sm:$0xff]  ;;  %v10633_v60 = vld [vmem:[#allocation25_spill] sm:$0xff]  ;;  %v10634_v20 = vld [vmem:[#allocation78_spill] sm:$0xff] }
 0x76f   : > { %6334 = vmatpush1.msk.msra.mxu0 %vm459_vm6, %v1873_v47  ;;  %v1396_v1 = vsel %vm450_vm13, %v1395_v14, %v10623_v48  ;;  %v692_v44 = vsel %vm446_vm11, %v691_v41, %v10626_v7  ;;  %v935_v49 = vsel %vm450_vm13, %v934_v30, %v10627_v27  ;;  %v927_v2 = vsel %vm448_vm12, %v926_v8, %v10628_v23  ;;  %v10632_v54 = vld [vmem:[#allocation48_spill] sm:$0xff]  ;;  %v10637_v34 = vld [vmem:[#allocation34_spill] sm:$0xff]  ;;  %v10638_v53 = vld [vmem:[#allocation27_spill] sm:$0xff] }
 0x770   : > { %6335 = vmatprep.subr.msk.mxu0 %vm459_vm6, %v8345_v51  ;;  %v4072_v13 = vrot.slane %v4058_v58, %v6744_v12  ;;  %v8822_v24 = vrot.slane %v4057_v9, %v6744_v12  ;;  %v10622_v51 = vld [vmem:[#allocation83_spill] sm:$0xff]  ;;  %v4125_v37 = vcombine.low %v4101_v32, %v4117_v6  ;;  %v4074_v17 = vcombine.high %v4040_v52, %v4056_v33  ;;  %v10635_v33 = vld [vmem:[#allocation69_spill] sm:$0xff]  ;;  %v10639_v5 = vld [vmem:[#allocation36_spill] sm:$0xff] }
 0x771   : > { %6336 = vmatpush1.msk.msra.mxu0 %vm459_vm6, %v8334_v59  ;;  %v1169_v29 = vsel %vm450_vm13, %v1168_v4, %v10622_v51  ;;  %v10624_v59 = vld [vmem:[#allocation59_spill] sm:$0xff]  ;;  %v4081_v55 = vrot.slane %v4073_v22, %v6744_v12  ;;  %v457_v61 = vsel %vm448_vm12, %v10631_v62, %v10630_v42  ;;  %v700_v63 = vsel %vm448_vm12, %v10633_v60, %v10632_v54  ;;  %v10644_v57 = vld [vmem:[#allocation18_spill] sm:$0xff]  ;;  %v10646_v41 = vld [vmem:[#allocation21_spill] sm:$0xff] }
 0x772   : > { %10617 = vst [vmem:[#allocation43_spill] sm:$0xff] %v8822_v24  ;;  %6337 = vmatprep.subr.msk.mxu0 %vm459_vm6, %v1403_v25  ;;  %v1161_v26 = vsel %vm448_vm12, %v1160_v38, %v10624_v59  ;;  %4166 = vrot.lane.b32.xlu1 %v4072_v13, %s6412_s24  ;;  %v4089_v56 = vcombine.high %v8822_v24, %v10625_v31  ;;  %v10640_v9 = vld [vmem:[#allocation71_spill] sm:$0xff]  ;;  %v10647_v21 = vld [vmem:[#allocation20_spill] sm:$0xff]  ;;  %v10648_v35 = vld [vmem:[#allocation22_spill] sm:$0xff] }
 0x773   : > { %6338 = vmatpush1.msk.msra.mxu0 %vm459_vm6, %v1396_v1  ;;  %v1162_v0 = vsel %vm450_vm13, %v1161_v26, %v10629_v19  ;;  %v928_v45 = vsel %vm450_vm13, %v927_v2, %v10634_v20  ;;  %v701_v8 = vsel %vm450_vm13, %v700_v63, %v10635_v33  ;;  %v693_v43 = vsel %vm448_vm12, %v692_v44, %v10636_v3  ;;  %v10642_v38 = vld [vmem:[#allocation35_spill] sm:$0xff]  ;;  %v10650_v51 = vld [vmem:[#allocation24_spill] sm:$0xff]  ;;  %v10655_v26 = vld [vmem:[#allocation10_spill] sm:$0xff] }
 0x774   : > { %6339 = vmatprep.subr.msk.mxu0 %vm459_vm6, %v1169_v29  ;;  %4162 = vrot.lane.b32.xlu0 %v4089_v56, %s6415_s27  ;;  %v4090_v16 = vcombine.high %v4072_v13, %v10625_v31  ;;  %v449_v47 = vsel %vm448_vm12, %v10638_v53, %v10637_v34  ;;  %v458_v52 = vsel %vm450_vm13, %v457_v61, %v10639_v5  ;;  %v10643_v13 = vld [vmem:[#allocation17_spill] sm:$0xff]  ;;  %v10645_v40 = vld [vmem:[#allocation19_spill] sm:$0xff]  ;;  %v10651_v29 = vld [vmem:[#allocation14_spill] sm:$0xff] }
 0x775   : > { %6340 = vmatpush1.msk.msra.mxu0 %vm459_vm6, %v1162_v0  ;;  %v694_v58 = vsel %vm450_vm13, %v693_v43, %v10640_v9  ;;  %v4126_v15 = vcombine.high %v4101_v32, %v4117_v6  ;;  %v4088_v4 = vrot.slane %v4074_v17, %v6744_v12  ;;  %v8882_v11 = vrot.slane %v4125_v37, %v6744_v12  ;;  %v10649_v30 = vld [vmem:[#allocation23_spill] sm:$0xff]  ;;  %v10652_v48 = vld [vmem:[#allocation12_spill] sm:$0xff]  ;;  %v10656_v32 = vld [vmem:[#allocation9_spill] sm:$0xff] }
 0x776   : > { %6341 = vmatprep.subr.msk.mxu0 %vm459_vm6, %v935_v49  ;;  %4174 = vrot.lane.b32.xlu1 %v4081_v55, %s6413_s25  ;;  %v451_v46 = vsel %vm450_vm13, %v449_v47, %v10642_v38  ;;  %v4091_v25 = vcombine.high %v4081_v55, %v10625_v31  ;;  %v10653_v1 = vld [vmem:[#allocation16_spill] sm:$0xff]  ;;  %v10654_v59 = vld [vmem:[#allocation15_spill] sm:$0xff]  ;;  %v10657_v56 = vld [vmem:[#allocation13_spill] sm:$0xff] }
 0x777   : > { %6342 = vmatpush1.msk.msra.mxu0 %vm459_vm6, %v928_v45  ;;  %10641 = vst [vmem:[#allocation38_spill] sm:$0xff] %v8882_v11  ;;  %v4157_v39 = vcombine.high %v8882_v11, %v10625_v31  ;;  %v4140_v14 = vrot.slane %v4126_v15, %v6744_v12  ;;  %v4092_v6 = vcombine.high %v4088_v4, %v10625_v31  ;;  %v10658_v7 = vld [vmem:[#allocation11_spill] sm:$0xff] }
 0x778   : > { %6343 = vmatprep.subr.msk.mxu0 %vm459_vm6, %v701_v8  ;;  %4170 = vrot.lane.b32.xlu0 %v4090_v16, %s6416_s28 }
 0x779   : > { %6344 = vmatpush1.msk.msra.mxu0 %vm459_vm6, %v694_v58  ;;  %v4158_v22 = vcombine.high %v4140_v14, %v10625_v31 }
 0x77a   : > { %6345 = vmatprep.subr.msk.mxu0 %vm459_vm6, %v458_v52  ;;  %4182 = vrot.lane.b32.xlu1 %v4088_v4, %s6414_s26 }
 0x77b   : > { %6346 = vmatpush1.msk.msra.mxu0 %vm459_vm6, %v451_v46 }
 0x77c   : > { %4178 = vrot.lane.b32.xlu0 %v4091_v25, %s6417_s29 }
 0x77e   : > { %4190 = vrot.lane.b32.xlu1 %v4157_v39, %s6415_s27 }
 0x780   : > { %4186 = vrot.lane.b32.xlu0 %v4092_v6, %s6418_s30 }
 0x782   : > { %4198 = vrot.lane.b32.xlu1 %v4158_v22, %s6416_s28 }
 0x784   : > { %4194 = vrot.lane.b32.xlu0 %v4140_v14, %s6412_s24 }
 0x786   : > { %5883 = vrot.lane.b32.xlu1 %v10643_v13, %s6410_s23 }
 0x788   : > { %5879 = vrot.lane.b32.xlu0 %v10644_v57, %s6410_s23 }
 0x78a   : > { %5891 = vrot.lane.b32.xlu1 %v10645_v40, %s6410_s23 }
 0x78c   : > { %5887 = vrot.lane.b32.xlu0 %v10646_v41, %s6410_s23 }
 0x78e   : > { %5881 = vrot.lane.b32.xlu1 %v10647_v21, %s6410_s23 }
 0x790   : > { %5877 = vrot.lane.b32.xlu0 %v10648_v35, %s6410_s23 }
 0x792   : > { %5889 = vrot.lane.b32.xlu1 %v10649_v30, %s6410_s23 }
 0x794   : > { %5885 = vrot.lane.b32.xlu0 %v10650_v51, %s6410_s23 }
 0x796   : > { %5649 = vrot.lane.b32.xlu1 %v10643_v13, %s6409_s22 }
 0x798   : > { %5645 = vrot.lane.b32.xlu0 %v10644_v57, %s6409_s22 }
 0x79a   : > { %5657 = vrot.lane.b32.xlu1 %v10645_v40, %s6409_s22 }
 0x79c   : > { %5653 = vrot.lane.b32.xlu0 %v10646_v41, %s6409_s22 }
 0x79e   : > { %5647 = vrot.lane.b32.xlu1 %v10647_v21, %s6409_s22 }
 0x7a0   : > { %5643 = vrot.lane.b32.xlu0 %v10648_v35, %s6409_s22 }
 0x7a2   : > { %5655 = vrot.lane.b32.xlu1 %v10649_v30, %s6409_s22 }
 0x7a4   : > { %5651 = vrot.lane.b32.xlu0 %v10650_v51, %s6409_s22 }
 0x7a6   : > { %5415 = vrot.lane.b32.xlu1 %v10643_v13, %s6408_s21 }
 0x7a8   : > { %5411 = vrot.lane.b32.xlu0 %v10644_v57, %s6408_s21 }
 0x7aa   : > { %5423 = vrot.lane.b32.xlu1 %v10645_v40, %s6408_s21 }
 0x7ac   : > { %5419 = vrot.lane.b32.xlu0 %v10646_v41, %s6408_s21 }
 0x7ae   : > { %5413 = vrot.lane.b32.xlu1 %v10647_v21, %s6408_s21 }
 0x7b0   : > { %5409 = vrot.lane.b32.xlu0 %v10648_v35, %s6408_s21 }
 0x7b2   : > { %5421 = vrot.lane.b32.xlu1 %v10649_v30, %s6408_s21 }
 0x7b4   : > { %5417 = vrot.lane.b32.xlu0 %v10650_v51, %s6408_s21 }
 0x7b6   : > { %5181 = vrot.lane.b32.xlu1 %v10643_v13, %s6406_s20 }
 0x7b8   : > { %5177 = vrot.lane.b32.xlu0 %v10644_v57, %s6406_s20 }
 0x7ba   : > { %5189 = vrot.lane.b32.xlu1 %v10645_v40, %s6406_s20 }
 0x7bc   : > { %5185 = vrot.lane.b32.xlu0 %v10646_v41, %s6406_s20 }
 0x7be   : > { %5179 = vrot.lane.b32.xlu1 %v10647_v21, %s6406_s20 }
 0x7c0   : > { %5175 = vrot.lane.b32.xlu0 %v10648_v35, %s6406_s20 }
 0x7c2   : > { %5187 = vrot.lane.b32.xlu1 %v10649_v30, %s6406_s20 }
 0x7c4   : > { %5183 = vrot.lane.b32.xlu0 %v10650_v51, %s6406_s20 }
 0x7c6   : > { %4709 = vrot.lane.b32.xlu1 %v10651_v29, %s6410_s23 }
 0x7c8   : > { %4705 = vrot.lane.b32.xlu0 %v10652_v48, %s6410_s23 }
 0x7ca   : > { %4717 = vrot.lane.b32.xlu1 %v10653_v1, %s6410_s23 }
 0x7cc   : > { %4713 = vrot.lane.b32.xlu0 %v10654_v59, %s6410_s23 }
 0x7ce   : > { %4707 = vrot.lane.b32.xlu1 %v10655_v26, %s6410_s23 }
 0x7d0   : > { %4703 = vrot.lane.b32.xlu0 %v10656_v32, %s6410_s23 }
 0x7d2   : > { %4715 = vrot.lane.b32.xlu1 %v10657_v56, %s6410_s23 }
 0x7d4   : > { %4711 = vrot.lane.b32.xlu0 %v10658_v7, %s6410_s23 }
 0x7d6   : > { %4475 = vrot.lane.b32.xlu1 %v10651_v29, %s6409_s22 }
 0x7d8   : > { %4471 = vrot.lane.b32.xlu0 %v10652_v48, %s6409_s22 }
 0x7da   : > { %4483 = vrot.lane.b32.xlu1 %v10653_v1, %s6409_s22 }
 0x7dc   : > { %4479 = vrot.lane.b32.xlu0 %v10654_v59, %s6409_s22 }
 0x7de   : > { %4473 = vrot.lane.b32.xlu1 %v10655_v26, %s6409_s22 }
 0x7e0   : > { %4469 = vrot.lane.b32.xlu0 %v10656_v32, %s6409_s22 }
 0x7e2   : > { %4481 = vrot.lane.b32.xlu1 %v10657_v56, %s6409_s22 }
 0x7e4   : > { %v8994_v44 = vpop.permute.xlu1 %4166  ;;  %4477 = vrot.lane.b32.xlu0 %v10658_v7, %s6409_s22 }
 0x7e5   : > { %10659 = vst [vmem:[#allocation77_spill] sm:$0xff] %v8994_v44 }
 0x7e6   : > { %4241 = vrot.lane.b32.xlu1 %v10651_v29, %s6408_s21  ;;  %v9000_v27 = vpop.permute.xlu0 %4162 }
 0x7e7   : > { %10660 = vst [vmem:[#allocation37_spill] sm:$0xff] %v9000_v27 }
 0x7e8   : > { %v9002_v49 = vpop.permute.xlu1 %4174  ;;  %4237 = vrot.lane.b32.xlu0 %v10652_v48, %s6408_s21 }
 0x7e9   : > { %10661 = vst [vmem:[#allocation42_spill] sm:$0xff] %v9002_v49 }
 0x7ea   : > { %4249 = vrot.lane.b32.xlu1 %v10653_v1, %s6408_s21  ;;  %v9008_v23 = vpop.permute.xlu0 %4170 }
 0x7eb   : > { %10662 = vst [vmem:[#allocation46_spill] sm:$0xff] %v9008_v23 }
 0x7ec   : > { %v9010_v2 = vpop.permute.xlu1 %4182  ;;  %4245 = vrot.lane.b32.xlu0 %v10654_v59, %s6408_s21 }
 0x7ed   : > { %10663 = vst [vmem:[#allocation50_spill] sm:$0xff] %v9010_v2 }
 0x7ee   : > { %4239 = vrot.lane.b32.xlu1 %v10655_v26, %s6408_s21  ;;  %v9016_v19 = vpop.permute.xlu0 %4178 }
 0x7ef   : > { %10664 = vst [vmem:[#allocation85_spill] sm:$0xff] %v9016_v19 }
 0x7f0   : > { %v9018_v0 = vpop.permute.xlu1 %4190  ;;  %4235 = vrot.lane.b32.xlu0 %v10656_v32, %s6408_s21 }
 0x7f1   : > { %10665 = vst [vmem:[#allocation40_spill] sm:$0xff] %v9018_v0 }
 0x7f2   : > { %4247 = vrot.lane.b32.xlu1 %v10657_v56, %s6408_s21  ;;  %v9024_v37 = vpop.permute.xlu0 %4186 }
 0x7f3   : > { %10666 = vst [vmem:[#allocation44_spill] sm:$0xff] %v9024_v37 }
 0x7f4   : > { %v9026_v17 = vpop.permute.xlu1 %4198  ;;  %4243 = vrot.lane.b32.xlu0 %v10658_v7, %s6408_s21 }
 0x7f5   : > { %10667 = vst [vmem:[#allocation72_spill] sm:$0xff] %v9026_v17 }
 0x7f6   : > { %v9030_v55 = vpop.permute.xlu0 %4194 }
 0x7f7   : > { %10668 = vst [vmem:[#allocation49_spill] sm:$0xff] %v9030_v55 }
 0x7f8   : > { %v5884_v42 = vpop.permute.xlu1 %5883 }
 0x7fa   : > { %v5880_v62 = vpop.permute.xlu0 %5879 }
 0x7fc   : > { %v5892_v61 = vpop.permute.xlu1 %5891 }
 0x7fd   : > { %v5985_v54 = vcombine.low %v5884_v42, %v5892_v61 }
 0x7fe   : > { %v5888_v60 = vpop.permute.xlu0 %5887 }
 0x7ff   : > { %v5969_v63 = vcombine.low %v5880_v62, %v5888_v60  ;;  %v5993_v45 = vrot.slane %v5985_v54, %v6516_v36 }
 0x800   : > { %v9032_v20 = vpop.permute.xlu1 %5881 }
 0x801   : > { %v5977_v33 = vrot.slane %v5969_v63, %v6516_v36 }
 0x802   : > { %v9036_v8 = vpop.permute.xlu0 %5877 }
 0x803   : > { %v6001_v3 = vcombine.low %v5977_v33, %v5993_v45  ;;  %v6002_v5 = vcombine.high %v5977_v33, %v5993_v45 }
 0x804   : > { %v9038_v43 = vpop.permute.xlu1 %5889 }
 0x805   : > { %v5917_v16 = vcombine.low %v9032_v20, %v9038_v43  ;;  %v9043_v34 = vrot.slane %v6001_v3, %v6744_v12  ;;  %v6016_v39 = vrot.slane %v6002_v5, %v6744_v12 }
 0x806   : > { %v9045_v53 = vpop.permute.xlu0 %5885 }
 0x807   : > { %v5901_v47 = vcombine.low %v9036_v8, %v9045_v53  ;;  %v6033_v9 = vcombine.high %v9043_v34, %v10625_v31  ;;  %v5925_v58 = vrot.slane %v5917_v16, %v6516_v36  ;;  %v5970_v16 = vcombine.high %v5880_v62, %v5888_v60 }
 0x808   : > { %v9049_v52 = vpop.permute.xlu1 %5649  ;;  %v6034_v60 = vcombine.high %v6016_v39, %v10625_v31 }
 0x809   : > { %v5909_v15 = vrot.slane %v5901_v47, %v6516_v36  ;;  %6066 = vrot.lane.b32.xlu0 %v6033_v9, %s6415_s27 }
 0x80a   : > { %v9056_v4 = vpop.permute.xlu0 %5645 }
 0x80b   : > { %v5933_v38 = vcombine.low %v5909_v15, %v5925_v58  ;;  %v5934_v46 = vcombine.high %v5909_v15, %v5925_v58  ;;  %v5986_v15 = vcombine.high %v5884_v42, %v5892_v61 }
 0x80c   : > { %v9058_v25 = vpop.permute.xlu1 %5657 }
 0x80d   : > { %v5751_v14 = vcombine.low %v9049_v52, %v9058_v25  ;;  %v9064_v6 = vrot.slane %v5933_v38, %v6744_v12  ;;  %6070 = vrot.lane.b32.xlu0 %v6016_v39, %s6412_s24  ;;  %v5948_v1 = vrot.slane %v5934_v46, %v6744_v12  ;;  %v9114_v42 = vrot.slane %v5986_v15, %v6516_v36 }
 0x80e   : > { %v9067_v22 = vpop.permute.xlu0 %5653  ;;  %v5902_v39 = vcombine.high %v9036_v8, %v9045_v53 }
 0x80f   : > { %v5735_v29 = vcombine.low %v9056_v4, %v9067_v22  ;;  %v5965_v59 = vcombine.high %v9064_v6, %v10625_v31  ;;  %v5759_v26 = vrot.slane %v5751_v14, %v6516_v36  ;;  %v9103_v14 = vrot.slane %v5970_v16, %v6516_v36 }
 0x810   : > { %v9071_v48 = vpop.permute.xlu1 %5647  ;;  %v9139_v53 = vrot.slane %v5902_v39, %v6516_v36  ;;  %v5736_v49 = vcombine.high %v9056_v4, %v9067_v22 }
 0x811   : > { %v5743_v32 = vrot.slane %v5735_v29, %v6516_v36  ;;  %6042 = vrot.lane.b32.xlu0 %v5948_v1, %s6412_s24  ;;  %6038 = vrot.lane.b32.xlu1 %v5965_v59, %s6415_s27 }
 0x812   : > { %v9080_v56 = vpop.permute.xlu0 %5643 }
 0x813   : > { %v5767_v7 = vcombine.low %v5743_v32, %v5759_v26  ;;  %v5768_v29 = vcombine.high %v5743_v32, %v5759_v26  ;;  %v6017_v32 = vcombine.low %v9103_v14, %v9114_v42 }
 0x814   : > { %v9082_v54 = vpop.permute.xlu1 %5655 }
 0x815   : > { %v5683_v63 = vcombine.low %v9071_v48, %v9082_v54  ;;  %v9087_v45 = vrot.slane %v5767_v7, %v6744_v12  ;;  %v5684_v11 = vcombine.high %v9071_v48, %v9082_v54 }
 0x816   : > { %v9089_v33 = vpop.permute.xlu0 %5651 }
 0x817   : > { %v5667_v3 = vcombine.low %v9080_v56, %v9089_v33  ;;  %v5799_v5 = vcombine.high %v9087_v45, %v10625_v31  ;;  %v5691_v9 = vrot.slane %v5683_v63, %v6516_v36  ;;  %v9243_v48 = vrot.slane %v5684_v11, %v6516_v36 }
 0x818   : > { %v9093_v47 = vpop.permute.xlu1 %5415 }
 0x819   : > { %v5675_v58 = vrot.slane %v5667_v3, %v6516_v36  ;;  %5832 = vrot.lane.b32.xlu1 %v5799_v5, %s6415_s27  ;;  %v5782_v3 = vrot.slane %v5768_v29, %v6744_v12 }
 0x81a   : > { %v9100_v38 = vpop.permute.xlu0 %5411 }
 0x81b   : > { %v5699_v46 = vcombine.low %v5675_v58, %v5691_v9  ;;  %v5700_v29 = vcombine.high %v5675_v58, %v5691_v9  ;;  %v5800_v23 = vcombine.high %v5782_v3, %v10625_v31 }
 0x81c   : > { %v9105_v62 = vpop.permute.xlu1 %5423 }
 0x81d   : > { %v5517_v59 = vcombine.low %v9093_v47, %v9105_v62  ;;  %v9111_v7 = vrot.slane %v5699_v46, %v6744_v12  ;;  %6074 = vrot.lane.b32.xlu1 %v6034_v60, %s6416_s28  ;;  %v5918_v46 = vcombine.high %v9032_v20, %v9038_v43  ;;  %v5714_v39 = vrot.slane %v5700_v29, %v6744_v12 }
 0x81e   : > { %v9117_v61 = vpop.permute.xlu0 %5419  ;;  %v5518_v0 = vcombine.high %v9093_v47, %v9105_v62 }
 0x81f   : > { %10669 = vst [vmem:[#allocation97_spill] sm:$0xff] %v9111_v7  ;;  %v5501_v26 = vcombine.low %v9100_v38, %v9117_v61  ;;  %v5731_v16 = vcombine.high %v9111_v7, %v10625_v31  ;;  %v5525_v5 = vrot.slane %v5517_v59, %v6516_v36  ;;  %v6025_v59 = vrot.slane %v6017_v32, %v6744_v12 }
 0x820   : > { %v9125_v63 = vpop.permute.xlu1 %5413  ;;  %v9293_v62 = vrot.slane %v5518_v0, %v6516_v36 }
 0x821   : > { %v5509_v15 = vrot.slane %v5501_v26, %v6516_v36  ;;  %5836 = vrot.lane.b32.xlu1 %v5782_v3, %s6412_s24  ;;  %5804 = vrot.lane.b32.xlu0 %v5731_v16, %s6415_s27  ;;  %v5966_v26 = vcombine.high %v5948_v1, %v10625_v31  ;;  %v9151_v16 = vrot.slane %v5918_v46, %v6516_v36 }
 0x822   : > { %v9136_v60 = vpop.permute.xlu0 %5409  ;;  %v9192_v3 = vrot.slane %v5736_v49, %v6516_v36 }
 0x823   : > { %v5533_v8 = vcombine.low %v5509_v15, %v5525_v5  ;;  %v5949_v1 = vcombine.low %v9139_v53, %v9151_v16 }
 0x824   : > { %v9141_v37 = vpop.permute.xlu1 %5421 }
 0x825   : > { %v5449_v20 = vcombine.low %v9125_v63, %v9141_v37  ;;  %v9148_v43 = vrot.slane %v5533_v8, %v6744_v12  ;;  %6078 = vrot.lane.b32.xlu1 %v6025_v59, %s6413_s25  ;;  %6046 = vrot.lane.b32.xlu0 %v5966_v26, %s6416_s28  ;;  %v5957_v29 = vrot.slane %v5949_v1, %v6744_v12 }
 0x826   : > { %v9155_v9 = vpop.permute.xlu0 %5417  ;;  %v6035_v1 = vcombine.high %v6025_v59, %v10625_v31 }
 0x827   : > { %10670 = vst [vmem:[#allocation94_spill] sm:$0xff] %v9148_v43  ;;  %v5433_v58 = vcombine.low %v9136_v60, %v9155_v9  ;;  %v5565_v46 = vcombine.high %v9148_v43, %v10625_v31  ;;  %v5457_v8 = vrot.slane %v5449_v20, %v6516_v36 }
 0x828   : > { %v9161_v32 = vpop.permute.xlu1 %5181 }
 0x829   : > { %v5441_v2 = vrot.slane %v5433_v58, %v6516_v36  ;;  %5808 = vrot.lane.b32.xlu1 %v5714_v39, %s6412_s24  ;;  %5598 = vrot.lane.b32.xlu0 %v5565_v46, %s6415_s27  ;;  %v5752_v58 = vcombine.high %v9049_v52, %v9058_v25 }
 0x82a   : > { %v9170_v26 = vpop.permute.xlu0 %5177 }
 0x82b   : > { %v5465_v19 = vcombine.low %v5441_v2, %v5457_v8  ;;  %v9201_v55 = vrot.slane %v5752_v58, %v6516_v36  ;;  %v6018_v58 = vcombine.high %v9103_v14, %v9114_v42  ;;  %v5466_v42 = vcombine.high %v5441_v2, %v5457_v8 }
 0x82c   : > { %v9174_v17 = vpop.permute.xlu1 %5189 }
 0x82d   : > { %v9179_v20 = vrot.slane %v5465_v19, %v6744_v12  ;;  %v5283_v46 = vcombine.low %v9161_v32, %v9174_v17  ;;  %6050 = vrot.lane.b32.xlu1 %v5957_v29, %s6413_s25  ;;  %5840 = vrot.lane.b32.xlu0 %v5800_v23, %s6416_s28  ;;  %v5534_v19 = vcombine.high %v5509_v15, %v5525_v5 }
 0x82e   : > { %v9187_v4 = vpop.permute.xlu0 %5185  ;;  %v5783_v5 = vcombine.low %v9192_v3, %v9201_v55 }
 0x82f   : > { %10671 = vst [vmem:[#allocation67_spill] sm:$0xff] %v9179_v20  ;;  %v5267_v22 = vcombine.low %v9170_v26, %v9187_v4  ;;  %v5497_v52 = vcombine.high %v9179_v20, %v10625_v31  ;;  %v5291_v23 = vrot.slane %v5283_v46, %v6516_v36  ;;  %v5548_v59 = vrot.slane %v5534_v19, %v6744_v12 }
 0x830   : > { %v9213_v44 = vpop.permute.xlu1 %5179  ;;  %v5668_v46 = vcombine.high %v9080_v56, %v9089_v33  ;;  %v5967_v19 = vcombine.high %v5957_v29, %v10625_v31  ;;  %v6032_v56 = vrot.slane %v6018_v58, %v6744_v12 }
 0x831   : > { %v9198_v25 = vrot.slane %v5267_v22, %v6516_v36  ;;  %6082 = vrot.lane.b32.xlu0 %v6035_v1, %s6417_s29  ;;  %5570 = vrot.lane.b32.xlu1 %v5497_v52, %s6415_s27  ;;  %v5732_v22 = vcombine.high %v5714_v39, %v10625_v31  ;;  %v5791_v52 = vrot.slane %v5783_v5, %v6744_v12 }
 0x832   : > { %v9206_v49 = vpop.permute.xlu0 %5175  ;;  %v9236_v33 = vrot.slane %v5668_v46, %v6516_v36  ;;  %v5566_v11 = vcombine.high %v5548_v59, %v10625_v31 }
 0x833   : > { %v5299_v15 = vcombine.low %v9198_v25, %v5291_v23 }
 0x834   : > { %v9232_v14 = vpop.permute.xlu1 %5187  ;;  %v5715_v2 = vcombine.low %v9236_v33, %v9243_v48 }
 0x835   : > { %5602 = vrot.lane.b32.xlu0 %v5548_v59, %s6412_s24  ;;  %5812 = vrot.lane.b32.xlu1 %v5732_v22, %s6416_s28  ;;  %v9226_v39 = vrot.slane %v5299_v15, %v6744_v12  ;;  %v5215_v54 = vcombine.low %v9213_v44, %v9232_v14  ;;  %v5480_v22 = vrot.slane %v5466_v42, %v6744_v12 }
 0x836   : > { %v9221_v1 = vpop.permute.xlu0 %5183  ;;  %v5723_v59 = vrot.slane %v5715_v2, %v6744_v12 }
 0x837   : > { %v5199_v29 = vcombine.low %v9206_v49, %v9221_v1  ;;  %v5331_v5 = vcombine.high %v9226_v39, %v10625_v31  ;;  %v9259_v58 = vrot.slane %v5215_v54, %v6516_v36  ;;  %v5801_v54 = vcombine.high %v5791_v52, %v10625_v31 }
 0x838   : > { %v9261_v46 = vpop.permute.xlu1 %4709  ;;  %v5498_v24 = vcombine.high %v5480_v22, %v10625_v31 }
 0x839   : > { %5844 = vrot.lane.b32.xlu0 %v5791_v52, %s6413_s25  ;;  %6054 = vrot.lane.b32.xlu1 %v5967_v19, %s6417_s29  ;;  %v9254_v8 = vrot.slane %v5199_v29, %v6516_v36  ;;  %v5950_v19 = vcombine.high %v9139_v53, %v9151_v16  ;;  %v5502_v29 = vcombine.high %v9100_v38, %v9117_v61 }
 0x83a   : > { %v9247_v15 = vpop.permute.xlu0 %4705  ;;  %v6036_v53 = vcombine.high %v6032_v56, %v10625_v31  ;;  %v5049_v38 = vcombine.low %v10643_v13, %v10645_v40  ;;  %v5300_v16 = vcombine.high %v9198_v25, %v5291_v23 }
 0x83b   : > { %v5231_v42 = vcombine.low %v9254_v8, %v9259_v58  ;;  %v9283_v61 = vrot.slane %v5502_v29, %v6516_v36  ;;  %v5964_v52 = vrot.slane %v5950_v19, %v6744_v12 }
 0x83c   : > { %v9286_v2 = vpop.permute.xlu1 %4717  ;;  %v5314_v23 = vrot.slane %v5300_v16, %v6744_v12  ;;  %v9307_v0 = vrot.slane %v5049_v38, %v6516_v36 }
 0x83d   : > { %6086 = vrot.lane.b32.xlu0 %v6032_v56, %s6414_s26  ;;  %5364 = vrot.lane.b32.xlu1 %v5331_v5, %s6415_s27  ;;  %v9290_v47 = vrot.slane %v5231_v42, %v6744_v12  ;;  %v5033_v56 = vcombine.low %v10644_v57, %v10646_v41  ;;  %v5549_v25 = vcombine.low %v9283_v61, %v9293_v62 }
 0x83e   : > { %v9271_v5 = vpop.permute.xlu0 %4713 }
 0x83f   : > { %v5263_v19 = vcombine.high %v9290_v47, %v10625_v31  ;;  %v5041_v42 = vrot.slane %v5033_v56, %v6516_v36  ;;  %v5557_v16 = vrot.slane %v5549_v25, %v6744_v12 }
 0x840   : > { %v9309_v29 = vpop.permute.xlu1 %4707 }
 0x841   : > { %5574 = vrot.lane.b32.xlu0 %v5480_v22, %s6412_s24  ;;  %5606 = vrot.lane.b32.xlu1 %v5566_v11, %s6416_s28  ;;  %v5065_v38 = vcombine.low %v5041_v42, %v9307_v0  ;;  %v5450_v22 = vcombine.high %v9125_v63, %v9141_v37  ;;  %v5968_v37 = vcombine.high %v5964_v52, %v10625_v31 }
 0x842   : > { %v9295_v11 = vpop.permute.xlu0 %4703  ;;  %v4965_v63 = vcombine.low %v10648_v35, %v10650_v51 }
 0x844   : > { %v9325_v27 = vpop.permute.xlu1 %4715 }
 0x845   : > { %5816 = vrot.lane.b32.xlu0 %v5723_v59, %s6413_s25  ;;  %5848 = vrot.lane.b32.xlu1 %v5801_v54, %s6417_s29  ;;  %v5784_v54 = vcombine.high %v9192_v3, %v9201_v55  ;;  %v5733_v55 = vcombine.high %v5723_v59, %v10625_v31  ;;  %v9330_v3 = vrot.slane %v5065_v38, %v6744_v12 }
 0x847   : > { %v5798_v56 = vrot.slane %v5784_v54, %v6744_v12  ;;  %10672 = vst [vmem:[#allocation68_spill] sm:$0xff] %v9330_v3  ;;  %v5097_v59 = vcombine.high %v9330_v3, %v10625_v31  ;;  %v9351_v54 = vrot.slane %v5450_v22, %v6516_v36  ;;  %v4973_v22 = vrot.slane %v4965_v63, %v6516_v36 }
 0x848   : > { %v9353_v38 = vpop.permute.xlu1 %4475  ;;  %v5284_v63 = vcombine.high %v9161_v32, %v9174_v17 }
 0x849   : > { %6058 = vrot.lane.b32.xlu0 %v5964_v52, %s6414_s26  ;;  %6090 = vrot.lane.b32.xlu1 %v6036_v53, %s6418_s30  ;;  %v9316_v53 = vpop.permute.xlu0 %4711  ;;  %v5332_v52 = vcombine.high %v5314_v23, %v10625_v31 }
 0x84a   : > { %v9396_v32 = vrot.slane %v5284_v63, %v6516_v36  ;;  %v5550_v63 = vcombine.high %v9283_v61, %v9293_v62 }
 0x84c   : > { %v9374_v20 = vpop.permute.xlu1 %4483 }
 0x84d   : > { %5368 = vrot.lane.b32.xlu1 %v5314_v23, %s6412_s24  ;;  %5336 = vrot.lane.b32.xlu0 %v5263_v19, %s6415_s27  ;;  %v5434_v19 = vcombine.high %v9136_v60, %v9155_v9  ;;  %v9334_v25 = vpop.permute.xlu0 %4471  ;;  %v5232_v9 = vcombine.high %v9254_v8, %v9259_v58  ;;  %v5567_v23 = vcombine.high %v5557_v16, %v10625_v31 }
 0x84f   : > { %v9341_v60 = vrot.slane %v5434_v19, %v6516_v36 }
 0x851   : > { %5610 = vrot.lane.b32.xlu1 %v5557_v16, %s6413_s25  ;;  %5578 = vrot.lane.b32.xlu0 %v5498_v24, %s6416_s28  ;;  %v4981_v24 = vcombine.low %v10647_v21, %v10649_v30  ;;  %v5481_v8 = vcombine.low %v9341_v60, %v9351_v54  ;;  %v9362_v58 = vpop.permute.xlu0 %4479  ;;  %v5802_v16 = vcombine.high %v5798_v56, %v10625_v31 }
 0x853   : > { %v9358_v19 = vrot.slane %v4981_v24, %v6516_v36  ;;  %v5716_v24 = vcombine.high %v9236_v33, %v9243_v48  ;;  %v5066_v33 = vcombine.high %v5041_v42, %v9307_v0  ;;  %v9400_v0 = vpop.permute.xlu1 %4473 }
 0x855   : > { %5852 = vrot.lane.b32.xlu1 %v5798_v56, %s6414_s26  ;;  %5820 = vrot.lane.b32.xlu0 %v5733_v55, %s6417_s29  ;;  %v5246_v55 = vrot.slane %v5232_v9, %v6744_v12  ;;  %v5489_v9 = vrot.slane %v5481_v8, %v6744_v12  ;;  %v5730_v17 = vrot.slane %v5716_v24, %v6744_v12 }
 0x856   : > { %v4811_v8 = vcombine.low %v9261_v46, %v9286_v2  ;;  %v5080_v24 = vrot.slane %v5066_v33, %v6744_v12 }
 0x857   : > { %v5264_v33 = vcombine.high %v5246_v55, %v10625_v31  ;;  %v5499_v61 = vcombine.high %v5489_v9, %v10625_v31 }
 0x859   : > { %5130 = vrot.lane.b32.xlu1 %v5097_v59, %s6415_s27  ;;  %6062 = vrot.lane.b32.xlu0 %v5968_v37, %s6418_s30  ;;  %v4997_v59 = vcombine.low %v4973_v22, %v9358_v19  ;;  %v5268_v37 = vcombine.high %v9170_v26, %v9187_v4  ;;  %v4795_v4 = vcombine.low %v9247_v15, %v9271_v5 }
 0x85b   : > { %v9386_v48 = vrot.slane %v4997_v59, %v6744_v12  ;;  %v9389_v26 = vrot.slane %v5268_v37, %v6516_v36  ;;  %v9407_v59 = vrot.slane %v4795_v4, %v6516_v36  ;;  %v9420_v4 = vpop.permute.xlu1 %4481 }
 0x85d   : > { %5372 = vrot.lane.b32.xlu1 %v5332_v52, %s6416_s28  ;;  %5340 = vrot.lane.b32.xlu0 %v5246_v55, %s6412_s24  ;;  %v9380_v52 = vpop.permute.xlu0 %4469  ;;  %10673 = vst [vmem:[#allocation74_spill] sm:$0xff] %v9386_v48  ;;  %v5315_v42 = vcombine.low %v9389_v26, %v9396_v32  ;;  %v5029_v37 = vcombine.high %v9386_v48, %v10625_v31 }
 0x85f   : > { %v5323_v43 = vrot.slane %v5315_v42, %v6744_v12  ;;  %v5216_v42 = vcombine.high %v9213_v44, %v9232_v14  ;;  %v9437_v55 = vpop.permute.xlu1 %4241 }
 0x861   : > { %5614 = vrot.lane.b32.xlu1 %v5567_v23, %s6417_s29  ;;  %5582 = vrot.lane.b32.xlu0 %v5489_v9, %s6413_s25  ;;  %v9409_v56 = vpop.permute.xlu0 %4477  ;;  %v4819_v23 = vrot.slane %v4811_v8, %v6516_v36  ;;  %v5200_v8 = vcombine.high %v9206_v49, %v9221_v1  ;;  %v4727_v1 = vcombine.low %v9295_v11, %v9316_v53 }
 0x862   : > { %v9453_v14 = vrot.slane %v5216_v42, %v6516_v36 }
 0x863   : > { %v9443_v49 = vrot.slane %v5200_v8, %v6516_v36 }
 0x865   : > { %5856 = vrot.lane.b32.xlu1 %v5802_v16, %s6418_s30  ;;  %5824 = vrot.lane.b32.xlu0 %v5730_v17, %s6414_s26  ;;  %v4827_v16 = vcombine.low %v9407_v59, %v4819_v23  ;;  %v9424_v7 = vpop.permute.xlu0 %4237 }
 0x867   : > { %v9433_v62 = vrot.slane %v4827_v16, %v6744_v12  ;;  %v4743_v16 = vcombine.low %v9309_v29, %v9325_v27 }
 0x869   : > { %5134 = vrot.lane.b32.xlu1 %v5080_v24, %s6412_s24  ;;  %5102 = vrot.lane.b32.xlu0 %v5029_v37, %s6415_s27  ;;  %v5564_v37 = vrot.slane %v5550_v63, %v6744_v12  ;;  %10674 = vst [vmem:[#allocation56_spill] sm:$0xff] %v9433_v62  ;;  %v9447_v9 = vpop.permute.xlu0 %4245  ;;  %v5734_v63 = vcombine.high %v5730_v17, %v10625_v31  ;;  %v9464_v17 = vpop.permute.xlu1 %4249 }
 0x86a   : > { %v4859_v44 = vcombine.high %v9433_v62, %v10625_v31  ;;  %v9469_v42 = vrot.slane %v4743_v16, %v6516_v36 }
 0x86d   : > { %5376 = vrot.lane.b32.xlu1 %v5323_v43, %s6413_s25  ;;  %5344 = vrot.lane.b32.xlu0 %v5264_v33, %s6416_s28  ;;  %v4998_v33 = vcombine.high %v4973_v22, %v9358_v19  ;;  %v5247_v19 = vcombine.low %v9443_v49, %v9453_v14  ;;  %v9462_v22 = vrot.slane %v4727_v1, %v6516_v36  ;;  %v9471_v62 = vpop.permute.xlu0 %4235  ;;  %v9483_v16 = vpop.permute.xlu1 %4239 }
 0x86e   : > { %v5482_v1 = vcombine.high %v9341_v60, %v9351_v54  ;;  %v4828_v60 = vcombine.high %v9407_v59, %v4819_v23  ;;  %v4561_v54 = vcombine.low %v9334_v25, %v9362_v58 }
 0x86f   : > { %v5012_v8 = vrot.slane %v4998_v33, %v6744_v12  ;;  %v4759_v33 = vcombine.low %v9462_v22, %v9469_v42 }
 0x870   : > { %v9510_v59 = vrot.slane %v4561_v54, %v6516_v36 }
 0x871   : > { %5618 = vrot.lane.b32.xlu1 %v5564_v37, %s6414_s26  ;;  %5586 = vrot.lane.b32.xlu0 %v5499_v61, %s6417_s29  ;;  %v5098_v61 = vcombine.high %v5080_v24, %v10625_v31  ;;  %v5255_v24 = vrot.slane %v5247_v19, %v6744_v12  ;;  %v5496_v19 = vrot.slane %v5482_v1, %v6744_v12  ;;  %v9512_v23 = vpop.permute.xlu1 %4247 }
 0x872   : > { %v9500_v48 = vrot.slane %v4759_v33, %v6744_v12 }
 0x874   : > { %10675 = vst [vmem:[#allocation79_spill] sm:$0xff] %v9500_v48  ;;  %v4791_v1 = vcombine.high %v9500_v48, %v10625_v31  ;;  %v5030_v48 = vcombine.high %v5012_v8, %v10625_v31 }
 0x875   : > { %5828 = vrot.lane.b32.xlu0 %v5734_v63, %s6418_s30  ;;  %4892 = vrot.lane.b32.xlu1 %v4859_v44, %s6415_s27  ;;  %v5050_v63 = vcombine.high %v10643_v13, %v10645_v40  ;;  %v5333_v44 = vcombine.high %v5323_v43, %v10625_v31  ;;  %v5568_v13 = vcombine.high %v5564_v37, %v10625_v31  ;;  %v9496_v43 = vpop.permute.xlu0 %4243 }
 0x877   : > { %v9491_v40 = vrot.slane %v5050_v63, %v6516_v36  ;;  %v4842_v63 = vrot.slane %v4828_v60, %v6744_v12 }
 0x879   : > { %5106 = vrot.lane.b32.xlu0 %v5012_v8, %s6412_s24  ;;  %5138 = vrot.lane.b32.xlu1 %v5098_v61, %s6416_s28  ;;  %v5034_v61 = vcombine.high %v10644_v57, %v10646_v41  ;;  %v4577_v57 = vcombine.low %v9353_v38, %v9374_v20  ;;  %v4966_v8 = vcombine.high %v10648_v35, %v10650_v51 }
 0x87a   : > { %v4509_v35 = vcombine.low %v9400_v0, %v9420_v4 }
 0x87b   : > { %v9507_v41 = vrot.slane %v5034_v61, %v6516_v36  ;;  %v9514_v37 = vpop.permute.xlu0 %6066  ;;  %v5316_v61 = vcombine.high %v9389_v26, %v9396_v32  ;;  %v5265_v32 = vcombine.high %v5255_v24, %v10625_v31  ;;  %v9570_v51 = vrot.slane %v4966_v8, %v6516_v36 }
 0x87c   : > { %v5248_v8 = vcombine.high %v9443_v49, %v9453_v14 }
 0x87d   : > { %5348 = vrot.lane.b32.xlu0 %v5255_v24, %s6413_s25  ;;  %5380 = vrot.lane.b32.xlu1 %v5333_v44, %s6417_s29  ;;  %v5081_v33 = vcombine.low %v9507_v41, %v9491_v40  ;;  %v9522_v44 = vrot.slane %v4577_v57, %v6516_v36  ;;  %v4982_v57 = vcombine.high %v10647_v21, %v10649_v30 }
 0x87e   : > { %v5330_v26 = vrot.slane %v5316_v61, %v6744_v12  ;;  %v4760_v21 = vcombine.high %v9462_v22, %v9469_v42  ;;  %v4493_v30 = vcombine.low %v9380_v52, %v9409_v56  ;;  %v5500_v61 = vcombine.high %v5496_v19, %v10625_v31 }
 0x87f   : > { %v5089_v54 = vrot.slane %v5081_v33, %v6744_v12  ;;  %v9534_v28 = vpop.permute.xlu0 %6070  ;;  %v4594_v14 = vcombine.high %v9510_v59, %v9522_v44 }
 0x880   : > { %v9573_v22 = vrot.slane %v4493_v30, %v6516_v36  ;;  %v4796_v30 = vcombine.high %v9247_v15, %v9271_v5  ;;  %v5262_v15 = vrot.slane %v5248_v8, %v6744_v12  ;;  %v5334_v5 = vcombine.high %v5330_v26, %v10625_v31 }
 0x881   : > { %5590 = vrot.lane.b32.xlu0 %v5496_v19, %s6414_s26  ;;  %5622 = vrot.lane.b32.xlu1 %v5568_v13, %s6418_s30  ;;  %v4593_v13 = vcombine.low %v9510_v59, %v9522_v44  ;;  %v4774_v19 = vrot.slane %v4760_v21, %v6744_v12 }
 0x882   : > { %v9607_v49 = vrot.slane %v4796_v30, %v6516_v36 }
 0x883   : > { %v9530_v60 = vpop.permute.xlu1 %6038  ;;  %v9545_v50 = vrot.slane %v4593_v13, %v6744_v12  ;;  %v9558_v24 = vpop.permute.xlu0 %6042 }
 0x885   : > { %4896 = vrot.lane.b32.xlu1 %v4842_v63, %s6412_s24  ;;  %4864 = vrot.lane.b32.xlu0 %v4791_v1, %s6415_s27  ;;  %10676 = vst [vmem:[#allocation80_spill] sm:$0xff] %v9545_v50  ;;  %v4625_v13 = vcombine.high %v9545_v50, %v10625_v31 }
 0x889   : > { %5142 = vrot.lane.b32.xlu1 %v5089_v54, %s6413_s25  ;;  %5110 = vrot.lane.b32.xlu0 %v5030_v48, %s6416_s28  ;;  %v9552_v48 = vrot.slane %v4982_v57, %v6516_v36 }
 0x88b   : > { %v9540_v1 = vpop.permute.xlu1 %5832  ;;  %v5013_v50 = vcombine.low %v9570_v51, %v9552_v48 }
 0x88d   : > { %5384 = vrot.lane.b32.xlu1 %v5330_v26, %s6414_s26  ;;  %5352 = vrot.lane.b32.xlu0 %v5265_v32, %s6417_s29  ;;  %v4860_v32 = vcombine.high %v4842_v63, %v10625_v31  ;;  %v4343_v26 = vcombine.low %v9437_v55, %v9464_v17 }
 0x88f   : > { %v9560_v33 = vpop.permute.xlu1 %6074 }
 0x891   : > { %5594 = vrot.lane.b32.xlu0 %v5500_v61, %s6418_s30  ;;  %4658 = vrot.lane.b32.xlu1 %v4625_v13, %s6415_s27  ;;  %v9584_v61 = vrot.slane %v4509_v35, %v6516_v36  ;;  %v5021_v35 = vrot.slane %v5013_v50, %v6744_v12  ;;  %v4327_v50 = vcombine.low %v9424_v7, %v9447_v9 }
 0x893   : > { %v9575_v42 = vpop.permute.xlu1 %5836  ;;  %v9577_v57 = vpop.permute.xlu0 %5804  ;;  %v4525_v21 = vcombine.low %v9573_v22, %v9584_v61  ;;  %v9630_v44 = vrot.slane %v4327_v50, %v6516_v36 }
 0x894   : > { %10677 = vst [vmem:[#allocation39_spill] sm:$0xff] %v9577_v57  ;;  %v5099_v57 = vcombine.high %v5089_v54, %v10625_v31 }
 0x895   : > { %4868 = vrot.lane.b32.xlu0 %v4774_v19, %s6412_s24  ;;  %4900 = vrot.lane.b32.xlu1 %v4860_v32, %s6416_s28  ;;  %v4812_v32 = vcombine.high %v9261_v46, %v9286_v2  ;;  %v9618_v2 = vrot.slane %v4525_v21, %v6744_v12  ;;  %v4608_v21 = vrot.slane %v4594_v14, %v6744_v12 }
 0x896   : > { %v4792_v14 = vcombine.high %v4774_v19, %v10625_v31 }
 0x897   : > { %v9594_v63 = vpop.permute.xlu1 %6078  ;;  %v9596_v13 = vpop.permute.xlu0 %6046  ;;  %10680 = vst [vmem:[#allocation41_spill] sm:$0xff] %v9618_v2 }
 0x899   : > { %5114 = vrot.lane.b32.xlu0 %v5021_v35, %s6413_s25  ;;  %5146 = vrot.lane.b32.xlu1 %v5099_v57, %s6417_s29  ;;  %v9621_v57 = vrot.slane %v4812_v32, %v6516_v36  ;;  %v4557_v32 = vcombine.high %v9618_v2, %v10625_v31  ;;  %v5082_v2 = vcombine.high %v9507_v41, %v9491_v40 }
 0x89a   : > { %v4744_v40 = vcombine.high %v9309_v29, %v9325_v27  ;;  %v4526_v41 = vcombine.high %v9573_v22, %v9584_v61 }
 0x89b   : > { %v9613_v54 = vpop.permute.xlu1 %5808  ;;  %v9615_v46 = vpop.permute.xlu0 %5598  ;;  %v4843_v59 = vcombine.low %v9607_v49, %v9621_v57 }
 0x89c   : > { %10678 = vst [vmem:[#allocation63_spill] sm:$0xff] %v9613_v54  ;;  %10679 = vst [vmem:[#allocation88_spill] sm:$0xff] %v9615_v46  ;;  %v9640_v46 = vrot.slane %v4343_v26, %v6516_v36  ;;  %v4728_v26 = vcombine.high %v9295_v11, %v9316_v53  ;;  %v5266_v11 = vcombine.high %v5262_v15, %v10625_v31 }
 0x89d   : > { %5356 = vrot.lane.b32.xlu0 %v5262_v15, %s6414_s26  ;;  %5388 = vrot.lane.b32.xlu1 %v5334_v5, %s6418_s30  ;;  %v4851_v3 = vrot.slane %v4843_v59, %v6744_v12  ;;  %v5031_v59 = vcombine.high %v5021_v35, %v10625_v31  ;;  %v4259_v35 = vcombine.low %v9471_v62, %v9496_v43 }
 0x89e   : > { %v4359_v5 = vcombine.low %v9630_v44, %v9640_v46  ;;  %v9671_v53 = vrot.slane %v4728_v26, %v6516_v36  ;;  %v9684_v29 = vrot.slane %v4744_v40, %v6516_v36  ;;  %v4275_v15 = vcombine.low %v9483_v16, %v9512_v23 }
 0x89f   : > { %v9632_v8 = vpop.permute.xlu1 %6050  ;;  %v9634_v30 = vpop.permute.xlu0 %5840  ;;  %v9693_v61 = vrot.slane %v4259_v35, %v6516_v36  ;;  %v4626_v40 = vcombine.high %v4608_v21, %v10625_v31  ;;  %v4562_v35 = vcombine.high %v9334_v25, %v9362_v58  ;;  %v6100_v25 = vsel %vm438_vm7, %v9043_v34, %v9514_v37 }
 0x8a0   : > { %v9663_v19 = vrot.slane %v4359_v5, %v6744_v12  ;;  %v4775_v22 = vcombine.low %v9671_v53, %v9684_v29 }
 0x8a1   : > { %4662 = vrot.lane.b32.xlu1 %v4608_v21, %s6412_s24  ;;  %4630 = vrot.lane.b32.xlu0 %v4557_v32, %s6415_s27 }
 0x8a2   : > { %10683 = vst [vmem:[#allocation96_spill] sm:$0xff] %v9663_v19  ;;  %v4391_v27 = vcombine.high %v9663_v19, %v10625_v31  ;;  %v9698_v19 = vrot.slane %v4275_v15, %v6516_v36  ;;  %v4783_v21 = vrot.slane %v4775_v22, %v6744_v12  ;;  %v4861_v15 = vcombine.high %v4851_v3, %v10625_v31 }
 0x8a3   : > { %v9646_v50 = vpop.permute.xlu1 %5570  ;;  %v6083_v54 = vpop.permute.xlu0 %6082 }
 0x8a4   : > { %10681 = vst [vmem:[#allocation52_spill] sm:$0xff] %v9646_v50  ;;  %v5096_v50 = vrot.slane %v5082_v2, %v6744_v12 }
 0x8a5   : > { %4904 = vrot.lane.b32.xlu1 %v4851_v3, %s6413_s25  ;;  %4872 = vrot.lane.b32.xlu0 %v4792_v14, %s6416_s28  ;;  %v4360_v3 = vcombine.high %v9630_v44, %v9640_v46 }
 0x8a7   : > { %v9656_v32 = vpop.permute.xlu1 %5812  ;;  %v9658_v18 = vpop.permute.xlu0 %5602 }
 0x8a8   : > { %10682 = vst [vmem:[#allocation87_spill] sm:$0xff] %v9658_v18 }
 0x8a9   : > { %5150 = vrot.lane.b32.xlu1 %v5096_v50, %s6414_s26  ;;  %5118 = vrot.lane.b32.xlu0 %v5031_v59, %s6417_s29  ;;  %v4540_v59 = vrot.slane %v4526_v41, %v6744_v12 }
 0x8ab   : > { %v9677_v2 = vpop.permute.xlu1 %6054  ;;  %v9679_v5 = vpop.permute.xlu0 %5844 }
 0x8ad   : > { %5360 = vrot.lane.b32.xlu0 %v5266_v11, %s6418_s30  ;;  %4424 = vrot.lane.b32.xlu1 %v4391_v27, %s6415_s27  ;;  %v5014_v11 = vcombine.high %v9570_v51, %v9552_v48  ;;  %v4291_v27 = vcombine.low %v9693_v61, %v9698_v19  ;;  %v5100_v48 = vcombine.high %v5096_v50, %v10625_v31 }
 0x8ae   : > { %v9724_v51 = vrot.slane %v4562_v35, %v6516_v36 }
 0x8af   : > { %v5365_v14 = vpop.permute.xlu1 %5364  ;;  %v6087_v26 = vpop.permute.xlu0 %6086  ;;  %v5028_v58 = vrot.slane %v5014_v11, %v6744_v12 }
 0x8b1   : > { %4634 = vrot.lane.b32.xlu0 %v4540_v59, %s6412_s24  ;;  %4666 = vrot.lane.b32.xlu1 %v4626_v40, %s6416_s28  ;;  %v4578_v40 = vcombine.high %v9353_v38, %v9374_v20  ;;  %v6101_v20 = vsel %vm440_vm8, %v6100_v25, %v9534_v28 }
 0x8b2   : > { %v6102_v34 = vsel %vm442_vm9, %v6101_v20, %v9560_v33  ;;  %v4374_v33 = vrot.slane %v4360_v3, %v6744_v12  ;;  %v4558_v20 = vcombine.high %v4540_v59, %v10625_v31  ;;  %v4793_v59 = vcombine.high %v4783_v21, %v10625_v31 }
 0x8b3   : > { %v9708_v18 = vpop.permute.xlu1 %5606  ;;  %v9710_v41 = vpop.permute.xlu0 %5574  ;;  %v9740_v37 = vrot.slane %v4578_v40, %v6516_v36  ;;  %v6103_v50 = vsel %vm444_vm10, %v6102_v34, %v9594_v63  ;;  %v5398_v40 = vsel %vm438_vm7, %v9226_v39, %v5365_v14  ;;  %v4292_v39 = vcombine.high %v9693_v61, %v9698_v19 }
 0x8b4   : > { %v6104_v28 = vsel %vm446_vm11, %v6103_v50, %v6083_v54  ;;  %v4844_v54 = vcombine.high %v9607_v49, %v9621_v57  ;;  %v4510_v49 = vcombine.high %v9400_v0, %v9420_v4  ;;  %v6093_v0 = vsel %vm438_vm7, %v9064_v6, %v9530_v60 }
 0x8b5   : > { %4876 = vrot.lane.b32.xlu0 %v4783_v21, %s6413_s25  ;;  %4908 = vrot.lane.b32.xlu1 %v4861_v15, %s6417_s29  ;;  %v9735_v15 = vrot.slane %v4291_v27, %v6744_v12  ;;  %v4609_v46 = vcombine.low %v9724_v51, %v9740_v37  ;;  %v6105_v44 = vsel %vm448_vm12, %v6104_v28, %v6087_v26 }
 0x8b6   : > { %v4494_v26 = vcombine.high %v9380_v52, %v9409_v56  ;;  %v4858_v14 = vrot.slane %v4844_v54, %v6744_v12  ;;  %v9787_v4 = vrot.slane %v4510_v49, %v6516_v36  ;;  %v6094_v61 = vsel %vm440_vm8, %v6093_v0, %v9558_v24 }
 0x8b7   : > { %v9730_v38 = vpop.permute.xlu1 %5848  ;;  %v9732_v22 = vpop.permute.xlu0 %5816  ;;  %v4323_v27 = vcombine.high %v9735_v15, %v10625_v31  ;;  %v4617_v3 = vrot.slane %v4609_v46, %v6744_v12  ;;  %v4306_v21 = vrot.slane %v4292_v39, %v6744_v12  ;;  %v5032_v6 = vcombine.high %v5028_v58, %v10625_v31 }
 0x8b8   : > { %v9773_v52 = vrot.slane %v4494_v26, %v6516_v36  ;;  %v6095_v60 = vsel %vm442_vm9, %v6094_v61, %v9596_v13  ;;  %v4776_v24 = vcombine.high %v9671_v53, %v9684_v29  ;;  %v4344_v26 = vcombine.high %v9437_v55, %v9464_v17 }
 0x8b9   : > { %5122 = vrot.lane.b32.xlu0 %v5028_v58, %s6414_s26  ;;  %5154 = vrot.lane.b32.xlu1 %v5100_v48, %s6418_s30  ;;  %v6096_v46 = vsel %vm444_vm10, %v6095_v60, %v9632_v8  ;;  %v4392_v8 = vcombine.high %v4374_v33, %v10625_v31  ;;  %v4324_v49 = vcombine.high %v4306_v21, %v10625_v31 }
 0x8ba   : > { %v4541_v19 = vcombine.low %v9773_v52, %v9787_v4  ;;  %v4790_v29 = vrot.slane %v4776_v24, %v6744_v12  ;;  %v9833_v17 = vrot.slane %v4344_v26, %v6516_v36  ;;  %v10686_v24 = vld [vmem:[#allocation32_spill] sm:$0xff]  ;;  %v10688_v26 = vld [vmem:[#allocation39_spill] sm:$0xff] }
 0x8bb   : > { %v6091_v11 = vpop.permute.xlu1 %6090  ;;  %v6059_v35 = vpop.permute.xlu0 %6058 }
 0x8bc   : > { %v6106_v63 = vsel %vm450_vm13, %v6105_v44, %v6091_v11  ;;  %v6097_v44 = vsel %vm446_vm11, %v6096_v46, %v9677_v2  ;;  %v4328_v11 = vcombine.high %v9424_v7, %v9447_v9 }
 0x8bd   : > { %4428 = vrot.lane.b32.xlu1 %v4374_v33, %s6412_s24  ;;  %4396 = vrot.lane.b32.xlu0 %v4323_v27, %s6415_s27  ;;  %v6098_v58 = vsel %vm448_vm12, %v6097_v44, %v6059_v35  ;;  %v4627_v35 = vcombine.high %v4617_v3, %v10625_v31  ;;  %v4862_v33 = vcombine.high %v4858_v14, %v10625_v31  ;;  %v10687_v44 = vld [vmem:[#allocation29_spill] sm:$0xff] }
 0x8be   : > { %6347 = vmatprep.subr.msk.mxu0 %vm459_vm6, %v6106_v63  ;;  %v4549_v63 = vrot.slane %v4541_v19, %v6744_v12  ;;  %v9821_v7 = vrot.slane %v4328_v11, %v6516_v36  ;;  %v10685_v19 = vld [vmem:[#allocation68_spill] sm:$0xff]  ;;  %v4094_v11 = vcombine.high %v10687_v44, %v10686_v24  ;;  %v6419_v44 = vmov 0  }
 0x8bf   : > { %v5369_v25 = vpop.permute.xlu1 %5368  ;;  %v5337_v48 = vpop.permute.xlu0 %5336  ;;  %6389 = vset.pattern.permute.xlu0 %v6419_v44 }
 0x8c0   : > { %v9766_v34 = vsel %vm440_vm8, %v5398_v40, %v5369_v25  ;;  %v5391_v9 = vsel %vm438_vm7, %v9290_v47, %v5337_v48  ;;  %v5866_v47 = vsel %vm438_vm7, %v9087_v45, %v9540_v1  ;;  %v4375_v40 = vcombine.low %v9821_v7, %v9833_v17 }
 0x8c1   : > { %4670 = vrot.lane.b32.xlu1 %v4617_v3, %s6413_s25  ;;  %4638 = vrot.lane.b32.xlu0 %v4558_v20, %s6416_s28  ;;  %v4260_v25 = vcombine.high %v9471_v62, %v9496_v43  ;;  %v5867_v48 = vsel %vm440_vm8, %v5866_v47, %v9575_v42  ;;  %v4276_v1 = vcombine.high %v9483_v16, %v9512_v23 }
 0x8c2   : > { %v5868_v45 = vsel %vm442_vm9, %v5867_v48, %v9634_v30  ;;  %v4610_v62 = vcombine.high %v9724_v51, %v9740_v37  ;;  %v4559_v23 = vcombine.high %v4549_v63, %v10625_v31  ;;  %v10684_v51 = vld [vmem:[#allocation31_spill] sm:$0xff] }
 0x8c3   : > { %v9777_v56 = vpop.permute.xlu1 %5610  ;;  %v9779_v57 = vpop.permute.xlu0 %5578  ;;  %v5869_v39 = vsel %vm444_vm10, %v5868_v45, %v9679_v5  ;;  %v9865_v42 = vrot.slane %v4260_v25, %v6516_v36  ;;  %v4383_v5 = vrot.slane %v4375_v40, %v6744_v12  ;;  %v4290_v0 = vrot.slane %v4276_v1, %v6516_v36 }
 0x8c4   : > { %v5870_v43 = vsel %vm446_vm11, %v5869_v39, %v9730_v38  ;;  %v4110_v38 = vcombine.high %v10684_v51, %v8762_v10  ;;  %v4624_v60 = vrot.slane %v4610_v62, %v6744_v12  ;;  %v10694_v51 = vld [vmem:[#allocation87_spill] sm:$0xff] }
 0x8c5   : > { %4912 = vrot.lane.b32.xlu1 %v4858_v14, %s6414_s26  ;;  %4880 = vrot.lane.b32.xlu0 %v4793_v59, %s6417_s29  ;;  %v4307_v37 = vcombine.low %v9865_v42, %v4290_v0 }
 0x8c6   : > { %v4124_v10 = vrot.slane %v4110_v38, %v6516_v36 }
 0x8c7   : > { %v5853_v50 = vpop.permute.xlu1 %5852  ;;  %v9795_v28 = vpop.permute.xlu0 %5820 }
 0x8c8   : > { %v5871_v30 = vsel %vm448_vm12, %v5870_v43, %v5853_v50  ;;  %v10691_v43 = vld [vmem:[#allocation74_spill] sm:$0xff] }
 0x8c9   : > { %4400 = vrot.lane.b32.xlu1 %v4306_v21, %s6412_s24  ;;  %5126 = vrot.lane.b32.xlu0 %v5032_v6, %s6418_s30  ;;  %v4794_v6 = vcombine.high %v4790_v29, %v10625_v31 }
 0x8cb   : > { %v5131_v27 = vpop.permute.xlu1 %5130  ;;  %v6063_v13 = vpop.permute.xlu0 %6062 }
 0x8cc   : > { %v6099_v54 = vsel %vm450_vm13, %v6098_v58, %v6063_v13  ;;  %v5164_v61 = vsel %vm438_vm7, %v10685_v19, %v5131_v27  ;;  %v4542_v58 = vcombine.high %v9773_v52, %v9787_v4  ;;  %v10690_v52 = vld [vmem:[#allocation63_spill] sm:$0xff] }
 0x8cd   : > { %4642 = vrot.lane.b32.xlu1 %v4549_v63, %s6413_s25  ;;  %4432 = vrot.lane.b32.xlu0 %v4392_v8, %s6416_s28  ;;  %v4393_v63 = vcombine.high %v4383_v5, %v10625_v31  ;;  %v4315_v8 = vrot.slane %v4307_v37, %v6744_v12 }
 0x8ce   : > { %6348 = vmatpush2.msk.msra.mxu0 %vm459_vm6, %v6099_v54  ;;  %v4108_v54 = vrot.slane %v4094_v11, %v6516_v36  ;;  %v4556_v40 = vrot.slane %v4542_v58, %v6744_v12 }
 0x8cf   : > { %v9825_v53 = vpop.permute.xlu1 %5372  ;;  %v5341_v2 = vpop.permute.xlu0 %5340  ;;  %v4325_v62 = vcombine.high %v4315_v8, %v10625_v31 }
 0x8d0   : > { %v9830_v55 = vsel %vm440_vm8, %v5391_v9, %v5341_v2  ;;  %v10689_v9 = vld [vmem:[#allocation97_spill] sm:$0xff] }
 0x8d1   : > { %4884 = vrot.lane.b32.xlu1 %v4790_v29, %s6414_s26  ;;  %4674 = vrot.lane.b32.xlu0 %v4627_v35, %s6417_s29  ;;  %v5859_v2 = vsel %vm438_vm7, %v10689_v9, %v10688_v26  ;;  %v4141_v29 = vcombine.low %v4108_v54, %v4124_v10 }
 0x8d2   : > { %v5860_v4 = vsel %vm440_vm8, %v5859_v2, %v10690_v52 }
 0x8d3   : > { %v9847_v3 = vpop.permute.xlu1 %5614  ;;  %v9849_v20 = vpop.permute.xlu0 %5582  ;;  %v5861_v36 = vsel %vm442_vm9, %v5860_v4, %v9656_v32  ;;  %v4149_v32 = vrot.slane %v4141_v29, %v6744_v12  ;;  %v6163_v29 = vld [vmem:[%s10141_s2] sm:$0xff] }
 0x8d4   : > { %v5862_v25 = vsel %vm444_vm10, %v5861_v36, %v9732_v22 }
 0x8d5   : > { %4404 = vrot.lane.b32.xlu1 %v4324_v49, %s6416_s28  ;;  %4916 = vrot.lane.b32.xlu0 %v4862_v33, %s6418_s30  ;;  %v4628_v33 = vcombine.high %v4624_v60, %v10625_v31  ;;  %v5863_v48 = vsel %vm446_vm11, %v5862_v25, %v9795_v28  ;;  %v4376_v49 = vcombine.high %v9821_v7, %v9833_v17 }
 0x8d6   : > { %v4308_v28 = vcombine.high %v9865_v42, %v4290_v0  ;;  %v10693_v42 = vld [vmem:[#allocation94_spill] sm:$0xff] }
 0x8d7   : > { %v5857_v14 = vpop.permute.xlu1 %5856  ;;  %v5825_v16 = vpop.permute.xlu0 %5824 }
 0x8d8   : > { %v5872_v59 = vsel %vm450_vm13, %v5871_v30, %v5857_v14  ;;  %v5864_v45 = vsel %vm448_vm12, %v5863_v48, %v5825_v16  ;;  %v4560_v14 = vcombine.high %v4556_v40, %v10625_v31  ;;  %v4390_v16 = vrot.slane %v4376_v49, %v6744_v12 }
 0x8d9   : > { %4646 = vrot.lane.b32.xlu1 %v4559_v23, %s6417_s29  ;;  %4436 = vrot.lane.b32.xlu0 %v4383_v5, %s6413_s25  ;;  %v4142_v5 = vcombine.high %v4108_v54, %v4124_v10 }
 0x8da   : > { %6349 = vmatprep.subr.msk.mxu0 %vm459_vm6, %v5872_v59  ;;  %v10692_v59 = vld [vmem:[#allocation88_spill] sm:$0xff] }
 0x8db   : > { %v5135_v50 = vpop.permute.xlu1 %5134  ;;  %v5103_v21 = vpop.permute.xlu0 %5102  ;;  %v5632_v0 = vsel %vm438_vm7, %v10693_v42, %v10692_v59 }
 0x8dc   : > { %v9883_v46 = vsel %vm440_vm8, %v5164_v61, %v5135_v50  ;;  %v5157_v7 = vsel %vm438_vm7, %v10691_v43, %v5103_v21  ;;  %v5633_v38 = vsel %vm440_vm8, %v5632_v0, %v10694_v51  ;;  %v4322_v61 = vrot.slane %v4308_v28, %v6744_v12  ;;  %v6112_v21 = vld [vmem:[%s10140_s1 + $0x8] sm:$0xff] }
 0x8dd   : > { %4888 = vrot.lane.b32.xlu1 %v4794_v6, %s6418_s30  ;;  %4678 = vrot.lane.b32.xlu0 %v4624_v60, %s6414_s26  ;;  %v4159_v50 = vcombine.high %v4149_v32, %v10625_v31  ;;  %v5634_v6 = vsel %vm442_vm9, %v5633_v38, %v9708_v18  ;;  %v4394_v18 = vcombine.high %v4390_v16, %v10625_v31 }
 0x8de   : > { %6310 = vmatprep.mubr.msk.f32.mxu0 %vm6169_vm14, %v6112_v21  ;;  %v5635_v60 = vsel %vm444_vm10, %v5634_v6, %v9777_v56  ;;  %v10695_v56 = vld [vmem:[#allocation56_spill] sm:$0xff]  ;;  %v4326_v2 = vcombine.high %v4322_v61, %v10625_v31 }
 0x8df   : > { %v9892_v27 = vpop.permute.xlu1 %5376  ;;  %v9894_v13 = vpop.permute.xlu0 %5344  ;;  %v5636_v24 = vsel %vm446_vm11, %v5635_v60, %v9847_v3 }
 0x8e1   : > { %4440 = vrot.lane.b32.xlu1 %v4393_v63, %s6417_s29  ;;  %4408 = vrot.lane.b32.xlu0 %v4315_v8, %s6413_s25  ;;  %v4156_v63 = vrot.slane %v4142_v5, %v6744_v12 }
 0x8e3   : > { %v5619_v35 = vpop.permute.xlu1 %5618  ;;  %v9906_v47 = vpop.permute.xlu0 %5586  ;;  %v4160_v9 = vcombine.high %v4156_v63, %v10625_v31 }
 0x8e4   : > { %v5637_v11 = vsel %vm448_vm12, %v5636_v24, %v5619_v35  ;;  %v10696_v35 = vld [vmem:[#allocation52_spill] sm:$0xff] }
 0x8e5   : > { %4682 = vrot.lane.b32.xlu1 %v4628_v33, %s6418_s30  ;;  %4650 = vrot.lane.b32.xlu0 %v4556_v40, %s6414_s26  ;;  %v10697_v33 = vld [vmem:[#allocation67_spill] sm:$0xff] }
 0x8e6   : > { %v5625_v40 = vsel %vm438_vm7, %v10697_v33, %v10696_v35 }
 0x8e7   : > { %v4893_v1 = vpop.permute.xlu1 %4892  ;;  %v5829_v39 = vpop.permute.xlu0 %5828  ;;  %v5626_v31 = vsel %vm440_vm8, %v5625_v40, %v9710_v41  ;;  %v10698_v41 = vld [vmem:[#allocation79_spill] sm:$0xff] }
 0x8e8   : > { %v5865_v22 = vsel %vm450_vm13, %v5864_v45, %v5829_v39  ;;  %v4926_v3 = vsel %vm438_vm7, %v10695_v56, %v4893_v1  ;;  %v5627_v48 = vsel %vm442_vm9, %v5626_v31, %v9779_v57 }
 0x8e9   : > { %4412 = vrot.lane.b32.xlu1 %v4325_v62, %s6417_s29  ;;  %4202 = vrot.lane.b32.xlu0 %v4149_v32, %s6413_s25  ;;  %v5628_v49 = vsel %vm444_vm10, %v5627_v48, %v9849_v20 }
 0x8ea   : > { %6350 = vmatpush2.msk.msra.mxu0 %vm459_vm6, %v5865_v22  ;;  %v5629_v45 = vsel %vm446_vm11, %v5628_v49, %v9906_v47  ;;  %v5400_v47 = vsel %vm442_vm9, %v9766_v34, %v9825_v53 }
 0x8eb   : > { %v9930_v17 = vpop.permute.xlu1 %5138  ;;  %v5107_v30 = vpop.permute.xlu0 %5106 }
 0x8ec   : > { %v9935_v23 = vsel %vm440_vm8, %v5157_v7, %v5107_v30  ;;  %v5401_v30 = vsel %vm444_vm10, %v5400_v47, %v9892_v27  ;;  %v5393_v27 = vsel %vm442_vm9, %v9830_v55, %v9894_v13  ;;  %v5166_v55 = vsel %vm442_vm9, %v9883_v46, %v9930_v17 }
 0x8ed   : > { %4654 = vrot.lane.b32.xlu1 %v4560_v14, %s6418_s30  ;;  %4444 = vrot.lane.b32.xlu0 %v4390_v16, %s6414_s26 }
 0x8ef   : > { %v5381_v37 = vpop.permute.xlu1 %5380  ;;  %v9944_v19 = vpop.permute.xlu0 %5348 }
 0x8f0   : > { %v5402_v14 = vsel %vm446_vm11, %v5401_v30, %v5381_v37  ;;  %v5394_v37 = vsel %vm444_vm10, %v5393_v27, %v9944_v19 }
 0x8f1   : > { %4416 = vrot.lane.b32.xlu1 %v4322_v61, %s6414_s26  ;;  %4206 = vrot.lane.b32.xlu0 %v4159_v50, %s6417_s29 }
 0x8f3   : > { %v5623_v10 = vpop.permute.xlu1 %5622  ;;  %v5591_v58 = vpop.permute.xlu0 %5590 }
 0x8f4   : > { %v5638_v8 = vsel %vm450_vm13, %v5637_v11, %v5623_v10  ;;  %v5630_v1 = vsel %vm448_vm12, %v5629_v45, %v5591_v58 }
 0x8f5   : > { %4210 = vrot.lane.b32.xlu1 %v4156_v63, %s6414_s26  ;;  %4448 = vrot.lane.b32.xlu0 %v4394_v18, %s6418_s30 }
 0x8f6   : > { %6351 = vmatprep.subr.msk.mxu0 %vm459_vm6, %v5638_v8 }
 0x8f7   : > { %v4897_v54 = vpop.permute.xlu1 %4896  ;;  %v4865_v26 = vpop.permute.xlu0 %4864 }
 0x8f8   : > { %v9971_v12 = vsel %vm440_vm8, %v4926_v3, %v4897_v54  ;;  %v4919_v22 = vsel %vm438_vm7, %v10698_v41, %v4865_v26 }
 0x8f9   : > { %4214 = vrot.lane.b32.xlu1 %v4160_v9, %s6418_s30  ;;  %4420 = vrot.lane.b32.xlu0 %v4326_v2, %s6418_s30 }
 0x8fb   : > { %v5143_v52 = vpop.permute.xlu1 %5142  ;;  %v5111_v4 = vpop.permute.xlu0 %5110 }
 0x8fc   : > { %v5167_v13 = vsel %vm444_vm10, %v5166_v55, %v5143_v52  ;;  %v5159_v17 = vsel %vm442_vm9, %v9935_v23, %v5111_v4 }
 0x8fd   : > { %6166 = vperm.xlu0 %6389, %v6163_v29  }
 0x8ff   : > { %v5385_v36 = vpop.permute.xlu1 %5384  ;;  %v5353_v25 = vpop.permute.xlu0 %5352 }
 0x900   : > { %v5403_v16 = vsel %vm448_vm12, %v5402_v14, %v5385_v36  ;;  %v5395_v50 = vsel %vm446_vm11, %v5394_v37, %v5353_v25 }
 0x903   : > { %v9990_v39 = vpop.permute.xlu1 %4658  ;;  %v5595_v62 = vpop.permute.xlu0 %5594 }
 0x904   : > { %v5631_v32 = vsel %vm450_vm13, %v5630_v1, %v5595_v62 }
 0x905   : > { %6352 = vmatpush2.msk.msra.mxu0 %vm459_vm6, %v5631_v32 }
 0x907   : > { %v4901_v28 = vpop.permute.xlu1 %4900  ;;  %v4869_v57 = vpop.permute.xlu0 %4868 }
 0x908   : > { %v9997_v43 = vsel %vm440_vm8, %v4919_v22, %v4869_v57  ;;  %v4928_v23 = vsel %vm442_vm9, %v9971_v12, %v4901_v28 }
 0x90b   : > { %v5147_v20 = vpop.permute.xlu1 %5146  ;;  %v5115_v7 = vpop.permute.xlu0 %5114 }
 0x90c   : > { %v5168_v19 = vsel %vm446_vm11, %v5167_v13, %v5147_v20  ;;  %v5160_v29 = vsel %vm444_vm10, %v5159_v17, %v5115_v7  ;;  %v10705_v17 = vld [vmem:[#allocation38_spill] sm:$0xff] }
 0x90f   : > { %v5389_v5 = vpop.permute.xlu1 %5388  ;;  %v5357_v59 = vpop.permute.xlu0 %5356 }
 0x910   : > { %v5404_v42 = vsel %vm450_vm13, %v5403_v16, %v5389_v5  ;;  %v5396_v21 = vsel %vm448_vm12, %v5395_v50, %v5357_v59  ;;  %v10699_v16 = vld [vmem:[#allocation80_spill] sm:$0xff] }
 0x911   : > { %6353 = vmatprep.subr.msk.mxu0 %vm459_vm6, %v5404_v42  ;;  %v4692_v5 = vsel %vm438_vm7, %v10699_v16, %v9990_v39  ;;  %v10700_v39 = vld [vmem:[#allocation41_spill] sm:$0xff] }
 0x913   : > { %v10008_v0 = vpop.permute.xlu1 %4662  ;;  %v10010_v51 = vpop.permute.xlu0 %4630 }
 0x914   : > { %v4693_v59 = vsel %vm440_vm8, %v4692_v5, %v10008_v0  ;;  %v4685_v0 = vsel %vm438_vm7, %v10700_v39, %v10010_v51  ;;  %v10702_v51 = vld [vmem:[#allocation43_spill] sm:$0xff] }
 0x917   : > { %v4905_v38 = vpop.permute.xlu1 %4904  ;;  %v4873_v61 = vpop.permute.xlu0 %4872 }
 0x918   : > { %v4929_v4 = vsel %vm444_vm10, %v4928_v23, %v4905_v38  ;;  %v4921_v20 = vsel %vm442_vm9, %v9997_v43, %v4873_v61 }
 0x91b   : > { %v5151_v34 = vpop.permute.xlu1 %5150  ;;  %v5119_v53 = vpop.permute.xlu0 %5118 }
 0x91c   : > { %v5169_v63 = vsel %vm448_vm12, %v5168_v19, %v5151_v34  ;;  %v5161_v52 = vsel %vm446_vm11, %v5160_v29, %v5119_v53 }
 0x91f   : > { %v10019_v6 = vpop.permute.xlu1 %4424  ;;  %v5361_v60 = vpop.permute.xlu0 %5360 }
 0x920   : > { %v5397_v24 = vsel %vm450_vm13, %v5396_v21, %v5361_v60 }
 0x921   : > { %6354 = vmatpush2.msk.msra.mxu0 %vm459_vm6, %v5397_v24 }
 0x923   : > { %v4667_v44 = vpop.permute.xlu1 %4666  ;;  %v4635_v11 = vpop.permute.xlu0 %4634 }
 0x924   : > { %v4694_v38 = vsel %vm442_vm9, %v4693_v59, %v4667_v44  ;;  %v4686_v21 = vsel %vm440_vm8, %v4685_v0, %v4635_v11 }
 0x927   : > { %v4909_v10 = vpop.permute.xlu1 %4908  ;;  %v4877_v58 = vpop.permute.xlu0 %4876 }
 0x928   : > { %v4930_v45 = vsel %vm446_vm11, %v4929_v4, %v4909_v10  ;;  %v4922_v7 = vsel %vm444_vm10, %v4921_v20, %v4877_v58  ;;  %v10710_v20 = vld [vmem:[#allocation42_spill] sm:$0xff] }
 0x92b   : > { %v5155_v18 = vpop.permute.xlu1 %5154  ;;  %v5123_v8 = vpop.permute.xlu0 %5122 }
 0x92c   : > { %v5170_v56 = vsel %vm450_vm13, %v5169_v63, %v5155_v18  ;;  %v5162_v35 = vsel %vm448_vm12, %v5161_v52, %v5123_v8  ;;  %v10701_v18 = vld [vmem:[#allocation37_spill] sm:$0xff]  ;;  %v10703_v8 = vld [vmem:[#allocation96_spill] sm:$0xff] }
 0x92d   : > { %6355 = vmatprep.subr.msk.mxu0 %vm459_vm6, %v5170_v56  ;;  %v4217_v11 = vsel %vm438_vm7, %v10702_v51, %v10701_v18  ;;  %v4458_v56 = vsel %vm438_vm7, %v10703_v8, %v10019_v6  ;;  %v10708_v6 = vld [vmem:[#allocation46_spill] sm:$0xff] }
 0x92f   : > { %v10031_v3 = vpop.permute.xlu1 %4428  ;;  %v10033_v54 = vpop.permute.xlu0 %4396 }
 0x933   : > { %v4671_v26 = vpop.permute.xlu1 %4670  ;;  %v4639_v9 = vpop.permute.xlu0 %4638 }
 0x934   : > { %v4695_v61 = vsel %vm444_vm10, %v4694_v38, %v4671_v26  ;;  %v4687_v44 = vsel %vm442_vm9, %v4686_v21, %v4639_v9  ;;  %v4459_v26 = vsel %vm440_vm8, %v4458_v56, %v10031_v3  ;;  %v4451_v3 = vsel %vm438_vm7, %v9735_v15, %v10033_v54  ;;  %v6111_v38 = vld [vmem:[%s10140_s1] sm:$0xff] }
 0x937   : > { %v4913_v2 = vpop.permute.xlu1 %4912  ;;  %v4881_v46 = vpop.permute.xlu0 %4880 }
 0x938   : > { %v4931_v1 = vsel %vm448_vm12, %v4930_v45, %v4913_v2  ;;  %v4923_v12 = vsel %vm446_vm11, %v4922_v7, %v4881_v46  ;;  %v10704_v46 = vld [vmem:[#allocation40_spill] sm:$0xff] }
 0x939   : > { %v4224_v29 = vsel %vm438_vm7, %v10705_v17, %v10704_v46 }
 0x93b   : > { %v10040_v33 = vpop.permute.xlu1 %4400  ;;  %v5127_v40 = vpop.permute.xlu0 %5126 }
 0x93c   : > { %v5163_v31 = vsel %vm450_vm13, %v5162_v35, %v5127_v40  ;;  %v10706_v35 = vld [vmem:[#allocation77_spill] sm:$0xff] }
 0x93d   : > { %6356 = vmatpush2.msk.msra.mxu0 %vm459_vm6, %v5163_v31  ;;  %v4218_v40 = vsel %vm440_vm8, %v4217_v11, %v10706_v35  ;;  %v10707_v31 = vld [vmem:[#allocation49_spill] sm:$0xff] }
 0x93f   : > { %v4643_v36 = vpop.permute.xlu1 %4642  ;;  %v4433_v25 = vpop.permute.xlu0 %4432 }
 0x940   : > { %v4688_v10 = vsel %vm444_vm10, %v4687_v44, %v4643_v36  ;;  %v4460_v52 = vsel %vm442_vm9, %v4459_v26, %v4433_v25  ;;  %v4225_v36 = vsel %vm440_vm8, %v4224_v29, %v10707_v31  ;;  %v4452_v25 = vsel %vm440_vm8, %v4451_v3, %v10040_v33  ;;  %v10711_v33 = vld [vmem:[#allocation85_spill] sm:$0xff] }
 0x943   : > { %v4885_v48 = vpop.permute.xlu1 %4884  ;;  %v4675_v49 = vpop.permute.xlu0 %4674 }
 0x944   : > { %v4924_v28 = vsel %vm448_vm12, %v4923_v12, %v4885_v48  ;;  %v4696_v34 = vsel %vm446_vm11, %v4695_v61, %v4675_v49  ;;  %v4219_v49 = vsel %vm442_vm9, %v4218_v40, %v10708_v6  ;;  %v10713_v61 = vld [vmem:[#allocation44_spill] sm:$0xff] }
 0x945   : > { %v4220_v7 = vsel %vm444_vm10, %v4219_v49, %v10710_v20 }
 0x946   : > { %v4221_v12 = vsel %vm446_vm11, %v4220_v7, %v10711_v33 }
 0x947   : > { %v4405_v62 = vpop.permute.xlu1 %4404  ;;  %v4917_v32 = vpop.permute.xlu0 %4916 }
 0x948   : > { %v4932_v41 = vsel %vm450_vm13, %v4931_v1, %v4917_v32  ;;  %v4453_v32 = vsel %vm442_vm9, %v4452_v25, %v4405_v62 }
 0x949   : > { %6357 = vmatprep.subr.msk.mxu0 %vm459_vm6, %v4932_v41  ;;  %v10709_v41 = vld [vmem:[#allocation72_spill] sm:$0xff] }
 0x94b   : > { %v4647_v22 = vpop.permute.xlu1 %4646  ;;  %v4437_v57 = vpop.permute.xlu0 %4436 }
 0x94c   : > { %v4689_v58 = vsel %vm446_vm11, %v4688_v10, %v4647_v22  ;;  %v4461_v48 = vsel %vm444_vm10, %v4460_v52, %v4437_v57  ;;  %v4226_v22 = vsel %vm442_vm9, %v4225_v36, %v10709_v41 }
 0x94f   : > { %v4889_v47 = vpop.permute.xlu1 %4888  ;;  %v4679_v30 = vpop.permute.xlu0 %4678 }
 0x950   : > { %v4925_v14 = vsel %vm450_vm13, %v4924_v28, %v4889_v47  ;;  %v4697_v53 = vsel %vm448_vm12, %v4696_v34, %v4679_v30 }
 0x951   : > { %6358 = vmatpush2.msk.msra.mxu0 %vm459_vm6, %v4925_v14 }
 0x953   : > { %v4441_v43 = vpop.permute.xlu1 %4440  ;;  %v4409_v42 = vpop.permute.xlu0 %4408 }
 0x954   : > { %v4462_v23 = vsel %vm446_vm11, %v4461_v48, %v4441_v43  ;;  %v4454_v15 = vsel %vm444_vm10, %v4453_v32, %v4409_v42  ;;  %v10712_v43 = vld [vmem:[#allocation50_spill] sm:$0xff] }
 0x955   : > { %v4222_v42 = vsel %vm448_vm12, %v4221_v12, %v10712_v43 }
 0x956   : > { %v4223_v34 = vsel %vm450_vm13, %v4222_v42, %v10713_v61 }
 0x957   : > { %v4683_v27 = vpop.permute.xlu1 %4682  ;;  %v4651_v37 = vpop.permute.xlu0 %4650 }
 0x958   : > { %v4698_v50 = vsel %vm450_vm13, %v4697_v53, %v4683_v27  ;;  %v4690_v55 = vsel %vm448_vm12, %v4689_v58, %v4651_v37 }
 0x959   : > { %6359 = vmatprep.subr.msk.mxu0 %vm459_vm6, %v4698_v50 }
 0x95b   : > { %v4413_v60 = vpop.permute.xlu1 %4412  ;;  %v4203_v24 = vpop.permute.xlu0 %4202 }
 0x95c   : > { %v4227_v54 = vsel %vm444_vm10, %v4226_v22, %v4203_v24  ;;  %v4455_v62 = vsel %vm446_vm11, %v4454_v15, %v4413_v60 }
 0x95f   : > { %v4655_v13 = vpop.permute.xlu1 %4654  ;;  %v4445_v19 = vpop.permute.xlu0 %4444 }
 0x960   : > { %v4691_v63 = vsel %vm450_vm13, %v4690_v55, %v4655_v13  ;;  %v4463_v4 = vsel %vm448_vm12, %v4462_v23, %v4445_v19 }
 0x961   : > { %6360 = vmatpush2.msk.msra.mxu0 %vm459_vm6, %v4691_v63 }
 0x963   : > { %v4417_v9 = vpop.permute.xlu1 %4416  ;;  %v4207_v2 = vpop.permute.xlu0 %4206 }
 0x964   : > { %v4228_v28 = vsel %vm446_vm11, %v4227_v54, %v4207_v2  ;;  %v4456_v47 = vsel %vm448_vm12, %v4455_v62, %v4417_v9 }
 0x967   : > { %v4211_v45 = vpop.permute.xlu1 %4210  ;;  %v4449_v1 = vpop.permute.xlu0 %4448 }
 0x968   : > { %v4464_v57 = vsel %vm450_vm13, %v4463_v4, %v4449_v1  ;;  %v4229_v30 = vsel %vm448_vm12, %v4228_v28, %v4211_v45 }
 0x969   : > { %6361 = vmatprep.subr.msk.mxu0 %vm459_vm6, %v4464_v57 }
 0x96b   : > { %v4215_v14 = vpop.permute.xlu1 %4214  ;;  %v4421_v16 = vpop.permute.xlu0 %4420 }
 0x96c   : > { %v4230_v5 = vsel %vm450_vm13, %v4229_v30, %v4215_v14  ;;  %v4457_v59 = vsel %vm450_vm13, %v4456_v47, %v4421_v16 }
 0x96d   : > { %6362 = vmatpush2.msk.msra.mxu0 %vm459_vm6, %v4457_v59 }
 0x96e   : > { %6363 = vmatprep.subr.msk.mxu0 %vm459_vm6, %v4230_v5 }
 0x96f   : > { %6364 = vmatpush2.msk.msra.mxu0 %vm459_vm6, %v4223_v34 }
 0x970   : > { %6238 = vmatmul.mubr.f32.vlgmr.msra.gmra.mxu0 %v6111_v38 }
 0x978   : > { %v6167_v53 = vpop.permute.xlu0 %6166 }
 0xa30   : > { %v6239_v27 = vpop.f32.mrf.mxu0 }
 0xa31   : > { %v6240_v37 = vadd.f32 %v6239_v27, %v6167_v53 }
 0xa32   : > { %v6241_v50 = vpop.f32.mrf.mxu0 }
 0xa33   : > { %6244 = vst [vmem:[%s170_s15] sm:$0xff] %v6240_v37  ;;  %v6242_v39 = vadd.f32 %v6241_v50, %v6167_v53 }
 0xa35   : > { %6245 = vst [vmem:[%s170_s15 + $0x8] sm:$0xff] %v6242_v39 }
 0xa36 PF: > { %s13_s12 = sadd.s32 1, %s6402_s12  }
 0xa37   : > { %p10_p4 = scmp.ge.s32.totalorder %s13_s12, 4  }
 0xa39   :  { %12 = sbr.rel (!%p10_p4) target bundleno = 1 (0x1), region = 62 }

// kernel: multi_scale_block.2
= control target key start
LH: loop header
LB: loop body
LE: loop exit
PB: predicated region body
PF: predicated region fallthrough
CT: control target
= control target key end

     0   :  { %8 = vsyncpa [#allocation5], 0  ;;  %s10808_s0 = inlined_call_operand.hbm [shape: f32[2,4,16,16], index: 0, kind: input, shape index: {}]   ;;  %s10809_s1 = inlined_call_operand.hbm [shape: f32[24,200], index: 1, kind: input, shape index: {}]   ;;  %s10810_s2 = inlined_call_operand.vmem [shape: f32[24,1], index: 2, kind: input, shape index: {}]   ;;  %s10811_s3 = inlined_call_operand.vmem [shape: f32[2,24,2], index: 3, kind: output, shape index: {}]  }
   0x1   :  { %10 = vsyncpa [#allocation5 + $0x1], 0 }
   0x2   :  { %11 = vsyncpa [#allocation7], 0  ;;  %s6754_s12 = smov 0   ;;  %s6756_s13 = smov 0  }
   0x3   :  { %s6758_s14 = smov 0   ;;  %s6760_s15 = smov 0  }
   0x4 LB: > { %s6773_s16 = sadd.s32 4294967295, %s6710_s15   ;;  %p37_p0 = scmp.ne.s32.totalorder %s6702_s13, %s6698_s12  ;;  %s6710_s15 = sphi %s6760_s15, %s11598_s15   ;;  %s6706_s14 = sphi %s6758_s14, %s11597_s14   ;;  %s6702_s13 = sphi %s6756_s13, %s11596_s13   ;;  %s6698_s12 = sphi %s6754_s12, %s11595_s12  }
   0x5   : > { %p10812_p1 = scmp.eq.s32.totalorder %s6773_s16, 0  ;;  %p6423_p2 = scmp.ge.s32.totalorder %s6710_s15, 1 }
   0x6   : > { %p116_p3 = scmp.lt.s32.totalorder %s6710_s15, 3  ;;  %s6712_s19 = smov [#allocation6]  }
   0x7   : > { %p6781_p4 = por %p10812_p1, %p37_p0  ;;  %s128_s20 = sshll.u32 %s6712_s19, 4  ;;  %s129_s20 = int_to_ptr.vmem [resolvable:$true] %s128_s20 }
   0x8   : > { %p6785_p5 = pnand %p6423_p2, %p116_p3  ;;  %s6798_s22 = sadd.s32 1, %s6710_s15  }
   0x9   : > { %s10930_s17 = scalar_select %p6781_p4, 1, 0 }
   0xa   : > { %s10931_s18 = scalar_select %p6785_p5, 1, 0 }
   0xb   : > { %p6546_p6 = pneg %p6785_p5  ;;  %s24_s23 = sadd.s32 1, %s6706_s14 }
   0xc   : > { %s21_s24 = ssub.s32 %s6710_s15, %s6798_s22  ;;  %s6629_s25 = scalar_lea.vmem %s129_s20, 768 }
   0xd   : > { %p6793_p7 = pnand %p6546_p6, %p10812_p1  ;;  %p6630_p9 = scmp.ne.s32.totalorder %s129_s20, %s6629_s25 }
   0xe   : > { %p6637_p12 = scmp.lt.s32.totalorder %s129_s20, %s129_s20  ;;  %p6638_p13 = scmp.lt.s32.totalorder %s6629_s25, %s6629_s25 }
   0xf   : > { %p6620_p8 = pneg %p6793_p7 }
  0x10   : > { %p6639_p0 = por %p6638_p13, %p6637_p12 }
  0x11   : > { %p6632_p10 = pnand %p6630_p9, %p6620_p8 }
  0x13   : > { %p6633_p11 = pneg %p6632_p10 }
  0x15   : > { %p6640_p2 = pnand %p6639_p0, %p6633_p11 }
  0x17   : > { %6643 = shalt.err (!%p6640_p2)
}
  0x18   : > { %s6713_s26 = smov 256   ;;  %s6714_s27 = smov 16  }
  0x19   : > { %6549 = dma.hbm_to_vmem [thread:$0]  (!%p6793_p7), %s10809_s1, 768, %s129_s20, [#allocation7], %s6713_s26, %s6713_s26, %s6714_s27  }
  0x1a   : > { %p22_p3 = scmp.eq.s32.totalorder %s21_s24, 0  ;;  %p31_p6 = scmp.ne.s32.totalorder %s6706_s14, %s6702_s13 }
  0x1b   : > { %p32_p8 = scmp.eq.s32.totalorder %s6710_s15, 0  ;;  %p6555_p9 = scmp.lt.s32.totalorder %s6710_s15, 2 }
  0x1c   : > { %s6815_s30 = scalar_select %p22_p3, %s6706_s14, %s24_s23  }
  0x1d   : > { %p33_p10 = por %p32_p8, %p31_p6  ;;  %s145_s4 = sand.u32 1, %s6706_s14  }
  0x1e   : > { %s6426_s5 = sshll.u32 %s145_s4, 6  ;;  %s6438_s6 = sshll.u32 %s6710_s15, 10 }
  0x1f   : > { %s6822_s9 = scalar_lea.hbm %s10808_s0, %s6438_s6  ;;  %s149_s10 = scalar_lea.vmem [#allocation4], %s6426_s5 }
  0x20   : > { %s156_s11 = sshll.u32 %s149_s10, 4  ;;  %p6826_p7 = pnand %p6555_p9, %p33_p10  ;;  %s6824_s11 = int_to_ptr.vmem [resolvable:$true] %s156_s11 }
  0x21   : > { %s6830_s19 = scalar_lea.sflag [#allocation5], %s145_s4  ;;  %s6644_s15 = scalar_lea.hbm %s6822_s9, 1024 }
  0x22   : > { %p6645_p11 = scmp.ne.s32.totalorder %s6822_s9, %s6644_s15  ;;  %p6646_p12 = pneg %p6826_p7 }
  0x23   : > { %s6649_s23 = scalar_lea.hbm %s10808_s0, 2048  ;;  %p6650_p2 = scmp.lt.s32.totalorder %s6822_s9, %s10808_s0 }
  0x24   : > { %p6647_p13 = pnand %p6646_p12, %p6645_p11  ;;  %p6651_p3 = scmp.lt.s32.totalorder %s6649_s23, %s6644_s15 }
  0x26   : > { %p6648_p0 = pneg %p6647_p13  ;;  %p6652_p6 = por %p6651_p3, %p6650_p2 }
  0x28   : > { %p6653_p8 = pnand %p6652_p6, %p6648_p0 }
  0x2a   : > { %6656 = shalt.err (!%p6653_p8)
}
  0x2b   : > { %s6657_s26 = scalar_lea.vmem %s6824_s11, 1024  ;;  %s6715_s27 = smov [#allocation4]  }
  0x2c   : > { %p6658_p9 = scmp.ne.s32.totalorder %s6824_s11, %s6657_s26  ;;  %s6662_s28 = sshll.u32 %s6715_s27, 4  ;;  %s6663_s28 = int_to_ptr.vmem [resolvable:$false] %s6662_s28 }
  0x2d   : > { %s6664_s29 = scalar_lea.vmem %s6663_s28, 2048  ;;  %p6665_p13 = scmp.lt.s32.totalorder %s6824_s11, %s6663_s28 }
  0x2e   : > { %p6660_p10 = pnand %p6658_p9, %p6646_p12  ;;  %p6666_p1 = scmp.lt.s32.totalorder %s6664_s29, %s6657_s26 }
  0x30   : > { %p6661_p11 = pneg %p6660_p10  ;;  %p6667_p4 = por %p6666_p1, %p6665_p13 }
  0x32   : > { %p6668_p5 = pnand %p6667_p4, %p6661_p11 }
  0x34   : > { %6671 = shalt.err (!%p6668_p5)
}
  0x35   : > { %s6716_s4 = smov 128   ;;  %s6717_s5 = smov 8  }
  0x36   : > { %6553 = dma.hbm_to_vmem [thread:$0]  (!%p6826_p7), %s6822_s9, 1024, %s6824_s11, %s6830_s19, %s6716_s4, %s6716_s4, %s6717_s5  }
  0x37   : > { %p10934_p12 = scmp.ne.s32.totalorder %s10931_s18, 0 }
  0x39   : > { %168 = sbr.rel (%p10934_p12) target bundleno = 2682 (0xa7a), region = 32 }
  0x3e   : > { %s170_s6 = sand.u32 1, %s6702_s13   ;;  %p10935_p1 = scmp.ne.s32.totalorder %s10930_s17, 0 }
  0x3f   : > { %s6430_s7 = sshll.u32 %s170_s6, 6  ;;  %s171_s8 = scalar_lea.sflag [#allocation5], %s170_s6 }
  0x40   : > { %s6854_s10 = scalar_lea.vmem [#allocation4], %s6430_s7 }
  0x41   : > { %6689 = dma.done.wait (%p10935_p1), %s171_s8, 1024  }
  0x42   : > { %6691 = vsyncadd (%p10935_p1), %s171_s8, 4294966272  ;;  %p10936_p4 = scmp.eq.s32.totalorder %s6773_s16, 0 }
  0x44   : > { %6693 = dma.done.wait (%p10936_p4), [#allocation7], 768   ;;  %p10937_p5 = pmov %p10936_p4 }
  0x45   : > { %vm206_vm0 = vcmask 162816   ;;  %v10815_v0 = vmov 0.0   ;;  %vm209_vm1 = vcmask 158720   ;;  %v222_v1 = vld [vmem:[%s6854_s10 + $0x10] sm:$0xff]  ;;  %v220_v2 = vld [vmem:[%s6854_s10] sm:$0xff]  ;;  %s6719_s17 = smov 2   ;;  %v286_v19 = vlaneseq }
  0x46   : > { %6695 = vsyncadd (%p10937_p5), [#allocation7], 4294966528  ;;  %211 = vst.msk [vmem:[#allocation2 + $0x18] sm:$0xff] %vm206_vm0, %v10815_v0  ;;  %240 = vrot.lane.b32.xlu1 %v222_v1, %s6719_s17  ;;  %236 = vrot.lane.b32.xlu0 %v220_v2, %s6719_s17  ;;  %v223_v3 = vld [vmem:[%s6854_s10 + $0x18] sm:$0xff]  ;;  %v221_v4 = vld [vmem:[%s6854_s10 + $0x8] sm:$0xff]  ;;  %vm260_vm2 = vcmask 146448  }
  0x47   : > { %212 = vst.msk [vmem:[#allocation2 + $0x20] sm:$0xff] %vm206_vm0, %v10815_v0  ;;  %207 = vst.msk [vmem:[#allocation2] sm:$0xff] %vm206_vm0, %v10815_v0  ;;  %v225_v5 = vld [vmem:[%s6854_s10 + $0x28] sm:$0xff]  ;;  %v224_v6 = vld [vmem:[%s6854_s10 + $0x20] sm:$0xff]  ;;  %s6720_s18 = smov 127   ;;  %v6904_v24 = vshrl.u32 %v286_v19, 7 }
  0x48   : > { %208 = vst.msk [vmem:[#allocation2 + $0x8] sm:$0xff] %vm206_vm0, %v10815_v0  ;;  %214 = vst.msk [vmem:[#allocation2 + $0x30] sm:$0xff] %vm206_vm0, %v10815_v0  ;;  %v227_v7 = vld [vmem:[%s6854_s10 + $0x38] sm:$0xff]  ;;  %v226_v8 = vld [vmem:[%s6854_s10 + $0x30] sm:$0xff]  ;;  %v6721_v17 = vmov 1983009808  }
  0x49   : > { %215 = vst.msk [vmem:[#allocation2 + $0x38] sm:$0xff] %vm206_vm0, %v10815_v0  ;;  %217 = vst.msk [vmem:[#allocation2 + $0x48] sm:$0xff] %vm206_vm0, %v10815_v0  ;;  %v284_v18 = vunpack.c.l.s4 %v6721_v17  ;;  %vm2622_vm3 = vcmask 1045504   ;;  %s6722_s9 = smov 126   ;;  %vm1447_vm4 = vcmask 1046528   ;;  %s6723_s11 = smov 125  }
  0x4a   : > { %218 = vst.msk [vmem:[#allocation2 + $0x50] sm:$0xff] %vm206_vm0, %v10815_v0  ;;  %242 = vrot.lane.b32.xlu1 %v223_v3, %s6719_s17  ;;  %238 = vrot.lane.b32.xlu0 %v221_v4, %s6719_s17  ;;  %vm3797_vm5 = vcmask 1044480   ;;  %s6724_s12 = smov 124   ;;  %vm494_vm6 = vcmask 1043456   ;;  %s6726_s19 = smov 32   ;;  %vm473_vm7 = vcmask 130048  }
  0x4b   : > { %213 = vst.msk [vmem:[#allocation2 + $0x28] sm:$0xf] %vm209_vm1, %v10815_v0  ;;  %210 = vst.msk [vmem:[#allocation2 + $0x10] sm:$0xf] %vm209_vm1, %v10815_v0  ;;  %v285_v23 = vunpack.c.0.s8 %v284_v18  ;;  %s6727_s15 = smov 64   ;;  %s6728_s20 = smov 96  }
  0x4c   : > { %216 = vst.msk [vmem:[#allocation2 + $0x40] sm:$0xf] %vm209_vm1, %v10815_v0  ;;  %219 = vst.msk [vmem:[#allocation2 + $0x58] sm:$0xf] %vm209_vm1, %v10815_v0  ;;  %s6729_s21 = smov 16   ;;  %s6730_s23 = smov 48  }
  0x4d   : > { %v6921_v31 = vsub.s32 %v285_v23, %v6904_v24  ;;  %s6731_s24 = smov 80   ;;  %s6732_s25 = smov 112   ;;  %vm475_vm8 = vcmask 261120   ;;  %vm477_vm9 = vcmask 392192   ;;  %vm479_vm10 = vcmask 523264  }
  0x4e   : > { %246 = vrot.lane.b32.xlu1 %v225_v5, %s6719_s17  ;;  %244 = vrot.lane.b32.xlu0 %v224_v6, %s6719_s17  ;;  %vm481_vm11 = vcmask 654336   ;;  %vm483_vm12 = vcmask 785408   ;;  %vm485_vm13 = vcmask 916480   ;;  %vm6220_vm14 = vcmask 588800   ;;  %p201_p7 = scmp.lt.s32.totalorder %s6773_s16, 1 }
  0x4f   : > { %vm6337_vm15 = vcmask 7168   ;;  %vm6341_vm0 = vcmask 15360  }
  0x50   : > { %s11600_s16 = smov (!%p201_p7, %s6773_s16), 1 }
  0x51   : > { %s6539_s6 = smul.u32 24, %s11600_s16 }
  0x52   : > { %250 = vrot.lane.b32.xlu1 %v227_v7, %s6719_s17  ;;  %248 = vrot.lane.b32.xlu0 %v226_v8, %s6719_s17 }
  0x53   : > { %s205_s10 = scalar_lea.vmem %s10811_s3, %s6539_s6 }
  0xb8   : > { %v241_v9 = vpop.permute.xlu1 %240  ;;  %v237_v10 = vpop.permute.xlu0 %236 }
  0xb9   : > { %263 = vst.msk [vmem:[#allocation2 + $0x1a] sm:$0xff] %vm260_vm2, %v241_v9  ;;  %261 = vst.msk [vmem:[#allocation2 + $0x2] sm:$0xff] %vm260_vm2, %v237_v10 }
  0xbc   : > { %v243_v11 = vpop.permute.xlu1 %242  ;;  %v239_v12 = vpop.permute.xlu0 %238 }
  0xbd   : > { %264 = vst.msk [vmem:[#allocation2 + $0x22] sm:$0xff] %vm260_vm2, %v243_v11  ;;  %262 = vst.msk [vmem:[#allocation2 + $0xa] sm:$0xff] %vm260_vm2, %v239_v12 }
  0xc0   : > { %v247_v13 = vpop.permute.xlu1 %246  ;;  %v245_v14 = vpop.permute.xlu0 %244  ;;  %v6888_v15 = vld [vmem:[#allocation2] sm:$0xff]  ;;  %v6894_v16 = vld [vmem:[#allocation2 + $0x18] sm:$0xff] }
  0xc1   : > { %266 = vst.msk [vmem:[#allocation2 + $0x3a] sm:$0xff] %vm260_vm2, %v247_v13  ;;  %265 = vst.msk [vmem:[#allocation2 + $0x32] sm:$0xff] %vm260_vm2, %v245_v14  ;;  %507 = vrot.lane.b32.xlu0 %v6888_v15, %s6720_s18  ;;  %v2623_v29 = vrot.slane %v6888_v15, 2  ;;  %v2628_v54 = vrot.slane %v6894_v16, 2  ;;  %v3798_v14 = vrot.slane %v6888_v15, 3  ;;  %v3803_v17 = vrot.slane %v6894_v16, 3 }
  0xc4   : > { %v251_v20 = vpop.permute.xlu1 %250  ;;  %v249_v21 = vpop.permute.xlu0 %248  ;;  %v6896_v22 = vld [vmem:[#allocation2 + $0x8] sm:$0xff]  ;;  %v6907_v26 = vld [vmem:[#allocation2 + $0x20] sm:$0xff]  ;;  %v7005_v61 = vld [vmem:[#allocation2 + $0x10] sm:$0xf] }
  0xc5   : > { %268 = vst.msk [vmem:[#allocation2 + $0x52] sm:$0xff] %vm260_vm2, %v251_v20  ;;  %267 = vst.msk [vmem:[#allocation2 + $0x4a] sm:$0xff] %vm260_vm2, %v249_v21  ;;  %509 = vrot.lane.b32.xlu1 %v6896_v22, %s6720_s18  ;;  %511 = vrot.lane.b32.xlu0 %v6894_v16, %s6720_s18  ;;  %v2624_v25 = vrot.slane %v6896_v22, 2  ;;  %v2629_v55 = vrot.slane %v6907_v26, 2  ;;  %v7007_v62 = vld [vmem:[#allocation2 + $0x28] sm:$0xf] }
  0xc6   : > { %v2626_v1 = vrot.slane %v7005_v61, 2  ;;  %v2631_v5 = vrot.slane %v7007_v62, 2  ;;  %v3799_v10 = vrot.slane %v6896_v22, 3  ;;  %v3804_v18 = vrot.slane %v6907_v26, 3 }
  0xc7   : > { %v6930_v34 = vsel %vm2622_vm3, %v2623_v29, %v2624_v25  ;;  %v7000_v59 = vsel %vm2622_vm3, %v2628_v54, %v2629_v55  ;;  %v3806_v29 = vrot.slane %v7007_v62, 3 }
  0xc8   : > { %v6909_v27 = vld [vmem:[#allocation2 + $0x30] sm:$0xff]  ;;  %v6911_v28 = vld [vmem:[#allocation2 + $0x38] sm:$0xff]  ;;  %10938 = vst [vmem:[#allocation10_spill] sm:$0xff] %v6930_v34  ;;  %v7009_v63 = vld [vmem:[#allocation2 + $0x40] sm:$0xf]  ;;  %v7033_v9 = vsel %vm2622_vm3, %v2624_v25, %v2626_v1  ;;  %v7037_v11 = vsel %vm2622_vm3, %v2629_v55, %v2631_v5  ;;  %v7053_v19 = vsel %vm3797_vm5, %v3798_v14, %v3799_v10  ;;  %v7056_v20 = vsel %vm3797_vm5, %v3803_v17, %v3804_v18 }
  0xc9   : > { %513 = vrot.lane.b32.xlu1 %v6907_v26, %s6720_s18  ;;  %515 = vrot.lane.b32.xlu0 %v6909_v27, %s6720_s18  ;;  %v281_v30 = vcombine.low %v6888_v15, %v6909_v27  ;;  %v350_v32 = vcombine.high %v6896_v22, %v6911_v28  ;;  %v282_v33 = vcombine.high %v6888_v15, %v6909_v27  ;;  %v2633_v56 = vrot.slane %v6909_v27, 2 }
  0xca   : > { %v2634_v57 = vrot.slane %v6911_v28, 2  ;;  %v2636_v6 = vrot.slane %v7009_v63, 2  ;;  %10940 = vst [vmem:[#allocation12_spill] sm:$0xff] %v7033_v9  ;;  %10941 = vst [vmem:[#allocation13_spill] sm:$0xff] %v7037_v11  ;;  %v3808_v21 = vrot.slane %v6909_v27, 3  ;;  %v3809_v23 = vrot.slane %v6911_v28, 3 }
  0xcb   : > { %v6947_v40 = vrot.slane %v350_v32, %v6921_v31  ;;  %v6953_v42 = vrot.slane %v281_v30, %v6921_v31  ;;  %v6959_v44 = vrot.slane %v282_v33, %v6921_v31  ;;  %10944 = vst [vmem:[#allocation16_spill] sm:$0xff] %v7053_v19  ;;  %10945 = vst [vmem:[#allocation17_spill] sm:$0xff] %v7056_v20  ;;  %v3801_v25 = vrot.slane %v7005_v61, 3 }
  0xcc   : > { %v6932_v35 = vld [vmem:[#allocation2 + $0x48] sm:$0xff]  ;;  %v6934_v36 = vld [vmem:[#allocation2 + $0x50] sm:$0xff]  ;;  %v7003_v60 = vsel %vm2622_vm3, %v2633_v56, %v2634_v57  ;;  %v7016_v2 = vld [vmem:[#allocation2 + $0x58] sm:$0xf]  ;;  %v7040_v12 = vsel %vm2622_vm3, %v2634_v57, %v2636_v6  ;;  %v3811_v30 = vrot.slane %v7009_v63, 3  ;;  %v7072_v32 = vsel %vm3797_vm5, %v3808_v21, %v3809_v23 }
  0xcd   : > { %517 = vrot.lane.b32.xlu1 %v6911_v28, %s6720_s18  ;;  %519 = vrot.lane.b32.xlu0 %v6932_v35, %s6720_s18  ;;  %v366_v37 = vcombine.high %v6907_v26, %v6934_v36  ;;  %v297_v38 = vcombine.low %v6894_v16, %v6932_v35  ;;  %v298_v39 = vcombine.high %v6894_v16, %v6932_v35  ;;  %v1464_v52 = vrot.slane %v6934_v36, 1 }
  0xce   : > { %v1463_v53 = vrot.slane %v6932_v35, 1  ;;  %10939 = vst [vmem:[#allocation11_spill] sm:$0xff] %v7003_v60  ;;  %v2638_v3 = vrot.slane %v6932_v35, 2  ;;  %v2639_v4 = vrot.slane %v6934_v36, 2  ;;  %v2641_v7 = vrot.slane %v7016_v2, 2  ;;  %10942 = vst [vmem:[#allocation14_spill] sm:$0xff] %v7040_v12 }
  0xcf   : > { %v6950_v41 = vrot.slane %v366_v37, %v6921_v31  ;;  %v6956_v43 = vrot.slane %v297_v38, %v6921_v31  ;;  %v6962_v45 = vrot.slane %v298_v39, %v6921_v31  ;;  %10946 = vst [vmem:[#allocation18_spill] sm:$0xff] %v7072_v32  ;;  %v3813_v33 = vrot.slane %v6932_v35, 3 }
  0xd0   : > { %v6993_v58 = vsel %vm1447_vm4, %v1463_v53, %v1464_v52  ;;  %v7028_v8 = vsel %vm2622_vm3, %v2638_v3, %v2639_v4  ;;  %v7043_v13 = vsel %vm2622_vm3, %v2639_v4, %v2641_v7  ;;  %v3814_v37 = vrot.slane %v6934_v36, 3 }
  0xd1   : > { %521 = vrot.lane.b32.xlu1 %v6934_v36, %s6720_s18  ;;  %741 = vrot.lane.b32.xlu0 %v6888_v15, %s6722_s9  ;;  %v397_v46 = vcombine.low %v6947_v40, %v6950_v41  ;;  %v314_v47 = vcombine.high %v6953_v42, %v6956_v43  ;;  %v398_v48 = vcombine.high %v6947_v40, %v6950_v41  ;;  %v3816_v55 = vrot.slane %v7016_v2, 3 }
  0xd2   : > { %v329_v49 = vcombine.low %v6959_v44, %v6962_v45  ;;  %v330_v50 = vcombine.high %v6959_v44, %v6962_v45  ;;  %v313_v51 = vcombine.low %v6953_v42, %v6956_v43  ;;  %10943 = vst [vmem:[#allocation15_spill] sm:$0xff] %v7043_v13  ;;  %v7077_v38 = vsel %vm3797_vm5, %v3813_v33, %v3814_v37 }
  0xd3   : > { %10947 = vst [vmem:[#allocation19_spill] sm:$0xff] %v7077_v38  ;;  %v7080_v39 = vsel %vm3797_vm5, %v3799_v10, %v3801_v25  ;;  %v7083_v53 = vsel %vm3797_vm5, %v3804_v18, %v3806_v29  ;;  %v7090_v54 = vsel %vm3797_vm5, %v3809_v23, %v3811_v30  ;;  %v4978_v56 = vrot.slane %v6907_v26, 4 }
  0xd4   : > { %10948 = vst [vmem:[#allocation20_spill] sm:$0xff] %v7080_v39  ;;  %10949 = vst [vmem:[#allocation21_spill] sm:$0xff] %v7083_v53  ;;  %v4980_v57 = vrot.slane %v7007_v62, 4  ;;  %v7096_v1 = vsel %vm3797_vm5, %v3814_v37, %v3816_v55  ;;  %v4973_v3 = vrot.slane %v6896_v22, 4  ;;  %v4975_v4 = vrot.slane %v7005_v61, 4 }
  0xd5   : > { %743 = vrot.lane.b32.xlu1 %v6896_v22, %s6722_s9  ;;  %745 = vrot.lane.b32.xlu0 %v6894_v16, %s6722_s9  ;;  %10950 = vst [vmem:[#allocation22_spill] sm:$0xff] %v7090_v54  ;;  %10951 = vst [vmem:[#allocation23_spill] sm:$0xff] %v7096_v1  ;;  %v4988_v5 = vrot.slane %v6934_v36, 4  ;;  %v4990_v7 = vrot.slane %v7016_v2, 4  ;;  %v4977_v10 = vrot.slane %v6894_v16, 4  ;;  %v4983_v18 = vrot.slane %v6911_v28, 4 }
  0xd6   : > { %v7106_v6 = vsel %vm494_vm6, %v4978_v56, %v4980_v57  ;;  %v7111_v14 = vsel %vm494_vm6, %v4973_v3, %v4975_v4  ;;  %v4972_v21 = vrot.slane %v6888_v15, 4  ;;  %v4985_v23 = vrot.slane %v7009_v63, 4 }
  0xd7   : > { %10952 = vst [vmem:[#allocation24_spill] sm:$0xff] %v7106_v6  ;;  %10953 = vst [vmem:[#allocation25_spill] sm:$0xff] %v7111_v14  ;;  %v7114_v17 = vsel %vm494_vm6, %v4988_v5, %v4990_v7  ;;  %v7124_v25 = vsel %vm494_vm6, %v4977_v10, %v4978_v56  ;;  %v4987_v30 = vrot.slane %v6932_v35, 4  ;;  %v4982_v33 = vrot.slane %v6909_v27, 4 }
  0xd8   : > { %10954 = vst [vmem:[#allocation26_spill] sm:$0xff] %v7114_v17  ;;  %10955 = vst [vmem:[#allocation27_spill] sm:$0xff] %v7124_v25  ;;  %v7127_v29 = vsel %vm494_vm6, %v4972_v21, %v4973_v3  ;;  %v7132_v37 = vsel %vm494_vm6, %v4983_v18, %v4985_v23  ;;  %v1449_v55 = vrot.slane %v6896_v22, 1  ;;  %v1448_v56 = vrot.slane %v6888_v15, 1 }
  0xd9   : > { %747 = vrot.lane.b32.xlu1 %v6907_v26, %s6722_s9  ;;  %749 = vrot.lane.b32.xlu0 %v6909_v27, %s6722_s9  ;;  %10956 = vst [vmem:[#allocation28_spill] sm:$0xff] %v7127_v29  ;;  %10957 = vst [vmem:[#allocation29_spill] sm:$0xff] %v7132_v37  ;;  %v7136_v57 = vsel %vm494_vm6, %v4987_v30, %v4988_v5  ;;  %v7139_v4 = vsel %vm494_vm6, %v4982_v33, %v4983_v18  ;;  %v6725_v3 = vmov 1934713408   ;;  %v1451_v5 = vrot.slane %v7005_v61, 1 }
  0xda   : > { %10958 = vst [vmem:[#allocation30_spill] sm:$0xff] %v7136_v57  ;;  %10959 = vst [vmem:[#allocation31_spill] sm:$0xff] %v7139_v4  ;;  %v316_v7 = vunpack.c.l.s4 %v6725_v3  ;;  %v365_v10 = vcombine.low %v6907_v26, %v6934_v36  ;;  %v7149_v21 = vsel %vm1447_vm4, %v1448_v56, %v1449_v55  ;;  %v1453_v18 = vrot.slane %v6894_v16, 1 }
  0xdb   : > { %v1454_v23 = vrot.slane %v6907_v26, 1  ;;  %v7163_v61 = vsel %vm1447_vm4, %v1449_v55, %v1451_v5  ;;  %v1459_v56 = vrot.slane %v6911_v28, 1 }
  0xdc   : > { %v317_v30 = vunpack.c.0.s8 %v316_v7  ;;  %v373_v33 = vrot.slane %v365_v10, %v6921_v31 }
  0xdd   : > { %751 = vrot.lane.b32.xlu1 %v6911_v28, %s6722_s9  ;;  %753 = vrot.lane.b32.xlu0 %v6932_v35, %s6722_s9 }
  0xe1   : > { %755 = vrot.lane.b32.xlu1 %v6934_v36, %s6722_s9  ;;  %975 = vrot.lane.b32.xlu0 %v6888_v15, %s6723_s11 }
  0xe5   : > { %977 = vrot.lane.b32.xlu1 %v6896_v22, %s6723_s11  ;;  %979 = vrot.lane.b32.xlu0 %v6894_v16, %s6723_s11 }
  0xe9   : > { %981 = vrot.lane.b32.xlu1 %v6907_v26, %s6723_s11  ;;  %983 = vrot.lane.b32.xlu0 %v6909_v27, %s6723_s11 }
  0xed   : > { %985 = vrot.lane.b32.xlu1 %v6911_v28, %s6723_s11  ;;  %987 = vrot.lane.b32.xlu0 %v6932_v35, %s6723_s11 }
  0xf1   : > { %989 = vrot.lane.b32.xlu1 %v6934_v36, %s6723_s11  ;;  %1209 = vrot.lane.b32.xlu0 %v6888_v15, %s6724_s12  ;;  %v349_v15 = vcombine.low %v6896_v22, %v6911_v28 }
  0xf5   : > { %1211 = vrot.lane.b32.xlu1 %v6896_v22, %s6724_s12  ;;  %1213 = vrot.lane.b32.xlu0 %v6894_v16, %s6724_s12  ;;  %v7166_v16 = vsel %vm1447_vm4, %v1453_v18, %v1454_v23  ;;  %v357_v22 = vrot.slane %v349_v15, %v6921_v31 }
  0xf7   : > { %v382_v55 = vcombine.high %v357_v22, %v373_v33  ;;  %v381_v18 = vcombine.low %v357_v22, %v373_v33 }
  0xf9   : > { %1215 = vrot.lane.b32.xlu1 %v6907_v26, %s6724_s12  ;;  %1217 = vrot.lane.b32.xlu0 %v6909_v27, %s6724_s12  ;;  %v1458_v26 = vrot.slane %v6909_v27, 1  ;;  %v1461_v27 = vrot.slane %v7009_v63, 1 }
  0xfb   : > { %v7182_v7 = vsel %vm1447_vm4, %v1458_v26, %v1459_v56 }
  0xfd   : > { %1219 = vrot.lane.b32.xlu1 %v6911_v28, %s6724_s12  ;;  %1221 = vrot.lane.b32.xlu0 %v6932_v35, %s6724_s12  ;;  %v1456_v35 = vrot.slane %v7007_v62, 1  ;;  %v7176_v62 = vsub.s32 %v317_v30, %v6904_v24  ;;  %v7191_v24 = vsel %vm1447_vm4, %v1459_v56, %v1461_v27  ;;  %v1493_v27 = vcombine.high %v7166_v16, %v6993_v58 }
  0xfe   : > { %v1545_v30 = vcombine.high %v7163_v61, %v7191_v24 }
  0xff   : > { %v7179_v3 = vsel %vm1447_vm4, %v1454_v23, %v1456_v35  ;;  %v396_v28 = vrot.slane %v382_v55, %v7176_v62  ;;  %v405_v63 = vrot.slane %v397_v46, %v7176_v62  ;;  %v328_v10 = vrot.slane %v314_v47, %v7176_v62 }
 0x100   : > { %v412_v5 = vrot.slane %v398_v48, %v7176_v62  ;;  %v337_v46 = vrot.slane %v329_v49, %v7176_v62  ;;  %v7218_v47 = vrot.slane %v313_v51, %v7176_v62  ;;  %v1466_v23 = vrot.slane %v7016_v2, 1 }
 0x101   : > { %1223 = vrot.lane.b32.xlu1 %v6934_v36, %s6724_s12  ;;  %1686 = vrot.lane.b32.xlu0 %v7149_v21, %s6720_s18  ;;  %v344_v40 = vrot.slane %v330_v50, %v7176_v62  ;;  %v7230_v42 = vrot.slane %v381_v18, %v7176_v62  ;;  %v346_v45 = vcombine.high %v328_v10, %v10815_v0 }
 0x102   : > { %10960 = vst [vmem:[#allocation32_spill] sm:$0xff] %v7218_v47  ;;  %v345_v41 = vcombine.high %v7218_v47, %v10815_v0  ;;  %v7235_v43 = vsel %vm1447_vm4, %v1464_v52, %v1466_v23  ;;  %v1544_v36 = vcombine.low %v7163_v61, %v7191_v24  ;;  %v414_v49 = vcombine.high %v396_v28, %v10815_v0 }
 0x103   : > { %10961 = vst [vmem:[#allocation33_spill] sm:$0xff] %v7230_v42  ;;  %v413_v44 = vcombine.high %v7230_v42, %v10815_v0  ;;  %v1560_v48 = vcombine.low %v7179_v3, %v7235_v43  ;;  %v347_v50 = vcombine.high %v337_v46, %v10815_v0  ;;  %v1492_v52 = vcombine.low %v7166_v16, %v6993_v58 }
 0x104   : > { %v1561_v2 = vcombine.high %v7179_v3, %v7235_v43  ;;  %v1552_v15 = vrot.slane %v1544_v36, %v6921_v31  ;;  %v1476_v35 = vcombine.low %v7149_v21, %v7182_v7  ;;  %v415_v33 = vcombine.high %v405_v63, %v10815_v0 }
 0x105   : > { %1688 = vrot.lane.b32.xlu1 %v7163_v61, %s6720_s18  ;;  %1690 = vrot.lane.b32.xlu0 %v7166_v16, %s6720_s18  ;;  %v1568_v51 = vrot.slane %v1560_v48, %v6921_v31  ;;  %v348_v26 = vcombine.high %v344_v40, %v10815_v0  ;;  %v1500_v22 = vrot.slane %v1492_v52, %v6921_v31 }
 0x106   : > { %v1575_v55 = vrot.slane %v1561_v2, %v6921_v31 }
 0x107   : > { %v1577_v56 = vcombine.high %v1552_v15, %v1568_v51 }
 0x109   : > { %1692 = vrot.lane.b32.xlu1 %v7179_v3, %s6720_s18  ;;  %1694 = vrot.lane.b32.xlu0 %v7182_v7, %s6720_s18  ;;  %v1591_v18 = vrot.slane %v1577_v56, %v7176_v62 }
 0x10d   : > { %1696 = vrot.lane.b32.xlu1 %v7191_v24, %s6720_s18  ;;  %450 = vrot.lane.b32.xlu0 %v396_v28, %s6726_s19  ;;  %v1484_v28 = vrot.slane %v1476_v35, %v6921_v31 }
 0x10f   : > { %v1509_v23 = vcombine.high %v1484_v28, %v1500_v22 }
 0x111   : > { %458 = vrot.lane.b32.xlu0 %v405_v63, %s6727_s15  ;;  %422 = vrot.lane.b32.xlu1 %v328_v10, %s6726_s19  ;;  %v1559_v10 = vrot.slane %v1545_v30, %v6921_v31  ;;  %v1477_v63 = vcombine.high %v7149_v21, %v7182_v7  ;;  %v1523_v48 = vrot.slane %v1509_v23, %v7176_v62 }
 0x115   : > { %466 = vrot.lane.b32.xlu0 %v412_v5, %s6728_s20  ;;  %430 = vrot.lane.b32.xlu1 %v337_v46, %s6727_s15  ;;  %v416_v46 = vcombine.high %v412_v5, %v10815_v0  ;;  %v1576_v5 = vcombine.low %v1552_v15, %v1568_v51 }
 0x117   : > { %v7295_v51 = vrot.slane %v1576_v5, %v7176_v62 }
 0x119   : > { %438 = vrot.lane.b32.xlu1 %v344_v40, %s6728_s20  ;;  %418 = vrot.lane.b32.xlu0 %v345_v41, %s6729_s21  ;;  %v1592_v40 = vcombine.low %v1559_v10, %v1575_v55  ;;  %v1507_v41 = vrot.slane %v1493_v27, %v6921_v31  ;;  %10963 = vst [vmem:[#allocation35_spill] sm:$0xff] %v7295_v51 }
 0x11a   : > { %v1541_v27 = vcombine.high %v1523_v48, %v10815_v0 }
 0x11b   : > { %v1600_v36 = vrot.slane %v1592_v40, %v7176_v62 }
 0x11d   : > { %446 = vrot.lane.b32.xlu1 %v413_v44, %s6729_s21  ;;  %426 = vrot.lane.b32.xlu0 %v346_v45, %s6730_s23  ;;  %v1491_v44 = vrot.slane %v1477_v63, %v6921_v31  ;;  %v1593_v45 = vcombine.high %v1559_v10, %v1575_v55  ;;  %v1608_v55 = vcombine.high %v7295_v51, %v10815_v0 }
 0x11e   : > { %v1609_v63 = vcombine.high %v1591_v18, %v10815_v0 }
 0x11f   : > { %v1607_v2 = vrot.slane %v1593_v45, %v7176_v62  ;;  %v1525_v35 = vcombine.high %v1491_v44, %v1507_v41 }
 0x121   : > { %454 = vrot.lane.b32.xlu1 %v414_v49, %s6730_s23  ;;  %434 = vrot.lane.b32.xlu0 %v347_v50, %s6731_s24  ;;  %v1524_v49 = vcombine.low %v1491_v44, %v1507_v41  ;;  %v1508_v50 = vcombine.low %v1484_v28, %v1500_v22  ;;  %v1610_v44 = vcombine.high %v1600_v36, %v10815_v0 }
 0x123   : > { %v1532_v52 = vrot.slane %v1524_v49, %v7176_v62  ;;  %v7287_v30 = vrot.slane %v1508_v50, %v7176_v62 }
 0x125   : > { %462 = vrot.lane.b32.xlu1 %v415_v33, %s6731_s24  ;;  %442 = vrot.lane.b32.xlu0 %v348_v26, %s6732_s25  ;;  %10962 = vst [vmem:[#allocation34_spill] sm:$0xff] %v7287_v30  ;;  %v1539_v26 = vrot.slane %v1525_v35, %v7176_v62  ;;  %v1540_v56 = vcombine.high %v7287_v30, %v10815_v0 }
 0x127   : > { %v1543_v45 = vcombine.high %v1539_v26, %v10815_v0 }
 0x129   : > { %470 = vrot.lane.b32.xlu1 %v416_v46, %s6732_s25  ;;  %1645 = vrot.lane.b32.xlu0 %v1591_v18, %s6726_s19  ;;  %v1542_v46 = vcombine.high %v1532_v52, %v10815_v0 }
 0x12d   : > { %1617 = vrot.lane.b32.xlu1 %v1523_v48, %s6726_s19  ;;  %1653 = vrot.lane.b32.xlu0 %v1600_v36, %s6727_s15 }
 0x131   : > { %1625 = vrot.lane.b32.xlu1 %v1532_v52, %s6727_s15  ;;  %1661 = vrot.lane.b32.xlu0 %v1607_v2, %s6728_s20 }
 0x133   : > { %v508_v33 = vpop.permute.xlu0 %507 }
 0x135   : > { %1633 = vrot.lane.b32.xlu1 %v1539_v26, %s6728_s20  ;;  %1613 = vrot.lane.b32.xlu0 %v1540_v56, %s6729_s21  ;;  %v1611_v26 = vcombine.high %v1607_v2, %v10815_v0 }
 0x137   : > { %v510_v15 = vpop.permute.xlu1 %509  ;;  %v512_v22 = vpop.permute.xlu0 %511 }
 0x139   : > { %1641 = vrot.lane.b32.xlu1 %v1608_v55, %s6729_s21  ;;  %1621 = vrot.lane.b32.xlu0 %v1541_v27, %s6730_s23 }
 0x13b   : > { %v514_v28 = vpop.permute.xlu1 %513  ;;  %v516_v10 = vpop.permute.xlu0 %515 }
 0x13c   : > { %v531_v23 = vcombine.low %v508_v33, %v516_v10  ;;  %v532_v50 = vcombine.high %v508_v33, %v516_v10 }
 0x13d   : > { %1649 = vrot.lane.b32.xlu1 %v1609_v63, %s6730_s23  ;;  %1629 = vrot.lane.b32.xlu0 %v1542_v46, %s6731_s24 }
 0x13e   : > { %v7313_v18 = vrot.slane %v531_v23, %v6921_v31  ;;  %v546_v10 = vrot.slane %v532_v50, %v6921_v31 }
 0x13f   : > { %v518_v40 = vpop.permute.xlu1 %517  ;;  %v520_v41 = vpop.permute.xlu0 %519 }
 0x140   : > { %v547_v48 = vcombine.low %v512_v22, %v520_v41  ;;  %v548_v49 = vcombine.high %v512_v22, %v520_v41  ;;  %v599_v5 = vcombine.low %v510_v15, %v518_v40  ;;  %v600_v55 = vcombine.high %v510_v15, %v518_v40 }
 0x141   : > { %1657 = vrot.lane.b32.xlu1 %v1610_v44, %s6731_s24  ;;  %1637 = vrot.lane.b32.xlu0 %v1543_v45, %s6732_s25 }
 0x142   : > { %v7316_v52 = vrot.slane %v547_v48, %v6921_v31  ;;  %v562_v35 = vrot.slane %v548_v49, %v6921_v31  ;;  %v7325_v63 = vrot.slane %v599_v5, %v6921_v31  ;;  %v614_v41 = vrot.slane %v600_v55, %v6921_v31 }
 0x143   : > { %v522_v56 = vpop.permute.xlu1 %521  ;;  %v742_v36 = vpop.permute.xlu0 %741 }
 0x144   : > { %v615_v22 = vcombine.low %v514_v28, %v522_v56  ;;  %v616_v33 = vcombine.high %v514_v28, %v522_v56  ;;  %v564_v27 = vcombine.high %v7313_v18, %v7316_v52  ;;  %v579_v40 = vcombine.low %v546_v10, %v562_v35 }
 0x145   : > { %1665 = vrot.lane.b32.xlu1 %v1611_v26, %s6732_s25  ;;  %v580_v56 = vcombine.high %v546_v10, %v562_v35 }
 0x146   : > { %v7328_v46 = vrot.slane %v615_v22, %v6921_v31  ;;  %v630_v23 = vrot.slane %v616_v33, %v6921_v31  ;;  %v7332_v2 = vrot.slane %v564_v27, %v7176_v62  ;;  %v7343_v5 = vrot.slane %v579_v40, %v7176_v62 }
 0x147   : > { %v744_v15 = vpop.permute.xlu1 %743  ;;  %v746_v28 = vpop.permute.xlu0 %745 }
 0x148   : > { %v632_v44 = vcombine.high %v7325_v63, %v7328_v46  ;;  %v647_v48 = vcombine.low %v614_v41, %v630_v23  ;;  %v648_v26 = vcombine.high %v614_v41, %v630_v23 }
 0x149   : > { %672 = vrot.lane.b32.xlu1 %v7332_v2, %s6726_s19 }
 0x14a   : > { %v7340_v45 = vrot.slane %v632_v44, %v7176_v62  ;;  %v7350_v22 = vrot.slane %v647_v48, %v7176_v62  ;;  %v7353_v44 = vrot.slane %v580_v56, %v7176_v62  ;;  %v7360_v35 = vrot.slane %v648_v26, %v7176_v62 }
 0x14b   : > { %v748_v49 = vpop.permute.xlu1 %747  ;;  %v750_v50 = vpop.permute.xlu0 %749 }
 0x14c   : > { %700 = vrot.lane.b32.xlu0 %v7340_v45, %s6726_s19  ;;  %v765_v55 = vcombine.low %v742_v36, %v750_v50  ;;  %v766_v0 = vcombine.high %v742_v36, %v750_v50 }
 0x14d   : > { %680 = vrot.lane.b32.xlu1 %v7343_v5, %s6727_s15 }
 0x14e   : > { %v7363_v10 = vrot.slane %v765_v55, %v6921_v31  ;;  %v780_v50 = vrot.slane %v766_v0, %v6921_v31 }
 0x14f   : > { %v752_v33 = vpop.permute.xlu1 %751  ;;  %v754_v27 = vpop.permute.xlu0 %753 }
 0x150   : > { %v781_v40 = vcombine.low %v746_v28, %v754_v27  ;;  %v782_v51 = vcombine.high %v746_v28, %v754_v27  ;;  %708 = vrot.lane.b32.xlu0 %v7350_v22, %s6727_s15  ;;  %v833_v23 = vcombine.low %v744_v15, %v752_v33  ;;  %v834_v55 = vcombine.high %v744_v15, %v752_v33 }
 0x151   : > { %688 = vrot.lane.b32.xlu1 %v7353_v44, %s6728_s20 }
 0x152   : > { %v7366_v41 = vrot.slane %v781_v40, %v6921_v31  ;;  %v796_v36 = vrot.slane %v782_v51, %v6921_v31  ;;  %v7375_v42 = vrot.slane %v833_v23, %v6921_v31  ;;  %v848_v33 = vrot.slane %v834_v55, %v6921_v31 }
 0x153   : > { %v756_v48 = vpop.permute.xlu1 %755  ;;  %v976_v28 = vpop.permute.xlu0 %975 }
 0x154   : > { %v849_v56 = vcombine.low %v748_v49, %v756_v48  ;;  %v850_v27 = vcombine.high %v748_v49, %v756_v48  ;;  %716 = vrot.lane.b32.xlu0 %v7360_v35, %s6728_s20  ;;  %v798_v26 = vcombine.high %v7363_v10, %v7366_v41  ;;  %v813_v30 = vcombine.low %v780_v50, %v796_v36 }
 0x156   : > { %v7378_v40 = vrot.slane %v849_v56, %v6921_v31  ;;  %v7381_v51 = vrot.slane %v798_v26, %v7176_v62  ;;  %v864_v0 = vrot.slane %v850_v27, %v6921_v31  ;;  %v7390_v23 = vrot.slane %v813_v30, %v7176_v62 }
 0x157   : > { %v978_v49 = vpop.permute.xlu1 %977  ;;  %v980_v48 = vpop.permute.xlu0 %979  ;;  %v814_v26 = vcombine.high %v780_v50, %v796_v36 }
 0x158   : > { %906 = vrot.lane.b32.xlu1 %v7381_v51, %s6726_s19  ;;  %v866_v15 = vcombine.high %v7375_v42, %v7378_v40  ;;  %v881_v27 = vcombine.low %v848_v33, %v864_v0 }
 0x159   : > { %v7400_v29 = vrot.slane %v814_v26, %v7176_v62 }
 0x15a   : > { %v7393_v56 = vrot.slane %v866_v15, %v7176_v62  ;;  %v7403_v25 = vrot.slane %v881_v27, %v7176_v62  ;;  %v882_v15 = vcombine.high %v848_v33, %v864_v0 }
 0x15b   : > { %v982_v47 = vpop.permute.xlu1 %981  ;;  %v984_v4 = vpop.permute.xlu0 %983 }
 0x15c   : > { %914 = vrot.lane.b32.xlu1 %v7390_v23, %s6727_s15  ;;  %934 = vrot.lane.b32.xlu0 %v7393_v56, %s6726_s19  ;;  %v999_v57 = vcombine.low %v976_v28, %v984_v4  ;;  %v1000_v36 = vcombine.high %v976_v28, %v984_v4  ;;  %v7417_v4 = vrot.slane %v882_v15, %v7176_v62 }
 0x15e   : > { %v7410_v17 = vrot.slane %v999_v57, %v6921_v31  ;;  %v1014_v28 = vrot.slane %v1000_v36, %v6921_v31 }
 0x15f   : > { %v986_v55 = vpop.permute.xlu1 %985  ;;  %v988_v30 = vpop.permute.xlu0 %987 }
 0x160   : > { %v1015_v50 = vcombine.low %v980_v48, %v988_v30  ;;  %v1016_v37 = vcombine.high %v980_v48, %v988_v30  ;;  %922 = vrot.lane.b32.xlu1 %v7400_v29, %s6728_s20  ;;  %942 = vrot.lane.b32.xlu0 %v7403_v25, %s6727_s15  ;;  %v1067_v26 = vcombine.low %v978_v49, %v986_v55 }
 0x161   : > { %v1068_v57 = vcombine.high %v978_v49, %v986_v55 }
 0x162   : > { %v7413_v14 = vrot.slane %v1015_v50, %v6921_v31  ;;  %v1030_v27 = vrot.slane %v1016_v37, %v6921_v31  ;;  %v7425_v50 = vrot.slane %v1067_v26, %v6921_v31 }
 0x163   : > { %v990_v6 = vpop.permute.xlu1 %989  ;;  %v1210_v0 = vpop.permute.xlu0 %1209  ;;  %v1082_v55 = vrot.slane %v1068_v57, %v6921_v31 }
 0x164   : > { %v1083_v48 = vcombine.low %v982_v47, %v990_v6  ;;  %v1084_v33 = vcombine.high %v982_v47, %v990_v6  ;;  %v1032_v30 = vcombine.high %v7410_v17, %v7413_v14  ;;  %950 = vrot.lane.b32.xlu0 %v7417_v4, %s6728_s20  ;;  %v1047_v39 = vcombine.low %v1014_v28, %v1030_v27 }
 0x166   : > { %v7428_v37 = vrot.slane %v1083_v48, %v6921_v31  ;;  %v7431_v15 = vrot.slane %v1032_v30, %v7176_v62  ;;  %v1098_v36 = vrot.slane %v1084_v33, %v6921_v31  ;;  %v7440_v26 = vrot.slane %v1047_v39, %v7176_v62 }
 0x167   : > { %v1212_v6 = vpop.permute.xlu1 %1211  ;;  %v1214_v47 = vpop.permute.xlu0 %1213  ;;  %v1048_v30 = vcombine.high %v1014_v28, %v1030_v27 }
 0x168   : > { %1140 = vrot.lane.b32.xlu1 %v7431_v15, %s6726_s19  ;;  %v1100_v49 = vcombine.high %v7425_v50, %v7428_v37  ;;  %v1115_v33 = vcombine.low %v1082_v55, %v1098_v36  ;;  %v1116_v27 = vcombine.high %v1082_v55, %v1098_v36 }
 0x169   : > { %v7450_v19 = vrot.slane %v1048_v30, %v7176_v62 }
 0x16a   : > { %v7443_v48 = vrot.slane %v1100_v49, %v7176_v62  ;;  %v7453_v49 = vrot.slane %v1115_v33, %v7176_v62 }
 0x16b   : > { %v1216_v54 = vpop.permute.xlu1 %1215  ;;  %v1218_v53 = vpop.permute.xlu0 %1217 }
 0x16c   : > { %1148 = vrot.lane.b32.xlu1 %v7440_v26, %s6727_s15  ;;  %1168 = vrot.lane.b32.xlu0 %v7443_v48, %s6726_s19  ;;  %v1233_v1 = vcombine.low %v1210_v0, %v1218_v53  ;;  %v1234_v57 = vcombine.high %v1210_v0, %v1218_v53 }
 0x16e   : > { %v7460_v9 = vrot.slane %v1233_v1, %v6921_v31  ;;  %v1248_v30 = vrot.slane %v1234_v57, %v6921_v31 }
 0x16f   : > { %v1220_v39 = vpop.permute.xlu1 %1219  ;;  %v1222_v32 = vpop.permute.xlu0 %1221 }
 0x170   : > { %v1249_v28 = vcombine.low %v1214_v47, %v1222_v32  ;;  %v1250_v20 = vcombine.high %v1214_v47, %v1222_v32  ;;  %1156 = vrot.lane.b32.xlu1 %v7450_v19, %s6728_s20  ;;  %v1301_v38 = vcombine.low %v1212_v6, %v1220_v39  ;;  %1176 = vrot.lane.b32.xlu0 %v7453_v49, %s6727_s15 }
 0x171   : > { %v7470_v32 = vrot.slane %v1116_v27, %v7176_v62  ;;  %v1302_v47 = vcombine.high %v1212_v6, %v1220_v39 }
 0x172   : > { %v7463_v53 = vrot.slane %v1249_v28, %v6921_v31  ;;  %v1264_v0 = vrot.slane %v1250_v20, %v6921_v31  ;;  %v7475_v11 = vrot.slane %v1301_v38, %v6921_v31 }
 0x173   : > { %v1224_v36 = vpop.permute.xlu1 %1223  ;;  %v7467_v55 = vpop.permute.xlu0 %1686  ;;  %v1316_v28 = vrot.slane %v1302_v47, %v6921_v31 }
 0x174   : > { %v1317_v33 = vcombine.low %v1216_v54, %v1224_v36  ;;  %v1318_v12 = vcombine.high %v1216_v54, %v1224_v36  ;;  %v1266_v1 = vcombine.high %v7460_v9, %v7463_v53  ;;  %1184 = vrot.lane.b32.xlu0 %v7470_v32, %s6728_s20  ;;  %v1281_v6 = vcombine.low %v1248_v30, %v1264_v0 }
 0x175   : > { %v631_v36 = vcombine.low %v7325_v63, %v7328_v46  ;;  %v563_v63 = vcombine.low %v7313_v18, %v7316_v52  ;;  %v10966_v18 = vmov 0.0  }
 0x176   : > { %v7480_v20 = vrot.slane %v1317_v33, %v6921_v31  ;;  %v1332_v57 = vrot.slane %v1318_v12, %v6921_v31  ;;  %v7484_v27 = vrot.slane %v1266_v1, %v7176_v62  ;;  %v7498_v12 = vrot.slane %v1281_v6, %v7176_v62 }
 0x177   : > { %v7486_v39 = vpop.permute.xlu1 %1688  ;;  %v7488_v54 = vpop.permute.xlu0 %1690  ;;  %v1282_v1 = vcombine.high %v1248_v30, %v1264_v0  ;;  %v7520_v0 = vrot.slane %v631_v36, %v7176_v62  ;;  %v7536_v36 = vrot.slane %v563_v63, %v7176_v62  ;;  %v596_v63 = vcombine.high %v7332_v2, %v10966_v18 }
 0x178   : > { %1374 = vrot.lane.b32.xlu1 %v7484_v27, %s6726_s19  ;;  %v1334_v38 = vcombine.high %v7475_v11, %v7480_v20  ;;  %v1349_v13 = vcombine.low %v1316_v28, %v1332_v57  ;;  %v1350_v30 = vcombine.high %v1316_v28, %v1332_v57  ;;  %v797_v2 = vcombine.low %v7363_v10, %v7366_v41 }
 0x179   : > { %v7514_v46 = vrot.slane %v1282_v1, %v7176_v62  ;;  %10964 = vst [vmem:[#allocation36_spill] sm:$0xff] %v7520_v0  ;;  %v663_v52 = vcombine.high %v7520_v0, %v10966_v18  ;;  %10967 = vst [vmem:[#allocation38_spill] sm:$0xff] %v7536_v36  ;;  %v664_v1 = vcombine.high %v7340_v45, %v10966_v18 }
 0x17a   : > { %v7501_v33 = vrot.slane %v1334_v38, %v7176_v62  ;;  %v7517_v6 = vrot.slane %v1349_v13, %v7176_v62  ;;  %v7533_v13 = vrot.slane %v1350_v30, %v7176_v62  ;;  %v865_v45 = vcombine.low %v7375_v42, %v7378_v40 }
 0x17b   : > { %v7503_v34 = vpop.permute.xlu1 %1692  ;;  %v7505_v47 = vpop.permute.xlu0 %1694  ;;  %v7587_v41 = vrot.slane %v797_v2, %v7176_v62  ;;  %v830_v2 = vcombine.high %v7381_v51, %v10966_v18  ;;  %v1031_v51 = vcombine.low %v7410_v17, %v7413_v14 }
 0x17c   : > { %1382 = vrot.lane.b32.xlu1 %v7498_v12, %s6727_s15  ;;  %1402 = vrot.lane.b32.xlu0 %v7501_v33, %s6726_s19 }
 0x17d   : > { %10972 = vst [vmem:[#allocation43_spill] sm:$0xff] %v7587_v41  ;;  %v7637_v17 = vrot.slane %v1031_v51, %v7176_v62  ;;  %v1064_v51 = vcombine.high %v7431_v15, %v10966_v18  ;;  %v1134_v15 = vcombine.high %v7470_v32, %v10966_v18 }
 0x17f   : > { %v7522_v38 = vpop.permute.xlu1 %1696  ;;  %v7524_v60 = vpop.permute.xlu0 %450  ;;  %10978 = vst [vmem:[#allocation49_spill] sm:$0xff] %v7637_v17 }
 0x180   : > { %10965 = vst [vmem:[#allocation37_spill] sm:$0xff] %v7524_v60  ;;  %1390 = vrot.lane.b32.xlu1 %v7514_v46, %s6728_s20  ;;  %1410 = vrot.lane.b32.xlu0 %v7517_v6, %s6727_s15  ;;  %v595_v60 = vcombine.high %v7536_v36, %v10966_v18 }
 0x183   : > { %v7538_v57 = vpop.permute.xlu0 %458  ;;  %v7540_v28 = vpop.permute.xlu1 %422 }
 0x184   : > { %10968 = vst [vmem:[#allocation39_spill] sm:$0xff] %v7538_v57  ;;  %696 = vrot.lane.b32.xlu1 %v663_v52, %s6729_s21  ;;  %1418 = vrot.lane.b32.xlu0 %v7533_v13, %s6728_s20  ;;  %v665_v52 = vcombine.high %v7350_v22, %v10966_v18  ;;  %v666_v22 = vcombine.high %v7360_v35, %v10966_v18 }
 0x187   : > { %v7549_v30 = vpop.permute.xlu0 %466  ;;  %v7551_v0 = vpop.permute.xlu1 %430 }
 0x188   : > { %10969 = vst [vmem:[#allocation40_spill] sm:$0xff] %v7549_v30  ;;  %704 = vrot.lane.b32.xlu1 %v664_v1, %s6730_s23  ;;  %668 = vrot.lane.b32.xlu0 %v595_v60, %s6729_s21  ;;  %v597_v60 = vcombine.high %v7343_v5, %v10966_v18  ;;  %v7574_v1 = vrot.slane %v865_v45, %v7176_v62 }
 0x189   : > { %v598_v5 = vcombine.high %v7353_v44, %v10966_v18  ;;  %v829_v44 = vcombine.high %v7587_v41, %v10966_v18 }
 0x18a   : > { %10971 = vst [vmem:[#allocation42_spill] sm:$0xff] %v7574_v1  ;;  %v897_v10 = vcombine.high %v7574_v1, %v10966_v18 }
 0x18b   : > { %v7561_v57 = vpop.permute.xlu1 %438  ;;  %v7563_v36 = vpop.permute.xlu0 %418 }
 0x18c   : > { %10970 = vst [vmem:[#allocation41_spill] sm:$0xff] %v7561_v57  ;;  %712 = vrot.lane.b32.xlu1 %v665_v52, %s6731_s24  ;;  %676 = vrot.lane.b32.xlu0 %v596_v63, %s6730_s23  ;;  %v898_v52 = vcombine.high %v7393_v56, %v10966_v18  ;;  %v1099_v56 = vcombine.low %v7425_v50, %v7428_v37 }
 0x18f   : > { %v7576_v42 = vpop.permute.xlu1 %446  ;;  %v7578_v40 = vpop.permute.xlu0 %426 }
 0x190   : > { %720 = vrot.lane.b32.xlu1 %v666_v22, %s6732_s25  ;;  %684 = vrot.lane.b32.xlu0 %v597_v60, %s6731_s24  ;;  %v899_v22 = vcombine.high %v7403_v25, %v10966_v18  ;;  %v900_v25 = vcombine.high %v7417_v4, %v10966_v18 }
 0x193   : > { %v7589_v35 = vpop.permute.xlu1 %454  ;;  %v7591_v63 = vpop.permute.xlu0 %434 }
 0x194   : > { %930 = vrot.lane.b32.xlu1 %v897_v10, %s6729_s21  ;;  %692 = vrot.lane.b32.xlu0 %v598_v5, %s6732_s25 }
 0x197   : > { %v7599_v45 = vpop.permute.xlu1 %462  ;;  %v7601_v60 = vpop.permute.xlu0 %442 }
 0x198   : > { %10973 = vst [vmem:[#allocation44_spill] sm:$0xff] %v7599_v45  ;;  %10974 = vst [vmem:[#allocation45_spill] sm:$0xff] %v7601_v60  ;;  %938 = vrot.lane.b32.xlu1 %v898_v52, %s6730_s23  ;;  %902 = vrot.lane.b32.xlu0 %v829_v44, %s6729_s21  ;;  %v831_v52 = vcombine.high %v7390_v23, %v10966_v18  ;;  %v7624_v44 = vrot.slane %v1099_v56, %v7176_v62 }
 0x199   : > { %v832_v23 = vcombine.high %v7400_v29, %v10966_v18  ;;  %v1063_v29 = vcombine.high %v7637_v17, %v10966_v18 }
 0x19a   : > { %10976 = vst [vmem:[#allocation47_spill] sm:$0xff] %v7624_v44  ;;  %v1131_v14 = vcombine.high %v7624_v44, %v10966_v18 }
 0x19b   : > { %v7611_v5 = vpop.permute.xlu1 %470  ;;  %v7613_v10 = vpop.permute.xlu0 %1645 }
 0x19c   : > { %10975 = vst [vmem:[#allocation46_spill] sm:$0xff] %v7611_v5  ;;  %946 = vrot.lane.b32.xlu1 %v899_v22, %s6731_s24  ;;  %910 = vrot.lane.b32.xlu0 %v830_v2, %s6730_s23  ;;  %v1132_v22 = vcombine.high %v7443_v48, %v10966_v18  ;;  %v1333_v48 = vcombine.low %v7475_v11, %v7480_v20 }
 0x19f   : > { %v7626_v50 = vpop.permute.xlu1 %1617  ;;  %v7628_v37 = vpop.permute.xlu0 %1653 }
 0x1a0   : > { %10977 = vst [vmem:[#allocation48_spill] sm:$0xff] %v7628_v37  ;;  %954 = vrot.lane.b32.xlu1 %v900_v25, %s6732_s25  ;;  %918 = vrot.lane.b32.xlu0 %v831_v52, %s6731_s24  ;;  %v1133_v25 = vcombine.high %v7453_v49, %v10966_v18  ;;  %v7674_v49 = vrot.slane %v1333_v48, %v7176_v62 }
 0x1a1   : > { %v1298_v48 = vcombine.high %v7484_v27, %v10966_v18 }
 0x1a2   : > { %10981 = vst [vmem:[#allocation52_spill] sm:$0xff] %v7674_v49 }
 0x1a3   : > { %v7639_v4 = vpop.permute.xlu1 %1625  ;;  %v7641_v2 = vpop.permute.xlu0 %1661 }
 0x1a4   : > { %10979 = vst [vmem:[#allocation50_spill] sm:$0xff] %v7641_v2  ;;  %1164 = vrot.lane.b32.xlu1 %v1131_v14, %s6729_s21  ;;  %926 = vrot.lane.b32.xlu0 %v832_v23, %s6732_s25  ;;  %v1065_v14 = vcombine.high %v7440_v26, %v10966_v18  ;;  %v1066_v26 = vcombine.high %v7450_v19, %v10966_v18 }
 0x1a5   : > { %v1778_v2 = vcombine.low %v7486_v39, %v7522_v38 }
 0x1a7   : > { %v7649_v56 = vpop.permute.xlu1 %1633  ;;  %v7651_v52 = vpop.permute.xlu0 %1613 }
 0x1a8   : > { %10980 = vst [vmem:[#allocation51_spill] sm:$0xff] %v7649_v56  ;;  %1172 = vrot.lane.b32.xlu1 %v1132_v22, %s6730_s23  ;;  %1136 = vrot.lane.b32.xlu0 %v1063_v29, %s6729_s21  ;;  %v1265_v22 = vcombine.low %v7460_v9, %v7463_v53  ;;  %v1365_v9 = vcombine.high %v7674_v49, %v10966_v18 }
 0x1aa   : > { %v7685_v53 = vrot.slane %v1265_v22, %v7176_v62 }
 0x1ab   : > { %v7661_v23 = vpop.permute.xlu1 %1641  ;;  %v7671_v29 = vpop.permute.xlu0 %1621 }
 0x1ac   : > { %1180 = vrot.lane.b32.xlu1 %v1133_v25, %s6731_s24  ;;  %1144 = vrot.lane.b32.xlu0 %v1064_v51, %s6730_s23  ;;  %10982 = vst [vmem:[#allocation53_spill] sm:$0xff] %v7685_v53  ;;  %v1366_v51 = vcombine.high %v7501_v33, %v10966_v18  ;;  %v1297_v19 = vcombine.high %v7685_v53, %v10966_v18 }
 0x1ad   : > { %v1299_v33 = vcombine.high %v7498_v12, %v10966_v18 }
 0x1af   : > { %v7676_v11 = vpop.permute.xlu1 %1649  ;;  %v7689_v20 = vpop.permute.xlu0 %1629 }
 0x1b0   : > { %1188 = vrot.lane.b32.xlu1 %v1134_v15, %s6732_s25  ;;  %1152 = vrot.lane.b32.xlu0 %v1065_v14, %s6731_s24  ;;  %v1367_v14 = vcombine.high %v7517_v6, %v10966_v18  ;;  %v1300_v6 = vcombine.high %v7514_v46, %v10966_v18 }
 0x1b3   : > { %v7687_v32 = vpop.permute.xlu1 %1657  ;;  %v7705_v22 = vpop.permute.xlu0 %1637 }
 0x1b4   : > { %10983 = vst [vmem:[#allocation54_spill] sm:$0xff] %v7687_v32  ;;  %1398 = vrot.lane.b32.xlu1 %v1365_v9, %s6729_s21  ;;  %1160 = vrot.lane.b32.xlu0 %v1066_v26, %s6732_s25  ;;  %10985 = vst [vmem:[#allocation56_spill] sm:$0xff] %v7705_v22  ;;  %v1368_v26 = vcombine.high %v7533_v13, %v10966_v18 }
 0x1b7   : > { %v7697_v25 = vpop.permute.xlu1 %1665 }
 0x1b8   : > { %10984 = vst [vmem:[#allocation55_spill] sm:$0xff] %v7697_v25  ;;  %1406 = vrot.lane.b32.xlu1 %v1366_v51, %s6730_s23  ;;  %1370 = vrot.lane.b32.xlu0 %v1297_v19, %s6729_s21 }
 0x1bb   : > { %v7707_v15 = vpop.permute.xlu1 %672 }
 0x1bc   : > { %10986 = vst [vmem:[#allocation57_spill] sm:$0xff] %v7707_v15  ;;  %1414 = vrot.lane.b32.xlu1 %v1367_v14, %s6731_s24  ;;  %1378 = vrot.lane.b32.xlu0 %v1298_v48, %s6730_s23 }
 0x1be   : > { %v7715_v9 = vpop.permute.xlu0 %700 }
 0x1bf   : > { %v7717_v27 = vpop.permute.xlu1 %680 }
 0x1c0   : > { %10987 = vst [vmem:[#allocation58_spill] sm:$0xff] %v7717_v27  ;;  %1422 = vrot.lane.b32.xlu1 %v1368_v26, %s6732_s25  ;;  %1386 = vrot.lane.b32.xlu0 %v1299_v33, %s6731_s24 }
 0x1c2   : > { %v7723_v51 = vpop.permute.xlu0 %708 }
 0x1c3   : > { %10988 = vst [vmem:[#allocation59_spill] sm:$0xff] %v7723_v51  ;;  %v7728_v12 = vpop.permute.xlu1 %688 }
 0x1c4   : > { %1700 = vrot.lane.b32.xlu1 %v7235_v43, %s6720_s18  ;;  %1394 = vrot.lane.b32.xlu0 %v1300_v6, %s6732_s25  ;;  %10989 = vst [vmem:[#allocation60_spill] sm:$0xff] %v7728_v12 }
 0x1c6   : > { %v7732_v13 = vpop.permute.xlu0 %716 }
 0x1c7   : > { %10990 = vst [vmem:[#allocation61_spill] sm:$0xff] %v7732_v13 }
 0x1c8   : > { %1698 = vrot.lane.b32.xlu0 %v6993_v58, %s6720_s18 }
 0x1ca   : > { %v7734_v19 = vpop.permute.xlu1 %906 }
 0x1cb   : > { %10991 = vst [vmem:[#allocation62_spill] sm:$0xff] %v7734_v19 }
 0x1ce   : > { %v7736_v48 = vpop.permute.xlu0 %934  ;;  %v7738_v14 = vpop.permute.xlu1 %914 }
 0x1cf   : > { %10992 = vst [vmem:[#allocation63_spill] sm:$0xff] %v7736_v48  ;;  %10993 = vst [vmem:[#allocation64_spill] sm:$0xff] %v7738_v14 }
 0x1d2   : > { %v7740_v46 = vpop.permute.xlu0 %942  ;;  %v7742_v33 = vpop.permute.xlu1 %922 }
 0x1d3   : > { %10994 = vst [vmem:[#allocation65_spill] sm:$0xff] %v7740_v46  ;;  %10995 = vst [vmem:[#allocation66_spill] sm:$0xff] %v7742_v33 }
 0x1d6   : > { %v7744_v26 = vpop.permute.xlu0 %950 }
 0x1d7   : > { %10996 = vst [vmem:[#allocation67_spill] sm:$0xff] %v7744_v26 }
 0x1da   : > { %v7746_v6 = vpop.permute.xlu1 %1140 }
 0x1db   : > { %10997 = vst [vmem:[#allocation68_spill] sm:$0xff] %v7746_v6 }
 0x1de   : > { %v7748_v5 = vpop.permute.xlu0 %1168  ;;  %v7750_v60 = vpop.permute.xlu1 %1148 }
 0x1df   : > { %10998 = vst [vmem:[#allocation69_spill] sm:$0xff] %v7748_v5  ;;  %10999 = vst [vmem:[#allocation70_spill] sm:$0xff] %v7750_v60 }
 0x1e2   : > { %v7752_v30 = vpop.permute.xlu0 %1176  ;;  %v7754_v12 = vpop.permute.xlu1 %1156 }
 0x1e3   : > { %11000 = vst [vmem:[#allocation71_spill] sm:$0xff] %v7752_v30  ;;  %11001 = vst [vmem:[#allocation72_spill] sm:$0xff] %v7754_v12 }
 0x1e6   : > { %v7756_v53 = vpop.permute.xlu0 %1184 }
 0x1e7   : > { %11002 = vst [vmem:[#allocation73_spill] sm:$0xff] %v7756_v53 }
 0x1ea   : > { %v7758_v49 = vpop.permute.xlu1 %1374 }
 0x1eb   : > { %11003 = vst [vmem:[#allocation74_spill] sm:$0xff] %v7758_v49 }
 0x1ee   : > { %v7760_v14 = vpop.permute.xlu1 %1382  ;;  %v7762_v17 = vpop.permute.xlu0 %1402 }
 0x1ef   : > { %11004 = vst [vmem:[#allocation75_spill] sm:$0xff] %v7760_v14  ;;  %11005 = vst [vmem:[#allocation76_spill] sm:$0xff] %v7762_v17 }
 0x1f2   : > { %v7764_v33 = vpop.permute.xlu1 %1390  ;;  %v7766_v26 = vpop.permute.xlu0 %1410 }
 0x1f3   : > { %11006 = vst [vmem:[#allocation77_spill] sm:$0xff] %v7764_v33  ;;  %11007 = vst [vmem:[#allocation78_spill] sm:$0xff] %v7766_v26 }
 0x1f6   : > { %v7768_v6 = vpop.permute.xlu1 %696  ;;  %v7770_v5 = vpop.permute.xlu0 %1418 }
 0x1f7   : > { %11008 = vst [vmem:[#allocation79_spill] sm:$0xff] %v7770_v5 }
 0x1fa   : > { %v7772_v60 = vpop.permute.xlu1 %704  ;;  %v7774_v30 = vpop.permute.xlu0 %668 }
 0x1fb   : > { %11009 = vst [vmem:[#allocation80_spill] sm:$0xff] %v7774_v30 }
 0x1fe   : > { %v7776_v12 = vpop.permute.xlu1 %712  ;;  %v7778_v53 = vpop.permute.xlu0 %676 }
 0x1ff   : > { %11010 = vst [vmem:[#allocation81_spill] sm:$0xff] %v7776_v12  ;;  %11011 = vst [vmem:[#allocation82_spill] sm:$0xff] %v7778_v53 }
 0x202   : > { %v7780_v49 = vpop.permute.xlu1 %720  ;;  %v7782_v14 = vpop.permute.xlu0 %684 }
 0x203   : > { %11012 = vst [vmem:[#allocation83_spill] sm:$0xff] %v7780_v49  ;;  %11013 = vst [vmem:[#allocation84_spill] sm:$0xff] %v7782_v14 }
 0x206   : > { %v7784_v17 = vpop.permute.xlu1 %930  ;;  %v7786_v33 = vpop.permute.xlu0 %692 }
 0x207   : > { %11014 = vst [vmem:[#allocation85_spill] sm:$0xff] %v7784_v17  ;;  %11015 = vst [vmem:[#allocation86_spill] sm:$0xff] %v7786_v33 }
 0x20a   : > { %v7788_v26 = vpop.permute.xlu1 %938  ;;  %v7790_v19 = vpop.permute.xlu0 %902 }
 0x20b   : > { %11016 = vst [vmem:[#allocation87_spill] sm:$0xff] %v7788_v26  ;;  %11017 = vst [vmem:[#allocation88_spill] sm:$0xff] %v7790_v19 }
 0x20e   : > { %v7792_v5 = vpop.permute.xlu1 %946  ;;  %v7794_v46 = vpop.permute.xlu0 %910 }
 0x20f   : > { %11018 = vst [vmem:[#allocation89_spill] sm:$0xff] %v7792_v5  ;;  %11019 = vst [vmem:[#allocation90_spill] sm:$0xff] %v7794_v46 }
 0x212   : > { %v7796_v27 = vpop.permute.xlu1 %954  ;;  %v7798_v13 = vpop.permute.xlu0 %918 }
 0x213   : > { %11020 = vst [vmem:[#allocation91_spill] sm:$0xff] %v7796_v27  ;;  %11021 = vst [vmem:[#allocation92_spill] sm:$0xff] %v7798_v13 }
 0x216   : > { %v7800_v25 = vpop.permute.xlu1 %1164  ;;  %v7802_v49 = vpop.permute.xlu0 %926 }
 0x217   : > { %11022 = vst [vmem:[#allocation93_spill] sm:$0xff] %v7800_v25  ;;  %11023 = vst [vmem:[#allocation94_spill] sm:$0xff] %v7802_v49 }
 0x21a   : > { %v7804_v14 = vpop.permute.xlu1 %1172  ;;  %v7806_v44 = vpop.permute.xlu0 %1136 }
 0x21b   : > { %11024 = vst [vmem:[#allocation95_spill] sm:$0xff] %v7804_v14  ;;  %11025 = vst [vmem:[#allocation96_spill] sm:$0xff] %v7806_v44 }
 0x21e   : > { %v7808_v33 = vpop.permute.xlu1 %1180  ;;  %v7810_v41 = vpop.permute.xlu0 %1144 }
 0x21f   : > { %11026 = vst [vmem:[#allocation97_spill] sm:$0xff] %v7808_v33  ;;  %11027 = vst [vmem:[#allocation98_spill] sm:$0xff] %v7810_v41 }
 0x222   : > { %v7812_v19 = vpop.permute.xlu1 %1188  ;;  %v7814_v5 = vpop.permute.xlu0 %1152 }
 0x223   : > { %11028 = vst [vmem:[#allocation99_spill] sm:$0xff] %v7812_v19  ;;  %11029 = vst [vmem:[#allocation100_spill] sm:$0xff] %v7814_v5  ;;  %v1710_v19 = vcombine.low %v7467_v55, %v7505_v47 }
 0x226   : > { %v7816_v46 = vpop.permute.xlu1 %1398  ;;  %v7818_v27 = vpop.permute.xlu0 %1160 }
 0x227   : > { %11030 = vst [vmem:[#allocation101_spill] sm:$0xff] %v7816_v46  ;;  %11031 = vst [vmem:[#allocation102_spill] sm:$0xff] %v7818_v27  ;;  %v1711_v27 = vcombine.high %v7467_v55, %v7505_v47 }
 0x22a   : > { %v7820_v13 = vpop.permute.xlu1 %1406  ;;  %v7822_v25 = vpop.permute.xlu0 %1370 }
 0x22b   : > { %11032 = vst [vmem:[#allocation103_spill] sm:$0xff] %v7820_v13  ;;  %11033 = vst [vmem:[#allocation104_spill] sm:$0xff] %v7822_v25  ;;  %v1725_v25 = vrot.slane %v1711_v27, %v6921_v31 }
 0x22e   : > { %v7824_v49 = vpop.permute.xlu0 %1378  ;;  %v7826_v14 = vpop.permute.xlu1 %1414 }
 0x22f   : > { %11034 = vst [vmem:[#allocation105_spill] sm:$0xff] %v7824_v49  ;;  %11035 = vst [vmem:[#allocation106_spill] sm:$0xff] %v7826_v14  ;;  %v1718_v14 = vrot.slane %v1710_v19, %v6921_v31  ;;  %v1786_v19 = vrot.slane %v1778_v2, %v6921_v31 }
 0x232   : > { %v7828_v44 = vpop.permute.xlu0 %1386  ;;  %v7830_v33 = vpop.permute.xlu1 %1422 }
 0x233   : > { %11036 = vst [vmem:[#allocation107_spill] sm:$0xff] %v7828_v44  ;;  %11037 = vst [vmem:[#allocation108_spill] sm:$0xff] %v7830_v33 }
 0x236   : > { %v7832_v41 = vpop.permute.xlu0 %1394  ;;  %v1701_v46 = vpop.permute.xlu1 %1700 }
 0x237   : > { %11038 = vst [vmem:[#allocation109_spill] sm:$0xff] %v7832_v41  ;;  %v1794_v44 = vcombine.low %v7503_v34, %v1701_v46  ;;  %v1795_v27 = vcombine.high %v7503_v34, %v1701_v46 }
 0x239   : > { %v1802_v55 = vrot.slane %v1794_v44, %v6921_v31 }
 0x23a   : > { %v1699_v5 = vpop.permute.xlu0 %1698 }
 0x23b   : > { %v1726_v13 = vcombine.low %v7488_v54, %v1699_v5  ;;  %v1727_v49 = vcombine.high %v7488_v54, %v1699_v5 }
 0x23d   : > { %v1734_v33 = vrot.slane %v1726_v13, %v6921_v31  ;;  %v1741_v41 = vrot.slane %v1727_v49, %v6921_v31  ;;  %v1810_v13 = vcombine.low %v1786_v19, %v1802_v55 }
 0x23f   : > { %v1742_v22 = vcombine.low %v1718_v14, %v1734_v33  ;;  %v1743_v45 = vcombine.high %v1718_v14, %v1734_v33  ;;  %v1758_v47 = vcombine.low %v1725_v25, %v1741_v41  ;;  %v1759_v26 = vcombine.high %v1725_v25, %v1741_v41 }
 0x240   : > { %v1811_v14 = vcombine.high %v1786_v19, %v1802_v55  ;;  %v7867_v41 = vrot.slane %v1810_v13, %v7176_v62 }
 0x241   : > { %v1757_v54 = vrot.slane %v1743_v45, %v7176_v62  ;;  %v7850_v5 = vrot.slane %v1742_v22, %v7176_v62  ;;  %v1766_v44 = vrot.slane %v1758_v47, %v7176_v62  ;;  %v1779_v45 = vcombine.high %v7486_v39, %v7522_v38 }
 0x242   : > { %v1809_v22 = vrot.slane %v1795_v27, %v6921_v31  ;;  %v1773_v34 = vrot.slane %v1759_v26, %v7176_v62  ;;  %11040 = vst [vmem:[#allocation111_spill] sm:$0xff] %v7867_v41  ;;  %v1842_v46 = vcombine.high %v7867_v41, %v10966_v18  ;;  %v1825_v33 = vrot.slane %v1811_v14, %v7176_v62 }
 0x243   : > { %11039 = vst [vmem:[#allocation110_spill] sm:$0xff] %v7850_v5  ;;  %1851 = vrot.lane.b32.xlu1 %v1757_v54, %s6726_s19  ;;  %v1774_v49 = vcombine.high %v7850_v5, %v10966_v18  ;;  %v1775_v2 = vcombine.high %v1757_v54, %v10966_v18  ;;  %v1793_v25 = vrot.slane %v1779_v45, %v6921_v31 }
 0x244   : > { %v1776_v39 = vcombine.high %v1766_v44, %v10966_v18  ;;  %v1777_v26 = vcombine.high %v1773_v34, %v10966_v18  ;;  %v1843_v47 = vcombine.high %v1825_v33, %v10966_v18 }
 0x245   : > { %1847 = vrot.lane.b32.xlu0 %v1774_v49, %s6729_s21  ;;  %v1826_v38 = vcombine.low %v1793_v25, %v1809_v22  ;;  %v1827_v55 = vcombine.high %v1793_v25, %v1809_v22 }
 0x247   : > { %1859 = vrot.lane.b32.xlu1 %v1766_v44, %s6727_s15  ;;  %v1834_v54 = vrot.slane %v1826_v38, %v7176_v62  ;;  %v1841_v49 = vrot.slane %v1827_v55, %v7176_v62 }
 0x249   : > { %1855 = vrot.lane.b32.xlu0 %v1775_v2, %s6730_s23  ;;  %v1844_v19 = vcombine.high %v1834_v54, %v10966_v18  ;;  %v1845_v27 = vcombine.high %v1841_v49, %v10966_v18 }
 0x24b   : > { %1867 = vrot.lane.b32.xlu1 %v1773_v34, %s6728_s20 }
 0x24d   : > { %1863 = vrot.lane.b32.xlu0 %v1776_v39, %s6731_s24 }
 0x24f   : > { %1875 = vrot.lane.b32.xlu1 %v1842_v46, %s6729_s21 }
 0x251   : > { %1871 = vrot.lane.b32.xlu0 %v1777_v26, %s6732_s25 }
 0x253   : > { %1883 = vrot.lane.b32.xlu1 %v1843_v47, %s6730_s23 }
 0x255   : > { %1879 = vrot.lane.b32.xlu0 %v1825_v33, %s6726_s19 }
 0x257   : > { %1891 = vrot.lane.b32.xlu1 %v1844_v19, %s6731_s24 }
 0x259   : > { %1887 = vrot.lane.b32.xlu0 %v1834_v54, %s6727_s15 }
 0x25b   : > { %1899 = vrot.lane.b32.xlu1 %v1845_v27, %s6732_s25 }
 0x25d   : > { %1895 = vrot.lane.b32.xlu0 %v1841_v49, %s6728_s20 }
 0x25f   : > { %1922 = vrot.lane.b32.xlu1 %v7163_v61, %s6722_s9 }
 0x261   : > { %1920 = vrot.lane.b32.xlu0 %v7149_v21, %s6722_s9 }
 0x263   : > { %1926 = vrot.lane.b32.xlu1 %v7179_v3, %s6722_s9 }
 0x265   : > { %1924 = vrot.lane.b32.xlu0 %v7166_v16, %s6722_s9 }
 0x267   : > { %1930 = vrot.lane.b32.xlu1 %v7191_v24, %s6722_s9 }
 0x269   : > { %1928 = vrot.lane.b32.xlu0 %v7182_v7, %s6722_s9 }
 0x26b   : > { %1934 = vrot.lane.b32.xlu1 %v7235_v43, %s6722_s9 }
 0x26d   : > { %1932 = vrot.lane.b32.xlu0 %v6993_v58, %s6722_s9 }
 0x2b5   : > { %v7906_v13 = vpop.permute.xlu1 %1851 }
 0x2b6   : > { %11041 = vst [vmem:[#allocation112_spill] sm:$0xff] %v7906_v13 }
 0x2b7   : > { %v7908_v44 = vpop.permute.xlu0 %1847 }
 0x2b8   : > { %11042 = vst [vmem:[#allocation113_spill] sm:$0xff] %v7908_v44 }
 0x2b9   : > { %v7910_v45 = vpop.permute.xlu1 %1859 }
 0x2ba   : > { %11043 = vst [vmem:[#allocation114_spill] sm:$0xff] %v7910_v45 }
 0x2bb   : > { %v7912_v2 = vpop.permute.xlu0 %1855 }
 0x2bc   : > { %11044 = vst [vmem:[#allocation115_spill] sm:$0xff] %v7912_v2 }
 0x2bd   : > { %v7914_v22 = vpop.permute.xlu1 %1867 }
 0x2be   : > { %11045 = vst [vmem:[#allocation116_spill] sm:$0xff] %v7914_v22 }
 0x2bf   : > { %v7916_v14 = vpop.permute.xlu0 %1863 }
 0x2c0   : > { %11046 = vst [vmem:[#allocation117_spill] sm:$0xff] %v7916_v14 }
 0x2c1   : > { %v7918_v34 = vpop.permute.xlu1 %1875 }
 0x2c2   : > { %11047 = vst [vmem:[#allocation118_spill] sm:$0xff] %v7918_v34 }
 0x2c3   : > { %v7920_v25 = vpop.permute.xlu0 %1871 }
 0x2c4   : > { %11048 = vst [vmem:[#allocation119_spill] sm:$0xff] %v7920_v25 }
 0x2c5   : > { %v7922_v39 = vpop.permute.xlu1 %1883 }
 0x2c6   : > { %11049 = vst [vmem:[#allocation120_spill] sm:$0xff] %v7922_v39 }
 0x2c7   : > { %v7924_v38 = vpop.permute.xlu0 %1879 }
 0x2c8   : > { %11050 = vst [vmem:[#allocation121_spill] sm:$0xff] %v7924_v38 }
 0x2c9   : > { %v7926_v46 = vpop.permute.xlu1 %1891 }
 0x2ca   : > { %11051 = vst [vmem:[#allocation122_spill] sm:$0xff] %v7926_v46 }
 0x2cb   : > { %v7928_v33 = vpop.permute.xlu0 %1887 }
 0x2cc   : > { %11052 = vst [vmem:[#allocation123_spill] sm:$0xff] %v7928_v33 }
 0x2cd   : > { %v7930_v26 = vpop.permute.xlu1 %1899 }
 0x2ce   : > { %11053 = vst [vmem:[#allocation124_spill] sm:$0xff] %v7930_v26 }
 0x2cf   : > { %v7932_v55 = vpop.permute.xlu0 %1895 }
 0x2d0   : > { %11054 = vst [vmem:[#allocation125_spill] sm:$0xff] %v7932_v55 }
 0x2d1   : > { %v1923_v47 = vpop.permute.xlu1 %1922 }
 0x2d3   : > { %v1921_v54 = vpop.permute.xlu0 %1920 }
 0x2d5   : > { %v1927_v19 = vpop.permute.xlu1 %1926 }
 0x2d7   : > { %v1925_v49 = vpop.permute.xlu0 %1924 }
 0x2d9   : > { %v1931_v27 = vpop.permute.xlu1 %1930 }
 0x2da   : > { %v2012_v55 = vcombine.low %v1923_v47, %v1931_v27 }
 0x2db   : > { %v1929_v22 = vpop.permute.xlu0 %1928 }
 0x2dc   : > { %v1944_v14 = vcombine.low %v1921_v54, %v1929_v22  ;;  %v1945_v13 = vcombine.high %v1921_v54, %v1929_v22  ;;  %v2020_v22 = vrot.slane %v2012_v55, %v6921_v31 }
 0x2dd   : > { %v1935_v45 = vpop.permute.xlu1 %1934 }
 0x2de   : > { %v1952_v46 = vrot.slane %v1944_v14, %v6921_v31  ;;  %v2028_v38 = vcombine.low %v1927_v19, %v1935_v45  ;;  %v1959_v41 = vrot.slane %v1945_v13, %v6921_v31  ;;  %v2029_v14 = vcombine.high %v1927_v19, %v1935_v45 }
 0x2df   : > { %v1933_v25 = vpop.permute.xlu0 %1932 }
 0x2e0   : > { %v1960_v39 = vcombine.low %v1925_v49, %v1933_v25  ;;  %v1961_v2 = vcombine.high %v1925_v49, %v1933_v25  ;;  %v2036_v44 = vrot.slane %v2028_v38, %v6921_v31 }
 0x2e2   : > { %v1968_v33 = vrot.slane %v1960_v39, %v6921_v31  ;;  %v1975_v26 = vrot.slane %v1961_v2, %v6921_v31  ;;  %v2044_v39 = vcombine.low %v2020_v22, %v2036_v44 }
 0x2e4   : > { %v1976_v34 = vcombine.low %v1952_v46, %v1968_v33  ;;  %v1977_v5 = vcombine.high %v1952_v46, %v1968_v33  ;;  %v1992_v53 = vcombine.low %v1959_v41, %v1975_v26  ;;  %v1993_v13 = vcombine.high %v1959_v41, %v1975_v26 }
 0x2e5   : > { %v2013_v46 = vcombine.high %v1923_v47, %v1931_v27  ;;  %v2045_v33 = vcombine.high %v2020_v22, %v2036_v44  ;;  %v7955_v45 = vrot.slane %v2044_v39, %v7176_v62 }
 0x2e6   : > { %v1991_v48 = vrot.slane %v1977_v5, %v7176_v62  ;;  %v7941_v25 = vrot.slane %v1976_v34, %v7176_v62  ;;  %v2000_v38 = vrot.slane %v1992_v53, %v7176_v62  ;;  %v2043_v34 = vrot.slane %v2029_v14, %v6921_v31 }
 0x2e7   : > { %v2007_v55 = vrot.slane %v1993_v13, %v7176_v62  ;;  %11056 = vst [vmem:[#allocation127_spill] sm:$0xff] %v7955_v45  ;;  %v2027_v41 = vrot.slane %v2013_v46, %v6921_v31  ;;  %v2059_v44 = vrot.slane %v2045_v33, %v7176_v62 }
 0x2e8   : > { %11055 = vst [vmem:[#allocation126_spill] sm:$0xff] %v7941_v25  ;;  %2085 = vrot.lane.b32.xlu1 %v1991_v48, %s6726_s19  ;;  %v2008_v2 = vcombine.high %v7941_v25, %v10966_v18  ;;  %v2009_v5 = vcombine.high %v1991_v48, %v10966_v18  ;;  %v2010_v53 = vcombine.high %v2000_v38, %v10966_v18 }
 0x2e9   : > { %v2060_v26 = vcombine.low %v2027_v41, %v2043_v34  ;;  %v2076_v48 = vcombine.high %v7955_v45, %v10966_v18  ;;  %v2011_v47 = vcombine.high %v2007_v55, %v10966_v18  ;;  %v2061_v54 = vcombine.high %v2027_v41, %v2043_v34 }
 0x2ea   : > { %2081 = vrot.lane.b32.xlu0 %v2008_v2, %s6729_s21  ;;  %v2077_v19 = vcombine.high %v2059_v44, %v10966_v18 }
 0x2eb   : > { %v2068_v49 = vrot.slane %v2060_v26, %v7176_v62  ;;  %v2075_v22 = vrot.slane %v2061_v54, %v7176_v62 }
 0x2ec   : > { %2093 = vrot.lane.b32.xlu1 %v2000_v38, %s6727_s15 }
 0x2ed   : > { %v2078_v27 = vcombine.high %v2068_v49, %v10966_v18  ;;  %v2079_v2 = vcombine.high %v2075_v22, %v10966_v18 }
 0x2ee   : > { %2089 = vrot.lane.b32.xlu0 %v2009_v5, %s6730_s23 }
 0x2f0   : > { %2101 = vrot.lane.b32.xlu1 %v2007_v55, %s6728_s20 }
 0x2f2   : > { %2097 = vrot.lane.b32.xlu0 %v2010_v53, %s6731_s24 }
 0x2f4   : > { %2109 = vrot.lane.b32.xlu1 %v2076_v48, %s6729_s21 }
 0x2f6   : > { %2105 = vrot.lane.b32.xlu0 %v2011_v47, %s6732_s25 }
 0x2f8   : > { %2117 = vrot.lane.b32.xlu1 %v2077_v19, %s6730_s23 }
 0x2fa   : > { %2113 = vrot.lane.b32.xlu0 %v2059_v44, %s6726_s19 }
 0x2fc   : > { %2125 = vrot.lane.b32.xlu1 %v2078_v27, %s6731_s24 }
 0x2fe   : > { %2121 = vrot.lane.b32.xlu0 %v2068_v49, %s6727_s15 }
 0x300   : > { %2133 = vrot.lane.b32.xlu1 %v2079_v2, %s6732_s25 }
 0x302   : > { %2129 = vrot.lane.b32.xlu0 %v2075_v22, %s6728_s20 }
 0x304   : > { %2156 = vrot.lane.b32.xlu1 %v7163_v61, %s6723_s11 }
 0x306   : > { %2154 = vrot.lane.b32.xlu0 %v7149_v21, %s6723_s11 }
 0x308   : > { %2160 = vrot.lane.b32.xlu1 %v7179_v3, %s6723_s11 }
 0x30a   : > { %2158 = vrot.lane.b32.xlu0 %v7166_v16, %s6723_s11 }
 0x30c   : > { %2164 = vrot.lane.b32.xlu1 %v7191_v24, %s6723_s11 }
 0x30e   : > { %2162 = vrot.lane.b32.xlu0 %v7182_v7, %s6723_s11 }
 0x310   : > { %2168 = vrot.lane.b32.xlu1 %v7235_v43, %s6723_s11 }
 0x312   : > { %2166 = vrot.lane.b32.xlu0 %v6993_v58, %s6723_s11 }
 0x35a   : > { %v7994_v14 = vpop.permute.xlu1 %2085 }
 0x35b   : > { %11057 = vst [vmem:[#allocation128_spill] sm:$0xff] %v7994_v14 }
 0x35c   : > { %v7996_v39 = vpop.permute.xlu0 %2081 }
 0x35d   : > { %11058 = vst [vmem:[#allocation129_spill] sm:$0xff] %v7996_v39 }
 0x35e   : > { %v7998_v13 = vpop.permute.xlu1 %2093 }
 0x35f   : > { %11059 = vst [vmem:[#allocation130_spill] sm:$0xff] %v7998_v13 }
 0x360   : > { %v8000_v38 = vpop.permute.xlu0 %2089 }
 0x361   : > { %11060 = vst [vmem:[#allocation131_spill] sm:$0xff] %v8000_v38 }
 0x362   : > { %v8002_v46 = vpop.permute.xlu1 %2101 }
 0x363   : > { %11061 = vst [vmem:[#allocation132_spill] sm:$0xff] %v8002_v46 }
 0x364   : > { %v8004_v5 = vpop.permute.xlu0 %2097 }
 0x365   : > { %11062 = vst [vmem:[#allocation133_spill] sm:$0xff] %v8004_v5 }
 0x366   : > { %v8006_v34 = vpop.permute.xlu1 %2109 }
 0x367   : > { %11063 = vst [vmem:[#allocation134_spill] sm:$0xff] %v8006_v34 }
 0x368   : > { %v8008_v33 = vpop.permute.xlu0 %2105 }
 0x369   : > { %11064 = vst [vmem:[#allocation135_spill] sm:$0xff] %v8008_v33 }
 0x36a   : > { %v8010_v55 = vpop.permute.xlu1 %2117 }
 0x36b   : > { %11065 = vst [vmem:[#allocation136_spill] sm:$0xff] %v8010_v55 }
 0x36c   : > { %v8012_v41 = vpop.permute.xlu0 %2113 }
 0x36d   : > { %11066 = vst [vmem:[#allocation137_spill] sm:$0xff] %v8012_v41 }
 0x36e   : > { %v8014_v53 = vpop.permute.xlu1 %2125 }
 0x36f   : > { %11067 = vst [vmem:[#allocation138_spill] sm:$0xff] %v8014_v53 }
 0x370   : > { %v8016_v26 = vpop.permute.xlu0 %2121 }
 0x371   : > { %11068 = vst [vmem:[#allocation139_spill] sm:$0xff] %v8016_v26 }
 0x372   : > { %v8018_v48 = vpop.permute.xlu1 %2133 }
 0x373   : > { %11069 = vst [vmem:[#allocation140_spill] sm:$0xff] %v8018_v48 }
 0x374   : > { %v8020_v44 = vpop.permute.xlu0 %2129 }
 0x375   : > { %11070 = vst [vmem:[#allocation141_spill] sm:$0xff] %v8020_v44 }
 0x376   : > { %v2157_v47 = vpop.permute.xlu1 %2156 }
 0x378   : > { %v2155_v54 = vpop.permute.xlu0 %2154 }
 0x37a   : > { %v2161_v19 = vpop.permute.xlu1 %2160 }
 0x37c   : > { %v2159_v49 = vpop.permute.xlu0 %2158 }
 0x37e   : > { %v2165_v27 = vpop.permute.xlu1 %2164 }
 0x37f   : > { %v2246_v44 = vcombine.low %v2157_v47, %v2165_v27 }
 0x380   : > { %v2163_v22 = vpop.permute.xlu0 %2162 }
 0x381   : > { %v2178_v2 = vcombine.low %v2155_v54, %v2163_v22  ;;  %v2179_v55 = vcombine.high %v2155_v54, %v2163_v22  ;;  %v2254_v54 = vrot.slane %v2246_v44, %v6921_v31 }
 0x382   : > { %v2169_v46 = vpop.permute.xlu1 %2168 }
 0x383   : > { %v2186_v53 = vrot.slane %v2178_v2, %v6921_v31  ;;  %v2262_v38 = vcombine.low %v2161_v19, %v2169_v46  ;;  %v2193_v14 = vrot.slane %v2179_v55, %v6921_v31 }
 0x384   : > { %v2167_v33 = vpop.permute.xlu0 %2166 }
 0x385   : > { %v2194_v5 = vcombine.low %v2159_v49, %v2167_v33  ;;  %v2195_v13 = vcombine.high %v2159_v49, %v2167_v33  ;;  %v2270_v34 = vrot.slane %v2262_v38, %v6921_v31 }
 0x387   : > { %v2202_v26 = vrot.slane %v2194_v5, %v6921_v31  ;;  %v2209_v48 = vrot.slane %v2195_v13, %v6921_v31  ;;  %v2263_v5 = vcombine.high %v2161_v19, %v2169_v46  ;;  %v2278_v49 = vcombine.low %v2254_v54, %v2270_v34 }
 0x389   : > { %v2210_v41 = vcombine.low %v2186_v53, %v2202_v26  ;;  %v2211_v45 = vcombine.high %v2186_v53, %v2202_v26  ;;  %v2226_v25 = vcombine.low %v2193_v14, %v2209_v48  ;;  %v2227_v55 = vcombine.high %v2193_v14, %v2209_v48 }
 0x38a   : > { %v2247_v53 = vcombine.high %v2157_v47, %v2165_v27  ;;  %v2279_v26 = vcombine.high %v2254_v54, %v2270_v34  ;;  %v8043_v46 = vrot.slane %v2278_v49, %v7176_v62 }
 0x38b   : > { %v2225_v39 = vrot.slane %v2211_v45, %v7176_v62  ;;  %v8029_v33 = vrot.slane %v2210_v41, %v7176_v62  ;;  %v2234_v38 = vrot.slane %v2226_v25, %v7176_v62  ;;  %v2277_v41 = vrot.slane %v2263_v5, %v6921_v31 }
 0x38c   : > { %v2241_v44 = vrot.slane %v2227_v55, %v7176_v62  ;;  %11072 = vst [vmem:[#allocation143_spill] sm:$0xff] %v8043_v46  ;;  %v2261_v14 = vrot.slane %v2247_v53, %v6921_v31  ;;  %v2293_v34 = vrot.slane %v2279_v26, %v7176_v62 }
 0x38d   : > { %11071 = vst [vmem:[#allocation142_spill] sm:$0xff] %v8029_v33  ;;  %2319 = vrot.lane.b32.xlu1 %v2225_v39, %s6726_s19  ;;  %v2242_v13 = vcombine.high %v8029_v33, %v10966_v18  ;;  %v2243_v45 = vcombine.high %v2225_v39, %v10966_v18  ;;  %v2244_v25 = vcombine.high %v2234_v38, %v10966_v18 }
 0x38e   : > { %v2294_v48 = vcombine.low %v2261_v14, %v2277_v41  ;;  %v2310_v39 = vcombine.high %v8043_v46, %v10966_v18  ;;  %v2245_v47 = vcombine.high %v2241_v44, %v10966_v18  ;;  %v2295_v19 = vcombine.high %v2261_v14, %v2277_v41 }
 0x38f   : > { %2315 = vrot.lane.b32.xlu0 %v2242_v13, %s6729_s21  ;;  %v2311_v27 = vcombine.high %v2293_v34, %v10966_v18 }
 0x390   : > { %v2302_v22 = vrot.slane %v2294_v48, %v7176_v62  ;;  %v2309_v54 = vrot.slane %v2295_v19, %v7176_v62 }
 0x391   : > { %2327 = vrot.lane.b32.xlu1 %v2234_v38, %s6727_s15 }
 0x392   : > { %v2312_v2 = vcombine.high %v2302_v22, %v10966_v18  ;;  %v2313_v13 = vcombine.high %v2309_v54, %v10966_v18 }
 0x393   : > { %2323 = vrot.lane.b32.xlu0 %v2243_v45, %s6730_s23 }
 0x395   : > { %2335 = vrot.lane.b32.xlu1 %v2241_v44, %s6728_s20 }
 0x397   : > { %2331 = vrot.lane.b32.xlu0 %v2244_v25, %s6731_s24 }
 0x399   : > { %2343 = vrot.lane.b32.xlu1 %v2310_v39, %s6729_s21 }
 0x39b   : > { %2339 = vrot.lane.b32.xlu0 %v2245_v47, %s6732_s25 }
 0x39d   : > { %2351 = vrot.lane.b32.xlu1 %v2311_v27, %s6730_s23 }
 0x39f   : > { %2347 = vrot.lane.b32.xlu0 %v2293_v34, %s6726_s19 }
 0x3a1   : > { %2359 = vrot.lane.b32.xlu1 %v2312_v2, %s6731_s24 }
 0x3a3   : > { %2355 = vrot.lane.b32.xlu0 %v2302_v22, %s6727_s15 }
 0x3a5   : > { %2367 = vrot.lane.b32.xlu1 %v2313_v13, %s6732_s25 }
 0x3a7   : > { %2363 = vrot.lane.b32.xlu0 %v2309_v54, %s6728_s20 }
 0x3a9   : > { %2390 = vrot.lane.b32.xlu1 %v7163_v61, %s6724_s12 }
 0x3ab   : > { %2388 = vrot.lane.b32.xlu0 %v7149_v21, %s6724_s12 }
 0x3ad   : > { %2394 = vrot.lane.b32.xlu1 %v7179_v3, %s6724_s12 }
 0x3af   : > { %2392 = vrot.lane.b32.xlu0 %v7166_v16, %s6724_s12 }
 0x3b1   : > { %2398 = vrot.lane.b32.xlu1 %v7191_v24, %s6724_s12 }
 0x3b3   : > { %2396 = vrot.lane.b32.xlu0 %v7182_v7, %s6724_s12 }
 0x3b5   : > { %2402 = vrot.lane.b32.xlu1 %v7235_v43, %s6724_s12 }
 0x3b7   : > { %2400 = vrot.lane.b32.xlu0 %v6993_v58, %s6724_s12 }
 0x3ff   : > { %v8082_v61 = vpop.permute.xlu1 %2319 }
 0x400   : > { %11073 = vst [vmem:[#allocation144_spill] sm:$0xff] %v8082_v61 }
 0x401   : > { %v8084_v21 = vpop.permute.xlu0 %2315 }
 0x402   : > { %11074 = vst [vmem:[#allocation145_spill] sm:$0xff] %v8084_v21 }
 0x403   : > { %v8086_v3 = vpop.permute.xlu1 %2327 }
 0x404   : > { %11075 = vst [vmem:[#allocation146_spill] sm:$0xff] %v8086_v3 }
 0x405   : > { %v8088_v5 = vpop.permute.xlu0 %2323 }
 0x406   : > { %11076 = vst [vmem:[#allocation147_spill] sm:$0xff] %v8088_v5 }
 0x407   : > { %v8090_v16 = vpop.permute.xlu1 %2335 }
 0x408   : > { %11077 = vst [vmem:[#allocation148_spill] sm:$0xff] %v8090_v16 }
 0x409   : > { %v8092_v24 = vpop.permute.xlu0 %2331 }
 0x40a   : > { %11078 = vst [vmem:[#allocation149_spill] sm:$0xff] %v8092_v24 }
 0x40b   : > { %v8094_v49 = vpop.permute.xlu1 %2343 }
 0x40c   : > { %11079 = vst [vmem:[#allocation150_spill] sm:$0xff] %v8094_v49 }
 0x40d   : > { %v8096_v7 = vpop.permute.xlu0 %2339 }
 0x40e   : > { %11080 = vst [vmem:[#allocation151_spill] sm:$0xff] %v8096_v7 }
 0x40f   : > { %v8098_v43 = vpop.permute.xlu1 %2351 }
 0x410   : > { %11081 = vst [vmem:[#allocation152_spill] sm:$0xff] %v8098_v43 }
 0x411   : > { %v8100_v55 = vpop.permute.xlu0 %2347 }
 0x412   : > { %11082 = vst [vmem:[#allocation153_spill] sm:$0xff] %v8100_v55 }
 0x413   : > { %v8102_v58 = vpop.permute.xlu1 %2359 }
 0x414   : > { %11083 = vst [vmem:[#allocation154_spill] sm:$0xff] %v8102_v58 }
 0x415   : > { %v8104_v38 = vpop.permute.xlu0 %2355 }
 0x416   : > { %11084 = vst [vmem:[#allocation155_spill] sm:$0xff] %v8104_v38 }
 0x417   : > { %v8106_v53 = vpop.permute.xlu1 %2367 }
 0x418   : > { %11085 = vst [vmem:[#allocation156_spill] sm:$0xff] %v8106_v53 }
 0x419   : > { %v8108_v45 = vpop.permute.xlu0 %2363 }
 0x41a   : > { %11086 = vst [vmem:[#allocation157_spill] sm:$0xff] %v8108_v45 }
 0x41b   : > { %v2391_v41 = vpop.permute.xlu1 %2390 }
 0x41d   : > { %v2389_v26 = vpop.permute.xlu0 %2388 }
 0x41f   : > { %v2395_v44 = vpop.permute.xlu1 %2394 }
 0x421   : > { %v2393_v14 = vpop.permute.xlu0 %2392 }
 0x423   : > { %v2399_v25 = vpop.permute.xlu1 %2398 }
 0x424   : > { %v2480_v53 = vcombine.low %v2391_v41, %v2399_v25 }
 0x425   : > { %v2397_v48 = vpop.permute.xlu0 %2396 }
 0x426   : > { %v2412_v39 = vcombine.low %v2389_v26, %v2397_v48  ;;  %v2413_v22 = vcombine.high %v2389_v26, %v2397_v48  ;;  %v2488_v26 = vrot.slane %v2480_v53, %v6921_v31 }
 0x427   : > { %v2403_v47 = vpop.permute.xlu1 %2402 }
 0x428   : > { %v2420_v2 = vrot.slane %v2412_v39, %v6921_v31  ;;  %v2496_v54 = vcombine.low %v2395_v44, %v2403_v47  ;;  %v2427_v16 = vrot.slane %v2413_v22, %v6921_v31  ;;  %v2497_v39 = vcombine.high %v2395_v44, %v2403_v47 }
 0x429   : > { %v2401_v34 = vpop.permute.xlu0 %2400  ;;  %v2481_v22 = vcombine.high %v2391_v41, %v2399_v25  ;;  %v2667_v25 = vcombine.low %v7000_v59, %v7028_v8 }
 0x42a   : > { %v2428_v19 = vcombine.low %v2393_v14, %v2401_v34  ;;  %v2429_v27 = vcombine.high %v2393_v14, %v2401_v34  ;;  %v2504_v58 = vrot.slane %v2496_v54, %v6921_v31 }
 0x42c   : > { %v2436_v13 = vrot.slane %v2428_v19, %v6921_v31  ;;  %v2443_v7 = vrot.slane %v2429_v27, %v6921_v31  ;;  %v2512_v34 = vcombine.low %v2488_v26, %v2504_v58  ;;  %v2513_v53 = vcombine.high %v2488_v26, %v2504_v58  ;;  %v11089_v26 = vld [vmem:[#allocation11_spill] sm:$0xff] }
 0x42e   : > { %v2444_v45 = vcombine.low %v2420_v2, %v2436_v13  ;;  %v2445_v24 = vcombine.high %v2420_v2, %v2436_v13  ;;  %v2460_v3 = vcombine.low %v2427_v16, %v2443_v7  ;;  %v2461_v19 = vcombine.high %v2427_v16, %v2443_v7 }
 0x42f   : > { %v8131_v44 = vrot.slane %v2512_v34, %v7176_v62  ;;  %v2495_v16 = vrot.slane %v2481_v22, %v6921_v31  ;;  %v2527_v58 = vrot.slane %v2513_v53, %v7176_v62  ;;  %v2675_v34 = vrot.slane %v2667_v25, %v6921_v31 }
 0x430   : > { %v2459_v38 = vrot.slane %v2445_v24, %v7176_v62  ;;  %v8117_v14 = vrot.slane %v2444_v45, %v7176_v62  ;;  %v2468_v27 = vrot.slane %v2460_v3, %v7176_v62  ;;  %v2511_v45 = vrot.slane %v2497_v39, %v6921_v31 }
 0x431   : > { %v2475_v2 = vrot.slane %v2461_v19, %v7176_v62  ;;  %11088 = vst [vmem:[#allocation159_spill] sm:$0xff] %v8131_v44  ;;  %v2545_v54 = vcombine.high %v2527_v58, %v10966_v18 }
 0x432   : > { %11087 = vst [vmem:[#allocation158_spill] sm:$0xff] %v8117_v14  ;;  %2553 = vrot.lane.b32.xlu1 %v2459_v38, %s6726_s19  ;;  %v2476_v48 = vcombine.high %v8117_v14, %v10966_v18  ;;  %v2477_v24 = vcombine.high %v2459_v38, %v10966_v18  ;;  %v2478_v3 = vcombine.high %v2468_v27, %v10966_v18 }
 0x433   : > { %v2528_v7 = vcombine.low %v2495_v16, %v2511_v45  ;;  %v2544_v38 = vcombine.high %v8131_v44, %v10966_v18  ;;  %v2479_v41 = vcombine.high %v2475_v2, %v10966_v18  ;;  %v2529_v47 = vcombine.high %v2495_v16, %v2511_v45 }
 0x434   : > { %2549 = vrot.lane.b32.xlu0 %v2476_v48, %s6729_s21  ;;  %v11090_v48 = vld [vmem:[#allocation10_spill] sm:$0xff] }
 0x435   : > { %v2536_v13 = vrot.slane %v2528_v7, %v7176_v62  ;;  %v2651_v39 = vcombine.low %v11090_v48, %v11089_v26  ;;  %v2652_v53 = vcombine.high %v11090_v48, %v11089_v26  ;;  %v11091_v7 = vld [vmem:[#allocation15_spill] sm:$0xff] }
 0x436   : > { %2561 = vrot.lane.b32.xlu1 %v2468_v27, %s6727_s15  ;;  %v2543_v27 = vrot.slane %v2529_v47, %v7176_v62  ;;  %v11094_v47 = vld [vmem:[#allocation14_spill] sm:$0xff] }
 0x437   : > { %v2546_v19 = vcombine.high %v2536_v13, %v10966_v18  ;;  %v2659_v22 = vrot.slane %v2651_v39, %v6921_v31  ;;  %v2666_v25 = vrot.slane %v2652_v53, %v6921_v31 }
 0x438   : > { %2557 = vrot.lane.b32.xlu0 %v2477_v24, %s6730_s23  ;;  %v2668_v24 = vcombine.high %v7000_v59, %v7028_v8 }
 0x439   : > { %v2683_v45 = vcombine.low %v2659_v22, %v2675_v34  ;;  %v2684_v16 = vcombine.high %v2659_v22, %v2675_v34 }
 0x43a   : > { %2569 = vrot.lane.b32.xlu1 %v2475_v2, %s6728_s20  ;;  %v2547_v2 = vcombine.high %v2543_v27, %v10966_v18 }
 0x43c   : > { %2565 = vrot.lane.b32.xlu0 %v2478_v3, %s6731_s24  ;;  %v2682_v3 = vrot.slane %v2668_v24, %v6921_v31 }
 0x43e   : > { %2577 = vrot.lane.b32.xlu1 %v2544_v38, %s6729_s21  ;;  %v11092_v38 = vld [vmem:[#allocation13_spill] sm:$0xff]  ;;  %v2699_v34 = vcombine.low %v2666_v25, %v2682_v3  ;;  %v2700_v53 = vcombine.high %v2666_v25, %v2682_v3 }
 0x440   : > { %2573 = vrot.lane.b32.xlu0 %v2479_v41, %s6732_s25  ;;  %v8167_v41 = vrot.slane %v2683_v45, %v7176_v62  ;;  %v2707_v45 = vrot.slane %v2699_v34, %v7176_v62 }
 0x442   : > { %2585 = vrot.lane.b32.xlu1 %v2545_v54, %s6730_s23  ;;  %11093 = vst [vmem:[#allocation11_spill] sm:$0xff] %v8167_v41  ;;  %v11095_v54 = vld [vmem:[#allocation12_spill] sm:$0xff]  ;;  %v2715_v22 = vcombine.high %v8167_v41, %v10966_v18  ;;  %v2717_v25 = vcombine.high %v2707_v45, %v10966_v18 }
 0x443   : > { %v2719_v39 = vcombine.low %v11095_v54, %v11094_v47 }
 0x444   : > { %2581 = vrot.lane.b32.xlu0 %v2527_v58, %s6726_s19  ;;  %v2735_v58 = vcombine.low %v11092_v38, %v11091_v7 }
 0x445   : > { %v2727_v24 = vrot.slane %v2719_v39, %v6921_v31  ;;  %v2714_v39 = vrot.slane %v2700_v53, %v7176_v62 }
 0x446   : > { %2593 = vrot.lane.b32.xlu1 %v2546_v19, %s6731_s24  ;;  %v2743_v19 = vrot.slane %v2735_v58, %v6921_v31  ;;  %v2720_v58 = vcombine.high %v11095_v54, %v11094_v47 }
 0x448   : > { %2589 = vrot.lane.b32.xlu0 %v2536_v13, %s6727_s15  ;;  %v2698_v13 = vrot.slane %v2684_v16, %v7176_v62  ;;  %v2752_v34 = vcombine.high %v2727_v24, %v2743_v19  ;;  %v2734_v44 = vrot.slane %v2720_v58, %v6921_v31 }
 0x44a   : > { %2601 = vrot.lane.b32.xlu1 %v2547_v2, %s6732_s25  ;;  %v2751_v2 = vcombine.low %v2727_v24, %v2743_v19  ;;  %v2716_v16 = vcombine.high %v2698_v13, %v10966_v18  ;;  %v2718_v19 = vcombine.high %v2714_v39, %v10966_v18 }
 0x44c   : > { %2597 = vrot.lane.b32.xlu0 %v2543_v27, %s6728_s20  ;;  %v2736_v27 = vcombine.high %v11092_v38, %v11091_v7 }
 0x44e   : > { %2792 = vrot.lane.b32.xlu1 %v2698_v13, %s6726_s19  ;;  %v2750_v3 = vrot.slane %v2736_v27, %v6921_v31 }
 0x450   : > { %2788 = vrot.lane.b32.xlu0 %v2715_v22, %s6729_s21  ;;  %v8190_v22 = vrot.slane %v2751_v2, %v7176_v62  ;;  %v2767_v53 = vcombine.low %v2734_v44, %v2750_v3  ;;  %v2768_v2 = vcombine.high %v2734_v44, %v2750_v3 }
 0x452   : > { %2800 = vrot.lane.b32.xlu1 %v2707_v45, %s6727_s15  ;;  %11096 = vst [vmem:[#allocation10_spill] sm:$0xff] %v8190_v22  ;;  %v2783_v13 = vcombine.high %v8190_v22, %v10966_v18  ;;  %v2775_v45 = vrot.slane %v2767_v53, %v7176_v62  ;;  %v2782_v58 = vrot.slane %v2768_v2, %v7176_v62 }
 0x454   : > { %2796 = vrot.lane.b32.xlu0 %v2716_v16, %s6730_s23  ;;  %v2766_v16 = vrot.slane %v2752_v34, %v7176_v62  ;;  %v2785_v27 = vcombine.high %v2775_v45, %v10966_v18 }
 0x456   : > { %2808 = vrot.lane.b32.xlu1 %v2714_v39, %s6728_s20  ;;  %v2784_v24 = vcombine.high %v2766_v16, %v10966_v18  ;;  %v2786_v39 = vcombine.high %v2782_v58, %v10966_v18 }
 0x458   : > { %2804 = vrot.lane.b32.xlu0 %v2717_v25, %s6731_s24 }
 0x45a   : > { %2816 = vrot.lane.b32.xlu1 %v2783_v13, %s6729_s21 }
 0x45c   : > { %2812 = vrot.lane.b32.xlu0 %v2718_v19, %s6732_s25 }
 0x45e   : > { %2824 = vrot.lane.b32.xlu1 %v2784_v24, %s6730_s23 }
 0x460   : > { %2820 = vrot.lane.b32.xlu0 %v2766_v16, %s6726_s19 }
 0x462   : > { %2832 = vrot.lane.b32.xlu1 %v2785_v27, %s6731_s24 }
 0x464   : > { %2828 = vrot.lane.b32.xlu0 %v2775_v45, %s6727_s15 }
 0x466   : > { %2840 = vrot.lane.b32.xlu1 %v2786_v39, %s6732_s25 }
 0x468   : > { %2836 = vrot.lane.b32.xlu0 %v2782_v58, %s6728_s20 }
 0x46a   : > { %2863 = vrot.lane.b32.xlu1 %v11095_v54, %s6720_s18 }
 0x46c   : > { %2861 = vrot.lane.b32.xlu0 %v11090_v48, %s6720_s18 }
 0x46e   : > { %2867 = vrot.lane.b32.xlu1 %v11092_v38, %s6720_s18 }
 0x470   : > { %2865 = vrot.lane.b32.xlu0 %v7000_v59, %s6720_s18 }
 0x472   : > { %2871 = vrot.lane.b32.xlu1 %v11094_v47, %s6720_s18 }
 0x474   : > { %2869 = vrot.lane.b32.xlu0 %v11089_v26, %s6720_s18 }
 0x476   : > { %2875 = vrot.lane.b32.xlu1 %v11091_v7, %s6720_s18 }
 0x478   : > { %2873 = vrot.lane.b32.xlu0 %v7028_v8, %s6720_s18 }
 0x4a4   : > { %v8230_v44 = vpop.permute.xlu1 %2553 }
 0x4a5   : > { %11097 = vst [vmem:[#allocation15_spill] sm:$0xff] %v8230_v44 }
 0x4a6   : > { %v8232_v34 = vpop.permute.xlu0 %2549 }
 0x4a7   : > { %11098 = vst [vmem:[#allocation13_spill] sm:$0xff] %v8232_v34 }
 0x4a8   : > { %v8234_v3 = vpop.permute.xlu1 %2561 }
 0x4a9   : > { %11099 = vst [vmem:[#allocation14_spill] sm:$0xff] %v8234_v3 }
 0x4aa   : > { %v8236_v25 = vpop.permute.xlu0 %2557 }
 0x4ab   : > { %11100 = vst [vmem:[#allocation12_spill] sm:$0xff] %v8236_v25 }
 0x4ac   : > { %v8238_v13 = vpop.permute.xlu1 %2569 }
 0x4ad   : > { %11101 = vst [vmem:[#allocation160_spill] sm:$0xff] %v8238_v13 }
 0x4ae   : > { %v8240_v16 = vpop.permute.xlu0 %2565 }
 0x4af   : > { %11102 = vst [vmem:[#allocation161_spill] sm:$0xff] %v8240_v16 }
 0x4b0   : > { %v8242_v53 = vpop.permute.xlu1 %2577 }
 0x4b1   : > { %11103 = vst [vmem:[#allocation162_spill] sm:$0xff] %v8242_v53 }
 0x4b2   : > { %v8244_v19 = vpop.permute.xlu0 %2573 }
 0x4b3   : > { %11104 = vst [vmem:[#allocation163_spill] sm:$0xff] %v8244_v19 }
 0x4b4   : > { %v8246_v24 = vpop.permute.xlu1 %2585 }
 0x4b5   : > { %11105 = vst [vmem:[#allocation164_spill] sm:$0xff] %v8246_v24 }
 0x4b6   : > { %v8248_v45 = vpop.permute.xlu0 %2581 }
 0x4b7   : > { %11106 = vst [vmem:[#allocation165_spill] sm:$0xff] %v8248_v45 }
 0x4b8   : > { %v8250_v2 = vpop.permute.xlu1 %2593 }
 0x4b9   : > { %11107 = vst [vmem:[#allocation166_spill] sm:$0xff] %v8250_v2 }
 0x4ba   : > { %v8252_v27 = vpop.permute.xlu0 %2589 }
 0x4bb   : > { %11108 = vst [vmem:[#allocation167_spill] sm:$0xff] %v8252_v27 }
 0x4bc   : > { %v8254_v58 = vpop.permute.xlu1 %2601 }
 0x4bd   : > { %11109 = vst [vmem:[#allocation168_spill] sm:$0xff] %v8254_v58 }
 0x4be   : > { %v8256_v39 = vpop.permute.xlu0 %2597 }
 0x4bf   : > { %11110 = vst [vmem:[#allocation169_spill] sm:$0xff] %v8256_v39 }
 0x4c0   : > { %v8258_v3 = vpop.permute.xlu1 %2792 }
 0x4c1   : > { %11111 = vst [vmem:[#allocation170_spill] sm:$0xff] %v8258_v3 }
 0x4c2   : > { %v8260_v13 = vpop.permute.xlu0 %2788 }
 0x4c3   : > { %11112 = vst [vmem:[#allocation171_spill] sm:$0xff] %v8260_v13 }
 0x4c4   : > { %v8262_v16 = vpop.permute.xlu1 %2800 }
 0x4c5   : > { %11113 = vst [vmem:[#allocation172_spill] sm:$0xff] %v8262_v16 }
 0x4c6   : > { %v8264_v22 = vpop.permute.xlu0 %2796 }
 0x4c7   : > { %11114 = vst [vmem:[#allocation173_spill] sm:$0xff] %v8264_v22 }
 0x4c8   : > { %v8266_v19 = vpop.permute.xlu1 %2808 }
 0x4c9   : > { %11115 = vst [vmem:[#allocation174_spill] sm:$0xff] %v8266_v19 }
 0x4ca   : > { %v8268_v24 = vpop.permute.xlu0 %2804 }
 0x4cb   : > { %11116 = vst [vmem:[#allocation175_spill] sm:$0xff] %v8268_v24 }
 0x4cc   : > { %v8270_v45 = vpop.permute.xlu1 %2816 }
 0x4cd   : > { %11117 = vst [vmem:[#allocation176_spill] sm:$0xff] %v8270_v45 }
 0x4ce   : > { %v8272_v2 = vpop.permute.xlu0 %2812 }
 0x4cf   : > { %11118 = vst [vmem:[#allocation177_spill] sm:$0xff] %v8272_v2 }
 0x4d0   : > { %v8274_v27 = vpop.permute.xlu1 %2824 }
 0x4d1   : > { %11119 = vst [vmem:[#allocation178_spill] sm:$0xff] %v8274_v27 }
 0x4d2   : > { %v8276_v58 = vpop.permute.xlu0 %2820 }
 0x4d3   : > { %11120 = vst [vmem:[#allocation179_spill] sm:$0xff] %v8276_v58 }
 0x4d4   : > { %v8278_v39 = vpop.permute.xlu1 %2832 }
 0x4d5   : > { %11121 = vst [vmem:[#allocation180_spill] sm:$0xff] %v8278_v39 }
 0x4d6   : > { %v8280_v3 = vpop.permute.xlu0 %2828 }
 0x4d7   : > { %11122 = vst [vmem:[#allocation181_spill] sm:$0xff] %v8280_v3 }
 0x4d8   : > { %v8282_v53 = vpop.permute.xlu1 %2840 }
 0x4d9   : > { %11123 = vst [vmem:[#allocation182_spill] sm:$0xff] %v8282_v53 }
 0x4da   : > { %v8284_v16 = vpop.permute.xlu0 %2836 }
 0x4db   : > { %11124 = vst [vmem:[#allocation183_spill] sm:$0xff] %v8284_v16 }
 0x4dc   : > { %v2864_v22 = vpop.permute.xlu1 %2863 }
 0x4de   : > { %v2862_v19 = vpop.permute.xlu0 %2861 }
 0x4e0   : > { %v2868_v25 = vpop.permute.xlu1 %2867 }
 0x4e2   : > { %v2866_v24 = vpop.permute.xlu0 %2865 }
 0x4e4   : > { %v2872_v41 = vpop.permute.xlu1 %2871 }
 0x4e5   : > { %v2953_v16 = vcombine.low %v2864_v22, %v2872_v41 }
 0x4e6   : > { %v2870_v45 = vpop.permute.xlu0 %2869 }
 0x4e7   : > { %v2885_v13 = vcombine.low %v2862_v19, %v2870_v45  ;;  %v2886_v58 = vcombine.high %v2862_v19, %v2870_v45 }
 0x4e8   : > { %v2876_v44 = vpop.permute.xlu1 %2875 }
 0x4e9   : > { %v2893_v39 = vrot.slane %v2885_v13, %v6921_v31  ;;  %v2969_v14 = vcombine.low %v2868_v25, %v2876_v44  ;;  %v2900_v34 = vrot.slane %v2886_v58, %v6921_v31  ;;  %v2961_v13 = vrot.slane %v2953_v16, %v6921_v31 }
 0x4ea   : > { %v2874_v2 = vpop.permute.xlu0 %2873  ;;  %v2970_v19 = vcombine.high %v2868_v25, %v2876_v44 }
 0x4eb   : > { %v2901_v27 = vcombine.low %v2866_v24, %v2874_v2  ;;  %v2902_v43 = vcombine.high %v2866_v24, %v2874_v2  ;;  %v2977_v61 = vrot.slane %v2969_v14, %v6921_v31 }
 0x4ed   : > { %v2909_v3 = vrot.slane %v2901_v27, %v6921_v31  ;;  %v2916_v53 = vrot.slane %v2902_v43, %v6921_v31  ;;  %v2985_v45 = vcombine.low %v2961_v13, %v2977_v61  ;;  %v2986_v16 = vcombine.high %v2961_v13, %v2977_v61 }
 0x4ef   : > { %v2917_v5 = vcombine.low %v2893_v39, %v2909_v3  ;;  %v2918_v55 = vcombine.high %v2893_v39, %v2909_v3  ;;  %v2933_v46 = vcombine.low %v2900_v34, %v2916_v53  ;;  %v2934_v2 = vcombine.high %v2900_v34, %v2916_v53 }
 0x4f0   : > { %v2954_v3 = vcombine.high %v2864_v22, %v2872_v41  ;;  %v8307_v44 = vrot.slane %v2985_v45, %v7176_v62  ;;  %v3000_v61 = vrot.slane %v2986_v16, %v7176_v62 }
 0x4f1   : > { %v2932_v49 = vrot.slane %v2918_v55, %v7176_v62  ;;  %v8293_v24 = vrot.slane %v2917_v5, %v7176_v62  ;;  %v2941_v14 = vrot.slane %v2933_v46, %v7176_v62  ;;  %v2984_v55 = vrot.slane %v2970_v19, %v6921_v31 }
 0x4f2   : > { %v2948_v27 = vrot.slane %v2934_v2, %v7176_v62  ;;  %11126 = vst [vmem:[#allocation185_spill] sm:$0xff] %v8307_v44  ;;  %v2968_v34 = vrot.slane %v2954_v3, %v6921_v31  ;;  %v3018_v53 = vcombine.high %v3000_v61, %v10966_v18 }
 0x4f3   : > { %11125 = vst [vmem:[#allocation184_spill] sm:$0xff] %v8293_v24  ;;  %3026 = vrot.lane.b32.xlu1 %v2932_v49, %s6726_s19  ;;  %v2949_v43 = vcombine.high %v8293_v24, %v10966_v18  ;;  %v2950_v5 = vcombine.high %v2932_v49, %v10966_v18  ;;  %v2951_v46 = vcombine.high %v2941_v14, %v10966_v18 }
 0x4f4   : > { %v3001_v41 = vcombine.low %v2968_v34, %v2984_v55  ;;  %v3017_v49 = vcombine.high %v8307_v44, %v10966_v18  ;;  %v2952_v22 = vcombine.high %v2948_v27, %v10966_v18  ;;  %v3002_v25 = vcombine.high %v2968_v34, %v2984_v55 }
 0x4f5   : > { %3022 = vrot.lane.b32.xlu0 %v2949_v43, %s6729_s21 }
 0x4f6   : > { %v3009_v58 = vrot.slane %v3001_v41, %v7176_v62  ;;  %v3016_v13 = vrot.slane %v3002_v25, %v7176_v62 }
 0x4f7   : > { %3034 = vrot.lane.b32.xlu1 %v2941_v14, %s6727_s15 }
 0x4f8   : > { %v3019_v39 = vcombine.high %v3009_v58, %v10966_v18  ;;  %v3020_v43 = vcombine.high %v3016_v13, %v10966_v18 }
 0x4f9   : > { %3030 = vrot.lane.b32.xlu0 %v2950_v5, %s6730_s23 }
 0x4fb   : > { %3042 = vrot.lane.b32.xlu1 %v2948_v27, %s6728_s20 }
 0x4fd   : > { %3038 = vrot.lane.b32.xlu0 %v2951_v46, %s6731_s24 }
 0x4ff   : > { %3050 = vrot.lane.b32.xlu1 %v3017_v49, %s6729_s21 }
 0x501   : > { %3046 = vrot.lane.b32.xlu0 %v2952_v22, %s6732_s25 }
 0x503   : > { %3058 = vrot.lane.b32.xlu1 %v3018_v53, %s6730_s23 }
 0x505   : > { %3054 = vrot.lane.b32.xlu0 %v3000_v61, %s6726_s19 }
 0x507   : > { %3066 = vrot.lane.b32.xlu1 %v3019_v39, %s6731_s24 }
 0x509   : > { %3062 = vrot.lane.b32.xlu0 %v3009_v58, %s6727_s15 }
 0x50b   : > { %3074 = vrot.lane.b32.xlu1 %v3020_v43, %s6732_s25 }
 0x50d   : > { %3070 = vrot.lane.b32.xlu0 %v3016_v13, %s6728_s20 }
 0x50f   : > { %3097 = vrot.lane.b32.xlu1 %v11095_v54, %s6722_s9 }
 0x511   : > { %3095 = vrot.lane.b32.xlu0 %v11090_v48, %s6722_s9 }
 0x513   : > { %3101 = vrot.lane.b32.xlu1 %v11092_v38, %s6722_s9 }
 0x515   : > { %3099 = vrot.lane.b32.xlu0 %v7000_v59, %s6722_s9 }
 0x517   : > { %3105 = vrot.lane.b32.xlu1 %v11094_v47, %s6722_s9 }
 0x519   : > { %3103 = vrot.lane.b32.xlu0 %v11089_v26, %s6722_s9 }
 0x51b   : > { %3109 = vrot.lane.b32.xlu1 %v11091_v7, %s6722_s9 }
 0x51d   : > { %3107 = vrot.lane.b32.xlu0 %v7028_v8, %s6722_s9 }
 0x565   : > { %v8346_v19 = vpop.permute.xlu1 %3026 }
 0x566   : > { %11127 = vst [vmem:[#allocation186_spill] sm:$0xff] %v8346_v19 }
 0x567   : > { %v8348_v45 = vpop.permute.xlu0 %3022 }
 0x568   : > { %11128 = vst [vmem:[#allocation187_spill] sm:$0xff] %v8348_v45 }
 0x569   : > { %v8350_v2 = vpop.permute.xlu1 %3034 }
 0x56a   : > { %11129 = vst [vmem:[#allocation188_spill] sm:$0xff] %v8350_v2 }
 0x56b   : > { %v8352_v14 = vpop.permute.xlu0 %3030 }
 0x56c   : > { %11130 = vst [vmem:[#allocation189_spill] sm:$0xff] %v8352_v14 }
 0x56d   : > { %v8354_v3 = vpop.permute.xlu1 %3042 }
 0x56e   : > { %11131 = vst [vmem:[#allocation190_spill] sm:$0xff] %v8354_v3 }
 0x56f   : > { %v8356_v5 = vpop.permute.xlu0 %3038 }
 0x570   : > { %11132 = vst [vmem:[#allocation191_spill] sm:$0xff] %v8356_v5 }
 0x571   : > { %v8358_v55 = vpop.permute.xlu1 %3050 }
 0x572   : > { %11133 = vst [vmem:[#allocation192_spill] sm:$0xff] %v8358_v55 }
 0x573   : > { %v8360_v16 = vpop.permute.xlu0 %3046 }
 0x574   : > { %11134 = vst [vmem:[#allocation193_spill] sm:$0xff] %v8360_v16 }
 0x575   : > { %v8362_v27 = vpop.permute.xlu1 %3058 }
 0x576   : > { %11135 = vst [vmem:[#allocation194_spill] sm:$0xff] %v8362_v27 }
 0x577   : > { %v8364_v34 = vpop.permute.xlu0 %3054 }
 0x578   : > { %11136 = vst [vmem:[#allocation195_spill] sm:$0xff] %v8364_v34 }
 0x579   : > { %v8366_v46 = vpop.permute.xlu1 %3066 }
 0x57a   : > { %11137 = vst [vmem:[#allocation196_spill] sm:$0xff] %v8366_v46 }
 0x57b   : > { %v8368_v41 = vpop.permute.xlu0 %3062 }
 0x57c   : > { %11138 = vst [vmem:[#allocation197_spill] sm:$0xff] %v8368_v41 }
 0x57d   : > { %v8370_v49 = vpop.permute.xlu1 %3074 }
 0x57e   : > { %11139 = vst [vmem:[#allocation198_spill] sm:$0xff] %v8370_v49 }
 0x57f   : > { %v8372_v61 = vpop.permute.xlu0 %3070 }
 0x580   : > { %11140 = vst [vmem:[#allocation199_spill] sm:$0xff] %v8372_v61 }
 0x581   : > { %v3098_v22 = vpop.permute.xlu1 %3097 }
 0x583   : > { %v3096_v25 = vpop.permute.xlu0 %3095 }
 0x585   : > { %v3102_v53 = vpop.permute.xlu1 %3101 }
 0x587   : > { %v3100_v58 = vpop.permute.xlu0 %3099 }
 0x589   : > { %v3106_v39 = vpop.permute.xlu1 %3105 }
 0x58a   : > { %v3187_v61 = vcombine.low %v3098_v22, %v3106_v39 }
 0x58b   : > { %v3104_v13 = vpop.permute.xlu0 %3103 }
 0x58c   : > { %v3119_v43 = vcombine.low %v3096_v25, %v3104_v13  ;;  %v3120_v27 = vcombine.high %v3096_v25, %v3104_v13  ;;  %v3195_v25 = vrot.slane %v3187_v61, %v6921_v31 }
 0x58d   : > { %v3110_v3 = vpop.permute.xlu1 %3109 }
 0x58e   : > { %v3127_v46 = vrot.slane %v3119_v43, %v6921_v31  ;;  %v3203_v14 = vcombine.low %v3102_v53, %v3110_v3  ;;  %v3134_v34 = vrot.slane %v3120_v27, %v6921_v31 }
 0x58f   : > { %v3108_v16 = vpop.permute.xlu0 %3107 }
 0x590   : > { %v3135_v5 = vcombine.low %v3100_v58, %v3108_v16  ;;  %v3136_v2 = vcombine.high %v3100_v58, %v3108_v16  ;;  %v3211_v55 = vrot.slane %v3203_v14, %v6921_v31 }
 0x592   : > { %v3143_v41 = vrot.slane %v3135_v5, %v6921_v31  ;;  %v3150_v49 = vrot.slane %v3136_v2, %v6921_v31  ;;  %v3204_v5 = vcombine.high %v3102_v53, %v3110_v3  ;;  %v3219_v58 = vcombine.low %v3195_v25, %v3211_v55 }
 0x594   : > { %v3151_v19 = vcombine.low %v3127_v46, %v3143_v41  ;;  %v3152_v44 = vcombine.high %v3127_v46, %v3143_v41  ;;  %v3167_v24 = vcombine.low %v3134_v34, %v3150_v49  ;;  %v3168_v27 = vcombine.high %v3134_v34, %v3150_v49 }
 0x595   : > { %v3188_v46 = vcombine.high %v3098_v22, %v3106_v39  ;;  %v3220_v41 = vcombine.high %v3195_v25, %v3211_v55  ;;  %v8395_v3 = vrot.slane %v3219_v58, %v7176_v62 }
 0x596   : > { %v3166_v45 = vrot.slane %v3152_v44, %v7176_v62  ;;  %v8381_v16 = vrot.slane %v3151_v19, %v7176_v62  ;;  %v3175_v14 = vrot.slane %v3167_v24, %v7176_v62  ;;  %v3218_v19 = vrot.slane %v3204_v5, %v6921_v31 }
 0x597   : > { %v3182_v61 = vrot.slane %v3168_v27, %v7176_v62  ;;  %11142 = vst [vmem:[#allocation201_spill] sm:$0xff] %v8395_v3  ;;  %v3202_v34 = vrot.slane %v3188_v46, %v6921_v31  ;;  %v3234_v55 = vrot.slane %v3220_v41, %v7176_v62 }
 0x598   : > { %11141 = vst [vmem:[#allocation200_spill] sm:$0xff] %v8381_v16  ;;  %3260 = vrot.lane.b32.xlu1 %v3166_v45, %s6726_s19  ;;  %v3183_v2 = vcombine.high %v8381_v16, %v10966_v18  ;;  %v3184_v44 = vcombine.high %v3166_v45, %v10966_v18  ;;  %v3185_v24 = vcombine.high %v3175_v14, %v10966_v18 }
 0x599   : > { %v3235_v49 = vcombine.low %v3202_v34, %v3218_v19  ;;  %v3251_v45 = vcombine.high %v8395_v3, %v10966_v18  ;;  %v3186_v22 = vcombine.high %v3182_v61, %v10966_v18  ;;  %v3236_v53 = vcombine.high %v3202_v34, %v3218_v19 }
 0x59a   : > { %3256 = vrot.lane.b32.xlu0 %v3183_v2, %s6729_s21  ;;  %v3252_v39 = vcombine.high %v3234_v55, %v10966_v18 }
 0x59b   : > { %v3243_v13 = vrot.slane %v3235_v49, %v7176_v62  ;;  %v3250_v25 = vrot.slane %v3236_v53, %v7176_v62 }
 0x59c   : > { %3268 = vrot.lane.b32.xlu1 %v3175_v14, %s6727_s15 }
 0x59d   : > { %v3253_v43 = vcombine.high %v3243_v13, %v10966_v18  ;;  %v3254_v2 = vcombine.high %v3250_v25, %v10966_v18 }
 0x59e   : > { %3264 = vrot.lane.b32.xlu0 %v3184_v44, %s6730_s23 }
 0x5a0   : > { %3276 = vrot.lane.b32.xlu1 %v3182_v61, %s6728_s20 }
 0x5a2   : > { %3272 = vrot.lane.b32.xlu0 %v3185_v24, %s6731_s24 }
 0x5a4   : > { %3284 = vrot.lane.b32.xlu1 %v3251_v45, %s6729_s21 }
 0x5a6   : > { %3280 = vrot.lane.b32.xlu0 %v3186_v22, %s6732_s25 }
 0x5a8   : > { %3292 = vrot.lane.b32.xlu1 %v3252_v39, %s6730_s23 }
 0x5aa   : > { %3288 = vrot.lane.b32.xlu0 %v3234_v55, %s6726_s19 }
 0x5ac   : > { %3300 = vrot.lane.b32.xlu1 %v3253_v43, %s6731_s24 }
 0x5ae   : > { %3296 = vrot.lane.b32.xlu0 %v3243_v13, %s6727_s15 }
 0x5b0   : > { %3308 = vrot.lane.b32.xlu1 %v3254_v2, %s6732_s25 }
 0x5b2   : > { %3304 = vrot.lane.b32.xlu0 %v3250_v25, %s6728_s20 }
 0x5b4   : > { %3331 = vrot.lane.b32.xlu1 %v11095_v54, %s6723_s11 }
 0x5b6   : > { %3329 = vrot.lane.b32.xlu0 %v11090_v48, %s6723_s11 }
 0x5b8   : > { %3335 = vrot.lane.b32.xlu1 %v11092_v38, %s6723_s11 }
 0x5ba   : > { %3333 = vrot.lane.b32.xlu0 %v7000_v59, %s6723_s11 }
 0x5bc   : > { %3339 = vrot.lane.b32.xlu1 %v11094_v47, %s6723_s11 }
 0x5be   : > { %3337 = vrot.lane.b32.xlu0 %v11089_v26, %s6723_s11 }
 0x5c0   : > { %3343 = vrot.lane.b32.xlu1 %v11091_v7, %s6723_s11 }
 0x5c2   : > { %3341 = vrot.lane.b32.xlu0 %v7028_v8, %s6723_s11 }
 0x60a   : > { %v8434_v5 = vpop.permute.xlu1 %3260 }
 0x60b   : > { %11143 = vst [vmem:[#allocation202_spill] sm:$0xff] %v8434_v5 }
 0x60c   : > { %v8436_v58 = vpop.permute.xlu0 %3256 }
 0x60d   : > { %11144 = vst [vmem:[#allocation203_spill] sm:$0xff] %v8436_v58 }
 0x60e   : > { %v8438_v27 = vpop.permute.xlu1 %3268 }
 0x60f   : > { %11145 = vst [vmem:[#allocation204_spill] sm:$0xff] %v8438_v27 }
 0x610   : > { %v8440_v14 = vpop.permute.xlu0 %3264 }
 0x611   : > { %11146 = vst [vmem:[#allocation205_spill] sm:$0xff] %v8440_v14 }
 0x612   : > { %v8442_v46 = vpop.permute.xlu1 %3276 }
 0x613   : > { %11147 = vst [vmem:[#allocation206_spill] sm:$0xff] %v8442_v46 }
 0x614   : > { %v8444_v44 = vpop.permute.xlu0 %3272 }
 0x615   : > { %11148 = vst [vmem:[#allocation207_spill] sm:$0xff] %v8444_v44 }
 0x616   : > { %v8446_v19 = vpop.permute.xlu1 %3284 }
 0x617   : > { %11149 = vst [vmem:[#allocation208_spill] sm:$0xff] %v8446_v19 }
 0x618   : > { %v8448_v41 = vpop.permute.xlu0 %3280 }
 0x619   : > { %11150 = vst [vmem:[#allocation209_spill] sm:$0xff] %v8448_v41 }
 0x61a   : > { %v8450_v61 = vpop.permute.xlu1 %3292 }
 0x61b   : > { %11151 = vst [vmem:[#allocation210_spill] sm:$0xff] %v8450_v61 }
 0x61c   : > { %v8452_v34 = vpop.permute.xlu0 %3288 }
 0x61d   : > { %11152 = vst [vmem:[#allocation211_spill] sm:$0xff] %v8452_v34 }
 0x61e   : > { %v8454_v24 = vpop.permute.xlu1 %3300 }
 0x61f   : > { %11153 = vst [vmem:[#allocation212_spill] sm:$0xff] %v8454_v24 }
 0x620   : > { %v8456_v49 = vpop.permute.xlu0 %3296 }
 0x621   : > { %11154 = vst [vmem:[#allocation213_spill] sm:$0xff] %v8456_v49 }
 0x622   : > { %v8458_v45 = vpop.permute.xlu1 %3308 }
 0x623   : > { %11155 = vst [vmem:[#allocation214_spill] sm:$0xff] %v8458_v45 }
 0x624   : > { %v8460_v55 = vpop.permute.xlu0 %3304 }
 0x625   : > { %11156 = vst [vmem:[#allocation215_spill] sm:$0xff] %v8460_v55 }
 0x626   : > { %v3332_v22 = vpop.permute.xlu1 %3331 }
 0x628   : > { %v3330_v53 = vpop.permute.xlu0 %3329 }
 0x62a   : > { %v3336_v39 = vpop.permute.xlu1 %3335 }
 0x62c   : > { %v3334_v13 = vpop.permute.xlu0 %3333 }
 0x62e   : > { %v3340_v43 = vpop.permute.xlu1 %3339 }
 0x62f   : > { %v3421_v55 = vcombine.low %v3332_v22, %v3340_v43 }
 0x630   : > { %v3338_v25 = vpop.permute.xlu0 %3337 }
 0x631   : > { %v3353_v2 = vcombine.low %v3330_v53, %v3338_v25  ;;  %v3354_v14 = vcombine.high %v3330_v53, %v3338_v25  ;;  %v3429_v53 = vrot.slane %v3421_v55, %v6921_v31 }
 0x632   : > { %v3344_v46 = vpop.permute.xlu1 %3343 }
 0x633   : > { %v3361_v24 = vrot.slane %v3353_v2, %v6921_v31  ;;  %v3437_v61 = vcombine.low %v3336_v39, %v3344_v46  ;;  %v3368_v5 = vrot.slane %v3354_v14, %v6921_v31 }
 0x634   : > { %v3342_v41 = vpop.permute.xlu0 %3341 }
 0x635   : > { %v3369_v44 = vcombine.low %v3334_v13, %v3342_v41  ;;  %v3370_v27 = vcombine.high %v3334_v13, %v3342_v41  ;;  %v3445_v58 = vrot.slane %v3437_v61, %v6921_v31 }
 0x637   : > { %v3377_v49 = vrot.slane %v3369_v44, %v6921_v31  ;;  %v3384_v45 = vrot.slane %v3370_v27, %v6921_v31  ;;  %v3438_v44 = vcombine.high %v3336_v39, %v3344_v46  ;;  %v3453_v13 = vcombine.low %v3429_v53, %v3445_v58 }
 0x639   : > { %v3385_v34 = vcombine.low %v3361_v24, %v3377_v49  ;;  %v3386_v16 = vcombine.high %v3361_v24, %v3377_v49  ;;  %v3401_v3 = vcombine.low %v3368_v5, %v3384_v45  ;;  %v3402_v14 = vcombine.high %v3368_v5, %v3384_v45 }
 0x63a   : > { %v3422_v24 = vcombine.high %v3332_v22, %v3340_v43  ;;  %v3454_v49 = vcombine.high %v3429_v53, %v3445_v58  ;;  %v8483_v46 = vrot.slane %v3453_v13, %v7176_v62 }
 0x63b   : > { %v3400_v19 = vrot.slane %v3386_v16, %v7176_v62  ;;  %v8469_v41 = vrot.slane %v3385_v34, %v7176_v62  ;;  %v3409_v61 = vrot.slane %v3401_v3, %v7176_v62  ;;  %v3452_v34 = vrot.slane %v3438_v44, %v6921_v31 }
 0x63c   : > { %v3416_v55 = vrot.slane %v3402_v14, %v7176_v62  ;;  %11158 = vst [vmem:[#allocation217_spill] sm:$0xff] %v8483_v46  ;;  %v3436_v5 = vrot.slane %v3422_v24, %v6921_v31  ;;  %v3468_v58 = vrot.slane %v3454_v49, %v7176_v62 }
 0x63d   : > { %11157 = vst [vmem:[#allocation216_spill] sm:$0xff] %v8469_v41  ;;  %3494 = vrot.lane.b32.xlu1 %v3400_v19, %s6726_s19  ;;  %v3417_v27 = vcombine.high %v8469_v41, %v10966_v18  ;;  %v3418_v16 = vcombine.high %v3400_v19, %v10966_v18  ;;  %v3419_v3 = vcombine.high %v3409_v61, %v10966_v18 }
 0x63e   : > { %v3469_v45 = vcombine.low %v3436_v5, %v3452_v34  ;;  %v3485_v19 = vcombine.high %v8483_v46, %v10966_v18  ;;  %v3420_v22 = vcombine.high %v3416_v55, %v10966_v18  ;;  %v3470_v39 = vcombine.high %v3436_v5, %v3452_v34 }
 0x63f   : > { %3490 = vrot.lane.b32.xlu0 %v3417_v27, %s6729_s21  ;;  %v3486_v43 = vcombine.high %v3468_v58, %v10966_v18 }
 0x640   : > { %v3477_v25 = vrot.slane %v3469_v45, %v7176_v62  ;;  %v3484_v53 = vrot.slane %v3470_v39, %v7176_v62 }
 0x641   : > { %3502 = vrot.lane.b32.xlu1 %v3409_v61, %s6727_s15 }
 0x642   : > { %v3487_v2 = vcombine.high %v3477_v25, %v10966_v18  ;;  %v3488_v27 = vcombine.high %v3484_v53, %v10966_v18 }
 0x643   : > { %3498 = vrot.lane.b32.xlu0 %v3418_v16, %s6730_s23 }
 0x645   : > { %3510 = vrot.lane.b32.xlu1 %v3416_v55, %s6728_s20 }
 0x647   : > { %3506 = vrot.lane.b32.xlu0 %v3419_v3, %s6731_s24 }
 0x649   : > { %3518 = vrot.lane.b32.xlu1 %v3485_v19, %s6729_s21 }
 0x64b   : > { %3514 = vrot.lane.b32.xlu0 %v3420_v22, %s6732_s25 }
 0x64d   : > { %3526 = vrot.lane.b32.xlu1 %v3486_v43, %s6730_s23 }
 0x64f   : > { %3522 = vrot.lane.b32.xlu0 %v3468_v58, %s6726_s19 }
 0x651   : > { %3534 = vrot.lane.b32.xlu1 %v3487_v2, %s6731_s24 }
 0x653   : > { %3530 = vrot.lane.b32.xlu0 %v3477_v25, %s6727_s15 }
 0x655   : > { %3542 = vrot.lane.b32.xlu1 %v3488_v27, %s6732_s25 }
 0x657   : > { %3538 = vrot.lane.b32.xlu0 %v3484_v53, %s6728_s20 }
 0x659   : > { %3565 = vrot.lane.b32.xlu1 %v11095_v54, %s6724_s12 }
 0x65b   : > { %3563 = vrot.lane.b32.xlu0 %v11090_v48, %s6724_s12 }
 0x65d   : > { %3569 = vrot.lane.b32.xlu1 %v11092_v38, %s6724_s12 }
 0x65f   : > { %3567 = vrot.lane.b32.xlu0 %v7000_v59, %s6724_s12 }
 0x661   : > { %3573 = vrot.lane.b32.xlu1 %v11094_v47, %s6724_s12 }
 0x663   : > { %3571 = vrot.lane.b32.xlu0 %v11089_v26, %s6724_s12 }
 0x665   : > { %3577 = vrot.lane.b32.xlu1 %v11091_v7, %s6724_s12 }
 0x667   : > { %3575 = vrot.lane.b32.xlu0 %v7028_v8, %s6724_s12 }
 0x6af   : > { %v8522_v54 = vpop.permute.xlu1 %3494 }
 0x6b0   : > { %11159 = vst [vmem:[#allocation218_spill] sm:$0xff] %v8522_v54 }
 0x6b1   : > { %v8524_v48 = vpop.permute.xlu0 %3490 }
 0x6b2   : > { %11160 = vst [vmem:[#allocation219_spill] sm:$0xff] %v8524_v48 }
 0x6b3   : > { %v8526_v38 = vpop.permute.xlu1 %3502 }
 0x6b4   : > { %11161 = vst [vmem:[#allocation220_spill] sm:$0xff] %v8526_v38 }
 0x6b5   : > { %v8528_v44 = vpop.permute.xlu0 %3498 }
 0x6b6   : > { %11162 = vst [vmem:[#allocation221_spill] sm:$0xff] %v8528_v44 }
 0x6b7   : > { %v8530_v59 = vpop.permute.xlu1 %3510 }
 0x6b8   : > { %11163 = vst [vmem:[#allocation222_spill] sm:$0xff] %v8530_v59 }
 0x6b9   : > { %v8532_v47 = vpop.permute.xlu0 %3506 }
 0x6ba   : > { %11164 = vst [vmem:[#allocation223_spill] sm:$0xff] %v8532_v47 }
 0x6bb   : > { %v8534_v13 = vpop.permute.xlu1 %3518 }
 0x6bc   : > { %11165 = vst [vmem:[#allocation224_spill] sm:$0xff] %v8534_v13 }
 0x6bd   : > { %v8536_v26 = vpop.permute.xlu0 %3514 }
 0x6be   : > { %11166 = vst [vmem:[#allocation225_spill] sm:$0xff] %v8536_v26 }
 0x6bf   : > { %v8538_v7 = vpop.permute.xlu1 %3526 }
 0x6c0   : > { %11167 = vst [vmem:[#allocation226_spill] sm:$0xff] %v8538_v7 }
 0x6c1   : > { %v8540_v14 = vpop.permute.xlu0 %3522 }
 0x6c2   : > { %11168 = vst [vmem:[#allocation227_spill] sm:$0xff] %v8540_v14 }
 0x6c3   : > { %v8542_v8 = vpop.permute.xlu1 %3534 }
 0x6c4   : > { %11169 = vst [vmem:[#allocation228_spill] sm:$0xff] %v8542_v8 }
 0x6c5   : > { %v8544_v61 = vpop.permute.xlu0 %3530 }
 0x6c6   : > { %11170 = vst [vmem:[#allocation229_spill] sm:$0xff] %v8544_v61 }
 0x6c7   : > { %v8546_v24 = vpop.permute.xlu1 %3542 }
 0x6c8   : > { %11171 = vst [vmem:[#allocation230_spill] sm:$0xff] %v8546_v24 }
 0x6c9   : > { %v8548_v16 = vpop.permute.xlu0 %3538 }
 0x6ca   : > { %11172 = vst [vmem:[#allocation231_spill] sm:$0xff] %v8548_v16 }
 0x6cb   : > { %v3566_v34 = vpop.permute.xlu1 %3565 }
 0x6cd   : > { %v3564_v49 = vpop.permute.xlu0 %3563 }
 0x6cf   : > { %v3570_v55 = vpop.permute.xlu1 %3569 }
 0x6d1   : > { %v3568_v5 = vpop.permute.xlu0 %3567 }
 0x6d3   : > { %v3574_v3 = vpop.permute.xlu1 %3573 }
 0x6d4   : > { %v3655_v24 = vcombine.low %v3566_v34, %v3574_v3 }
 0x6d5   : > { %v3572_v45 = vpop.permute.xlu0 %3571 }
 0x6d6   : > { %v3587_v19 = vcombine.low %v3564_v49, %v3572_v45  ;;  %v3588_v25 = vcombine.high %v3564_v49, %v3572_v45  ;;  %v3663_v49 = vrot.slane %v3655_v24, %v6921_v31 }
 0x6d7   : > { %v3578_v22 = vpop.permute.xlu1 %3577 }
 0x6d8   : > { %v3595_v2 = vrot.slane %v3587_v19, %v6921_v31  ;;  %v3671_v53 = vcombine.low %v3570_v55, %v3578_v22  ;;  %v3602_v59 = vrot.slane %v3588_v25, %v6921_v31  ;;  %v3672_v19 = vcombine.high %v3570_v55, %v3578_v22  ;;  %v11176_v22 = vld [vmem:[#allocation17_spill] sm:$0xff] }
 0x6d9   : > { %v3576_v58 = vpop.permute.xlu0 %3575  ;;  %v3656_v25 = vcombine.high %v3566_v34, %v3574_v3  ;;  %v11175_v3 = vld [vmem:[#allocation19_spill] sm:$0xff] }
 0x6da   : > { %v3603_v39 = vcombine.low %v3568_v5, %v3576_v58  ;;  %v3604_v43 = vcombine.high %v3568_v5, %v3576_v58  ;;  %v3679_v8 = vrot.slane %v3671_v53, %v6921_v31  ;;  %v3842_v53 = vcombine.low %v11176_v22, %v11175_v3 }
 0x6dc   : > { %v3611_v27 = vrot.slane %v3603_v39, %v6921_v31  ;;  %v3618_v26 = vrot.slane %v3604_v43, %v6921_v31  ;;  %v3687_v58 = vcombine.low %v3663_v49, %v3679_v8  ;;  %v3688_v24 = vcombine.high %v3663_v49, %v3679_v8 }
 0x6de   : > { %v3619_v16 = vcombine.low %v3595_v2, %v3611_v27  ;;  %v3620_v47 = vcombine.high %v3595_v2, %v3611_v27  ;;  %v3635_v38 = vcombine.low %v3602_v59, %v3618_v26  ;;  %v3636_v39 = vcombine.high %v3602_v59, %v3618_v26 }
 0x6df   : > { %v8571_v55 = vrot.slane %v3687_v58, %v7176_v62  ;;  %v3670_v59 = vrot.slane %v3656_v25, %v6921_v31  ;;  %v3702_v8 = vrot.slane %v3688_v24, %v7176_v62  ;;  %v11178_v58 = vld [vmem:[#allocation16_spill] sm:$0xff]  ;;  %v3843_v24 = vcombine.high %v11176_v22, %v11175_v3 }
 0x6e0   : > { %v3634_v61 = vrot.slane %v3620_v47, %v7176_v62  ;;  %v8557_v5 = vrot.slane %v3619_v16, %v7176_v62  ;;  %v3643_v43 = vrot.slane %v3635_v38, %v7176_v62  ;;  %v3686_v16 = vrot.slane %v3672_v19, %v6921_v31  ;;  %v11177_v19 = vld [vmem:[#allocation18_spill] sm:$0xff] }
 0x6e1   : > { %v3650_v2 = vrot.slane %v3636_v39, %v7176_v62  ;;  %11174 = vst [vmem:[#allocation233_spill] sm:$0xff] %v8571_v55  ;;  %v3720_v49 = vcombine.high %v3702_v8, %v10966_v18  ;;  %v3826_v39 = vcombine.low %v11178_v58, %v11177_v19 }
 0x6e2   : > { %11173 = vst [vmem:[#allocation232_spill] sm:$0xff] %v8557_v5  ;;  %3728 = vrot.lane.b32.xlu1 %v3634_v61, %s6726_s19  ;;  %v3651_v45 = vcombine.high %v8557_v5, %v10966_v18  ;;  %v3652_v47 = vcombine.high %v3634_v61, %v10966_v18  ;;  %v3653_v38 = vcombine.high %v3643_v43, %v10966_v18 }
 0x6e3   : > { %v3703_v26 = vcombine.low %v3670_v59, %v3686_v16  ;;  %v3719_v61 = vcombine.high %v8571_v55, %v10966_v18  ;;  %v3654_v34 = vcombine.high %v3650_v2, %v10966_v18  ;;  %v3704_v27 = vcombine.high %v3670_v59, %v3686_v16 }
 0x6e4   : > { %3724 = vrot.lane.b32.xlu0 %v3651_v45, %s6729_s21  ;;  %v3834_v16 = vrot.slane %v3826_v39, %v6921_v31  ;;  %v3827_v59 = vcombine.high %v11178_v58, %v11177_v19  ;;  %v11182_v39 = vld [vmem:[#allocation22_spill] sm:$0xff] }
 0x6e5   : > { %v3711_v45 = vrot.slane %v3703_v26, %v7176_v62 }
 0x6e6   : > { %3736 = vrot.lane.b32.xlu1 %v3643_v43, %s6727_s15  ;;  %v3850_v43 = vrot.slane %v3842_v53, %v6921_v31 }
 0x6e7   : > { %v3721_v25 = vcombine.high %v3711_v45, %v10966_v18 }
 0x6e8   : > { %3732 = vrot.lane.b32.xlu0 %v3652_v47, %s6730_s23  ;;  %v3718_v47 = vrot.slane %v3704_v27, %v7176_v62  ;;  %v3859_v26 = vcombine.high %v3834_v16, %v3850_v43 }
 0x6ea   : > { %3744 = vrot.lane.b32.xlu1 %v3650_v2, %s6728_s20  ;;  %v3858_v2 = vcombine.low %v3834_v16, %v3850_v43 }
 0x6ec   : > { %3740 = vrot.lane.b32.xlu0 %v3653_v38, %s6731_s24  ;;  %v3722_v38 = vcombine.high %v3718_v47, %v10966_v18  ;;  %v8607_v27 = vrot.slane %v3858_v2, %v7176_v62 }
 0x6ee   : > { %3752 = vrot.lane.b32.xlu1 %v3719_v61, %s6729_s21  ;;  %v3857_v61 = vrot.slane %v3843_v24, %v6921_v31  ;;  %11181 = vst [vmem:[#allocation19_spill] sm:$0xff] %v8607_v27  ;;  %v3890_v24 = vcombine.high %v8607_v27, %v10966_v18 }
 0x6f0   : > { %3748 = vrot.lane.b32.xlu0 %v3654_v34, %s6732_s25  ;;  %v11180_v34 = vld [vmem:[#allocation21_spill] sm:$0xff] }
 0x6f2   : > { %3760 = vrot.lane.b32.xlu1 %v3720_v49, %s6730_s23  ;;  %v3841_v49 = vrot.slane %v3827_v59, %v6921_v31 }
 0x6f4   : > { %3756 = vrot.lane.b32.xlu0 %v3702_v8, %s6726_s19  ;;  %v11179_v8 = vld [vmem:[#allocation23_spill] sm:$0xff]  ;;  %v3874_v43 = vcombine.low %v3841_v49, %v3857_v61 }
 0x6f5   : > { %v3910_v53 = vcombine.low %v11180_v34, %v11179_v8 }
 0x6f6   : > { %3768 = vrot.lane.b32.xlu1 %v3721_v25, %s6731_s24  ;;  %v11183_v25 = vld [vmem:[#allocation20_spill] sm:$0xff]  ;;  %v3882_v59 = vrot.slane %v3874_v43, %v7176_v62 }
 0x6f7   : > { %v3894_v44 = vcombine.low %v11183_v25, %v11182_v39  ;;  %v3918_v16 = vrot.slane %v3910_v53, %v6921_v31  ;;  %v11185_v43 = vld [vmem:[#allocation24_spill] sm:$0xff] }
 0x6f8   : > { %3764 = vrot.lane.b32.xlu0 %v3711_v45, %s6727_s15  ;;  %v3873_v45 = vrot.slane %v3859_v26, %v7176_v62 }
 0x6f9   : > { %v3902_v2 = vrot.slane %v3894_v44, %v6921_v31  ;;  %v3892_v44 = vcombine.high %v3882_v59, %v10966_v18 }
 0x6fa   : > { %3776 = vrot.lane.b32.xlu1 %v3722_v38, %s6732_s25  ;;  %v3875_v38 = vcombine.high %v3841_v49, %v3857_v61 }
 0x6fb   : > { %v3926_v7 = vcombine.low %v3902_v2, %v3918_v16  ;;  %v3927_v54 = vcombine.high %v3902_v2, %v3918_v16  ;;  %v11186_v16 = vld [vmem:[#allocation25_spill] sm:$0xff]  ;;  %v11189_v2 = vld [vmem:[#allocation27_spill] sm:$0xff] }
 0x6fc   : > { %3772 = vrot.lane.b32.xlu0 %v3718_v47, %s6728_s20  ;;  %v3891_v47 = vcombine.high %v3873_v45, %v10966_v18  ;;  %v3889_v26 = vrot.slane %v3875_v38, %v7176_v62  ;;  %v11191_v38 = vld [vmem:[#allocation30_spill] sm:$0xff] }
 0x6fd   : > { %v8626_v53 = vrot.slane %v3926_v7, %v7176_v62  ;;  %v3941_v49 = vrot.slane %v3927_v54, %v7176_v62  ;;  %v11187_v54 = vld [vmem:[#allocation26_spill] sm:$0xff] }
 0x6fe   : > { %3967 = vrot.lane.b32.xlu1 %v3873_v45, %s6726_s19  ;;  %v3893_v45 = vcombine.high %v3889_v26, %v10966_v18 }
 0x6ff   : > { %11184 = vst [vmem:[#allocation17_spill] sm:$0xff] %v8626_v53  ;;  %v3958_v61 = vcombine.high %v8626_v53, %v10966_v18  ;;  %v3959_v7 = vcombine.high %v3941_v49, %v10966_v18 }
 0x700   : > { %3963 = vrot.lane.b32.xlu0 %v3890_v24, %s6729_s21  ;;  %v11188_v24 = vld [vmem:[#allocation29_spill] sm:$0xff] }
 0x702   : > { %3975 = vrot.lane.b32.xlu1 %v3882_v59, %s6727_s15  ;;  %v11190_v59 = vld [vmem:[#allocation28_spill] sm:$0xff] }
 0x704   : > { %3971 = vrot.lane.b32.xlu0 %v3891_v47, %s6730_s23  ;;  %v11192_v47 = vld [vmem:[#allocation31_spill] sm:$0xff] }
 0x706   : > { %3983 = vrot.lane.b32.xlu1 %v3889_v26, %s6728_s20 }
 0x708   : > { %3979 = vrot.lane.b32.xlu0 %v3892_v44, %s6731_s24 }
 0x70a   : > { %3991 = vrot.lane.b32.xlu1 %v3958_v61, %s6729_s21 }
 0x70c   : > { %3987 = vrot.lane.b32.xlu0 %v3893_v45, %s6732_s25 }
 0x70e   : > { %3999 = vrot.lane.b32.xlu1 %v3959_v7, %s6730_s23 }
 0x710   : > { %3995 = vrot.lane.b32.xlu0 %v3941_v49, %s6726_s19 }
 0x712   : > { %5918 = vrot.lane.b32.xlu1 %v11185_v43, %s6724_s12 }
 0x714   : > { %5914 = vrot.lane.b32.xlu0 %v11186_v16, %s6724_s12 }
 0x716   : > { %5926 = vrot.lane.b32.xlu1 %v11187_v54, %s6724_s12 }
 0x718   : > { %5922 = vrot.lane.b32.xlu0 %v11188_v24, %s6724_s12 }
 0x71a   : > { %5916 = vrot.lane.b32.xlu1 %v11189_v2, %s6724_s12 }
 0x71c   : > { %5912 = vrot.lane.b32.xlu0 %v11190_v59, %s6724_s12 }
 0x71e   : > { %5924 = vrot.lane.b32.xlu1 %v11191_v38, %s6724_s12 }
 0x720   : > { %5920 = vrot.lane.b32.xlu0 %v11192_v47, %s6724_s12 }
 0x722   : > { %5684 = vrot.lane.b32.xlu1 %v11185_v43, %s6723_s11 }
 0x724   : > { %5680 = vrot.lane.b32.xlu0 %v11186_v16, %s6723_s11 }
 0x726   : > { %5692 = vrot.lane.b32.xlu1 %v11187_v54, %s6723_s11 }
 0x728   : > { %5688 = vrot.lane.b32.xlu0 %v11188_v24, %s6723_s11 }
 0x72a   : > { %5682 = vrot.lane.b32.xlu1 %v11189_v2, %s6723_s11 }
 0x72c   : > { %5678 = vrot.lane.b32.xlu0 %v11190_v59, %s6723_s11 }
 0x72e   : > { %5690 = vrot.lane.b32.xlu1 %v11191_v38, %s6723_s11 }
 0x730   : > { %5686 = vrot.lane.b32.xlu0 %v11192_v47, %s6723_s11 }
 0x732   : > { %5450 = vrot.lane.b32.xlu1 %v11185_v43, %s6722_s9 }
 0x734   : > { %5446 = vrot.lane.b32.xlu0 %v11186_v16, %s6722_s9 }
 0x736   : > { %5458 = vrot.lane.b32.xlu1 %v11187_v54, %s6722_s9 }
 0x738   : > { %5454 = vrot.lane.b32.xlu0 %v11188_v24, %s6722_s9 }
 0x73a   : > { %5448 = vrot.lane.b32.xlu1 %v11189_v2, %s6722_s9 }
 0x73c   : > { %5444 = vrot.lane.b32.xlu0 %v11190_v59, %s6722_s9 }
 0x73e   : > { %5456 = vrot.lane.b32.xlu1 %v11191_v38, %s6722_s9 }
 0x740   : > { %5452 = vrot.lane.b32.xlu0 %v11192_v47, %s6722_s9 }
 0x742   : > { %5216 = vrot.lane.b32.xlu1 %v11185_v43, %s6720_s18 }
 0x744   : > { %5212 = vrot.lane.b32.xlu0 %v11186_v16, %s6720_s18 }
 0x746   : > { %5224 = vrot.lane.b32.xlu1 %v11187_v54, %s6720_s18 }
 0x748   : > { %5220 = vrot.lane.b32.xlu0 %v11188_v24, %s6720_s18 }
 0x74a   : > { %5214 = vrot.lane.b32.xlu1 %v11189_v2, %s6720_s18 }
 0x74c   : > { %5210 = vrot.lane.b32.xlu0 %v11190_v59, %s6720_s18 }
 0x74e   : > { %5222 = vrot.lane.b32.xlu1 %v11191_v38, %s6720_s18 }
 0x750   : > { %5218 = vrot.lane.b32.xlu0 %v11192_v47, %s6720_s18 }
 0x752   : > { %4744 = vrot.lane.b32.xlu1 %v11180_v34, %s6724_s12 }
 0x754   : > { %v8706_v26 = vpop.permute.xlu1 %3728  ;;  %4740 = vrot.lane.b32.xlu0 %v11183_v25, %s6724_s12 }
 0x755   : > { %11193 = vst [vmem:[#allocation18_spill] sm:$0xff] %v8706_v26 }
 0x756   : > { %4752 = vrot.lane.b32.xlu1 %v11179_v8, %s6724_s12  ;;  %v8712_v44 = vpop.permute.xlu0 %3724 }
 0x757   : > { %11194 = vst [vmem:[#allocation16_spill] sm:$0xff] %v8712_v44 }
 0x758   : > { %v8714_v61 = vpop.permute.xlu1 %3736  ;;  %4748 = vrot.lane.b32.xlu0 %v11182_v39, %s6724_s12 }
 0x759   : > { %11195 = vst [vmem:[#allocation23_spill] sm:$0xff] %v8714_v61 }
 0x75a   : > { %4742 = vrot.lane.b32.xlu1 %v11176_v22, %s6724_s12  ;;  %v8720_v49 = vpop.permute.xlu0 %3732 }
 0x75b   : > { %11196 = vst [vmem:[#allocation21_spill] sm:$0xff] %v8720_v49 }
 0x75c   : > { %v8722_v45 = vpop.permute.xlu1 %3744  ;;  %4738 = vrot.lane.b32.xlu0 %v11178_v58, %s6724_s12 }
 0x75d   : > { %11197 = vst [vmem:[#allocation22_spill] sm:$0xff] %v8722_v45 }
 0x75e   : > { %4750 = vrot.lane.b32.xlu1 %v11175_v3, %s6724_s12  ;;  %v8728_v7 = vpop.permute.xlu0 %3740 }
 0x75f   : > { %11198 = vst [vmem:[#allocation20_spill] sm:$0xff] %v8728_v7 }
 0x760   : > { %v8730_v26 = vpop.permute.xlu1 %3752  ;;  %4746 = vrot.lane.b32.xlu0 %v11177_v19, %s6724_s12 }
 0x761   : > { %11199 = vst [vmem:[#allocation24_spill] sm:$0xff] %v8730_v26 }
 0x762   : > { %4510 = vrot.lane.b32.xlu1 %v11180_v34, %s6723_s11  ;;  %v8736_v61 = vpop.permute.xlu0 %3748 }
 0x763   : > { %11200 = vst [vmem:[#allocation25_spill] sm:$0xff] %v8736_v61 }
 0x764   : > { %v8738_v49 = vpop.permute.xlu1 %3760  ;;  %4506 = vrot.lane.b32.xlu0 %v11183_v25, %s6723_s11 }
 0x765   : > { %11201 = vst [vmem:[#allocation26_spill] sm:$0xff] %v8738_v49 }
 0x766   : > { %4518 = vrot.lane.b32.xlu1 %v11179_v8, %s6723_s11  ;;  %v8744_v45 = vpop.permute.xlu0 %3756 }
 0x767   : > { %11202 = vst [vmem:[#allocation29_spill] sm:$0xff] %v8744_v45 }
 0x768   : > { %v8746_v7 = vpop.permute.xlu1 %3768  ;;  %4514 = vrot.lane.b32.xlu0 %v11182_v39, %s6723_s11 }
 0x769   : > { %11203 = vst [vmem:[#allocation27_spill] sm:$0xff] %v8746_v7 }
 0x76a   : > { %4508 = vrot.lane.b32.xlu1 %v11176_v22, %s6723_s11  ;;  %v8752_v53 = vpop.permute.xlu0 %3764 }
 0x76b   : > { %11204 = vst [vmem:[#allocation28_spill] sm:$0xff] %v8752_v53 }
 0x76c   : > { %v8754_v61 = vpop.permute.xlu1 %3776  ;;  %4504 = vrot.lane.b32.xlu0 %v11178_v58, %s6723_s11 }
 0x76d   : > { %11205 = vst [vmem:[#allocation30_spill] sm:$0xff] %v8754_v61 }
 0x76e   : > { %4516 = vrot.lane.b32.xlu1 %v11175_v3, %s6723_s11  ;;  %v8760_v49 = vpop.permute.xlu0 %3772 }
 0x76f   : > { %11206 = vst [vmem:[#allocation31_spill] sm:$0xff] %v8760_v49 }
 0x770   : > { %v8762_v45 = vpop.permute.xlu1 %3967  ;;  %4512 = vrot.lane.b32.xlu0 %v11177_v19, %s6723_s11 }
 0x771   : > { %11207 = vst [vmem:[#allocation234_spill] sm:$0xff] %v8762_v45 }
 0x772   : > { %4276 = vrot.lane.b32.xlu1 %v11180_v34, %s6722_s9  ;;  %v8768_v7 = vpop.permute.xlu0 %3963 }
 0x773   : > { %11208 = vst [vmem:[#allocation235_spill] sm:$0xff] %v8768_v7 }
 0x774   : > { %v8770_v53 = vpop.permute.xlu1 %3975  ;;  %4272 = vrot.lane.b32.xlu0 %v11183_v25, %s6722_s9 }
 0x775   : > { %11209 = vst [vmem:[#allocation236_spill] sm:$0xff] %v8770_v53 }
 0x776   : > { %4284 = vrot.lane.b32.xlu1 %v11179_v8, %s6722_s9  ;;  %v8776_v61 = vpop.permute.xlu0 %3971 }
 0x777   : > { %11210 = vst [vmem:[#allocation237_spill] sm:$0xff] %v8776_v61 }
 0x778   : > { %v8778_v49 = vpop.permute.xlu1 %3983  ;;  %4280 = vrot.lane.b32.xlu0 %v11182_v39, %s6722_s9 }
 0x779   : > { %11211 = vst [vmem:[#allocation238_spill] sm:$0xff] %v8778_v49  ;;  %v3911_v49 = vcombine.high %v11180_v34, %v11179_v8 }
 0x77a   : > { %4274 = vrot.lane.b32.xlu1 %v11176_v22, %s6722_s9  ;;  %v8784_v45 = vpop.permute.xlu0 %3979 }
 0x77b   : > { %11212 = vst [vmem:[#allocation239_spill] sm:$0xff] %v8784_v45 }
 0x77c   : > { %v8786_v14 = vpop.permute.xlu1 %3991  ;;  %4270 = vrot.lane.b32.xlu0 %v11178_v58, %s6722_s9 }
 0x77d   : > { %11213 = vst [vmem:[#allocation240_spill] sm:$0xff] %v8786_v14  ;;  %v3895_v14 = vcombine.high %v11183_v25, %v11182_v39 }
 0x77e   : > { %4282 = vrot.lane.b32.xlu1 %v11175_v3, %s6722_s9  ;;  %v8792_v53 = vpop.permute.xlu0 %3987 }
 0x77f   : > { %11214 = vst [vmem:[#allocation241_spill] sm:$0xff] %v8792_v53  ;;  %v3925_v53 = vrot.slane %v3911_v49, %v6921_v31  ;;  %v3909_v7 = vrot.slane %v3895_v14, %v6921_v31 }
 0x780   : > { %v8794_v61 = vpop.permute.xlu1 %3999  ;;  %4278 = vrot.lane.b32.xlu0 %v11177_v19, %s6722_s9 }
 0x781   : > { %11215 = vst [vmem:[#allocation242_spill] sm:$0xff] %v8794_v61 }
 0x782   : > { %4042 = vrot.lane.b32.xlu1 %v11180_v34, %s6720_s18  ;;  %v8802_v45 = vpop.permute.xlu0 %3995 }
 0x783   : > { %11216 = vst [vmem:[#allocation243_spill] sm:$0xff] %v8802_v45  ;;  %v3942_v45 = vcombine.low %v3909_v7, %v3925_v53 }
 0x784   : > { %v8806_v27 = vpop.permute.xlu1 %5918  ;;  %4038 = vrot.lane.b32.xlu0 %v11183_v25, %s6720_s18 }
 0x785   : > { %v3950_v14 = vrot.slane %v3942_v45, %v7176_v62 }
 0x786   : > { %4050 = vrot.lane.b32.xlu1 %v11179_v8, %s6720_s18  ;;  %v8813_v61 = vpop.permute.xlu0 %5914 }
 0x787   : > { %v3960_v46 = vcombine.high %v3950_v14, %v10966_v18 }
 0x788   : > { %v8816_v34 = vpop.permute.xlu1 %5926  ;;  %4046 = vrot.lane.b32.xlu0 %v11182_v39, %s6720_s18  ;;  %v3943_v39 = vcombine.high %v3909_v7, %v3925_v53 }
 0x789   : > { %v6020_v8 = vcombine.low %v8806_v27, %v8816_v34 }
 0x78a   : > { %4040 = vrot.lane.b32.xlu1 %v11176_v22, %s6720_s18  ;;  %v8822_v55 = vpop.permute.xlu0 %5922 }
 0x78b   : > { %v6004_v25 = vcombine.low %v8813_v61, %v8822_v55  ;;  %v6028_v5 = vrot.slane %v6020_v8, %v6921_v31 }
 0x78c   : > { %v8828_v49 = vpop.permute.xlu1 %5916  ;;  %4036 = vrot.lane.b32.xlu0 %v11178_v58, %s6720_s18  ;;  %v3957_v58 = vrot.slane %v3943_v39, %v7176_v62 }
 0x78d   : > { %v6012_v26 = vrot.slane %v6004_v25, %v6921_v31 }
 0x78e   : > { %4048 = vrot.lane.b32.xlu1 %v11175_v3, %s6720_s18  ;;  %v8836_v22 = vpop.permute.xlu0 %5912 }
 0x78f   : > { %v6036_v45 = vcombine.low %v6012_v26, %v6028_v5 }
 0x790   : > { %v8839_v44 = vpop.permute.xlu1 %5924  ;;  %4044 = vrot.lane.b32.xlu0 %v11177_v19, %s6720_s18  ;;  %v3961_v19 = vcombine.high %v3957_v58, %v10966_v18 }
 0x791   : > { %v5952_v53 = vcombine.low %v8828_v49, %v8839_v44  ;;  %v5953_v17 = vcombine.high %v8828_v49, %v8839_v44 }
 0x792   : > { %4007 = vrot.lane.b32.xlu1 %v3960_v46, %s6731_s24  ;;  %v8848_v3 = vpop.permute.xlu0 %5920  ;;  %v8862_v46 = vrot.slane %v6036_v45, %v7176_v62 }
 0x793   : > { %v5936_v7 = vcombine.low %v8836_v22, %v8848_v3  ;;  %v5960_v8 = vrot.slane %v5952_v53, %v6921_v31  ;;  %v6037_v53 = vcombine.high %v6012_v26, %v6028_v5 }
 0x794   : > { %v8852_v25 = vpop.permute.xlu1 %5684  ;;  %4003 = vrot.lane.b32.xlu0 %v3950_v14, %s6727_s15  ;;  %11217 = vst [vmem:[#allocation244_spill] sm:$0xff] %v8862_v46 }
 0x795   : > { %v5944_v39 = vrot.slane %v5936_v7, %v6921_v31 }
 0x796   : > { %4015 = vrot.lane.b32.xlu1 %v3961_v19, %s6732_s25  ;;  %v8859_v13 = vpop.permute.xlu0 %5680  ;;  %v6068_v19 = vcombine.high %v8862_v46, %v10966_v18  ;;  %v6051_v46 = vrot.slane %v6037_v53, %v7176_v62  ;;  %v6005_v53 = vcombine.high %v8813_v61, %v8822_v55 }
 0x797   : > { %v5968_v41 = vcombine.low %v5944_v39, %v5960_v8  ;;  %v5969_v5 = vcombine.high %v5944_v39, %v5960_v8 }
 0x798   : > { %v8864_v48 = vpop.permute.xlu1 %5692  ;;  %4011 = vrot.lane.b32.xlu0 %v3957_v58, %s6728_s20  ;;  %v8917_v55 = vrot.slane %v6005_v53, %v6921_v31 }
 0x799   : > { %v5786_v14 = vcombine.low %v8852_v25, %v8864_v48  ;;  %v8870_v33 = vrot.slane %v5968_v41, %v7176_v62  ;;  %v5983_v8 = vrot.slane %v5969_v5, %v7176_v62  ;;  %v6021_v5 = vcombine.high %v8806_v27, %v8816_v34 }
 0x79a   : > { %v8872_v7 = vpop.permute.xlu0 %5688 }
 0x79b   : > { %11218 = vst [vmem:[#allocation245_spill] sm:$0xff] %v8870_v33  ;;  %v5770_v45 = vcombine.low %v8859_v13, %v8872_v7  ;;  %v6000_v58 = vcombine.high %v8870_v33, %v10966_v18  ;;  %v5794_v15 = vrot.slane %v5786_v14, %v6921_v31  ;;  %v8928_v27 = vrot.slane %v6021_v5, %v6921_v31 }
 0x79c   : > { %v8878_v21 = vpop.permute.xlu1 %5682  ;;  %6101 = vrot.lane.b32.xlu0 %v6068_v19, %s6729_s21 }
 0x79d   : > { %v5778_v41 = vrot.slane %v5770_v45, %v6921_v31  ;;  %6073 = vrot.lane.b32.xlu1 %v6000_v58, %s6729_s21 }
 0x79e   : > { %v8886_v26 = vpop.permute.xlu0 %5678 }
 0x79f   : > { %v5802_v12 = vcombine.low %v5778_v41, %v5794_v15  ;;  %v5803_v61 = vcombine.high %v5778_v41, %v5794_v15  ;;  %v6052_v41 = vcombine.low %v8917_v55, %v8928_v27 }
 0x7a0   : > { %v8889_v56 = vpop.permute.xlu1 %5690  ;;  %6105 = vrot.lane.b32.xlu0 %v6051_v46, %s6726_s19 }
 0x7a1   : > { %v5718_v19 = vcombine.low %v8878_v21, %v8889_v56  ;;  %v8895_v33 = vrot.slane %v5802_v12, %v7176_v62 }
 0x7a2   : > { %v8897_v14 = vpop.permute.xlu0 %5686 }
 0x7a3   : > { %11219 = vst [vmem:[#allocation246_spill] sm:$0xff] %v8895_v33  ;;  %v5702_v39 = vcombine.low %v8886_v26, %v8897_v14  ;;  %v5834_v58 = vcombine.high %v8895_v33, %v10966_v18  ;;  %v5726_v12 = vrot.slane %v5718_v19, %v6921_v31  ;;  %v6069_v33 = vcombine.high %v6051_v46, %v10966_v18 }
 0x7a4   : > { %v8904_v45 = vpop.permute.xlu1 %5450  ;;  %6077 = vrot.lane.b32.xlu0 %v5983_v8, %s6726_s19  ;;  %v5937_v46 = vcombine.high %v8836_v22, %v8848_v3 }
 0x7a5   : > { %v5710_v51 = vrot.slane %v5702_v39, %v6921_v31  ;;  %5867 = vrot.lane.b32.xlu1 %v5834_v58, %s6729_s21 }
 0x7a6   : > { %v8914_v32 = vpop.permute.xlu0 %5446  ;;  %v8953_v3 = vrot.slane %v5937_v46, %v6921_v31 }
 0x7a7   : > { %v5734_v57 = vcombine.low %v5710_v51, %v5726_v12 }
 0x7a8   : > { %v8919_v1 = vpop.permute.xlu1 %5458 }
 0x7a9   : > { %v5552_v19 = vcombine.low %v8904_v45, %v8919_v1  ;;  %v8925_v39 = vrot.slane %v5734_v57, %v7176_v62  ;;  %6109 = vrot.lane.b32.xlu1 %v6069_v33, %s6730_s23  ;;  %v5817_v57 = vrot.slane %v5803_v61, %v7176_v62  ;;  %v5735_v61 = vcombine.high %v5710_v51, %v5726_v12 }
 0x7aa   : > { %v8931_v34 = vpop.permute.xlu0 %5454 }
 0x7ab   : > { %11220 = vst [vmem:[#allocation247_spill] sm:$0xff] %v8925_v39  ;;  %v5536_v15 = vcombine.low %v8914_v32, %v8931_v34  ;;  %v5766_v58 = vcombine.high %v8925_v39, %v10966_v18  ;;  %v5560_v33 = vrot.slane %v5552_v19, %v6921_v31  ;;  %v6060_v19 = vrot.slane %v6052_v41, %v7176_v62 }
 0x7ac   : > { %v8939_v53 = vpop.permute.xlu1 %5448  ;;  %v5749_v46 = vrot.slane %v5735_v61, %v7176_v62  ;;  %v5771_v61 = vcombine.high %v8859_v13, %v8872_v7 }
 0x7ad   : > { %11221 = vst [vmem:[#allocation248_spill] sm:$0xff] %v8939_v53  ;;  %v5544_v5 = vrot.slane %v5536_v15, %v6921_v31  ;;  %5871 = vrot.lane.b32.xlu1 %v5817_v57, %s6726_s19  ;;  %5839 = vrot.lane.b32.xlu0 %v5766_v58, %s6729_s21  ;;  %v6001_v15 = vcombine.high %v5983_v8, %v10966_v18 }
 0x7ae   : > { %v8950_v30 = vpop.permute.xlu0 %5444  ;;  %v8965_v58 = vrot.slane %v5953_v17, %v6921_v31 }
 0x7af   : > { %11222 = vst [vmem:[#allocation249_spill] sm:$0xff] %v8950_v30  ;;  %v5568_v22 = vcombine.low %v5544_v5, %v5560_v33 }
 0x7b0   : > { %v8955_v37 = vpop.permute.xlu1 %5456  ;;  %v5984_v8 = vcombine.low %v8953_v3, %v8965_v58 }
 0x7b1   : > { %11223 = vst [vmem:[#allocation250_spill] sm:$0xff] %v8955_v37  ;;  %v5484_v44 = vcombine.low %v8939_v53, %v8955_v37  ;;  %v8962_v49 = vrot.slane %v5568_v22, %v7176_v62  ;;  %6113 = vrot.lane.b32.xlu1 %v6060_v19, %s6727_s15  ;;  %6081 = vrot.lane.b32.xlu0 %v6001_v15, %s6730_s23 }
 0x7b2   : > { %v8969_v51 = vpop.permute.xlu0 %5452 }
 0x7b3   : > { %11224 = vst [vmem:[#allocation251_spill] sm:$0xff] %v8962_v49  ;;  %v5468_v12 = vcombine.low %v8950_v30, %v8969_v51  ;;  %v5600_v17 = vcombine.high %v8962_v49, %v10966_v18  ;;  %v8981_v22 = vrot.slane %v5484_v44, %v6921_v31  ;;  %v5992_v44 = vrot.slane %v5984_v8, %v7176_v62 }
 0x7b4   : > { %v8975_v41 = vpop.permute.xlu1 %5216  ;;  %v5835_v49 = vcombine.high %v5817_v57, %v10966_v18  ;;  %v9012_v57 = vrot.slane %v5771_v61, %v6921_v31 }
 0x7b5   : > { %11225 = vst [vmem:[#allocation252_spill] sm:$0xff] %v8975_v41  ;;  %v8984_v15 = vrot.slane %v5468_v12, %v6921_v31  ;;  %5843 = vrot.lane.b32.xlu1 %v5749_v46, %s6726_s19  ;;  %5633 = vrot.lane.b32.xlu0 %v5600_v17, %s6729_s21  ;;  %v5787_v17 = vcombine.high %v8852_v25, %v8864_v48 }
 0x7b6   : > { %v8988_v39 = vpop.permute.xlu0 %5212  ;;  %v6070_v48 = vcombine.high %v6060_v19, %v10966_v18 }
 0x7b7   : > { %11226 = vst [vmem:[#allocation253_spill] sm:$0xff] %v8988_v39  ;;  %v5500_v53 = vcombine.low %v8984_v15, %v8981_v22 }
 0x7b8   : > { %v8994_v37 = vpop.permute.xlu1 %5224 }
 0x7b9   : > { %11227 = vst [vmem:[#allocation254_spill] sm:$0xff] %v8994_v37  ;;  %v8999_v12 = vrot.slane %v5500_v53, %v7176_v62  ;;  %v5318_v30 = vcombine.low %v8975_v41, %v8994_v37  ;;  %6085 = vrot.lane.b32.xlu1 %v5992_v44, %s6727_s15  ;;  %5875 = vrot.lane.b32.xlu0 %v5835_v49, %s6730_s23 }
 0x7ba   : > { %v9007_v13 = vpop.permute.xlu0 %5220  ;;  %v5569_v53 = vcombine.high %v5544_v5, %v5560_v33  ;;  %v9023_v49 = vrot.slane %v5787_v17, %v6921_v31 }
 0x7bb   : > { %11228 = vst [vmem:[#allocation255_spill] sm:$0xff] %v8999_v12  ;;  %11229 = vst [vmem:[#allocation256_spill] sm:$0xff] %v9007_v13  ;;  %v5302_v7 = vcombine.low %v8988_v39, %v9007_v13  ;;  %v5532_v25 = vcombine.high %v8999_v12, %v10966_v18  ;;  %v9026_v37 = vrot.slane %v5318_v30, %v6921_v31 }
 0x7bc   : > { %v9014_v8 = vpop.permute.xlu1 %5214  ;;  %v5818_v5 = vcombine.low %v9012_v57, %v9023_v49  ;;  %v5583_v17 = vrot.slane %v5569_v53, %v7176_v62  ;;  %v6002_v53 = vcombine.high %v5992_v44, %v10966_v18  ;;  %v5016_v13 = vcombine.low %v11189_v2, %v11191_v38 }
 0x7bd   : > { %11230 = vst [vmem:[#allocation257_spill] sm:$0xff] %v9014_v8  ;;  %v9020_v41 = vrot.slane %v5302_v7, %v6921_v31  ;;  %6117 = vrot.lane.b32.xlu0 %v6070_v48, %s6731_s24  ;;  %5605 = vrot.lane.b32.xlu1 %v5532_v25, %s6729_s21  ;;  %v5767_v7 = vcombine.high %v5749_v46, %v10966_v18 }
 0x7be   : > { %v9030_v33 = vpop.permute.xlu0 %5210  ;;  %v6053_v48 = vcombine.high %v8917_v55, %v8928_v27  ;;  %v5703_v25 = vcombine.high %v8886_v26, %v8897_v14  ;;  %v5826_v39 = vrot.slane %v5818_v5, %v7176_v62  ;;  %v5719_v55 = vcombine.high %v8878_v21, %v8889_v56 }
 0x7bf   : > { %11231 = vst [vmem:[#allocation258_spill] sm:$0xff] %v9030_v33  ;;  %v5334_v19 = vcombine.low %v9020_v41, %v9026_v37  ;;  %v5068_v27 = vcombine.low %v11186_v16, %v11188_v24  ;;  %v5000_v44 = vcombine.low %v11190_v59, %v11192_v47  ;;  %v5501_v56 = vcombine.high %v8984_v15, %v8981_v22 }
 0x7c0   : > { %v9036_v61 = vpop.permute.xlu1 %5222  ;;  %v6067_v14 = vrot.slane %v6053_v48, %v7176_v62  ;;  %v9071_v5 = vrot.slane %v5703_v25, %v6921_v31 }
 0x7c1   : > { %11232 = vst [vmem:[#allocation259_spill] sm:$0xff] %v9036_v61  ;;  %5637 = vrot.lane.b32.xlu0 %v5583_v17, %s6726_s19  ;;  %5847 = vrot.lane.b32.xlu1 %v5767_v7, %s6730_s23  ;;  %v9053_v46 = vrot.slane %v5334_v19, %v7176_v62  ;;  %v5084_v7 = vcombine.low %v11185_v43, %v11187_v54 }
 0x7c2   : > { %v9042_v30 = vpop.permute.xlu0 %5218  ;;  %v5250_v25 = vcombine.low %v9014_v8, %v9036_v61  ;;  %v5076_v15 = vrot.slane %v5068_v27, %v6921_v31  ;;  %v5601_v27 = vcombine.high %v5583_v17, %v10966_v18  ;;  %v5985_v17 = vcombine.high %v8953_v3, %v8965_v58 }
 0x7c3   : > { %11234 = vst [vmem:[#allocation261_spill] sm:$0xff] %v9053_v46  ;;  %v5234_v21 = vcombine.low %v9030_v33, %v9042_v30  ;;  %v5366_v48 = vcombine.high %v9053_v46, %v10966_v18  ;;  %v5008_v46 = vrot.slane %v5000_v44, %v6921_v31 }
 0x7c4   : > { %v9048_v12 = vpop.permute.xlu1 %4744 }
 0x7c5   : > { %11233 = vst [vmem:[#allocation260_spill] sm:$0xff] %v9048_v12  ;;  %5879 = vrot.lane.b32.xlu0 %v5826_v39, %s6727_s15  ;;  %6089 = vrot.lane.b32.xlu1 %v6002_v53, %s6731_s24  ;;  %v5092_v53 = vrot.slane %v5084_v7, %v6921_v31  ;;  %v5024_v12 = vrot.slane %v5016_v13, %v6921_v31 }
 0x7c6   : > { %v9063_v26 = vpop.permute.xlu0 %4740  ;;  %v5069_v7 = vcombine.high %v11186_v16, %v11188_v24  ;;  %v5085_v13 = vcombine.high %v11185_v43, %v11187_v54  ;;  %v9101_v8 = vrot.slane %v5234_v21, %v6921_v31  ;;  %v5001_v16 = vcombine.high %v11190_v59, %v11192_v47 }
 0x7c7   : > { %11235 = vst [vmem:[#allocation262_spill] sm:$0xff] %v9063_v26  ;;  %v9084_v26 = vrot.slane %v5719_v55, %v6921_v31  ;;  %v5100_v44 = vcombine.low %v5076_v15, %v5092_v53  ;;  %v5032_v33 = vcombine.low %v5008_v46, %v5024_v12  ;;  %v9112_v43 = vrot.slane %v5250_v25, %v6921_v31 }
 0x7c8   : > { %v9077_v19 = vpop.permute.xlu1 %4752  ;;  %v5101_v24 = vcombine.high %v5076_v15, %v5092_v53  ;;  %v9122_v21 = vrot.slane %v5069_v7, %v6921_v31  ;;  %v9125_v59 = vrot.slane %v5085_v13, %v6921_v31  ;;  %v5537_v47 = vcombine.high %v8914_v32, %v8931_v34  ;;  %v11247_v7 = vld [vmem:[#allocation32_spill] sm:$0xff] }
 0x7c9   : > { %11236 = vst [vmem:[#allocation263_spill] sm:$0xff] %v9077_v19  ;;  %6121 = vrot.lane.b32.xlu0 %v6067_v14, %s6728_s20  ;;  %5399 = vrot.lane.b32.xlu1 %v5366_v48, %s6729_s21  ;;  %v5750_v55 = vcombine.low %v9071_v5, %v9084_v26  ;;  %v9106_v48 = vrot.slane %v5501_v56, %v7176_v62 }
 0x7ca   : > { %v9090_v22 = vpop.permute.xlu0 %4748  ;;  %v5033_v56 = vcombine.high %v5008_v46, %v5024_v12  ;;  %11240 = vst [vmem:[#allocation267_spill] sm:$0xff] %v9122_v21  ;;  %11241 = vst [vmem:[#allocation268_spill] sm:$0xff] %v9125_v59  ;;  %v5266_v25 = vcombine.low %v9101_v8, %v9112_v43  ;;  %v5836_v46 = vcombine.high %v5826_v39, %v10966_v18 }
 0x7cb   : > { %11237 = vst [vmem:[#allocation264_spill] sm:$0xff] %v9090_v22  ;;  %v9134_v12 = vrot.slane %v5750_v55, %v7176_v62  ;;  %v9138_v3 = vrot.slane %v5100_v44, %v7176_v62  ;;  %v9141_v58 = vrot.slane %v5032_v33, %v7176_v62  ;;  %v9144_v53 = vrot.slane %v5001_v16, %v6921_v31 }
 0x7cc   : > { %v9103_v61 = vpop.permute.xlu1 %4742  ;;  %v5017_v32 = vcombine.high %v11189_v2, %v11191_v38  ;;  %v5553_v34 = vcombine.high %v8904_v45, %v8919_v1  ;;  %v9156_v33 = vrot.slane %v5101_v24, %v7176_v62  ;;  %v9159_v15 = vrot.slane %v5033_v56, %v7176_v62  ;;  %v11248_v1 = vld [vmem:[#allocation34_spill] sm:$0xff] }
 0x7cd   : > { %11238 = vst [vmem:[#allocation265_spill] sm:$0xff] %v9103_v61  ;;  %5609 = vrot.lane.b32.xlu0 %v9106_v48, %s6726_s19  ;;  %5641 = vrot.lane.b32.xlu1 %v5601_v27, %s6730_s23  ;;  %11243 = vst [vmem:[#allocation270_spill] sm:$0xff] %v9138_v3  ;;  %v474_v2 = vsel %vm473_vm7, %v11247_v7, %v7563_v36  ;;  %v1668_v38 = vsel %vm473_vm7, %v11248_v1, %v7651_v52 }
 0x7ce   : > { %v9117_v54 = vpop.permute.xlu0 %4738  ;;  %11244 = vst [vmem:[#allocation271_spill] sm:$0xff] %v9141_v58  ;;  %11245 = vst [vmem:[#allocation272_spill] sm:$0xff] %v9144_v53  ;;  %v6071_v45 = vcombine.high %v6067_v14, %v10966_v18  ;;  %v9169_v13 = vrot.slane %v5537_v47, %v6921_v31  ;;  %v5335_v55 = vcombine.high %v9020_v41, %v9026_v37  ;;  %v11251_v47 = vld [vmem:[#allocation33_spill] sm:$0xff] }
 0x7cf   : > { %11239 = vst [vmem:[#allocation266_spill] sm:$0xff] %v9117_v54  ;;  %v9176_v16 = vrot.slane %v5985_v17, %v7176_v62  ;;  %v9179_v36 = vrot.slane %v5266_v25, %v7176_v62  ;;  %v9183_v24 = vcombine.high %v9138_v3, %v10966_v18  ;;  %v9187_v52 = vcombine.high %v9141_v58, %v10966_v18  ;;  %v11275_v58 = vld [vmem:[#allocation248_spill] sm:$0xff] }
 0x7d0   : > { %v9131_v27 = vpop.permute.xlu1 %4750  ;;  %v5116_v14 = vcombine.low %v9122_v21, %v9125_v59  ;;  %v9192_v37 = vrot.slane %v5017_v32, %v6921_v31  ;;  %v476_v41 = vsel %vm475_vm8, %v474_v2, %v7540_v28  ;;  %v9197_v56 = vrot.slane %v5553_v34, %v6921_v31  ;;  %v11252_v28 = vld [vmem:[#allocation35_spill] sm:$0xff] }
 0x7d1   : > { %11242 = vst [vmem:[#allocation269_spill] sm:$0xff] %v9131_v27  ;;  %5851 = vrot.lane.b32.xlu0 %v9134_v12, %s6727_s15  ;;  %5883 = vrot.lane.b32.xlu1 %v5836_v46, %s6731_s24  ;;  %11249 = vst [vmem:[#allocation32_spill] sm:$0xff] %v9179_v36  ;;  %v487_v25 = vsel %vm473_vm7, %v11251_v47, %v7576_v42  ;;  %v478_v46 = vsel %vm477_vm9, %v476_v41, %v7578_v40  ;;  %v11254_v41 = vld [vmem:[#allocation37_spill] sm:$0xff]  ;;  %v11311_v21 = vld [vmem:[#allocation111_spill] sm:$0xff] }
 0x7d2   : > { %v9153_v39 = vpop.permute.xlu0 %4746  ;;  %11250 = vst [vmem:[#allocation34_spill] sm:$0xff] %v9192_v37  ;;  %v1675_v32 = vsel %vm473_vm7, %v11252_v28, %v7661_v23  ;;  %v1669_v34 = vsel %vm475_vm8, %v1668_v38, %v7626_v50  ;;  %v5584_v2 = vcombine.low %v9169_v13, %v9197_v56  ;;  %v9221_v42 = vrot.slane %v5335_v55, %v7176_v62 }
 0x7d3   : > { %11246 = vst [vmem:[#allocation273_spill] sm:$0xff] %v9153_v39  ;;  %v1670_v7 = vsel %vm477_vm9, %v1669_v34, %v7671_v29  ;;  %v5298_v40 = vcombine.high %v9179_v36, %v10966_v18  ;;  %v9230_v50 = vcombine.high %v9156_v33, %v10966_v18  ;;  %v9233_v29 = vrot.slane %v5116_v14, %v7176_v62 }
 0x7d4   : > { %v9173_v44 = vpop.permute.xlu1 %4510  ;;  %v5048_v38 = vcombine.low %v9144_v53, %v9192_v37  ;;  %v488_v55 = vsel %vm475_vm8, %v487_v25, %v11254_v41  ;;  %v480_v47 = vsel %vm479_vm10, %v478_v46, %v7551_v0  ;;  %v1671_v46 = vsel %vm479_vm10, %v1670_v7, %v7639_v4  ;;  %v11257_v7 = vld [vmem:[#allocation80_spill] sm:$0xff]  ;;  %v11261_v41 = vld [vmem:[#allocation39_spill] sm:$0xff] }
 0x7d5   : > { %6093 = vrot.lane.b32.xlu0 %v9176_v16, %s6728_s20  ;;  %6125 = vrot.lane.b32.xlu1 %v6071_v45, %s6732_s25  ;;  %v11253_v45 = vld [vmem:[#allocation36_spill] sm:$0xff]  ;;  %v489_v28 = vsel %vm477_vm9, %v488_v55, %v7589_v35  ;;  %v482_v25 = vsel %vm481_vm11, %v480_v47, %v7591_v63  ;;  %v5533_v35 = vcombine.high %v9106_v48, %v10966_v18  ;;  %v11262_v47 = vld [vmem:[#allocation41_spill] sm:$0xff] }
 0x7d6   : > { %v9202_v17 = vpop.permute.xlu0 %4506  ;;  %v730_v23 = vsel %vm473_vm7, %v11253_v45, %v7768_v6  ;;  %v1676_v6 = vsel %vm475_vm8, %v1675_v32, %v7613_v10  ;;  %v5819_v32 = vcombine.high %v9012_v57, %v9023_v49  ;;  %v1672_v63 = vsel %vm481_vm11, %v1671_v46, %v7689_v20  ;;  %v11256_v57 = vld [vmem:[#allocation48_spill] sm:$0xff]  ;;  %v11259_v45 = vld [vmem:[#allocation85_spill] sm:$0xff]  ;;  %v11260_v20 = vld [vmem:[#allocation42_spill] sm:$0xff] }
 0x7d7   : > { %v1677_v0 = vsel %vm477_vm9, %v1676_v6, %v7676_v11  ;;  %v731_v10 = vsel %vm475_vm8, %v730_v23, %v7715_v9  ;;  %v9273_v11 = vcombine.high %v9159_v15, %v10966_v18  ;;  %v9277_v9 = vcombine.high %v9233_v29, %v10966_v18 }
 0x7d8   : > { %v9218_v1 = vpop.permute.xlu1 %4518  ;;  %v732_v4 = vsel %vm477_vm9, %v731_v10, %v7772_v60  ;;  %v1678_v49 = vsel %vm479_vm10, %v1677_v0, %v11256_v57  ;;  %v964_v23 = vsel %vm473_vm7, %v11260_v20, %v11259_v45  ;;  %v490_v55 = vsel %vm479_vm10, %v489_v28, %v11261_v41  ;;  %v11264_v0 = vld [vmem:[#allocation54_spill] sm:$0xff]  ;;  %v11266_v57 = vld [vmem:[#allocation59_spill] sm:$0xff]  ;;  %v11269_v41 = vld [vmem:[#allocation81_spill] sm:$0xff] }
 0x7d9   : > { %5403 = vrot.lane.b32.xlu1 %v9221_v42, %s6726_s19  ;;  %5371 = vrot.lane.b32.xlu0 %v5298_v40, %s6729_s21  ;;  %v9263_v40 = vrot.slane %v5584_v2, %v7176_v62  ;;  %11255 = vst [vmem:[#allocation33_spill] sm:$0xff] %v9277_v9  ;;  %v11258_v2 = vld [vmem:[#allocation38_spill] sm:$0xff]  ;;  %v9296_v6 = vsel %vm483_vm12, %v482_v25, %v11262_v47  ;;  %v11268_v20 = vld [vmem:[#allocation51_spill] sm:$0xff]  ;;  %v11270_v47 = vld [vmem:[#allocation57_spill] sm:$0xff] }
 0x7da   : > { %v9246_v14 = vpop.permute.xlu0 %4514  ;;  %v723_v48 = vsel %vm473_vm7, %v11258_v2, %v11257_v7  ;;  %11263 = vst [vmem:[#allocation35_spill] sm:$0xff] %v9296_v6  ;;  %v1679_v46 = vsel %vm481_vm11, %v1678_v49, %v11264_v0  ;;  %v9301_v10 = vrot.slane %v5048_v38, %v7176_v62  ;;  %v733_v7 = vsel %vm479_vm10, %v732_v4, %v11266_v57  ;;  %v11271_v0 = vld [vmem:[#allocation63_spill] sm:$0xff]  ;;  %v11272_v57 = vld [vmem:[#allocation82_spill] sm:$0xff]  ;;  %v11349_v9 = vld [vmem:[#allocation260_spill] sm:$0xff] }
 0x7db   : > { %v9310_v28 = vrot.slane %v5819_v32, %v7176_v62  ;;  %v5768_v25 = vcombine.high %v9134_v12, %v10966_v18  ;;  %v1673_v49 = vsel %vm483_vm12, %v1672_v63, %v11268_v20  ;;  %v734_v38 = vsel %vm481_vm11, %v733_v7, %v11269_v41  ;;  %v11274_v12 = vld [vmem:[#allocation250_spill] sm:$0xff]  ;;  %v11278_v7 = vld [vmem:[#allocation56_spill] sm:$0xff] }
 0x7dc   : > { %v9260_v34 = vpop.permute.xlu1 %4508  ;;  %11265 = vst [vmem:[#allocation36_spill] sm:$0xff] %v9301_v10  ;;  %v724_v4 = vsel %vm475_vm8, %v723_v48, %v11270_v47  ;;  %v5485_v3 = vcombine.high %v11275_v58, %v11274_v12  ;;  %v11276_v48 = vld [vmem:[#allocation44_spill] sm:$0xff]  ;;  %v9339_v20 = vsel %vm485_vm13, %v1673_v49, %v11278_v7  ;;  %v11280_v41 = vld [vmem:[#allocation50_spill] sm:$0xff]  ;;  %v11282_v58 = vld [vmem:[#allocation43_spill] sm:$0xff]  ;;  %v6003_v49 = vcombine.high %v9176_v16, %v10966_v18 }
 0x7dd   : > { %5645 = vrot.lane.b32.xlu1 %v9263_v40, %s6727_s15  ;;  %5613 = vrot.lane.b32.xlu0 %v5533_v35, %s6730_s23  ;;  %v11267_v35 = vld [vmem:[#allocation249_spill] sm:$0xff]  ;;  %v725_v32 = vsel %vm477_vm9, %v724_v4, %v11272_v57  ;;  %11279 = vst [vmem:[#allocation48_spill] sm:$0xff] %v9339_v20  ;;  %v1680_v47 = vsel %vm483_vm12, %v1679_v46, %v11280_v41  ;;  %v11281_v4 = vld [vmem:[#allocation88_spill] sm:$0xff]  ;;  %v11284_v57 = vld [vmem:[#allocation47_spill] sm:$0xff] }
 0x7de   : > { %v9290_v60 = vpop.permute.xlu0 %4504  ;;  %v5469_v2 = vcombine.high %v11267_v35, %v8969_v51  ;;  %v965_v51 = vsel %vm475_vm8, %v964_v23, %v11271_v0  ;;  %v11273_v35 = vld [vmem:[#allocation87_spill] sm:$0xff]  ;;  %v9335_v23 = vsel %vm481_vm11, %v490_v55, %v11276_v48  ;;  %v957_v0 = vsel %vm473_vm7, %v11282_v58, %v11281_v4  ;;  %v11288_v7 = vld [vmem:[#allocation61_spill] sm:$0xff]  ;;  %v11290_v4 = vld [vmem:[#allocation58_spill] sm:$0xff] }
 0x7df   : > { %v966_v36 = vsel %vm477_vm9, %v965_v51, %v11273_v35  ;;  %11277 = vst [vmem:[#allocation37_spill] sm:$0xff] %v9335_v23  ;;  %v11283_v51 = vld [vmem:[#allocation93_spill] sm:$0xff]  ;;  %v5267_v55 = vcombine.high %v9101_v8, %v9112_v43  ;;  %v11286_v46 = vld [vmem:[#allocation55_spill] sm:$0xff]  ;;  %v9364_v41 = vsel %vm483_vm12, %v734_v38, %v11288_v7  ;;  %v11293_v43 = vld [vmem:[#allocation62_spill] sm:$0xff] }
 0x7e0   : > { %v9307_v45 = vpop.permute.xlu1 %4516  ;;  %v9350_v35 = vrot.slane %v5469_v2, %v6921_v31  ;;  %v9360_v48 = vsel %vm485_vm13, %v1680_v47, %v11286_v46  ;;  %11289 = vst [vmem:[#allocation85_spill] sm:$0xff] %v9364_v41  ;;  %v9368_v2 = vsel %vm479_vm10, %v725_v32, %v11290_v4  ;;  %v11292_v58 = vld [vmem:[#allocation65_spill] sm:$0xff]  ;;  %v9378_v47 = vrot.slane %v5485_v3, %v6921_v31  ;;  %v11300_v4 = vld [vmem:[#allocation52_spill] sm:$0xff]  ;;  %v11312_v6 = vld [vmem:[#allocation98_spill] sm:$0xff] }
 0x7e1   : > { %5887 = vrot.lane.b32.xlu1 %v9310_v28, %s6728_s20  ;;  %5855 = vrot.lane.b32.xlu0 %v5768_v25, %s6731_s24  ;;  %v1198_v25 = vsel %vm473_vm7, %v11284_v57, %v11283_v51  ;;  %11287 = vst [vmem:[#allocation38_spill] sm:$0xff] %v9360_v48  ;;  %11291 = vst [vmem:[#allocation42_spill] sm:$0xff] %v9368_v2  ;;  %v967_v8 = vsel %vm479_vm10, %v966_v36, %v11292_v58  ;;  %v11294_v57 = vld [vmem:[#allocation96_spill] sm:$0xff]  ;;  %v11295_v16 = vld [vmem:[#allocation49_spill] sm:$0xff] }
 0x7e2   : > { %v9331_v63 = vpop.permute.xlu0 %4512  ;;  %v958_v51 = vsel %vm475_vm8, %v957_v0, %v11293_v43  ;;  %v1191_v53 = vsel %vm473_vm7, %v11295_v16, %v11294_v57  ;;  %v11297_v32 = vld [vmem:[#allocation89_spill] sm:$0xff]  ;;  %v11301_v3 = vld [vmem:[#allocation104_spill] sm:$0xff]  ;;  %v11304_v16 = vld [vmem:[#allocation110_spill] sm:$0xff]  ;;  %v5516_v37 = vcombine.low %v9350_v35, %v9378_v47 }
 0x7e3   : > { %v9387_v36 = vsel %vm481_vm11, %v967_v8, %v11297_v32  ;;  %v11298_v46 = vld [vmem:[#allocation69_spill] sm:$0xff]  ;;  %v9407_v32 = vrot.slane %v5267_v55, %v7176_v62  ;;  %v11314_v55 = vld [vmem:[#allocation76_spill] sm:$0xff]  ;;  %v11333_v41 = vld [vmem:[#allocation143_spill] sm:$0xff] }
 0x7e4   : > { %v9354_v12 = vpop.permute.xlu1 %4276  ;;  %v1199_v0 = vsel %vm475_vm8, %v1198_v25, %v11298_v46  ;;  %v11299_v7 = vld [vmem:[#allocation101_spill] sm:$0xff]  ;;  %v5367_v25 = vcombine.high %v9221_v42, %v10966_v18  ;;  %v11306_v46 = vld [vmem:[#allocation90_spill] sm:$0xff]  ;;  %v11348_v2 = vld [vmem:[#allocation152_spill] sm:$0xff] }
 0x7e5   : > { %11285 = vst [vmem:[#allocation80_spill] sm:$0xff] %v9354_v12  ;;  %5165 = vrot.lane.b32.xlu1 %v9183_v24, %s6729_s21  ;;  %6097 = vrot.lane.b32.xlu0 %v6003_v49, %s6732_s25  ;;  %v1432_v58 = vsel %vm473_vm7, %v11300_v4, %v11299_v7  ;;  %v11302_v43 = vld [vmem:[#allocation53_spill] sm:$0xff]  ;;  %v9411_v7 = vsel %vm477_vm9, %v958_v51, %v11306_v46  ;;  %v11308_v4 = vld [vmem:[#allocation95_spill] sm:$0xff]  ;;  %v11381_v20 = vld [vmem:[#allocation208_spill] sm:$0xff] }
 0x7e6   : > { %v9383_v38 = vpop.permute.xlu0 %4272  ;;  %v1425_v57 = vsel %vm473_vm7, %v11302_v43, %v11301_v3  ;;  %v11303_v24 = vld [vmem:[#allocation113_spill] sm:$0xff]  ;;  %11307 = vst [vmem:[#allocation54_spill] sm:$0xff] %v9411_v7  ;;  %v9415_v3 = vsel %vm477_vm9, %v1199_v0, %v11308_v4  ;;  %v11309_v43 = vld [vmem:[#allocation68_spill] sm:$0xff]  ;;  %v1433_v12 = vsel %vm475_vm8, %v1432_v58, %v11314_v55  ;;  %v11317_v0 = vld [vmem:[#allocation103_spill] sm:$0xff] }
 0x7e7   : > { %11296 = vst [vmem:[#allocation39_spill] sm:$0xff] %v9383_v38  ;;  %v1902_v49 = vsel %vm473_vm7, %v11304_v16, %v11303_v24  ;;  %v1192_v24 = vsel %vm475_vm8, %v1191_v53, %v11309_v43  ;;  %v11310_v16 = vld [vmem:[#allocation118_spill] sm:$0xff]  ;;  %v11315_v51 = vld [vmem:[#allocation121_spill] sm:$0xff]  ;;  %v11319_v43 = vld [vmem:[#allocation112_spill] sm:$0xff] }
 0x7e8   : > { %v9402_v8 = vpop.permute.xlu1 %4284  ;;  %v1909_v59 = vsel %vm473_vm7, %v11311_v21, %v11310_v16  ;;  %v9424_v42 = vsel %vm477_vm9, %v1192_v24, %v11312_v6  ;;  %v9437_v21 = vsel %vm477_vm9, %v1433_v12, %v11317_v0  ;;  %v11318_v4 = vld [vmem:[#allocation74_spill] sm:$0xff]  ;;  %v1903_v58 = vsel %vm475_vm8, %v1902_v49, %v11319_v43  ;;  %v11320_v24 = vld [vmem:[#allocation145_spill] sm:$0xff]  ;;  %v11322_v55 = vld [vmem:[#allocation256_spill] sm:$0xff] }
 0x7e9   : > { %11305 = vst [vmem:[#allocation41_spill] sm:$0xff] %v9402_v8  ;;  %11313 = vst [vmem:[#allocation59_spill] sm:$0xff] %v9424_v42  ;;  %v1910_v46 = vsel %vm475_vm8, %v1909_v59, %v11315_v51  ;;  %5407 = vrot.lane.b32.xlu1 %v5367_v25, %s6730_s23  ;;  %5375 = vrot.lane.b32.xlu0 %v9407_v32, %s6726_s19  ;;  %v1426_v6 = vsel %vm475_vm8, %v1425_v57, %v11318_v4  ;;  %v11321_v16 = vld [vmem:[#allocation142_spill] sm:$0xff]  ;;  %v11323_v51 = vld [vmem:[#allocation253_spill] sm:$0xff] }
 0x7ea   : > { %v9433_v53 = vpop.permute.xlu0 %4280  ;;  %v2370_v59 = vsel %vm473_vm7, %v11321_v16, %v11320_v24  ;;  %v5751_v25 = vcombine.high %v9071_v5, %v9084_v26  ;;  %v5303_v8 = vcombine.high %v11323_v51, %v11322_v55  ;;  %v5602_v12 = vcombine.high %v9263_v40, %v10966_v18  ;;  %v11325_v0 = vld [vmem:[#allocation105_spill] sm:$0xff]  ;;  %v11326_v4 = vld [vmem:[#allocation115_spill] sm:$0xff]  ;;  %v11327_v24 = vld [vmem:[#allocation120_spill] sm:$0xff] }
 0x7eb   : > { %11316 = vst [vmem:[#allocation249_spill] sm:$0xff] %v9433_v53  ;;  %v9455_v57 = vrot.slane %v5516_v37, %v7176_v62  ;;  %v9459_v49 = vsel %vm477_vm9, %v1426_v6, %v11325_v0  ;;  %v1904_v43 = vsel %vm477_vm9, %v1903_v58, %v11326_v4  ;;  %v1911_v26 = vsel %vm477_vm9, %v1910_v46, %v11327_v24  ;;  %v11328_v5 = vld [vmem:[#allocation129_spill] sm:$0xff]  ;;  %v11329_v16 = vld [vmem:[#allocation126_spill] sm:$0xff]  ;;  %v11335_v0 = vld [vmem:[#allocation252_spill] sm:$0xff] }
 0x7ec   : > { %v9450_v23 = vpop.permute.xlu1 %4274  ;;  %v2136_v55 = vsel %vm473_vm7, %v11329_v16, %v11328_v5  ;;  %v11330_v51 = vld [vmem:[#allocation134_spill] sm:$0xff]  ;;  %v11337_v58 = vld [vmem:[#allocation123_spill] sm:$0xff]  ;;  %v11338_v24 = vld [vmem:[#allocation137_spill] sm:$0xff] }
 0x7ed   : > { %11324 = vst [vmem:[#allocation51_spill] sm:$0xff] %v9450_v23  ;;  %v11331_v23 = vld [vmem:[#allocation127_spill] sm:$0xff]  ;;  %v11332_v37 = vld [vmem:[#allocation150_spill] sm:$0xff]  ;;  %5649 = vrot.lane.b32.xlu1 %v5602_v12, %s6731_s24  ;;  %5617 = vrot.lane.b32.xlu0 %v9455_v57, %s6727_s15  ;;  %v1912_v4 = vsel %vm479_vm10, %v1911_v26, %v11337_v58  ;;  %v11339_v5 = vld [vmem:[#allocation144_spill] sm:$0xff]  ;;  %v5837_v26 = vcombine.high %v9310_v28, %v10966_v18 }
 0x7ee   : > { %v2143_v40 = vsel %vm473_vm7, %v11331_v23, %v11330_v51  ;;  %v2377_v38 = vsel %vm473_vm7, %v11333_v41, %v11332_v37  ;;  %v11334_v6 = vld [vmem:[#allocation254_spill] sm:$0xff]  ;;  %v9479_v46 = vpop.permute.xlu0 %4270  ;;  %v2371_v16 = vsel %vm475_vm8, %v2370_v59, %v11339_v5  ;;  %v11340_v41 = vld [vmem:[#allocation153_spill] sm:$0xff]  ;;  %v9490_v37 = vrot.slane %v5303_v8, %v6921_v31  ;;  %v11345_v8 = vld [vmem:[#allocation147_spill] sm:$0xff] }
 0x7ef   : > { %v5319_v53 = vcombine.high %v11335_v0, %v11334_v6  ;;  %11336 = vst [vmem:[#allocation81_spill] sm:$0xff] %v9479_v46  ;;  %v2144_v23 = vsel %vm475_vm8, %v2143_v40, %v11338_v24  ;;  %v2378_v51 = vsel %vm475_vm8, %v2377_v38, %v11340_v41  ;;  %v11341_v12 = vld [vmem:[#allocation262_spill] sm:$0xff]  ;;  %v9499_v58 = vrot.slane %v5751_v25, %v7176_v62  ;;  %v11344_v24 = vld [vmem:[#allocation128_spill] sm:$0xff]  ;;  %v11346_v41 = vld [vmem:[#allocation13_spill] sm:$0xff] }
 0x7f0   : > { %v4830_v6 = vcombine.low %v11341_v12, %v9090_v22  ;;  %v9494_v0 = vpop.permute.xlu1 %4282  ;;  %v11343_v40 = vld [vmem:[#allocation114_spill] sm:$0xff]  ;;  %v2137_v38 = vsel %vm475_vm8, %v2136_v55, %v11344_v24  ;;  %v2372_v5 = vsel %vm477_vm9, %v2371_v16, %v11345_v8  ;;  %v2379_v28 = vsel %vm477_vm9, %v2378_v51, %v11348_v2  ;;  %v11354_v24 = vld [vmem:[#allocation155_spill] sm:$0xff]  ;;  %v11364_v10 = vld [vmem:[#allocation165_spill] sm:$0xff] }
 0x7f1   : > { %11342 = vst [vmem:[#allocation57_spill] sm:$0xff] %v9494_v0  ;;  %v9503_v59 = vsel %vm479_vm10, %v1904_v43, %v11343_v40  ;;  %v11347_v46 = vld [vmem:[#allocation158_spill] sm:$0xff]  ;;  %v9515_v25 = vrot.slane %v5319_v53, %v6921_v31  ;;  %v4846_v43 = vcombine.low %v11349_v9, %v9077_v19  ;;  %5891 = vrot.lane.b32.xlu1 %v5837_v26, %s6732_s25  ;;  %v11353_v53 = vld [vmem:[#allocation136_spill] sm:$0xff]  ;;  %v11355_v26 = vld [vmem:[#allocation15_spill] sm:$0xff] }
 0x7f2   : > { %v2604_v0 = vsel %vm473_vm7, %v11347_v46, %v11346_v41  ;;  %5859 = vrot.lane.b32.xlu0 %v9499_v58, %s6728_s20  ;;  %v9522_v55 = vpop.permute.xlu0 %4278  ;;  %v11351_v16 = vld [vmem:[#allocation122_spill] sm:$0xff]  ;;  %v11352_v46 = vld [vmem:[#allocation131_spill] sm:$0xff]  ;;  %v2145_v51 = vsel %vm477_vm9, %v2144_v23, %v11353_v53  ;;  %v2380_v8 = vsel %vm479_vm10, %v2379_v28, %v11354_v24  ;;  %v11365_v12 = vld [vmem:[#allocation176_spill] sm:$0xff] }
 0x7f3   : > { %11350 = vst [vmem:[#allocation63_spill] sm:$0xff] %v9522_v55  ;;  %v9526_v40 = vsel %vm481_vm11, %v1912_v4, %v11351_v16  ;;  %v9530_v2 = vsel %vm477_vm9, %v2137_v38, %v11352_v46  ;;  %v2605_v41 = vsel %vm475_vm8, %v2604_v0, %v11355_v26  ;;  %v11356_v9 = vld [vmem:[#allocation171_spill] sm:$0xff]  ;;  %v5350_v4 = vcombine.low %v9490_v37, %v9515_v25  ;;  %v11360_v28 = vld [vmem:[#allocation146_spill] sm:$0xff]  ;;  %v11361_v0 = vld [vmem:[#allocation12_spill] sm:$0xff] }
 0x7f4   : > { %v11357_v19 = vld [vmem:[#allocation11_spill] sm:$0xff]  ;;  %v9544_v16 = vrot.slane %v4830_v6, %v6921_v31  ;;  %v9546_v38 = vpop.permute.xlu1 %4042  ;;  %v9554_v53 = vsel %vm479_vm10, %v2372_v5, %v11360_v28  ;;  %v2606_v24 = vsel %vm477_vm9, %v2605_v41, %v11361_v0  ;;  %v11368_v41 = vld [vmem:[#allocation154_spill] sm:$0xff]  ;;  %v11382_v48 = vld [vmem:[#allocation201_spill] sm:$0xff] }
 0x7f5   : > { %v2843_v55 = vsel %vm473_vm7, %v11357_v19, %v11356_v9  ;;  %11358 = vst [vmem:[#allocation82_spill] sm:$0xff] %v9546_v38  ;;  %v11359_v46 = vld [vmem:[#allocation139_spill] sm:$0xff]  ;;  %v11362_v19 = vld [vmem:[#allocation162_spill] sm:$0xff]  ;;  %5169 = vrot.lane.b32.xlu1 %v9156_v33, %s6726_s19  ;;  %v5585_v33 = vcombine.high %v9169_v13, %v9197_v56  ;;  %v11377_v56 = vld [vmem:[#allocation192_spill] sm:$0xff] }
 0x7f6   : > { %v9550_v23 = vsel %vm479_vm10, %v2145_v51, %v11359_v46  ;;  %v11363_v9 = vld [vmem:[#allocation159_spill] sm:$0xff]  ;;  %v11366_v38 = vld [vmem:[#allocation10_spill] sm:$0xff]  ;;  %v9567_v51 = vrot.slane %v4846_v43, %v6921_v31  ;;  %5137 = vrot.lane.b32.xlu0 %v9187_v52, %s6729_s21  ;;  %v9573_v5 = vpop.permute.xlu0 %4038  ;;  %v9577_v46 = vsel %vm481_vm11, %v2380_v8, %v11368_v41  ;;  %v9593_v8 = vrot.slane %v5350_v4, %v7176_v62  ;;  %v11375_v41 = vld [vmem:[#allocation164_spill] sm:$0xff] }
 0x7f7   : > { %v2611_v26 = vsel %vm473_vm7, %v11363_v9, %v11362_v19  ;;  %v2850_v22 = vsel %vm473_vm7, %v11366_v38, %v11365_v12  ;;  %11367 = vst [vmem:[#allocation87_spill] sm:$0xff] %v9573_v5  ;;  %v11370_v0 = vld [vmem:[#allocation179_spill] sm:$0xff]  ;;  %v11372_v38 = vld [vmem:[#allocation184_spill] sm:$0xff] }
 0x7f8   : > { %v2612_v6 = vsel %vm475_vm8, %v2611_v26, %v11364_v10  ;;  %v11369_v10 = vld [vmem:[#allocation170_spill] sm:$0xff]  ;;  %v2851_v12 = vsel %vm475_vm8, %v2850_v22, %v11370_v0  ;;  %v11371_v43 = vld [vmem:[#allocation187_spill] sm:$0xff]  ;;  %v4862_v52 = vcombine.low %v9544_v16, %v9567_v51  ;;  %v9590_v9 = vpop.permute.xlu1 %4050  ;;  %v11376_v0 = vld [vmem:[#allocation173_spill] sm:$0xff] }
 0x7f9   : > { %v2844_v28 = vsel %vm475_vm8, %v2843_v55, %v11369_v10  ;;  %v3077_v19 = vsel %vm473_vm7, %v11372_v38, %v11371_v43  ;;  %11373 = vst [vmem:[#allocation250_spill] sm:$0xff] %v9590_v9  ;;  %v5299_v55 = vcombine.high %v9407_v32, %v10966_v18  ;;  %v11374_v26 = vld [vmem:[#allocation14_spill] sm:$0xff]  ;;  %v2613_v10 = vsel %vm477_vm9, %v2612_v6, %v11375_v41  ;;  %v11378_v43 = vld [vmem:[#allocation185_spill] sm:$0xff]  ;;  %v11380_v5 = vld [vmem:[#allocation195_spill] sm:$0xff] }
 0x7fa   : > { %v9599_v22 = vsel %vm479_vm10, %v2606_v24, %v11374_v26  ;;  %v2845_v13 = vsel %vm477_vm9, %v2844_v28, %v11376_v0  ;;  %v3084_v38 = vsel %vm473_vm7, %v11378_v43, %v11377_v56  ;;  %v11379_v9 = vld [vmem:[#allocation186_spill] sm:$0xff]  ;;  %v3318_v24 = vsel %vm473_vm7, %v11382_v48, %v11381_v20  ;;  %5411 = vrot.lane.b32.xlu1 %v9593_v8, %s6727_s15  ;;  %v9618_v6 = vpop.permute.xlu0 %4046  ;;  %v11385_v41 = vld [vmem:[#allocation189_spill] sm:$0xff]  ;;  %v11387_v0 = vld [vmem:[#allocation200_spill] sm:$0xff] }
 0x7fb   : > { %v3078_v4 = vsel %vm475_vm8, %v3077_v19, %v11379_v9  ;;  %v3085_v32 = vsel %vm475_vm8, %v3084_v38, %v11380_v5  ;;  %5379 = vrot.lane.b32.xlu0 %v5299_v55, %s6730_s23  ;;  %11383 = vst [vmem:[#allocation248_spill] sm:$0xff] %v9618_v6  ;;  %v11384_v28 = vld [vmem:[#allocation178_spill] sm:$0xff]  ;;  %v11386_v9 = vld [vmem:[#allocation203_spill] sm:$0xff]  ;;  %v9634_v55 = vrot.slane %v5585_v33, %v7176_v62 }
 0x7fc   : > { %v2852_v26 = vsel %vm477_vm9, %v2851_v12, %v11384_v28  ;;  %v3079_v19 = vsel %vm477_vm9, %v3078_v4, %v11385_v41  ;;  %v3311_v5 = vsel %vm473_vm7, %v11387_v0, %v11386_v9  ;;  %v11388_v56 = vld [vmem:[#allocation211_spill] sm:$0xff]  ;;  %v11389_v48 = vld [vmem:[#allocation258_spill] sm:$0xff]  ;;  %v9631_v38 = vpop.permute.xlu1 %4040  ;;  %v5534_v12 = vcombine.high %v9455_v57, %v10966_v18  ;;  %v11393_v9 = vld [vmem:[#allocation172_spill] sm:$0xff] }
 0x7fd   : > { %v3319_v20 = vsel %vm475_vm8, %v3318_v24, %v11388_v56  ;;  %v5235_v43 = vcombine.high %v11389_v48, %v9042_v30  ;;  %11390 = vst [vmem:[#allocation44_spill] sm:$0xff] %v9631_v38  ;;  %v9639_v4 = vrot.slane %v4862_v52, %v7176_v62  ;;  %v11392_v28 = vld [vmem:[#allocation167_spill] sm:$0xff]  ;;  %v9647_v24 = vsel %vm479_vm10, %v2845_v13, %v11393_v9  ;;  %v11394_v30 = vld [vmem:[#allocation181_spill] sm:$0xff]  ;;  %v11395_v33 = vld [vmem:[#allocation194_spill] sm:$0xff] }
 0x7fe   : > { %v9643_v41 = vsel %vm479_vm10, %v2613_v10, %v11392_v28  ;;  %v9651_v0 = vsel %vm479_vm10, %v2852_v26, %v11394_v30  ;;  %v3086_v56 = vsel %vm477_vm9, %v3085_v32, %v11395_v33  ;;  %v11396_v48 = vld [vmem:[#allocation202_spill] sm:$0xff]  ;;  %v11398_v6 = vld [vmem:[#allocation259_spill] sm:$0xff]  ;;  %v11399_v10 = vld [vmem:[#allocation257_spill] sm:$0xff]  ;;  %5653 = vrot.lane.b32.xlu1 %v9634_v55, %s6728_s20  ;;  %v9664_v13 = vpop.permute.xlu0 %4036 }
 0x7ff   : > { %11391 = vst [vmem:[#allocation56_spill] sm:$0xff] %v9639_v4  ;;  %v3312_v57 = vsel %vm475_vm8, %v3311_v5, %v11396_v48  ;;  %v11397_v52 = vld [vmem:[#allocation210_spill] sm:$0xff]  ;;  %v5251_v28 = vcombine.high %v11399_v10, %v11398_v6  ;;  %5621 = vrot.lane.b32.xlu0 %v5534_v12, %s6731_s24  ;;  %11400 = vst [vmem:[#allocation50_spill] sm:$0xff] %v9664_v13  ;;  %v11401_v26 = vld [vmem:[#allocation188_spill] sm:$0xff]  ;;  %v9679_v48 = vrot.slane %v5235_v43, %v6921_v31 }
 0x800   : > { %v3320_v38 = vsel %vm477_vm9, %v3319_v20, %v11397_v52  ;;  %v9668_v9 = vsel %vm479_vm10, %v3079_v19, %v11401_v26  ;;  %v11402_v32 = vld [vmem:[#allocation197_spill] sm:$0xff]  ;;  %v4762_v12 = vcombine.low %v9117_v54, %v9153_v39  ;;  %v9683_v52 = vpop.permute.xlu1 %4048  ;;  %v5769_v19 = vcombine.high %v9499_v58, %v10966_v18  ;;  %v11407_v10 = vld [vmem:[#allocation219_spill] sm:$0xff]  ;;  %v11408_v26 = vld [vmem:[#allocation216_spill] sm:$0xff] }
 0x801   : > { %v9672_v5 = vsel %vm479_vm10, %v3086_v56, %v11402_v32  ;;  %v11403_v30 = vld [vmem:[#allocation205_spill] sm:$0xff]  ;;  %11405 = vst [vmem:[#allocation88_spill] sm:$0xff] %v9679_v48  ;;  %11406 = vst [vmem:[#allocation43_spill] sm:$0xff] %v9683_v52  ;;  %v4894_v56 = vcombine.high %v9639_v4, %v10966_v18  ;;  %v11409_v32 = vld [vmem:[#allocation224_spill] sm:$0xff]  ;;  %v9705_v7 = vrot.slane %v5251_v28, %v6921_v31 }
 0x802   : > { %v3313_v20 = vsel %vm477_vm9, %v3312_v57, %v11403_v30  ;;  %v11404_v33 = vld [vmem:[#allocation213_spill] sm:$0xff]  ;;  %v3545_v57 = vsel %vm473_vm7, %v11408_v26, %v11407_v10  ;;  %v11411_v30 = vld [vmem:[#allocation16_spill] sm:$0xff]  ;;  %v11415_v58 = vld [vmem:[#allocation235_spill] sm:$0xff]  ;;  %v4778_v10 = vcombine.low %v9103_v61, %v9131_v27  ;;  %v9711_v26 = vpop.permute.xlu0 %4044 }
 0x803   : > { %v3321_v6 = vsel %vm479_vm10, %v3320_v38, %v11404_v33  ;;  %v11410_v38 = vld [vmem:[#allocation217_spill] sm:$0xff]  ;;  %v11412_v33 = vld [vmem:[#allocation232_spill] sm:$0xff]  ;;  %v11416_v42 = vld [vmem:[#allocation19_spill] sm:$0xff]  ;;  %11417 = vst [vmem:[#allocation93_spill] sm:$0xff] %v9705_v7  ;;  %5863 = vrot.lane.b32.xlu0 %v5769_v19, %s6732_s25  ;;  %4927 = vrot.lane.b32.xlu1 %v4894_v56, %s6729_s21 }
 0x804   : > { %v3552_v43 = vsel %vm473_vm7, %v11410_v38, %v11409_v32  ;;  %v3779_v13 = vsel %vm473_vm7, %v11412_v33, %v11411_v30  ;;  %v11413_v54 = vld [vmem:[#allocation24_spill] sm:$0xff]  ;;  %v11414_v52 = vld [vmem:[#allocation233_spill] sm:$0xff]  ;;  %v4018_v4 = vsel %vm473_vm7, %v11416_v42, %v11415_v58  ;;  %11418 = vst [vmem:[#allocation47_spill] sm:$0xff] %v9711_v26  ;;  %v11424_v61 = vld [vmem:[#allocation18_spill] sm:$0xff] }
 0x805   : > { %v3786_v39 = vsel %vm473_vm7, %v11414_v52, %v11413_v54  ;;  %v11419_v32 = vld [vmem:[#allocation204_spill] sm:$0xff]  ;;  %v11420_v54 = vld [vmem:[#allocation227_spill] sm:$0xff]  ;;  %v11421_v42 = vld [vmem:[#allocation29_spill] sm:$0xff]  ;;  %v3780_v19 = vsel %vm475_vm8, %v3779_v13, %v11424_v61  ;;  %v4008_v13 = vpop.permute.xlu1 %4007 }
 0x806   : > { %v9715_v38 = vsel %vm479_vm10, %v3313_v20, %v11419_v32  ;;  %v3553_v52 = vsel %vm475_vm8, %v3552_v43, %v11420_v54  ;;  %v3787_v28 = vsel %vm475_vm8, %v3786_v39, %v11421_v42  ;;  %v11422_v30 = vld [vmem:[#allocation240_spill] sm:$0xff]  ;;  %v11423_v33 = vld [vmem:[#allocation17_spill] sm:$0xff]  ;;  %v11425_v56 = vld [vmem:[#allocation243_spill] sm:$0xff]  ;;  %v5282_v20 = vcombine.low %v9679_v48, %v9705_v7 }
 0x807   : > { %v4025_v58 = vsel %vm473_vm7, %v11423_v33, %v11422_v30  ;;  %v9731_v32 = vrot.slane %v4762_v12, %v6921_v31  ;;  %v11426_v43 = vld [vmem:[#allocation212_spill] sm:$0xff]  ;;  %v11427_v39 = vld [vmem:[#allocation218_spill] sm:$0xff]  ;;  %v11428_v27 = vld [vmem:[#allocation21_spill] sm:$0xff]  ;;  %v9746_v7 = vrot.slane %v4778_v10, %v6921_v31  ;;  %5141 = vrot.lane.b32.xlu0 %v9159_v15, %s6726_s19  ;;  %5173 = vrot.lane.b32.xlu1 %v9230_v50, %s6730_s23 }
 0x808   : > { %v4026_v26 = vsel %vm475_vm8, %v4025_v58, %v11425_v56  ;;  %v3322_v54 = vsel %vm481_vm11, %v3321_v6, %v11426_v43  ;;  %v3546_v42 = vsel %vm475_vm8, %v3545_v57, %v11427_v39  ;;  %v3781_v30 = vsel %vm477_vm9, %v3780_v19, %v11428_v27  ;;  %v11429_v33 = vld [vmem:[#allocation234_spill] sm:$0xff]  ;;  %v11431_v48 = vld [vmem:[#allocation237_spill] sm:$0xff]  ;;  %v4004_v27 = vpop.permute.xlu0 %4003  ;;  %v11433_v57 = vld [vmem:[#allocation28_spill] sm:$0xff] }
 0x809   : > { %v4019_v61 = vsel %vm475_vm8, %v4018_v4, %v11429_v33  ;;  %v11430_v58 = vld [vmem:[#allocation26_spill] sm:$0xff]  ;;  %v4794_v43 = vcombine.low %v9731_v32, %v9746_v7  ;;  %v9764_v50 = vrot.slane %v5282_v20, %v7176_v62  ;;  %v11435_v39 = vld [vmem:[#allocation221_spill] sm:$0xff]  ;;  %v11440_v20 = vld [vmem:[#allocation239_spill] sm:$0xff] }
 0x80a   : > { %v3788_v56 = vsel %vm477_vm9, %v3787_v28, %v11430_v58  ;;  %v4020_v12 = vsel %vm477_vm9, %v4019_v61, %v11431_v48  ;;  %v11432_v6 = vld [vmem:[#allocation226_spill] sm:$0xff]  ;;  %v5517_v28 = vcombine.high %v9350_v35, %v9378_v47  ;;  %v3547_v33 = vsel %vm477_vm9, %v3546_v42, %v11435_v39  ;;  %v11436_v61 = vld [vmem:[#allocation229_spill] sm:$0xff]  ;;  %v11437_v47 = vld [vmem:[#allocation23_spill] sm:$0xff] }
 0x80b   : > { %v3554_v4 = vsel %vm477_vm9, %v3553_v52, %v11432_v6  ;;  %v3789_v19 = vsel %vm479_vm10, %v3788_v56, %v11433_v57  ;;  %v11434_v48 = vld [vmem:[#allocation242_spill] sm:$0xff]  ;;  %v5368_v52 = vcombine.high %v9593_v8, %v10966_v18  ;;  %v11438_v58 = vld [vmem:[#allocation236_spill] sm:$0xff]  ;;  %v11439_v6 = vld [vmem:[#allocation27_spill] sm:$0xff]  ;;  %5383 = vrot.lane.b32.xlu0 %v9764_v50, %s6727_s15  ;;  %v5603_v39 = vcombine.high %v9634_v55, %v10966_v18 }
 0x80c   : > { %v4027_v10 = vsel %vm477_vm9, %v4026_v26, %v11434_v48  ;;  %v3555_v35 = vsel %vm479_vm10, %v3554_v4, %v11436_v61  ;;  %v3782_v26 = vsel %vm479_vm10, %v3781_v30, %v11437_v47  ;;  %v4021_v56 = vsel %vm479_vm10, %v4020_v12, %v11438_v58  ;;  %v4012_v42 = vpop.permute.xlu0 %4011  ;;  %v11441_v4 = vld [vmem:[#allocation20_spill] sm:$0xff]  ;;  %v11442_v48 = vld [vmem:[#allocation31_spill] sm:$0xff]  ;;  %v11446_v55 = vld [vmem:[#allocation238_spill] sm:$0xff] }
 0x80d   : > { %v4028_v15 = vsel %vm479_vm10, %v4027_v10, %v4004_v27  ;;  %v3790_v27 = vsel %vm481_vm11, %v3789_v19, %v11439_v6  ;;  %v4022_v57 = vsel %vm481_vm11, %v4021_v56, %v11440_v20  ;;  %5415 = vrot.lane.b32.xlu1 %v5368_v52, %s6731_s24  ;;  %v3783_v30 = vsel %vm481_vm11, %v3782_v26, %v11441_v4  ;;  %v4016_v10 = vpop.permute.xlu1 %4015  ;;  %v11444_v47 = vld [vmem:[#allocation220_spill] sm:$0xff]  ;;  %v11448_v6 = vld [vmem:[#allocation231_spill] sm:$0xff]  ;;  %v11452_v4 = vld [vmem:[#allocation25_spill] sm:$0xff] }
 0x80e   : > { %v4029_v8 = vsel %vm481_vm11, %v4028_v15, %v4008_v13  ;;  %v3791_v12 = vsel %vm483_vm12, %v3790_v27, %v11442_v48  ;;  %v4863_v61 = vcombine.high %v9544_v16, %v9567_v51  ;;  %v9794_v52 = vrot.slane %v5517_v28, %v7176_v62  ;;  %v11445_v58 = vld [vmem:[#allocation228_spill] sm:$0xff]  ;;  %v11447_v51 = vld [vmem:[#allocation223_spill] sm:$0xff]  ;;  %v11450_v27 = vld [vmem:[#allocation22_spill] sm:$0xff] }
 0x80f   : > { %v4030_v19 = vsel %vm483_vm12, %v4029_v8, %v4012_v42  ;;  %v9798_v15 = vrot.slane %v4794_v43, %v7176_v62  ;;  %v3548_v26 = vsel %vm479_vm10, %v3547_v33, %v11444_v47  ;;  %v3556_v56 = vsel %vm481_vm11, %v3555_v35, %v11445_v58  ;;  %v11449_v33 = vld [vmem:[#allocation241_spill] sm:$0xff]  ;;  %v11451_v8 = vld [vmem:[#allocation30_spill] sm:$0xff]  ;;  %v11455_v58 = vld [vmem:[#allocation191_spill] sm:$0xff] }
 0x810   : > { %v4031_v13 = vsel %vm485_vm13, %v4030_v19, %v4016_v10  ;;  %v4023_v16 = vsel %vm483_vm12, %v4022_v57, %v11446_v55  ;;  %v3549_v28 = vsel %vm481_vm11, %v3548_v26, %v11447_v51  ;;  %v3557_v43 = vsel %vm483_vm12, %v3556_v56, %v11448_v6  ;;  %5625 = vrot.lane.b32.xlu0 %v9794_v52, %s6728_s20  ;;  %v9827_v10 = vpop.permute.xlu0 %6101  ;;  %v11456_v56 = vld [vmem:[#allocation222_spill] sm:$0xff]  ;;  %v11459_v6 = vld [vmem:[#allocation225_spill] sm:$0xff] }
 0x811   : > { %11443 = vst [vmem:[#allocation55_spill] sm:$0xff] %v9798_v15  ;;  %6439 = vmatprep.subr.msk.mxu0 %vm494_vm6, %v4031_v13  ;;  %6489 = vmatprep.subr.msk.mxu1 %vm494_vm6, %v4031_v13  ;;  %v4024_v35 = vsel %vm485_vm13, %v4023_v16, %v11449_v33  ;;  %v3784_v20 = vsel %vm483_vm12, %v3783_v30, %v11450_v27  ;;  %v11458_v16 = vld [vmem:[#allocation196_spill] sm:$0xff]  ;;  %v11461_v27 = vld [vmem:[#allocation206_spill] sm:$0xff] }
 0x812   : > { %5657 = vrot.lane.b32.xlu1 %v5603_v39, %s6732_s25  ;;  %v4596_v57 = vcombine.low %v9202_v17, %v9246_v14  ;;  %6440 = vmatpush1.msk.msra.mxu0 %vm494_vm6, %v4024_v35  ;;  %v3792_v42 = vsel %vm485_vm13, %v3791_v12, %v11451_v8  ;;  %v3785_v48 = vsel %vm485_vm13, %v3784_v20, %v11452_v4  ;;  %v11453_v39 = vld [vmem:[#allocation207_spill] sm:$0xff]  ;;  %v9869_v20 = vpop.permute.xlu1 %6073  ;;  %v11463_v8 = vld [vmem:[#allocation180_spill] sm:$0xff]  ;;  %v11464_v4 = vld [vmem:[#allocation209_spill] sm:$0xff] }
 0x813   : > { %6514 = vmatpush1.msk.msra.mxu1 %vm494_vm6, %v4024_v35  ;;  %6441 = vmatprep.subr.msk.mxu0 %vm494_vm6, %v3792_v42  ;;  %v9832_v30 = vrot.slane %v4863_v61, %v7176_v62  ;;  %v4826_v19 = vcombine.high %v9798_v15, %v10966_v18  ;;  %v3315_v13 = vsel %vm481_vm11, %v9715_v38, %v11453_v39  ;;  %v11454_v12 = vld [vmem:[#allocation215_spill] sm:$0xff]  ;;  %v11457_v38 = vld [vmem:[#allocation230_spill] sm:$0xff] }
 0x814   : > { %6490 = vmatprep.subr.msk.mxu1 %vm494_vm6, %v3792_v42  ;;  %v3323_v47 = vsel %vm483_vm12, %v3322_v54, %v11454_v12  ;;  %v4612_v26 = vcombine.low %v9173_v44, %v9218_v1  ;;  %6442 = vmatpush1.msk.msra.mxu0 %vm494_vm6, %v3785_v48  ;;  %v3081_v61 = vsel %vm481_vm11, %v9668_v9, %v11455_v58  ;;  %v11465_v39 = vld [vmem:[#allocation175_spill] sm:$0xff]  ;;  %v9892_v58 = vpop.permute.xlu0 %6105 }
 0x815   : > { %6515 = vmatpush1.msk.msra.mxu1 %vm494_vm6, %v3785_v48  ;;  %v3550_v55 = vsel %vm483_vm12, %v3549_v28, %v11456_v56  ;;  %4899 = vrot.lane.b32.xlu0 %v4826_v19, %s6729_s21  ;;  %v3558_v54 = vsel %vm485_vm13, %v3557_v43, %v11457_v38  ;;  %v3088_v51 = vsel %vm481_vm11, %v9672_v5, %v11458_v16  ;;  %v11460_v28 = vld [vmem:[#allocation199_spill] sm:$0xff]  ;;  %v11462_v5 = vld [vmem:[#allocation214_spill] sm:$0xff]  ;;  %v11471_v16 = vld [vmem:[#allocation193_spill] sm:$0xff] }
 0x816   : > { %4931 = vrot.lane.b32.xlu1 %v9832_v30, %s6726_s19  ;;  %v3551_v33 = vsel %vm485_vm13, %v3550_v55, %v11459_v6  ;;  %v9861_v9 = vrot.slane %v4596_v57, %v6921_v31  ;;  %6443 = vmatprep.subr.msk.mxu0 %vm494_vm6, %v3558_v54  ;;  %v3089_v35 = vsel %vm483_vm12, %v3088_v51, %v11460_v28  ;;  %v11466_v12 = vld [vmem:[#allocation183_spill] sm:$0xff] }
 0x817   : > { %6491 = vmatprep.subr.msk.mxu1 %vm494_vm6, %v3558_v54  ;;  %v3316_v43 = vsel %vm483_vm12, %v3315_v13, %v11461_v27  ;;  %6444 = vmatpush1.msk.msra.mxu0 %vm494_vm6, %v3551_v33  ;;  %v3324_v57 = vsel %vm485_vm13, %v3323_v47, %v11462_v5  ;;  %v2854_v42 = vsel %vm481_vm11, %v9651_v0, %v11463_v8  ;;  %v11470_v54 = vld [vmem:[#allocation166_spill] sm:$0xff] }
 0x818   : > { %6516 = vmatpush1.msk.msra.mxu1 %vm494_vm6, %v3551_v33  ;;  %v3317_v48 = vsel %vm485_vm13, %v3316_v43, %v11464_v4  ;;  %v9881_v19 = vrot.slane %v4612_v26, %v6921_v31  ;;  %6445 = vmatprep.subr.msk.mxu0 %vm494_vm6, %v3324_v57  ;;  %v2847_v13 = vsel %vm481_vm11, %v9647_v24, %v11465_v39  ;;  %v11467_v26 = vld [vmem:[#allocation190_spill] sm:$0xff] }
 0x819   : > { %6492 = vmatprep.subr.msk.mxu1 %vm494_vm6, %v3324_v57  ;;  %v2855_v47 = vsel %vm483_vm12, %v2854_v42, %v11466_v12  ;;  %v5351_v0 = vcombine.high %v9490_v37, %v9515_v25  ;;  %6446 = vmatpush1.msk.msra.mxu0 %vm494_vm6, %v3317_v48  ;;  %v3082_v56 = vsel %vm483_vm12, %v3081_v61, %v11467_v26  ;;  %v11468_v24 = vld [vmem:[#allocation198_spill] sm:$0xff]  ;;  %v11469_v25 = vld [vmem:[#allocation161_spill] sm:$0xff] }
 0x81a   : > { %6517 = vmatpush1.msk.msra.mxu1 %vm494_vm6, %v3317_v48  ;;  %v4628_v55 = vcombine.low %v9861_v9, %v9881_v19  ;;  %5177 = vrot.lane.b32.xlu1 %v9233_v29, %s6727_s15  ;;  %v3090_v37 = vsel %vm485_vm13, %v3089_v35, %v11468_v24  ;;  %v2608_v38 = vsel %vm481_vm11, %v9599_v22, %v11469_v25  ;;  %v9916_v29 = vpop.permute.xlu1 %5867  ;;  %v11473_v33 = vld [vmem:[#allocation174_spill] sm:$0xff]  ;;  %v11475_v35 = vld [vmem:[#allocation177_spill] sm:$0xff]  ;;  %v11484_v24 = vld [vmem:[#allocation163_spill] sm:$0xff] }
 0x81b   : > { %5145 = vrot.lane.b32.xlu0 %v9273_v11, %s6730_s23  ;;  %v2615_v61 = vsel %vm481_vm11, %v9643_v41, %v11470_v54  ;;  %v3083_v51 = vsel %vm485_vm13, %v3082_v56, %v11471_v16  ;;  %6447 = vmatprep.subr.msk.mxu0 %vm494_vm6, %v3090_v37  ;;  %v11472_v11 = vld [vmem:[#allocation169_spill] sm:$0xff]  ;;  %v2848_v28 = vsel %vm483_vm12, %v2847_v13, %v11473_v33  ;;  %v11474_v22 = vld [vmem:[#allocation182_spill] sm:$0xff]  ;;  %v11486_v54 = vld [vmem:[#allocation148_spill] sm:$0xff] }
 0x81c   : > { %6493 = vmatprep.subr.msk.mxu1 %vm494_vm6, %v3090_v37  ;;  %v2616_v6 = vsel %vm483_vm12, %v2615_v61, %v11472_v11  ;;  %6448 = vmatpush1.msk.msra.mxu0 %vm494_vm6, %v3083_v51  ;;  %v2856_v41 = vsel %vm485_vm13, %v2855_v47, %v11474_v22  ;;  %v2849_v27 = vsel %vm485_vm13, %v2848_v28, %v11475_v35  ;;  %v11476_v57 = vld [vmem:[#allocation149_spill] sm:$0xff]  ;;  %v11479_v39 = vld [vmem:[#allocation130_spill] sm:$0xff]  ;;  %v9951_v47 = vpop.permute.xlu0 %6077  ;;  %v11487_v16 = vld [vmem:[#allocation156_spill] sm:$0xff] }
 0x81d   : > { %6518 = vmatpush1.msk.msra.mxu1 %vm494_vm6, %v3083_v51  ;;  %6449 = vmatprep.subr.msk.mxu0 %vm494_vm6, %v2856_v41  ;;  %v9931_v43 = vrot.slane %v5351_v0, %v7176_v62  ;;  %v5300_v5 = vcombine.high %v9764_v50, %v10966_v18  ;;  %v2374_v8 = vsel %vm481_vm11, %v9554_v53, %v11476_v57  ;;  %v11477_v42 = vld [vmem:[#allocation157_spill] sm:$0xff]  ;;  %v11480_v50 = vld [vmem:[#allocation160_spill] sm:$0xff]  ;;  %v11488_v51 = vld [vmem:[#allocation151_spill] sm:$0xff] }
 0x81e   : > { %6494 = vmatprep.subr.msk.mxu1 %vm494_vm6, %v2856_v41  ;;  %v2382_v4 = vsel %vm483_vm12, %v9577_v46, %v11477_v42  ;;  %6450 = vmatpush1.msk.msra.mxu0 %vm494_vm6, %v2849_v27  ;;  %v9944_v48 = vrot.slane %v4628_v55, %v7176_v62  ;;  %v2139_v13 = vsel %vm479_vm10, %v9530_v2, %v11479_v39  ;;  %v11481_v53 = vld [vmem:[#allocation168_spill] sm:$0xff]  ;;  %v9958_v0 = vpop.permute.xlu1 %6109  ;;  %v11482_v26 = vld [vmem:[#allocation133_spill] sm:$0xff]  ;;  %v11483_v55 = vld [vmem:[#allocation138_spill] sm:$0xff] }
 0x81f   : > { %6519 = vmatpush1.msk.msra.mxu1 %vm494_vm6, %v2849_v27  ;;  %v2609_v12 = vsel %vm483_vm12, %v2608_v38, %v11480_v50  ;;  %5419 = vrot.lane.b32.xlu1 %v9931_v43, %s6728_s20  ;;  %v2617_v46 = vsel %vm485_vm13, %v2616_v6, %v11481_v53  ;;  %v2140_v56 = vsel %vm481_vm11, %v2139_v13, %v11482_v26  ;;  %v11485_v25 = vld [vmem:[#allocation141_spill] sm:$0xff]  ;;  %v11491_v57 = vld [vmem:[#allocation78_spill] sm:$0xff]  ;;  %v11495_v39 = vld [vmem:[#allocation75_spill] sm:$0xff] }
 0x820   : > { %11478 = vst [vmem:[#allocation61_spill] sm:$0xff] %v9944_v48  ;;  %5387 = vrot.lane.b32.xlu0 %v5300_v5, %s6731_s24  ;;  %v2147_v2 = vsel %vm481_vm11, %v9550_v23, %v11483_v55  ;;  %v2610_v37 = vsel %vm485_vm13, %v2609_v12, %v11484_v24  ;;  %6451 = vmatprep.subr.msk.mxu0 %vm494_vm6, %v2617_v46  ;;  %v11489_v28 = vld [vmem:[#allocation117_spill] sm:$0xff]  ;;  %v11496_v50 = vld [vmem:[#allocation135_spill] sm:$0xff]  ;;  %v11497_v12 = vld [vmem:[#allocation116_spill] sm:$0xff] }
 0x821   : > { %6495 = vmatprep.subr.msk.mxu1 %vm494_vm6, %v2617_v46  ;;  %v2148_v38 = vsel %vm483_vm12, %v2147_v2, %v11485_v25  ;;  %v2375_v61 = vsel %vm483_vm12, %v2374_v8, %v11486_v54  ;;  %6452 = vmatpush1.msk.msra.mxu0 %vm494_vm6, %v2610_v37  ;;  %v2383_v23 = vsel %vm485_vm13, %v2382_v4, %v11487_v16  ;;  %v11490_v41 = vld [vmem:[#allocation125_spill] sm:$0xff]  ;;  %v11498_v26 = vld [vmem:[#allocation124_spill] sm:$0xff] }
 0x822   : > { %6520 = vmatpush1.msk.msra.mxu1 %vm494_vm6, %v2610_v37  ;;  %v2376_v11 = vsel %vm485_vm13, %v2375_v61, %v11488_v51  ;;  %6453 = vmatprep.subr.msk.mxu0 %vm494_vm6, %v2383_v23  ;;  %v5535_v6 = vcombine.high %v9794_v52, %v10966_v18  ;;  %v4660_v33 = vcombine.high %v9944_v48, %v10966_v18  ;;  %v9995_v5 = vpop.permute.xlu1 %5871  ;;  %v9997_v52 = vpop.permute.xlu0 %5839  ;;  %v11501_v61 = vld [vmem:[#allocation107_spill] sm:$0xff] }
 0x823   : > { %6496 = vmatprep.subr.msk.mxu1 %vm494_vm6, %v2383_v23  ;;  %v1906_v22 = vsel %vm481_vm11, %v9503_v59, %v11489_v28  ;;  %v1914_v35 = vsel %vm483_vm12, %v9526_v40, %v11490_v41  ;;  %v4795_v27 = vcombine.high %v9731_v32, %v9746_v7  ;;  %6454 = vmatpush1.msk.msra.mxu0 %vm494_vm6, %v2376_v11  ;;  %v11492_v59 = vld [vmem:[#allocation132_spill] sm:$0xff]  ;;  %v11494_v32 = vld [vmem:[#allocation106_spill] sm:$0xff]  ;;  %v11502_v51 = vld [vmem:[#allocation67_spill] sm:$0xff] }
 0x824   : > { %6521 = vmatpush1.msk.msra.mxu1 %vm494_vm6, %v2376_v11  ;;  %v1435_v8 = vsel %vm479_vm10, %v9437_v21, %v11491_v57  ;;  %v2141_v42 = vsel %vm483_vm12, %v2140_v56, %v11492_v59  ;;  %5629 = vrot.lane.b32.xlu0 %v5535_v6, %s6732_s25  ;;  %v11493_v7 = vld [vmem:[#allocation140_spill] sm:$0xff]  ;;  %v1428_v13 = vsel %vm479_vm10, %v9459_v49, %v11495_v39  ;;  %v11499_v56 = vld [vmem:[#allocation119_spill] sm:$0xff]  ;;  %v11504_v6 = vld [vmem:[#allocation54_spill] sm:$0xff] }
 0x825   : > { %4693 = vrot.lane.b32.xlu1 %v4660_v33, %s6729_s21  ;;  %v2149_v40 = vsel %vm485_vm13, %v2148_v38, %v11493_v7  ;;  %v1436_v4 = vsel %vm481_vm11, %v1435_v8, %v11494_v32  ;;  %v2142_v21 = vsel %vm485_vm13, %v2141_v42, %v11496_v50  ;;  %v1907_v53 = vsel %vm483_vm12, %v1906_v22, %v11497_v12  ;;  %v11500_v38 = vld [vmem:[#allocation71_spill] sm:$0xff]  ;;  %v11503_v11 = vld [vmem:[#allocation64_spill] sm:$0xff]  ;;  %v11505_v28 = vld [vmem:[#allocation97_spill] sm:$0xff] }
 0x826   : > { %6455 = vmatprep.subr.msk.mxu0 %vm494_vm6, %v2149_v40  ;;  %6497 = vmatprep.subr.msk.mxu1 %vm494_vm6, %v2149_v40  ;;  %v4528_v46 = vcombine.low %v9290_v60, %v9331_v63  ;;  %v1915_v49 = vsel %vm485_vm13, %v1914_v35, %v11498_v26  ;;  %v1908_v55 = vsel %vm485_vm13, %v1907_v53, %v11499_v56  ;;  %v10034_v37 = vpop.permute.xlu1 %6113  ;;  %v10036_v25 = vpop.permute.xlu0 %6081  ;;  %v11506_v22 = vld [vmem:[#allocation70_spill] sm:$0xff]  ;;  %v11507_v41 = vld [vmem:[#allocation59_spill] sm:$0xff]  ;;  %v11510_v59 = vld [vmem:[#allocation100_spill] sm:$0xff] }
 0x827   : > { %6456 = vmatpush1.msk.msra.mxu0 %vm494_vm6, %v2142_v21  ;;  %6522 = vmatpush1.msk.msra.mxu1 %vm494_vm6, %v2142_v21  ;;  %v10030_v2 = vrot.slane %v4795_v27, %v7176_v62  ;;  %v4895_v24 = vcombine.high %v9832_v30, %v10966_v18  ;;  %v1201_v54 = vsel %vm479_vm10, %v9415_v3, %v11500_v38  ;;  %v11508_v27 = vld [vmem:[#allocation79_spill] sm:$0xff]  ;;  %v11509_v8 = vld [vmem:[#allocation38_spill] sm:$0xff]  ;;  %v11511_v7 = vld [vmem:[#allocation108_spill] sm:$0xff] }
 0x828   : > { %6457 = vmatprep.subr.msk.mxu0 %vm494_vm6, %v1915_v49  ;;  %6498 = vmatprep.subr.msk.mxu1 %vm494_vm6, %v1915_v49  ;;  %v1429_v16 = vsel %vm481_vm11, %v1428_v13, %v11501_v61  ;;  %v4544_v23 = vcombine.low %v9260_v34, %v9307_v45  ;;  %v969_v30 = vsel %vm483_vm12, %v9387_v36, %v11502_v51  ;;  %v11512_v32 = vld [vmem:[#allocation77_spill] sm:$0xff]  ;;  %v11513_v13 = vld [vmem:[#allocation48_spill] sm:$0xff]  ;;  %v11520_v61 = vld [vmem:[#allocation262_spill] sm:$0xff] }
 0x829   : > { %6458 = vmatpush1.msk.msra.mxu0 %vm494_vm6, %v1908_v55  ;;  %6523 = vmatpush1.msk.msra.mxu1 %vm494_vm6, %v1908_v55  ;;  %v960_v33 = vsel %vm479_vm10, %v11504_v6, %v11503_v11  ;;  %v1202_v3 = vsel %vm481_vm11, %v1201_v54, %v11505_v28  ;;  %v1194_v35 = vsel %vm479_vm10, %v11507_v41, %v11506_v22  ;;  %v11514_v21 = vld [vmem:[#allocation92_spill] sm:$0xff]  ;;  %v11515_v53 = vld [vmem:[#allocation109_spill] sm:$0xff]  ;;  %v11521_v51 = vld [vmem:[#allocation99_spill] sm:$0xff] }
 0x82a   : > { %4903 = vrot.lane.b32.xlu0 %v10030_v2, %s6726_s19  ;;  %4935 = vrot.lane.b32.xlu1 %v4895_v24, %s6730_s23  ;;  %v1437_v57 = vsel %vm483_vm12, %v1436_v4, %v11508_v27  ;;  %v10064_v36 = vrot.slane %v4528_v46, %v6921_v31  ;;  %v1195_v42 = vsel %vm481_vm11, %v1194_v35, %v11510_v59  ;;  %v10080_v4 = vpop.permute.xlu1 %5843  ;;  %v10082_v50 = vpop.permute.xlu0 %5633  ;;  %v11516_v49 = vld [vmem:[#allocation73_spill] sm:$0xff]  ;;  %v11518_v24 = vld [vmem:[#allocation88_spill] sm:$0xff]  ;;  %v11525_v22 = vld [vmem:[#allocation66_spill] sm:$0xff] }
 0x82b   : > { %6459 = vmatprep.subr.msk.mxu0 %vm494_vm6, %v11509_v8  ;;  %6499 = vmatprep.subr.msk.mxu1 %vm494_vm6, %v11509_v8  ;;  %v1438_v40 = vsel %vm485_vm13, %v1437_v57, %v11511_v7  ;;  %v1430_v39 = vsel %vm483_vm12, %v1429_v16, %v11512_v32  ;;  %v961_v12 = vsel %vm481_vm11, %v960_v33, %v11514_v21  ;;  %v11517_v55 = vld [vmem:[#allocation93_spill] sm:$0xff]  ;;  %v11519_v54 = vld [vmem:[#allocation264_spill] sm:$0xff]  ;;  %v11526_v35 = vld [vmem:[#allocation102_spill] sm:$0xff] }
 0x82c   : > { %6460 = vmatpush1.msk.msra.mxu0 %vm494_vm6, %v11513_v13  ;;  %6524 = vmatpush1.msk.msra.mxu1 %vm494_vm6, %v11513_v13  ;;  %v1431_v46 = vsel %vm485_vm13, %v1430_v39, %v11515_v53  ;;  %v10089_v26 = vrot.slane %v4544_v23, %v6921_v31  ;;  %v1203_v56 = vsel %vm483_vm12, %v1202_v3, %v11516_v49  ;;  %v11522_v11 = vld [vmem:[#allocation72_spill] sm:$0xff]  ;;  %v11524_v3 = vld [vmem:[#allocation33_spill] sm:$0xff]  ;;  %v11527_v57 = vld [vmem:[#allocation263_spill] sm:$0xff] }
 0x82d   : > { %6461 = vmatprep.subr.msk.mxu0 %vm494_vm6, %v1438_v40  ;;  %6500 = vmatprep.subr.msk.mxu1 %vm494_vm6, %v1438_v40  ;;  %v5283_v38 = vcombine.high %v11518_v24, %v11517_v55  ;;  %v4831_v16 = vcombine.high %v11520_v61, %v11519_v54  ;;  %v1204_v23 = vsel %vm485_vm13, %v1203_v56, %v11521_v51  ;;  %v11523_v28 = vld [vmem:[#allocation36_spill] sm:$0xff]  ;;  %v11530_v32 = vld [vmem:[#allocation42_spill] sm:$0xff]  ;;  %v11531_v13 = vld [vmem:[#allocation91_spill] sm:$0xff] }
 0x82e   : > { %6462 = vmatpush1.msk.msra.mxu0 %vm494_vm6, %v1431_v46  ;;  %6525 = vmatpush1.msk.msra.mxu1 %vm494_vm6, %v1431_v46  ;;  %v1196_v6 = vsel %vm483_vm12, %v1195_v42, %v11522_v11  ;;  %v4560_v33 = vcombine.low %v10064_v36, %v10089_v26  ;;  %v962_v41 = vsel %vm483_vm12, %v961_v12, %v11525_v22  ;;  %v11528_v8 = vld [vmem:[#allocation260_spill] sm:$0xff]  ;;  %v10119_v42 = vpop.permute.xlu1 %6085  ;;  %v10121_v7 = vpop.permute.xlu0 %5875  ;;  %v11532_v12 = vld [vmem:[#allocation94_spill] sm:$0xff]  ;;  %v11533_v55 = vld [vmem:[#allocation249_spill] sm:$0xff] }
 0x82f   : > { %5149 = vrot.lane.b32.xlu0 %v11523_v28, %s6727_s15  ;;  %5181 = vrot.lane.b32.xlu1 %v11524_v3, %s6731_s24  ;;  %v1197_v27 = vsel %vm485_vm13, %v1196_v6, %v11526_v35  ;;  %v4847_v59 = vcombine.high %v11528_v8, %v11527_v57  ;;  %v11529_v40 = vld [vmem:[#allocation84_spill] sm:$0xff]  ;;  %v970_v21 = vsel %vm485_vm13, %v969_v30, %v11531_v13  ;;  %v11534_v24 = vld [vmem:[#allocation39_spill] sm:$0xff]  ;;  %v11537_v51 = vld [vmem:[#allocation85_spill] sm:$0xff] }
 0x830   : > { %6463 = vmatprep.subr.msk.mxu0 %vm494_vm6, %v1204_v23  ;;  %6501 = vmatprep.subr.msk.mxu1 %vm494_vm6, %v1204_v23  ;;  %v727_v39 = vsel %vm481_vm11, %v11530_v32, %v11529_v40  ;;  %v963_v53 = vsel %vm485_vm13, %v962_v41, %v11532_v12  ;;  %v10133_v46 = vrot.slane %v4831_v16, %v6921_v31  ;;  %v11536_v16 = vld [vmem:[#allocation83_spill] sm:$0xff]  ;;  %v11538_v23 = vld [vmem:[#allocation60_spill] sm:$0xff]  ;;  %v11541_v22 = vld [vmem:[#allocation86_spill] sm:$0xff] }
 0x831   : > { %6464 = vmatpush1.msk.msra.mxu0 %vm494_vm6, %v1197_v27  ;;  %6526 = vmatpush1.msk.msra.mxu1 %vm494_vm6, %v1197_v27  ;;  %v5297_v49 = vrot.slane %v5283_v38, %v7176_v62  ;;  %v5369_v56 = vcombine.high %v9931_v43, %v10966_v18  ;;  %v4629_v30 = vcombine.high %v9861_v9, %v9881_v19  ;;  %v11539_v6 = vld [vmem:[#allocation40_spill] sm:$0xff]  ;;  %v11542_v35 = vld [vmem:[#allocation41_spill] sm:$0xff]  ;;  %v11546_v32 = vld [vmem:[#allocation46_spill] sm:$0xff] }
 0x832   : > { %6465 = vmatprep.subr.msk.mxu0 %vm494_vm6, %v970_v21  ;;  %6502 = vmatprep.subr.msk.mxu1 %vm494_vm6, %v970_v21  ;;  %v4362_v54 = vcombine.low %v11534_v24, %v11533_v55  ;;  %v10147_v61 = vrot.slane %v4560_v33, %v7176_v62  ;;  %v736_v38 = vsel %vm485_vm13, %v11537_v51, %v11536_v16  ;;  %v10159_v9 = vpop.permute.xlu1 %5605  ;;  %v10161_v19 = vpop.permute.xlu0 %6117  ;;  %v11540_v33 = vld [vmem:[#allocation37_spill] sm:$0xff]  ;;  %v11543_v27 = vld [vmem:[#allocation80_spill] sm:$0xff] }
 0x833   : > { %6466 = vmatpush1.msk.msra.mxu0 %vm494_vm6, %v963_v53  ;;  %6527 = vmatpush1.msk.msra.mxu1 %vm494_vm6, %v963_v53  ;;  %v728_v43 = vsel %vm483_vm12, %v727_v39, %v11538_v23  ;;  %v10155_v11 = vrot.slane %v4847_v59, %v6921_v31  ;;  %v492_v3 = vsel %vm483_vm12, %v11540_v33, %v11539_v6  ;;  %v11544_v8 = vld [vmem:[#allocation45_spill] sm:$0xff]  ;;  %v11545_v59 = vld [vmem:[#allocation35_spill] sm:$0xff]  ;;  %v11547_v23 = vld [vmem:[#allocation268_spill] sm:$0xff] }
 0x834   : > { %11535 = vst [vmem:[#allocation58_spill] sm:$0xff] %v10147_v61  ;;  %5391 = vrot.lane.b32.xlu0 %v5297_v49, %s6728_s20  ;;  %5423 = vrot.lane.b32.xlu1 %v5369_v56, %s6732_s25  ;;  %v729_v41 = vsel %vm485_vm13, %v728_v43, %v11541_v22  ;;  %v4378_v57 = vcombine.low %v11543_v27, %v11542_v35  ;;  %v11548_v43 = vld [vmem:[#allocation267_spill] sm:$0xff]  ;;  %v11549_v22 = vld [vmem:[#allocation273_spill] sm:$0xff] }
 0x835   : > { %6467 = vmatprep.subr.msk.mxu0 %vm494_vm6, %v736_v38  ;;  %6503 = vmatprep.subr.msk.mxu1 %vm494_vm6, %v736_v38  ;;  %v486_v40 = vsel %vm485_vm13, %v11545_v59, %v11544_v8  ;;  %v493_v39 = vsel %vm485_vm13, %v492_v3, %v11546_v32  ;;  %v4878_v13 = vcombine.low %v10133_v46, %v10155_v11  ;;  %v11553_v32 = vld [vmem:[#allocation265_spill] sm:$0xff] }
 0x836   : > { %6468 = vmatpush1.msk.msra.mxu0 %vm494_vm6, %v729_v41  ;;  %6528 = vmatpush1.msk.msra.mxu1 %vm494_vm6, %v729_v41  ;;  %v10182_v21 = vrot.slane %v4362_v54, %v6921_v31  ;;  %v4643_v12 = vrot.slane %v4629_v30, %v7176_v62  ;;  %v4592_v53 = vcombine.high %v10147_v61, %v10966_v18  ;;  %v10191_v56 = vpop.permute.xlu1 %5847  ;;  %v10193_v16 = vpop.permute.xlu0 %5637  ;;  %v11550_v41 = vld [vmem:[#allocation266_spill] sm:$0xff] }
 0x837   : > { %6469 = vmatprep.subr.msk.mxu0 %vm494_vm6, %v493_v39  ;;  %6504 = vmatprep.subr.msk.mxu1 %vm494_vm6, %v493_v39  ;;  %v10196_v54 = vrot.slane %v4378_v57, %v6921_v31  ;;  %v4886_v51 = vrot.slane %v4878_v13, %v7176_v62  ;;  %v4827_v38 = vcombine.high %v10030_v2, %v10966_v18 }
 0x838   : > { %6470 = vmatpush1.msk.msra.mxu0 %vm494_vm6, %v486_v40  ;;  %6529 = vmatpush1.msk.msra.mxu1 %vm494_vm6, %v486_v40  ;;  %v5117_v6 = vcombine.high %v11548_v43, %v11547_v23  ;;  %v4763_v57 = vcombine.high %v11550_v41, %v11549_v22  ;;  %v5066_v59 = vcombine.high %v11523_v28, %v10966_v18  ;;  %v11552_v40 = vld [vmem:[#allocation269_spill] sm:$0xff]  ;;  %v11555_v28 = vld [vmem:[#allocation63_spill] sm:$0xff] }
 0x839   : > { %4697 = vrot.lane.b32.xlu1 %v4643_v12, %s6726_s19  ;;  %4665 = vrot.lane.b32.xlu0 %v4592_v53, %s6729_s21  ;;  %v4394_v30 = vcombine.low %v10182_v21, %v10196_v54  ;;  %v4779_v39 = vcombine.high %v11553_v32, %v11552_v40  ;;  %v4561_v23 = vcombine.high %v10064_v36, %v10089_v26  ;;  %v11556_v43 = vld [vmem:[#allocation81_spill] sm:$0xff]  ;;  %v11559_v32 = vld [vmem:[#allocation51_spill] sm:$0xff] }
 0x83a   : > { %v10207_v33 = vpop.permute.xlu1 %6089  ;;  %v10209_v3 = vpop.permute.xlu0 %5879  ;;  %v5131_v8 = vrot.slane %v5117_v6, %v7176_v62  ;;  %v5301_v6 = vcombine.high %v5297_v49, %v10966_v18  ;;  %v11560_v49 = vld [vmem:[#allocation244_spill] sm:$0xff]  ;;  %v4661_v48 = vcombine.high %v4643_v12, %v10966_v18  ;;  %v4896_v12 = vcombine.high %v4886_v51, %v10966_v18 }
 0x83b   : > { %v10219_v2 = vrot.slane %v4394_v30, %v7176_v62  ;;  %v4294_v30 = vcombine.low %v11556_v43, %v11555_v28  ;;  %v10238_v41 = vrot.slane %v4779_v39, %v6921_v31  ;;  %v6135_v39 = vsel %vm473_vm7, %v11560_v49, %v9827_v10 }
 0x83d   : > { %4939 = vrot.lane.b32.xlu1 %v4886_v51, %s6727_s15  ;;  %4907 = vrot.lane.b32.xlu0 %v4827_v38, %s6730_s23  ;;  %11551 = vst [vmem:[#allocation65_spill] sm:$0xff] %v10219_v2  ;;  %v10228_v38 = vrot.slane %v4763_v57, %v6921_v31  ;;  %v4426_v22 = vcombine.high %v10219_v2, %v10966_v18  ;;  %v11558_v57 = vld [vmem:[#allocation57_spill] sm:$0xff] }
 0x83e   : > { %v10223_v13 = vpop.permute.xlu1 %5399  ;;  %v6122_v53 = vpop.permute.xlu0 %6121  ;;  %v4310_v61 = vcombine.low %v11559_v32, %v11558_v57  ;;  %v10251_v26 = vrot.slane %v4294_v30, %v6921_v31  ;;  %v4575_v2 = vrot.slane %v4561_v23, %v7176_v62  ;;  %v11562_v23 = vld [vmem:[#allocation272_spill] sm:$0xff]  ;;  %v4613_v51 = vcombine.high %v9173_v44, %v9218_v1 }
 0x83f   : > { %11554 = vst [vmem:[#allocation62_spill] sm:$0xff] %v10223_v13  ;;  %v4810_v36 = vcombine.low %v10228_v38, %v10238_v41  ;;  %v6136_v13 = vsel %vm475_vm8, %v6135_v39, %v9892_v58  ;;  %v11561_v58 = vld [vmem:[#allocation34_spill] sm:$0xff]  ;;  %v4597_v39 = vcombine.high %v9202_v17, %v9246_v14  ;;  %v5135_v14 = vcombine.high %v5131_v8, %v10966_v18  ;;  %v11563_v1 = vld [vmem:[#allocation248_spill] sm:$0xff] }
 0x840   : > { %v10265_v15 = vrot.slane %v4310_v61, %v6921_v31  ;;  %v6137_v30 = vsel %vm477_vm9, %v6136_v13, %v9958_v0  ;;  %v5049_v49 = vcombine.high %v11562_v23, %v11561_v58  ;;  %v4395_v44 = vcombine.high %v10182_v21, %v10196_v54  ;;  %v11568_v58 = vld [vmem:[#allocation250_spill] sm:$0xff] }
 0x841   : > { %5185 = vrot.lane.b32.xlu1 %v5131_v8, %s6728_s20  ;;  %5153 = vrot.lane.b32.xlu0 %v5066_v59, %s6731_s24  ;;  %v6138_v10 = vsel %vm479_vm10, %v6137_v30, %v10034_v37  ;;  %v4818_v13 = vrot.slane %v4810_v36, %v7176_v62  ;;  %v11569_v23 = vld [vmem:[#allocation82_spill] sm:$0xff] }
 0x842   : > { %v10240_v40 = vpop.permute.xlu1 %5641  ;;  %v10242_v59 = vpop.permute.xlu0 %5609  ;;  %v4326_v61 = vcombine.low %v10251_v26, %v10265_v15  ;;  %v6139_v0 = vsel %vm481_vm11, %v6138_v10, %v10161_v19  ;;  %v5063_v30 = vrot.slane %v5049_v49, %v7176_v62  ;;  %v10294_v19 = vrot.slane %v4597_v39, %v6921_v31 }
 0x843   : > { %11557 = vst [vmem:[#allocation96_spill] sm:$0xff] %v10242_v59  ;;  %v4144_v49 = vcombine.low %v11569_v23, %v11568_v58  ;;  %v4409_v39 = vrot.slane %v4395_v44, %v7176_v62  ;;  %v11571_v44 = vld [vmem:[#allocation245_spill] sm:$0xff] }
 0x844   : > { %v10301_v10 = vrot.slane %v4326_v61, %v7176_v62 }
 0x845   : > { %5395 = vrot.lane.b32.xlu0 %v5301_v6, %s6732_s25  ;;  %4459 = vrot.lane.b32.xlu1 %v4426_v22, %s6729_s21 }
 0x846   : > { %v10260_v6 = vpop.permute.xlu1 %5883  ;;  %v10262_v22 = vpop.permute.xlu0 %5851  ;;  %11565 = vst [vmem:[#allocation49_spill] sm:$0xff] %v10301_v10  ;;  %v4358_v61 = vcombine.high %v10301_v10, %v10966_v18 }
 0x849   : > { %4669 = vrot.lane.b32.xlu0 %v4575_v2, %s6726_s19  ;;  %4701 = vrot.lane.b32.xlu1 %v4661_v48, %s6730_s23  ;;  %v6140_v48 = vsel %vm483_vm12, %v6139_v0, %v6122_v53  ;;  %v11564_v53 = vld [vmem:[#allocation87_spill] sm:$0xff] }
 0x84a   : > { %v6126_v59 = vpop.permute.xlu1 %6125  ;;  %v6094_v37 = vpop.permute.xlu0 %6093  ;;  %v4128_v36 = vcombine.low %v11564_v53, %v11563_v1 }
 0x84b   : > { %v6141_v17 = vsel %vm485_vm13, %v6140_v48, %v6126_v59 }
 0x84c   : > { %6471 = vmatprep.subr.msk.mxu0 %vm494_vm6, %v6141_v17  ;;  %6505 = vmatprep.subr.msk.mxu1 %vm494_vm6, %v6141_v17  ;;  %v10317_v54 = vrot.slane %v4128_v36, %v6921_v31  ;;  %v4879_v17 = vcombine.high %v10133_v46, %v10155_v11  ;;  %v6128_v36 = vsel %vm473_vm7, %v11571_v44, %v9869_v20 }
 0x84d   : > { %4943 = vrot.lane.b32.xlu1 %v4896_v12, %s6731_s24  ;;  %4911 = vrot.lane.b32.xlu0 %v4818_v13, %s6727_s15  ;;  %v10308_v12 = vrot.slane %v4613_v51, %v6921_v31  ;;  %v10327_v51 = vrot.slane %v4144_v49, %v6921_v31  ;;  %v6129_v49 = vsel %vm475_vm8, %v6128_v36, %v9951_v47 }
 0x84e   : > { %v10303_v59 = vpop.permute.xlu1 %5403  ;;  %v10305_v8 = vpop.permute.xlu0 %5371  ;;  %v6130_v46 = vsel %vm477_vm9, %v6129_v49, %v10036_v25  ;;  %v4529_v20 = vcombine.high %v9290_v60, %v9331_v63  ;;  %v4893_v47 = vrot.slane %v4879_v17, %v7176_v62  ;;  %v4545_v25 = vcombine.high %v9260_v34, %v9307_v45  ;;  %v11572_v45 = vld [vmem:[#allocation47_spill] sm:$0xff] }
 0x84f   : > { %11566 = vst [vmem:[#allocation89_spill] sm:$0xff] %v10303_v59  ;;  %11567 = vst [vmem:[#allocation69_spill] sm:$0xff] %v10305_v8  ;;  %v4644_v21 = vcombine.low %v10294_v19, %v10308_v12  ;;  %v4593_v8 = vcombine.high %v4575_v2, %v10966_v18  ;;  %v6131_v11 = vsel %vm479_vm10, %v6130_v46, %v10119_v42  ;;  %v11574_v46 = vld [vmem:[#allocation43_spill] sm:$0xff] }
 0x850   : > { %v6132_v2 = vsel %vm481_vm11, %v6131_v11, %v10207_v33  ;;  %v10368_v42 = vrot.slane %v4529_v20, %v6921_v31  ;;  %v4327_v34 = vcombine.high %v10251_v26, %v10265_v15  ;;  %v11573_v33 = vld [vmem:[#allocation50_spill] sm:$0xff]  ;;  %v5067_v17 = vcombine.high %v5063_v30, %v10966_v18  ;;  %v11575_v20 = vld [vmem:[#allocation44_spill] sm:$0xff] }
 0x851   : > { %5189 = vrot.lane.b32.xlu1 %v5135_v14, %s6732_s25  ;;  %5157 = vrot.lane.b32.xlu0 %v5063_v30, %s6728_s20  ;;  %v4160_v14 = vcombine.low %v10317_v54, %v10327_v51  ;;  %v4652_v10 = vrot.slane %v4644_v21, %v7176_v62  ;;  %v4828_v21 = vcombine.high %v4818_v13, %v10966_v18  ;;  %v11576_v30 = vld [vmem:[#allocation246_spill] sm:$0xff] }
 0x852   : > { %v10322_v0 = vpop.permute.xlu1 %5645  ;;  %v10324_v48 = vpop.permute.xlu0 %5613  ;;  %v4060_v13 = vcombine.low %v11573_v33, %v11572_v45  ;;  %v4076_v11 = vcombine.low %v11575_v20, %v11574_v46 }
 0x853   : > { %11570 = vst [vmem:[#allocation101_spill] sm:$0xff] %v10324_v48 }
 0x854   : > { %v10393_v26 = vrot.slane %v4060_v13, %v6921_v31 }
 0x855   : > { %4463 = vrot.lane.b32.xlu1 %v4409_v39, %s6726_s19  ;;  %4431 = vrot.lane.b32.xlu0 %v4358_v61, %s6729_s21  ;;  %v10357_v61 = vrot.slane %v4160_v14, %v7176_v62  ;;  %v10380_v14 = vrot.slane %v4545_v25, %v6921_v31  ;;  %v4341_v25 = vrot.slane %v4327_v34, %v7176_v62 }
 0x856   : > { %v5888_v59 = vpop.permute.xlu1 %5887  ;;  %v10342_v48 = vpop.permute.xlu0 %5855  ;;  %v4363_v34 = vcombine.high %v11534_v24, %v11533_v55  ;;  %v4897_v24 = vcombine.high %v4893_v47, %v10966_v18 }
 0x857   : > { %v4576_v15 = vcombine.low %v10368_v42, %v10380_v14 }
 0x859   : > { %4705 = vrot.lane.b32.xlu1 %v4652_v10, %s6727_s15  ;;  %4673 = vrot.lane.b32.xlu0 %v4593_v8, %s6730_s23  ;;  %v6133_v8 = vsel %vm483_vm12, %v6132_v2, %v6094_v37  ;;  %v4192_v37 = vcombine.high %v10357_v61, %v10966_v18  ;;  %v5901_v2 = vsel %vm473_vm7, %v11576_v30, %v9916_v29 }
 0x85a   : > { %v10362_v44 = vpop.permute.xlu1 %5165  ;;  %v6098_v60 = vpop.permute.xlu0 %6097  ;;  %v4811_v29 = vcombine.high %v10228_v38, %v10238_v41  ;;  %v10435_v41 = vrot.slane %v4363_v34, %v6921_v31 }
 0x85b   : > { %v6134_v63 = vsel %vm485_vm13, %v6133_v8, %v6098_v60  ;;  %v5902_v8 = vsel %vm475_vm8, %v5901_v2, %v9995_v5 }
 0x85c   : > { %6472 = vmatpush2.msk.msra.mxu0 %vm494_vm6, %v6134_v63  ;;  %6530 = vmatpush2.msk.msra.mxu1 %vm494_vm6, %v6134_v63  ;;  %v5903_v13 = vsel %vm477_vm9, %v5902_v8, %v10121_v7 }
 0x85d   : > { %4947 = vrot.lane.b32.xlu1 %v4893_v47, %s6728_s20  ;;  %4915 = vrot.lane.b32.xlu0 %v4828_v21, %s6731_s24  ;;  %v4427_v21 = vcombine.high %v4409_v39, %v10966_v18  ;;  %v5904_v5 = vsel %vm479_vm10, %v5903_v13, %v10209_v3  ;;  %v4662_v39 = vcombine.high %v4652_v10, %v10966_v18 }
 0x85e   : > { %v10382_v36 = vpop.permute.xlu1 %5407  ;;  %v10384_v49 = vpop.permute.xlu0 %5375  ;;  %v5905_v7 = vsel %vm481_vm11, %v5904_v5, %v10260_v6  ;;  %v4379_v3 = vcombine.high %v11543_v27, %v11542_v35  ;;  %v4161_v6 = vcombine.high %v10317_v54, %v10327_v51  ;;  %v4825_v35 = vrot.slane %v4811_v29, %v7176_v62  ;;  %v11577_v5 = vld [vmem:[#allocation247_spill] sm:$0xff] }
 0x85f   : > { %v5906_v30 = vsel %vm483_vm12, %v5905_v7, %v5888_v59  ;;  %v4645_v13 = vcombine.high %v10294_v19, %v10308_v12  ;;  %v4295_v29 = vcombine.high %v11556_v43, %v11555_v28  ;;  %v4311_v19 = vcombine.high %v11559_v32, %v11558_v57 }
 0x861   : > { %4225 = vrot.lane.b32.xlu1 %v4192_v37, %s6729_s21  ;;  %5161 = vrot.lane.b32.xlu0 %v5067_v17, %s6732_s25  ;;  %v10407_v37 = vrot.slane %v4076_v11, %v6921_v31  ;;  %v4584_v11 = vrot.slane %v4576_v15, %v7176_v62  ;;  %v10444_v15 = vrot.slane %v4379_v3, %v6921_v31 }
 0x862   : > { %v10402_v60 = vpop.permute.xlu1 %5649  ;;  %v10404_v63 = vpop.permute.xlu0 %5617  ;;  %v4659_v43 = vrot.slane %v4645_v13, %v7176_v62 }
 0x863   : > { %v4092_v17 = vcombine.low %v10393_v26, %v10407_v37  ;;  %v4410_v47 = vcombine.low %v10435_v41, %v10444_v15  ;;  %v4093_v12 = vcombine.high %v10393_v26, %v10407_v37  ;;  %v11578_v26 = vld [vmem:[#allocation270_spill] sm:$0xff] }
 0x864   : > { %v5199_v37 = vsel %vm473_vm7, %v11578_v26, %v10362_v44 }
 0x865   : > { %4467 = vrot.lane.b32.xlu1 %v4427_v21, %s6730_s23  ;;  %4435 = vrot.lane.b32.xlu0 %v4341_v25, %s6726_s19  ;;  %v10441_v27 = vrot.slane %v4092_v17, %v7176_v62  ;;  %v4175_v21 = vrot.slane %v4161_v6, %v7176_v62  ;;  %v4418_v34 = vrot.slane %v4410_v47, %v7176_v62  ;;  %v11579_v6 = vld [vmem:[#allocation271_spill] sm:$0xff] }
 0x866   : > { %v5892_v2 = vpop.permute.xlu1 %5891  ;;  %v5860_v38 = vpop.permute.xlu0 %5859  ;;  %v4359_v17 = vcombine.high %v4341_v25, %v10966_v18 }
 0x867   : > { %v5907_v55 = vsel %vm485_vm13, %v5906_v30, %v5892_v2  ;;  %v4124_v54 = vcombine.high %v10441_v27, %v10966_v18 }
 0x868   : > { %6473 = vmatprep.subr.msk.mxu0 %vm494_vm6, %v5907_v55  ;;  %6506 = vmatprep.subr.msk.mxu1 %vm494_vm6, %v5907_v55  ;;  %v10491_v55 = vrot.slane %v4311_v19, %v6921_v31 }
 0x869   : > { %4709 = vrot.lane.b32.xlu1 %v4662_v39, %s6731_s24  ;;  %4677 = vrot.lane.b32.xlu0 %v4584_v11, %s6727_s15  ;;  %v5894_v39 = vsel %vm473_vm7, %v11577_v5, %v9997_v52 }
 0x86a   : > { %v5170_v10 = vpop.permute.xlu1 %5169  ;;  %v5138_v59 = vpop.permute.xlu0 %5137  ;;  %v5895_v7 = vsel %vm475_vm8, %v5894_v39, %v10080_v4  ;;  %v10482_v4 = vrot.slane %v4295_v29, %v6921_v31 }
 0x86b   : > { %v5896_v28 = vsel %vm477_vm9, %v5895_v7, %v10191_v56  ;;  %v4594_v56 = vcombine.high %v4584_v11, %v10966_v18  ;;  %v4107_v11 = vrot.slane %v4093_v12, %v7176_v62  ;;  %v5192_v47 = vsel %vm473_vm7, %v11579_v6, %v5138_v59  ;;  %v11580_v59 = vld [vmem:[#allocation251_spill] sm:$0xff] }
 0x86c   : > { %v5897_v52 = vsel %vm479_vm10, %v5896_v28, %v10262_v22  ;;  %v5667_v5 = vsel %vm473_vm7, %v11580_v59, %v10082_v50  ;;  %v4663_v12 = vcombine.high %v4659_v43, %v10966_v18  ;;  %v4343_v6 = vcombine.high %v10482_v4, %v10491_v55 }
 0x86d   : > { %4951 = vrot.lane.b32.xlu1 %v4897_v24, %s6732_s25  ;;  %4919 = vrot.lane.b32.xlu0 %v4825_v35, %s6728_s20  ;;  %v5898_v57 = vsel %vm481_vm11, %v5897_v52, %v10342_v48  ;;  %v4342_v48 = vcombine.low %v10482_v4, %v10491_v55  ;;  %v5200_v24 = vsel %vm475_vm8, %v5199_v37, %v5170_v10 }
 0x86e   : > { %v10453_v51 = vpop.permute.xlu1 %5411  ;;  %v10455_v8 = vpop.permute.xlu0 %5379  ;;  %v5899_v32 = vsel %vm483_vm12, %v5898_v57, %v5860_v38  ;;  %v4829_v38 = vcombine.high %v4825_v35, %v10966_v18  ;;  %v4577_v35 = vcombine.high %v10368_v42, %v10380_v14  ;;  %v4129_v10 = vcombine.high %v11564_v53, %v11563_v1  ;;  %v11581_v57 = vld [vmem:[#allocation56_spill] sm:$0xff] }
 0x86f   : > { %v4350_v39 = vrot.slane %v4342_v48, %v7176_v62  ;;  %v5668_v7 = vsel %vm475_vm8, %v5667_v5, %v10193_v16  ;;  %v4145_v42 = vcombine.high %v11569_v23, %v11568_v58  ;;  %v4428_v58 = vcombine.high %v4418_v34, %v10966_v18 }
 0x870   : > { %v5669_v1 = vsel %vm477_vm9, %v5668_v7, %v10240_v40  ;;  %v10540_v53 = vrot.slane %v4129_v10, %v6921_v31  ;;  %v4591_v14 = vrot.slane %v4577_v35, %v7176_v62  ;;  %v11584_v10 = vld [vmem:[#allocation101_spill] sm:$0xff] }
 0x871   : > { %4229 = vrot.lane.b32.xlu1 %v4175_v21, %s6726_s19  ;;  %4197 = vrot.lane.b32.xlu0 %v4124_v54, %s6729_s21  ;;  %v5670_v50 = vsel %vm479_vm10, %v5669_v1, %v10322_v0  ;;  %v4159_v52 = vrot.slane %v4145_v42, %v6921_v31 }
 0x872   : > { %v5654_v30 = vpop.permute.xlu1 %5653  ;;  %v10470_v2 = vpop.permute.xlu0 %5621  ;;  %v5671_v16 = vsel %vm481_vm11, %v5670_v50, %v10402_v60 }
 0x873   : > { %v5672_v23 = vsel %vm483_vm12, %v5671_v16, %v5654_v30  ;;  %v4176_v60 = vcombine.low %v10540_v53, %v4159_v52  ;;  %v4125_v30 = vcombine.high %v4107_v11, %v10966_v18  ;;  %v4177_v4 = vcombine.high %v10540_v53, %v4159_v52 }
 0x875   : > { %4471 = vrot.lane.b32.xlu1 %v4418_v34, %s6727_s15  ;;  %4439 = vrot.lane.b32.xlu0 %v4359_v17, %s6730_s23  ;;  %v4193_v17 = vcombine.high %v4175_v21, %v10966_v18  ;;  %v4061_v34 = vcombine.high %v11573_v33, %v11572_v45  ;;  %v4411_v45 = vcombine.high %v10435_v41, %v10444_v15  ;;  %v11582_v15 = vld [vmem:[#allocation255_spill] sm:$0xff] }
 0x876   : > { %v4928_v25 = vpop.permute.xlu1 %4927  ;;  %v5864_v3 = vpop.permute.xlu0 %5863  ;;  %v4191_v53 = vrot.slane %v4177_v4, %v7176_v62 }
 0x877   : > { %v5900_v22 = vsel %vm485_vm13, %v5899_v32, %v5864_v3  ;;  %v4075_v33 = vrot.slane %v4061_v34, %v6921_v31  ;;  %v4425_v41 = vrot.slane %v4411_v45, %v7176_v62  ;;  %v11586_v34 = vld [vmem:[#allocation62_spill] sm:$0xff] }
 0x878   : > { %6474 = vmatpush2.msk.msra.mxu0 %vm494_vm6, %v5900_v22  ;;  %6531 = vmatpush2.msk.msra.mxu1 %vm494_vm6, %v5900_v22  ;;  %v4077_v22 = vcombine.high %v11575_v20, %v11574_v46  ;;  %v4195_v45 = vcombine.high %v4191_v53, %v10966_v18 }
 0x879   : > { %4713 = vrot.lane.b32.xlu1 %v4659_v43, %s6728_s20  ;;  %4681 = vrot.lane.b32.xlu0 %v4594_v56, %s6731_s24  ;;  %v4961_v56 = vsel %vm473_vm7, %v11581_v57, %v4928_v25  ;;  %v4360_v43 = vcombine.high %v4350_v39, %v10966_v18  ;;  %v4184_v25 = vrot.slane %v4176_v60, %v7176_v62  ;;  %v6733_v60 = vmov 0  }
 0x87a   : > { %v5174_v54 = vpop.permute.xlu1 %5173  ;;  %v5142_v13 = vpop.permute.xlu0 %5141  ;;  %v4091_v26 = vrot.slane %v4077_v22, %v6921_v31  ;;  %v5660_v31 = vsel %vm473_vm7, %v11582_v15, %v10159_v9  ;;  %6611 = vset.pattern.permute.xlu1 %v6733_v60  ;;  %6610 = vset.pattern.permute.xlu0 %v6733_v60 }
 0x87b   : > { %v10511_v29 = vsel %vm477_vm9, %v5200_v24, %v5174_v54  ;;  %v10514_v44 = vsel %vm475_vm8, %v5192_v47, %v5142_v13  ;;  %v11583_v47 = vld [vmem:[#allocation96_spill] sm:$0xff]  ;;  %v4194_v13 = vcombine.high %v4184_v25, %v10966_v18 }
 0x87c   : > { %v4108_v37 = vcombine.low %v4075_v33, %v4091_v26  ;;  %v5661_v54 = vsel %vm475_vm8, %v5660_v31, %v11583_v47  ;;  %v4109_v50 = vcombine.high %v4075_v33, %v4091_v26 }
 0x87d   : > { %4201 = vrot.lane.b32.xlu1 %v4107_v11, %s6726_s19  ;;  %4923 = vrot.lane.b32.xlu0 %v4829_v38, %s6732_s25  ;;  %v4595_v11 = vcombine.high %v4591_v14, %v10966_v18  ;;  %v5662_v59 = vsel %vm477_vm9, %v5661_v54, %v11584_v10  ;;  %v11590_v54 = vld [vmem:[#allocation69_spill] sm:$0xff] }
 0x87e   : > { %v10529_v28 = vpop.permute.xlu0 %5383  ;;  %v4116_v35 = vrot.slane %v4108_v37, %v7176_v62  ;;  %v5663_v5 = vsel %vm479_vm10, %v5662_v59, %v10404_v63  ;;  %v6147_v63 = vld [vmem:[#allocation6 + $0x8] sm:$0xff]  ;;  %v4123_v52 = vrot.slane %v4109_v50, %v7176_v62 }
 0x87f   : > { %v10527_v19 = vpop.permute.xlu1 %5415  ;;  %v5664_v9 = vsel %vm481_vm11, %v5663_v5, %v10470_v2  ;;  %v6149_v2 = vld [vmem:[#allocation6 + $0x18] sm:$0xff]  ;;  %6433 = vmatprep.mubr.msk.f32.mxu0 %vm6220_vm14, %v6147_v63 }
 0x880   : > { %v4126_v16 = vcombine.high %v4116_v35, %v10966_v18  ;;  %6434 = vmatprep.mubr.msk.f32.mxu1 %vm6220_vm14, %v6149_v2  ;;  %v4127_v22 = vcombine.high %v4123_v52, %v10966_v18 }
 0x881   : > { %4443 = vrot.lane.b32.xlu1 %v4350_v39, %s6727_s15  ;;  %4233 = vrot.lane.b32.xlu0 %v4193_v17, %s6730_s23  ;;  %v4429_v39 = vcombine.high %v4425_v41, %v10966_v18  ;;  %v4357_v17 = vrot.slane %v4343_v6, %v7176_v62 }
 0x882   : > { %v5626_v21 = vpop.permute.xlu0 %5625 }
 0x883   : > { %v5665_v55 = vsel %vm483_vm12, %v5664_v9, %v5626_v21 }
 0x884   : > { %v5658_v40 = vpop.permute.xlu1 %5657 }
 0x885   : > { %4685 = vrot.lane.b32.xlu1 %v4591_v14, %s6728_s20  ;;  %4475 = vrot.lane.b32.xlu0 %v4428_v58, %s6731_s24  ;;  %v5673_v0 = vsel %vm485_vm13, %v5672_v23, %v5658_v40  ;;  %v11585_v14 = vld [vmem:[#allocation55_spill] sm:$0xff] }
 0x886   : > { %6475 = vmatprep.subr.msk.mxu0 %vm494_vm6, %v5673_v0  ;;  %6507 = vmatprep.subr.msk.mxu1 %vm494_vm6, %v5673_v0  ;;  %v4361_v0 = vcombine.high %v4357_v17, %v10966_v18  ;;  %v6202_v18 = vld [vmem:[%s10810_s2] sm:$0xff] }
 0x887   : > { %v4900_v3 = vpop.permute.xlu0 %4899 }
 0x888   : > { %v4932_v32 = vpop.permute.xlu1 %4931  ;;  %v4954_v58 = vsel %vm473_vm7, %v11585_v14, %v4900_v3 }
 0x889   : > { %4205 = vrot.lane.b32.xlu1 %v4125_v30, %s6730_s23  ;;  %4717 = vrot.lane.b32.xlu0 %v4663_v12, %s6732_s25  ;;  %v10565_v48 = vsel %vm475_vm8, %v4961_v56, %v4932_v32  ;;  %v11587_v30 = vld [vmem:[#allocation261_spill] sm:$0xff] }
 0x88a   : > { %v5433_v12 = vsel %vm473_vm7, %v11587_v30, %v11586_v34  ;;  %v11588_v32 = vld [vmem:[#allocation89_spill] sm:$0xff] }
 0x88b   : > { %v5434_v3 = vsel %vm475_vm8, %v5433_v12, %v11588_v32 }
 0x88c   : > { %v10575_v46 = vpop.permute.xlu1 %5177  ;;  %v5435_v62 = vsel %vm477_vm9, %v5434_v3, %v10382_v36  ;;  %v6203_v36 = vld [vmem:[%s10810_s2 + $0x8] sm:$0xff] }
 0x88d   : > { %4447 = vrot.lane.b32.xlu1 %v4360_v43, %s6731_s24  ;;  %4237 = vrot.lane.b32.xlu0 %v4184_v25, %s6727_s15  ;;  %v10577_v20 = vpop.permute.xlu0 %5145  ;;  %v5436_v33 = vsel %vm479_vm10, %v5435_v62, %v10453_v51  ;;  %v5202_v50 = vsel %vm479_vm10, %v10511_v29, %v10575_v46 }
 0x88e   : > { %v5437_v43 = vsel %vm481_vm11, %v5436_v33, %v10527_v19  ;;  %v6204_v19 = vld [vmem:[%s10810_s2 + $0x10] sm:$0xff]  ;;  %v5194_v46 = vsel %vm477_vm9, %v10514_v44, %v10577_v20 }
 0x891   : > { %4689 = vrot.lane.b32.xlu1 %v4595_v11, %s6732_s25  ;;  %4479 = vrot.lane.b32.xlu0 %v4425_v41, %s6728_s20  ;;  %v5420_v38 = vpop.permute.xlu1 %5419  ;;  %v11589_v11 = vld [vmem:[#allocation61_spill] sm:$0xff] }
 0x892   : > { %v10586_v24 = vpop.permute.xlu0 %5387  ;;  %v5438_v25 = vsel %vm483_vm12, %v5437_v43, %v5420_v38 }
 0x895   : > { %4241 = vrot.lane.b32.xlu1 %v4194_v13, %s6731_s24  ;;  %4209 = vrot.lane.b32.xlu0 %v4116_v35, %s6727_s15  ;;  %v11591_v13 = vld [vmem:[#allocation32_spill] sm:$0xff] }
 0x896   : > { %v5630_v42 = vpop.permute.xlu0 %5629  ;;  %v5426_v35 = vsel %vm473_vm7, %v11591_v13, %v11590_v54 }
 0x897   : > { %v4694_v7 = vpop.permute.xlu1 %4693  ;;  %v5666_v1 = vsel %vm485_vm13, %v5665_v55, %v5630_v42  ;;  %v5427_v10 = vsel %vm475_vm8, %v5426_v35, %v10384_v49  ;;  %v11592_v49 = vld [vmem:[#allocation58_spill] sm:$0xff] }
 0x898   : > { %6476 = vmatpush2.msk.msra.mxu0 %vm494_vm6, %v5666_v1  ;;  %6532 = vmatpush2.msk.msra.mxu1 %vm494_vm6, %v5666_v1  ;;  %v4727_v41 = vsel %vm473_vm7, %v11589_v11, %v4694_v7  ;;  %v5428_v9 = vsel %vm477_vm9, %v5427_v10, %v10455_v8 }
 0x899   : > { %4483 = vrot.lane.b32.xlu1 %v4429_v39, %s6732_s25  ;;  %4451 = vrot.lane.b32.xlu0 %v4357_v17, %s6728_s20  ;;  %v5429_v4 = vsel %vm479_vm10, %v5428_v9, %v10529_v28 }
 0x89a   : > { %v5430_v55 = vsel %vm481_vm11, %v5429_v4, %v10586_v24 }
 0x89c   : > { %v10617_v23 = vpop.permute.xlu1 %4935  ;;  %v4904_v40 = vpop.permute.xlu0 %4903 }
 0x89d   : > { %4245 = vrot.lane.b32.xlu1 %v4191_v53, %s6728_s20  ;;  %4213 = vrot.lane.b32.xlu0 %v4126_v16, %s6731_s24  ;;  %v10622_v21 = vsel %vm475_vm8, %v4954_v58, %v4904_v40  ;;  %v4963_v20 = vsel %vm477_vm9, %v10565_v48, %v10617_v23 }
 0x8a1   : > { %4217 = vrot.lane.b32.xlu1 %v4123_v52, %s6728_s20  ;;  %4455 = vrot.lane.b32.xlu0 %v4361_v0, %s6732_s25  ;;  %v5182_v57 = vpop.permute.xlu1 %5181  ;;  %v5150_v56 = vpop.permute.xlu0 %5149 }
 0x8a2   : > { %v5203_v53 = vsel %vm481_vm11, %v5202_v50, %v5182_v57  ;;  %v5195_v12 = vsel %vm479_vm10, %v5194_v46, %v5150_v56 }
 0x8a5   : > { %4221 = vrot.lane.b32.xlu1 %v4127_v22, %s6732_s25  ;;  %4249 = vrot.lane.b32.xlu0 %v4195_v45, %s6732_s25 }
 0x8a6   : > { %v5424_v26 = vpop.permute.xlu1 %5423  ;;  %v5392_v37 = vpop.permute.xlu0 %5391 }
 0x8a7   : > { %v5439_v51 = vsel %vm485_vm13, %v5438_v25, %v5424_v26  ;;  %v5431_v39 = vsel %vm483_vm12, %v5430_v55, %v5392_v37 }
 0x8a8   : > { %6477 = vmatprep.subr.msk.mxu0 %vm494_vm6, %v5439_v51  ;;  %6508 = vmatprep.subr.msk.mxu1 %vm494_vm6, %v5439_v51 }
 0x8a9   : > { %6212 = vperm.xlu1 %6611, %v6203_v36   ;;  %6207 = vperm.xlu0 %6610, %v6202_v18  }
 0x8ab   : > { %v4698_v15 = vpop.permute.xlu1 %4697  ;;  %v4666_v31 = vpop.permute.xlu0 %4665 }
 0x8ac   : > { %v10659_v38 = vsel %vm475_vm8, %v4727_v41, %v4698_v15  ;;  %v4720_v8 = vsel %vm473_vm7, %v11592_v49, %v4666_v31 }
 0x8ad   : > { %6217 = vperm.xlu1 %6611, %v6204_v19  }
 0x8af   : > { %v4940_v6 = vpop.permute.xlu1 %4939  ;;  %v10661_v47 = vpop.permute.xlu0 %4907 }
 0x8b0   : > { %v4964_v56 = vsel %vm479_vm10, %v4963_v20, %v4940_v6  ;;  %v4956_v23 = vsel %vm477_vm9, %v10622_v21, %v10661_v47 }
 0x8b3   : > { %v5186_v59 = vpop.permute.xlu1 %5185  ;;  %v5154_v5 = vpop.permute.xlu0 %5153 }
 0x8b4   : > { %v5204_v16 = vsel %vm483_vm12, %v5203_v53, %v5186_v59  ;;  %v5196_v57 = vsel %vm481_vm11, %v5195_v12, %v5154_v5 }
 0x8b7   : > { %v10675_v17 = vpop.permute.xlu1 %4459  ;;  %v5396_v7 = vpop.permute.xlu0 %5395 }
 0x8b8   : > { %v5432_v42 = vsel %vm485_vm13, %v5431_v39, %v5396_v7 }
 0x8b9   : > { %6478 = vmatpush2.msk.msra.mxu0 %vm494_vm6, %v5432_v42  ;;  %6533 = vmatpush2.msk.msra.mxu1 %vm494_vm6, %v5432_v42 }
 0x8bb   : > { %v4702_v1 = vpop.permute.xlu1 %4701  ;;  %v4670_v63 = vpop.permute.xlu0 %4669 }
 0x8bc   : > { %v10683_v28 = vsel %vm475_vm8, %v4720_v8, %v4670_v63  ;;  %v4729_v21 = vsel %vm477_vm9, %v10659_v38, %v4702_v1 }
 0x8bf   : > { %v4944_v24 = vpop.permute.xlu1 %4943  ;;  %v4912_v2 = vpop.permute.xlu0 %4911 }
 0x8c0   : > { %v4965_v25 = vsel %vm481_vm11, %v4964_v56, %v4944_v24  ;;  %v4957_v31 = vsel %vm479_vm10, %v4956_v23, %v4912_v2 }
 0x8c3   : > { %v5190_v14 = vpop.permute.xlu1 %5189  ;;  %v5158_v58 = vpop.permute.xlu0 %5157 }
 0x8c4   : > { %v5205_v40 = vsel %vm485_vm13, %v5204_v16, %v5190_v14  ;;  %v5197_v32 = vsel %vm483_vm12, %v5196_v57, %v5158_v58  ;;  %v11593_v14 = vld [vmem:[#allocation65_spill] sm:$0xff] }
 0x8c5   : > { %6479 = vmatprep.subr.msk.mxu0 %vm494_vm6, %v5205_v40  ;;  %6509 = vmatprep.subr.msk.mxu1 %vm494_vm6, %v5205_v40  ;;  %v4493_v58 = vsel %vm473_vm7, %v11593_v14, %v10675_v17  ;;  %v11594_v17 = vld [vmem:[#allocation49_spill] sm:$0xff] }
 0x8c7   : > { %v10693_v52 = vpop.permute.xlu1 %4463  ;;  %v10695_v0 = vpop.permute.xlu0 %4431 }
 0x8cb   : > { %v4706_v60 = vpop.permute.xlu1 %4705  ;;  %v4674_v34 = vpop.permute.xlu0 %4673 }
 0x8cc   : > { %v4730_v47 = vsel %vm479_vm10, %v4729_v21, %v4706_v60  ;;  %v4722_v24 = vsel %vm477_vm9, %v10683_v28, %v4674_v34  ;;  %v4494_v28 = vsel %vm475_vm8, %v4493_v58, %v10693_v52  ;;  %v4486_v52 = vsel %vm473_vm7, %v11594_v17, %v10695_v0 }
 0x8cf   : > { %v4948_v30 = vpop.permute.xlu1 %4947  ;;  %v4916_v29 = vpop.permute.xlu0 %4915 }
 0x8d0   : > { %v4966_v26 = vsel %vm483_vm12, %v4965_v25, %v4948_v30  ;;  %v4958_v6 = vsel %vm481_vm11, %v4957_v31, %v4916_v29 }
 0x8d3   : > { %v10703_v3 = vpop.permute.xlu1 %4225  ;;  %v5162_v62 = vpop.permute.xlu0 %5161 }
 0x8d4   : > { %v5198_v22 = vsel %vm485_vm13, %v5197_v32, %v5162_v62  ;;  %v4259_v20 = vsel %vm473_vm7, %v10357_v61, %v10703_v3 }
 0x8d5   : > { %6480 = vmatpush2.msk.msra.mxu0 %vm494_vm6, %v5198_v22  ;;  %6534 = vmatpush2.msk.msra.mxu1 %vm494_vm6, %v5198_v22 }
 0x8d7   : > { %v4468_v45 = vpop.permute.xlu1 %4467  ;;  %v10708_v33 = vpop.permute.xlu0 %4435 }
 0x8d8   : > { %v4495_v34 = vsel %vm477_vm9, %v4494_v28, %v4468_v45  ;;  %v4487_v62 = vsel %vm475_vm8, %v4486_v52, %v10708_v33 }
 0x8db   : > { %v4710_v43 = vpop.permute.xlu1 %4709  ;;  %v4678_v44 = vpop.permute.xlu0 %4677 }
 0x8dc   : > { %v4731_v55 = vsel %vm481_vm11, %v4730_v47, %v4710_v43  ;;  %v4723_v38 = vsel %vm479_vm10, %v4722_v24, %v4678_v44 }
 0x8df   : > { %v4952_v37 = vpop.permute.xlu1 %4951  ;;  %v4920_v36 = vpop.permute.xlu0 %4919 }
 0x8e0   : > { %v4967_v18 = vsel %vm485_vm13, %v4966_v26, %v4952_v37  ;;  %v4959_v54 = vsel %vm483_vm12, %v4958_v6, %v4920_v36 }
 0x8e1   : > { %6481 = vmatprep.subr.msk.mxu0 %vm494_vm6, %v4967_v18  ;;  %6510 = vmatprep.subr.msk.mxu1 %vm494_vm6, %v4967_v18 }
 0x8e3   : > { %v4230_v51 = vpop.permute.xlu1 %4229  ;;  %v4198_v19 = vpop.permute.xlu0 %4197 }
 0x8e4   : > { %v4252_v56 = vsel %vm473_vm7, %v10441_v27, %v4198_v19  ;;  %v4260_v0 = vsel %vm475_vm8, %v4259_v20, %v4230_v51 }
 0x8e7   : > { %v4472_v11 = vpop.permute.xlu1 %4471  ;;  %v4440_v41 = vpop.permute.xlu0 %4439 }
 0x8e8   : > { %v4496_v30 = vsel %vm479_vm10, %v4495_v34, %v4472_v11  ;;  %v4488_v43 = vsel %vm477_vm9, %v4487_v62, %v4440_v41 }
 0x8eb   : > { %v4714_v15 = vpop.permute.xlu1 %4713  ;;  %v4682_v48 = vpop.permute.xlu0 %4681 }
 0x8ec   : > { %v4732_v39 = vsel %vm483_vm12, %v4731_v55, %v4714_v15  ;;  %v4724_v1 = vsel %vm481_vm11, %v4723_v38, %v4682_v48 }
 0x8ef   : > { %v4202_v13 = vpop.permute.xlu1 %4201  ;;  %v4924_v35 = vpop.permute.xlu0 %4923 }
 0x8f0   : > { %v4960_v10 = vsel %vm485_vm13, %v4959_v54, %v4924_v35  ;;  %v4253_v26 = vsel %vm475_vm8, %v4252_v56, %v4202_v13  ;;  %v6146_v54 = vld [vmem:[#allocation6] sm:$0xff]  ;;  %v6148_v13 = vld [vmem:[#allocation6 + $0x10] sm:$0xff]  ;;  %v6151_v35 = vld [vmem:[#allocation6 + $0x28] sm:$0xff] }
 0x8f1   : > { %6482 = vmatpush2.msk.msra.mxu0 %vm494_vm6, %v4960_v10  ;;  %6535 = vmatpush2.msk.msra.mxu1 %vm494_vm6, %v4960_v10  ;;  %v6150_v10 = vld [vmem:[#allocation6 + $0x20] sm:$0xff] }
 0x8f3   : > { %v4444_v59 = vpop.permute.xlu1 %4443  ;;  %v4234_v5 = vpop.permute.xlu0 %4233 }
 0x8f4   : > { %v4489_v44 = vsel %vm479_vm10, %v4488_v43, %v4444_v59  ;;  %v4261_v18 = vsel %vm477_vm9, %v4260_v0, %v4234_v5 }
 0x8f7   : > { %v4686_v9 = vpop.permute.xlu1 %4685  ;;  %v4476_v4 = vpop.permute.xlu0 %4475 }
 0x8f8   : > { %v4725_v2 = vsel %vm483_vm12, %v4724_v1, %v4686_v9  ;;  %v4497_v29 = vsel %vm481_vm11, %v4496_v30, %v4476_v4 }
 0x8fb   : > { %v4206_v7 = vpop.permute.xlu1 %4205  ;;  %v4718_v42 = vpop.permute.xlu0 %4717 }
 0x8fc   : > { %v4733_v49 = vsel %vm485_vm13, %v4732_v39, %v4718_v42  ;;  %v4254_v11 = vsel %vm477_vm9, %v4253_v26, %v4206_v7 }
 0x8fd   : > { %6483 = vmatprep.subr.msk.mxu0 %vm494_vm6, %v4733_v49  ;;  %6511 = vmatprep.subr.msk.mxu1 %vm494_vm6, %v4733_v49 }
 0x8ff   : > { %v4448_v8 = vpop.permute.xlu1 %4447  ;;  %v4238_v63 = vpop.permute.xlu0 %4237 }
 0x900   : > { %v4490_v25 = vsel %vm481_vm11, %v4489_v44, %v4448_v8  ;;  %v4262_v61 = vsel %vm479_vm10, %v4261_v18, %v4238_v63 }
 0x903   : > { %v4690_v50 = vpop.permute.xlu1 %4689  ;;  %v4480_v53 = vpop.permute.xlu0 %4479 }
 0x904   : > { %v4726_v16 = vsel %vm485_vm13, %v4725_v2, %v4690_v50  ;;  %v4498_v46 = vsel %vm483_vm12, %v4497_v29, %v4480_v53 }
 0x905   : > { %6484 = vmatpush2.msk.msra.mxu0 %vm494_vm6, %v4726_v16  ;;  %6536 = vmatpush2.msk.msra.mxu1 %vm494_vm6, %v4726_v16 }
 0x907   : > { %v4242_v40 = vpop.permute.xlu1 %4241  ;;  %v4210_v60 = vpop.permute.xlu0 %4209 }
 0x908   : > { %v4255_v27 = vsel %vm479_vm10, %v4254_v11, %v4210_v60  ;;  %v4263_v3 = vsel %vm481_vm11, %v4262_v61, %v4242_v40 }
 0x90b   : > { %v4484_v12 = vpop.permute.xlu1 %4483  ;;  %v4452_v57 = vpop.permute.xlu0 %4451 }
 0x90c   : > { %v4499_v32 = vsel %vm485_vm13, %v4498_v46, %v4484_v12  ;;  %v4491_v33 = vsel %vm483_vm12, %v4490_v25, %v4452_v57 }
 0x90d   : > { %6485 = vmatprep.subr.msk.mxu0 %vm494_vm6, %v4499_v32  ;;  %6512 = vmatprep.subr.msk.mxu1 %vm494_vm6, %v4499_v32 }
 0x90f   : > { %v4246_v22 = vpop.permute.xlu1 %4245  ;;  %v4214_v45 = vpop.permute.xlu0 %4213 }
 0x910   : > { %v4256_v51 = vsel %vm481_vm11, %v4255_v27, %v4214_v45  ;;  %v4264_v19 = vsel %vm483_vm12, %v4263_v3, %v4246_v22 }
 0x913   : > { %v4218_v37 = vpop.permute.xlu1 %4217  ;;  %v4456_v36 = vpop.permute.xlu0 %4455 }
 0x914   : > { %v4492_v41 = vsel %vm485_vm13, %v4491_v33, %v4456_v36  ;;  %v4257_v15 = vsel %vm483_vm12, %v4256_v51, %v4218_v37 }
 0x915   : > { %6486 = vmatpush2.msk.msra.mxu0 %vm494_vm6, %v4492_v41  ;;  %6537 = vmatpush2.msk.msra.mxu1 %vm494_vm6, %v4492_v41 }
 0x917   : > { %v4222_v48 = vpop.permute.xlu1 %4221  ;;  %v4250_v23 = vpop.permute.xlu0 %4249 }
 0x918   : > { %v4258_v31 = vsel %vm485_vm13, %v4257_v15, %v4222_v48  ;;  %v4265_v6 = vsel %vm485_vm13, %v4264_v19, %v4250_v23 }
 0x919   : > { %6487 = vmatprep.subr.msk.mxu0 %vm494_vm6, %v4265_v6  ;;  %6513 = vmatprep.subr.msk.mxu1 %vm494_vm6, %v4265_v6 }
 0x91a   : > { %6488 = vmatpush2.msk.msra.mxu0 %vm494_vm6, %v4258_v31  ;;  %6538 = vmatpush2.msk.msra.mxu1 %vm494_vm6, %v4258_v31 }
 0x91b   : > { %6295 = vmatmul.mubr.f32.vlgmr.msra.gmra.mxu0 %v6146_v54  ;;  %6301 = vmatmul.mubr.f32.vlgmr.msra.gmra.mxu1 %v6148_v13 }
 0x91c   : > { %6435 = vmatprep.mubr.msk.f32.mxu1 %vm6220_vm14, %v6151_v35 }
 0x91f   : > { %6307 = vmatmul.mubr.f32.gmra.mxu1 %v6150_v10 }
 0x924   : > { %v6213_v59 = vpop.permute.xlu1 %6212  ;;  %v6208_v5 = vpop.permute.xlu0 %6207 }
 0x928   : > { %v6218_v38 = vpop.permute.xlu1 %6217 }
 0x9db   : > { %v6296_v9 = vpop.f32.mrf.mxu0  ;;  %v6302_v4 = vpop.f32.mrf.mxu1 }
 0x9dc   : > { %v6303_v55 = vadd.f32 %v6302_v4, %v6213_v59  ;;  %v6297_v39 = vadd.f32 %v6296_v9, %v6208_v5 }
 0x9dd   : > { %v6298_v21 = vpop.f32.mrf.mxu0  ;;  %v6304_v47 = vpop.f32.mrf.mxu1 }
 0x9de   : > { %v6299_v7 = vadd.f32 %v6298_v21, %v6208_v5  ;;  %v6305_v42 = vadd.f32 %v6304_v47, %v6213_v59  ;;  %v6324_v2 = vmul.f32 %v6303_v55, %v6303_v55  ;;  %v6322_v28 = vmul.f32 %v6297_v39, %v6297_v39 }
 0x9df   : > { %v6308_v49 = vpop.f32.mrf.mxu1 }
 0x9e0   : > { %v6313_v8 = vadd.f32 %v6299_v7, %v6297_v39  ;;  %v6316_v63 = vadd.f32 %v6305_v42, %v6303_v55  ;;  %v6325_v24 = vmul.f32 %v6305_v42, %v6305_v42  ;;  %v6309_v50 = vadd.f32 %v6308_v49, %v6218_v38 }
 0x9e1   : > { %v6310_v1 = vpop.f32.mrf.mxu1  ;;  %v6323_v16 = vmul.f32 %v6299_v7, %v6299_v7 }
 0x9e2   : > { %v6311_v53 = vadd.f32 %v6310_v1, %v6218_v38  ;;  %6317 = vadd.xlane.f32.xlu1 %v6316_v63  ;;  %6314 = vadd.xlane.f32.xlu0 %v6313_v8  ;;  %v6331_v58 = vadd.f32 %v6325_v24, %v6324_v2  ;;  %v6326_v34 = vmul.f32 %v6309_v50, %v6309_v50 }
 0x9e3   : > { %v6328_v60 = vadd.f32 %v6323_v16, %v6322_v28 }
 0x9e4   : > { %v6319_v14 = vadd.f32 %v6311_v53, %v6309_v50  ;;  %v6327_v40 = vmul.f32 %v6311_v53, %v6311_v53 }
 0x9e6   : > { %6332 = vadd.xlane.f32.xlu1 %v6331_v58  ;;  %6320 = vadd.xlane.f32.xlu0 %v6319_v14  ;;  %v6334_v30 = vadd.f32 %v6327_v40, %v6326_v34 }
 0x9ea   : > { %6329 = vadd.xlane.f32.xlu0 %v6328_v60 }
 0x9ee   : > { %6335 = vadd.xlane.f32.xlu0 %v6334_v30 }
 0xa6b   : > { %v6318_v29 = vpop.xlane.xlu1 %6317  ;;  %v6315_v46 = vpop.xlane.xlu0 %6314 }
 0xa6f   : > { %v6333_v12 = vpop.xlane.xlu1 %6332  ;;  %v6321_v57 = vpop.xlane.xlu0 %6320 }
 0xa70   : > { %v6339_v32 = vsel %vm6337_vm15, %v6318_v29, %v6333_v12 }
 0xa71   : > { %6343 = vst.msk [vmem:[%s205_s10 + $0x8] sm:$0xff] %vm6341_vm0, %v6339_v32 }
 0xa73   : > { %v6330_v17 = vpop.xlane.xlu0 %6329 }
 0xa74   : > { %v6338_v52 = vsel %vm6337_vm15, %v6315_v46, %v6330_v17 }
 0xa75   : > { %6342 = vst.msk [vmem:[%s205_s10] sm:$0xff] %vm6341_vm0, %v6338_v52 }
 0xa77   : > { %v6336_v62 = vpop.xlane.xlu0 %6335 }
 0xa78   : > { %v6340_v22 = vsel %vm6337_vm15, %v6321_v57, %v6336_v62 }
 0xa79   : > { %6344 = vst.msk [vmem:[%s205_s10 + $0x10] sm:$0xff] %vm6341_vm0, %v6340_v22 }
 0xa7a PF: > { %p14_p0 = scmp.ge.s32.totalorder %s6798_s22, 4   ;;  %s11595_s12 = smov %s6702_s13 }
 0xa7b   : > { %s11596_s13 = smov %s6706_s14  ;;  %s11597_s14 = smov %s6815_s30 }
 0xa7c   : > { %s11598_s15 = smov %s6798_s22  ;;  %16 = sbr.rel (!%p14_p0) target bundleno = 4 (0x4), region = 76 }
 0xa81   :  { %6366 = vsyncpa [#allocation5], 1 }
 0xa82   :  { %6368 = vsyncpa [#allocation5 + $0x1], 1 }
 0xa83   :  { %6369 = vsyncpa [#allocation7], 1 }

</bundles_post_ra>
